<compile_context>
chip_gen: v7x
topology: tpu7x:2x2x1
jax: 0.10.0
libtpu: 0.0.40
codegen_flags: <defaults>
</compile_context>

<pallas_src>
import functools

import jax
import jax.numpy as jnp
from jax.experimental import pallas as pl
from jax.experimental.pallas import tpu as pltpu


def _layernorm(v, g, b, eps):
    mu = jnp.mean(v, axis=-1, keepdims=True)
    var = jnp.mean((v - mu) ** 2, axis=-1, keepdims=True)
    return (v - mu) * jax.lax.rsqrt(var + eps) * g + b


def clip_layer_kernel(
    x_ref,                       # (Bt, S, D) input block
    bias_ref,                    # (S, S) f32 additive causal mask (hoisted)
    ln1_g_ref, ln1_b_ref,        # (1, D) f32
    w_qkv_ref, b_qkv_ref,        # (D, 3D) bf16 (q cols pre-scaled by 1/sqrt(dh)), (1, 3D) f32
    w_out_ref, b_out_ref,        # (D, D) bf16, (1, D) f32
    ln2_g_ref, ln2_b_ref,        # (1, D) f32
    w_fc1_ref, b_fc1_ref,        # (D, 4D) bf16, (1, 4D) f32
    w_fc2_ref, b_fc2_ref,        # (4D, D) bf16, (1, D) f32
    o_ref,                       # (Bt, S, D) output block
    *, n_head, eps,
):
    Bt, S, D = x_ref.shape
    H = n_head
    dh = D // H

    x = x_ref[...].astype(jnp.float32).reshape(Bt * S, D)      # (Bt*S, D) f32

    # ---------------- attention block ----------------
    h = _layernorm(x, ln1_g_ref[0], ln1_b_ref[0], eps).astype(jnp.bfloat16)

    # Single full-width QKV projection (N = 3D on the MXU); bf16 x bf16 -> f32.
    qkv = jnp.dot(h, w_qkv_ref[...], preferred_element_type=jnp.float32)
    qkv = qkv + b_qkv_ref[0]                                    # (Bt*S, 3D) f32

    # Per-head view (Bt*H, S, dh): static lane slices + leading-dim concat.
    def split_heads(part):
        base = part * D
        heads = [
            qkv[:, base + hh * dh: base + (hh + 1) * dh].reshape(Bt, 1, S, dh)
            for hh in range(H)
        ]
        t = jnp.concatenate(heads, axis=1)                      # (Bt, H, S, dh)
        return t.reshape(Bt * H, S, dh).astype(jnp.bfloat16)

    q = split_heads(0)      # 1/sqrt(dh) already folded into W_q / b_q
    k = split_heads(1)
    v = split_heads(2)

    # Causal attention batched over (Bt*H); scores in f32, softmax divide on the EUP.
    s = jnp.einsum("bqe,bke->bqk", q, k, preferred_element_type=jnp.float32)
    s = s + bias_ref[...][None]
    s = s - jnp.max(s, axis=-1, keepdims=True)
    p = jnp.exp(s)
    p = p * pl.reciprocal(jnp.sum(p, axis=-1, keepdims=True), approx=True)
    attn = jnp.einsum("bqk,bke->bqe", p.astype(jnp.bfloat16), v,
                      preferred_element_type=jnp.float32)       # (Bt*H, S, dh)

    # Merge heads and do ONE full-width output projection (head-sum in the MXU).
    attn = attn.reshape(Bt, H, S, dh)
    attn = jnp.concatenate([attn[:, hh] for hh in range(H)], axis=-1)   # (Bt, S, D)
    attn = attn.reshape(Bt * S, D).astype(jnp.bfloat16)
    o = jnp.dot(attn, w_out_ref[...], preferred_element_type=jnp.float32)
    x = x + o + b_out_ref[0]                                    # residual 1

    # ---------------- MLP block ----------------
    h = _layernorm(x, ln2_g_ref[0], ln2_b_ref[0], eps).astype(jnp.bfloat16)
    h1 = jnp.dot(h, w_fc1_ref[...], preferred_element_type=jnp.float32) + b_fc1_ref[0]
    h1 = h1 * jax.nn.sigmoid(1.702 * h1)                        # QuickGELU, f32
    h2 = jnp.dot(h1.astype(jnp.bfloat16), w_fc2_ref[...],
                 preferred_element_type=jnp.float32) + b_fc2_ref[0]

    o_ref[...] = (x + h2).reshape(Bt, S, D).astype(o_ref.dtype)  # residual 2


def _prepare_params(params, n_head):
    """PyTorch-layout f32 params -> kernel layout (bf16 matmul weights, f32 biases)."""
    D = params["w_qkv"].shape[0]
    dh = D // n_head
    scale = 1.0 / (dh ** 0.5)
    f32, bf16 = jnp.float32, jnp.bfloat16

    # Fold 1/sqrt(dh) into the q projection columns (no per-score VPU multiply).
    col_scale = jnp.concatenate([jnp.full((D,), scale, f32), jnp.ones((2 * D,), f32)])
    w_qkv = (params["w_qkv"].astype(f32) * col_scale[None, :]).astype(bf16)   # (D, 3D)
    b_qkv = (params["b_qkv"].astype(f32).reshape(1, 3 * D) * col_scale[None, :]).astype(f32)

    return [
        params["ln1_g"].astype(f32).reshape(1, D),
        params["ln1_b"].astype(f32).reshape(1, D),
        w_qkv, b_qkv,
        params["w_out"].astype(bf16),
        params["b_out"].astype(f32).reshape(1, D),
        params["ln2_g"].astype(f32).reshape(1, D),
        params["ln2_b"].astype(f32).reshape(1, D),
        params["w_fc1"].astype(bf16),
        params["b_fc1"].astype(f32).reshape(1, 4 * D),
        params["w_fc2"].astype(bf16),
        params["b_fc2"].astype(f32).reshape(1, D),
    ]


def _vmem_bytes(Bt, S, D, H, weight_bytes):
    """Rough VMEM footprint estimate (single-buffered weights, double-buffered acts)."""
    f32, bf16 = 4, 2
    act = 2 * 2 * Bt * S * D * f32              # in + out activation blocks, x2 buffers
    proj = Bt * S * 3 * D * (f32 + bf16)        # qkv f32 + bf16 per-head copies
    scores = Bt * H * S * S * (f32 + bf16)      # scores + probs
    mlp = Bt * S * 4 * D * (f32 + bf16)         # fc1 activations
    misc = 6 * Bt * S * D * f32                 # residual / LN temporaries
    return weight_bytes + S * S * f32 + int(1.25 * (act + proj + scores + mlp + misc))


def clip_layer(x, params, *, n_head, eps=1e-5, max_block_b=4):
    B, S, D = x.shape
    prepped = _prepare_params(params, n_head)

    # Pad S to a sublane multiple; causality automatically masks padded keys for
    # real query rows (padded columns sit past every real row index).
    S_pad = ((S + 7) // 8) * 8
    x_in = x if S_pad == S else jnp.pad(x, ((0, 0), (0, S_pad - S), (0, 0)))

    # Hoisted additive causal bias (finite, so no NaN rows; built once here).
    row = jax.lax.broadcasted_iota(jnp.int32, (S_pad, S_pad), 0)
    col = jax.lax.broadcasted_iota(jnp.int32, (S_pad, S_pad), 1)
    neg_bias = jnp.where(col <= row, 0.0, -1e30).astype(jnp.float32)

    weight_bytes = sum(int(p.size) * p.dtype.itemsize for p in prepped)
    weight_bytes += int(neg_bias.size) * 4

    # Bt: largest divisor of B that fits max_block_b and the VMEM budget.
    budget = 48 * 1024 * 1024     # <= 3/4 of v7x's 64 MiB/TC; trivially fine on v5e/v6e
    Bt = 1
    for cand in range(1, max_block_b + 1):
        if B % cand == 0 and _vmem_bytes(cand, S_pad, D, n_head, weight_bytes) <= budget:
            Bt = cand

    kernel = functools.partial(clip_layer_kernel, n_head=n_head, eps=eps)
    consts = [neg_bias] + prepped

    def build(single_buffer_weights):
        def const_spec(p):
            zero = (0,) * p.ndim
            idx = lambda b, _z=zero: _z
            if single_buffer_weights:
                # Constant blocks: no need to double-buffer the resident weights.
                return pl.BlockSpec(p.shape, idx, pipeline_mode=pl.Buffered(1))
            return pl.BlockSpec(p.shape, idx)

        return pl.pallas_call(
            kernel,
            out_shape=jax.ShapeDtypeStruct((B, S_pad, D), x.dtype),
            grid_spec=pltpu.PrefetchScalarGridSpec(
                num_scalar_prefetch=0,
                grid=(B // Bt,),
                in_specs=[pl.BlockSpec((Bt, S_pad, D), lambda b: (b, 0, 0))]
                + [const_spec(p) for p in consts],
                out_specs=pl.BlockSpec((Bt, S_pad, D), lambda b: (b, 0, 0)),
            ),
            compiler_params=pltpu.CompilerParams(
                dimension_semantics=("parallel",),
                vmem_limit_bytes=budget,
            ),
        )

    out, last_err = None, None
    for single in (True, False):   # fall back if pl.Buffered(1) is unsupported here
        try:
            out = jax.block_until_ready(build(single)(x_in, *consts))
            break
        except Exception as e:
            last_err, out = e, None
    if out is None:
        raise last_err
    return out[:, :S, :]


# ---------------- pure-JAX f32 reference (for correctness check) ----------------
def clip_layer_ref(x, params, *, n_head, eps=1e-5):
    B, S, D = x.shape
    dh = D // n_head

    def ln(v, g, b):
        mu = jnp.mean(v, axis=-1, keepdims=True)
        var = jnp.mean((v - mu) ** 2, axis=-1, keepdims=True)
        return (v - mu) / jnp.sqrt(var + eps) * g + b

    residue = x
    h = ln(x, params["ln1_g"][0], params["ln1_b"][0])
    qkv = h @ params["w_qkv"] + params["b_qkv"][0]
    q, k, v = jnp.split(qkv, 3, axis=-1)
    q = q.reshape(B, S, n_head, dh).transpose(0, 2, 1, 3)
    k = k.reshape(B, S, n_head, dh).transpose(0, 2, 1, 3)
    v = v.reshape(B, S, n_head, dh).transpose(0, 2, 1, 3)
    w = jnp.einsum("bhqd,bhkd->bhqk", q, k)
    mask = jnp.triu(jnp.ones((S, S), dtype=bool), 1)
    w = jnp.where(mask, -jnp.inf, w)
    w = w / jnp.sqrt(jnp.float32(dh))
    w = jax.nn.softmax(w, axis=-1)
    o = jnp.einsum("bhqk,bhkd->bhqd", w, v)
    o = o.transpose(0, 2, 1, 3).reshape(B, S, D)
    o = o @ params["w_out"] + params["b_out"][0]
    x = o + residue

    residue = x
    h = ln(x, params["ln2_g"][0], params["ln2_b"][0])
    h = h @ params["w_fc1"] + params["b_fc1"][0]
    h = h * jax.nn.sigmoid(1.702 * h)
    h = h @ params["w_fc2"] + params["b_fc2"][0]
    return h + residue


def init_params(key, n_embd):
    D = n_embd
    ks = jax.random.split(key, 6)
    std = 0.02
    return {
        "ln1_g": jnp.ones((1, D), jnp.float32),
        "ln1_b": jnp.zeros((1, D), jnp.float32),
        # linear weights stored as (in_features, out_features)
        "w_qkv": std * jax.random.normal(ks[0], (D, 3 * D), jnp.float32),
        "b_qkv": std * jax.random.normal(ks[1], (1, 3 * D), jnp.float32),
        "w_out": std * jax.random.normal(ks[2], (D, D), jnp.float32),
        "b_out": jnp.zeros((1, D), jnp.float32),
        "ln2_g": jnp.ones((1, D), jnp.float32),
        "ln2_b": jnp.zeros((1, D), jnp.float32),
        "w_fc1": std * jax.random.normal(ks[3], (D, 4 * D), jnp.float32),
        "b_fc1": std * jax.random.normal(ks[4], (1, 4 * D), jnp.float32),
        "w_fc2": std * jax.random.normal(ks[5], (4 * D, D), jnp.float32),
        "b_fc2": jnp.zeros((1, D), jnp.float32),
    }


if __name__ == "__main__":
    # Small but representative: dh = 64 (CLIP head dim), ragged S exercises padding,
    # B=8 gives Bt=4 -> a 2-step grid that exercises weight-block reuse.
    B, S, D, H = 8, 13, 128, 2

    key = jax.random.PRNGKey(0)
    kx, kp = jax.random.split(key)
    x = jax.random.normal(kx, (B, S, D), jnp.float32)
    params = init_params(kp, D)

    out = jax.block_until_ready(clip_layer(x, params, n_head=H))
    ref = jax.block_until_ready(clip_layer_ref(x, params, n_head=H))

    assert out.shape == (B, S, D)
    # bf16 matmul operands (f32 accumulation) + approx reciprocal -> loosened tolerance.
    assert jnp.allclose(out, ref, atol=3e-2, rtol=3e-2), (
        f"max abs err = {jnp.max(jnp.abs(out - ref))}"
    )

    print("KERNEL_OK")
</pallas_src>

<mosaic_0001>
module attributes {stable_mosaic.version = 11 : i64} {
  func.func @clip_layer_kernel(%arg0: i32, %arg1: memref<4x16x128xf32, #tpu.memory_space<vmem>>, %arg2: memref<16x16xf32, #tpu.memory_space<vmem>>, %arg3: memref<1x128xf32, #tpu.memory_space<vmem>>, %arg4: memref<1x128xf32, #tpu.memory_space<vmem>>, %arg5: memref<128x384xbf16, #tpu.memory_space<vmem>>, %arg6: memref<1x384xf32, #tpu.memory_space<vmem>>, %arg7: memref<128x128xbf16, #tpu.memory_space<vmem>>, %arg8: memref<1x128xf32, #tpu.memory_space<vmem>>, %arg9: memref<1x128xf32, #tpu.memory_space<vmem>>, %arg10: memref<1x128xf32, #tpu.memory_space<vmem>>, %arg11: memref<128x512xbf16, #tpu.memory_space<vmem>>, %arg12: memref<1x512xf32, #tpu.memory_space<vmem>>, %arg13: memref<512x128xbf16, #tpu.memory_space<vmem>>, %arg14: memref<1x128xf32, #tpu.memory_space<vmem>>, %arg15: memref<4x16x128xf32, #tpu.memory_space<vmem>>) attributes {dimension_semantics = [#tpu.dimension_semantics<parallel>], iteration_bounds = array<i64: 2>, scalar_prefetch = 0 : i64, scratch_operands = 0 : i64, tpu.core_type = #tpu.core_type<tc>, window_params = [{transform_indices = @transform_0, window_bounds = array<i64: 4, 16, 128>}, {pipeline_mode = #tpu.pipeline_mode<synchronous>, transform_indices = @transform_1, window_bounds = array<i64: 16, 16>}, {pipeline_mode = #tpu.pipeline_mode<synchronous>, transform_indices = @transform_2, window_bounds = array<i64: 1, 128>}, {pipeline_mode = #tpu.pipeline_mode<synchronous>, transform_indices = @transform_3, window_bounds = array<i64: 1, 128>}, {pipeline_mode = #tpu.pipeline_mode<synchronous>, transform_indices = @transform_4, window_bounds = array<i64: 128, 384>}, {pipeline_mode = #tpu.pipeline_mode<synchronous>, transform_indices = @transform_5, window_bounds = array<i64: 1, 384>}, {pipeline_mode = #tpu.pipeline_mode<synchronous>, transform_indices = @transform_6, window_bounds = array<i64: 128, 128>}, {pipeline_mode = #tpu.pipeline_mode<synchronous>, transform_indices = @transform_7, window_bounds = array<i64: 1, 128>}, {pipeline_mode = #tpu.pipeline_mode<synchronous>, transform_indices = @transform_8, window_bounds = array<i64: 1, 128>}, {pipeline_mode = #tpu.pipeline_mode<synchronous>, transform_indices = @transform_9, window_bounds = array<i64: 1, 128>}, {pipeline_mode = #tpu.pipeline_mode<synchronous>, transform_indices = @transform_10, window_bounds = array<i64: 128, 512>}, {pipeline_mode = #tpu.pipeline_mode<synchronous>, transform_indices = @transform_11, window_bounds = array<i64: 1, 512>}, {pipeline_mode = #tpu.pipeline_mode<synchronous>, transform_indices = @transform_12, window_bounds = array<i64: 512, 128>}, {pipeline_mode = #tpu.pipeline_mode<synchronous>, transform_indices = @transform_13, window_bounds = array<i64: 1, 128>}, {transform_indices = @transform_14, window_bounds = array<i64: 4, 16, 128>}]} {
    %c0 = arith.constant 0 : index
    %c0_0 = arith.constant 0 : index
    %c0_1 = arith.constant 0 : index
    %0 = vector.load %arg1[%c0, %c0_0, %c0_1] : memref<4x16x128xf32, #tpu.memory_space<vmem>>, vector<4x16x128xf32>
    %1 = vector.shape_cast %0 : vector<4x16x128xf32> to vector<64x128xf32>
    %c0_2 = arith.constant 0 : index
    %c0_3 = arith.constant 0 : index
    %2 = vector.load %arg3[%c0_2, %c0_3] : memref<1x128xf32, #tpu.memory_space<vmem>>, vector<1x128xf32>
    %3 = vector.shape_cast %2 : vector<1x128xf32> to vector<128xf32>
    %c0_4 = arith.constant 0 : index
    %c0_5 = arith.constant 0 : index
    %4 = vector.load %arg4[%c0_4, %c0_5] : memref<1x128xf32, #tpu.memory_space<vmem>>, vector<1x128xf32>
    %5 = vector.shape_cast %4 : vector<1x128xf32> to vector<128xf32>
    %cst = arith.constant dense<0.000000e+00> : vector<64xf32>
    %6 = vector.multi_reduction <add>, %1, %cst [1] : vector<64x128xf32> to vector<64xf32>
    %7 = vector.shape_cast %6 : vector<64xf32> to vector<64x1xf32>
    %cst_6 = arith.constant 1.280000e+02 : f32
    %8 = vector.broadcast %cst_6 : f32 to vector<64x1xf32>
    %9 = arith.divf %7, %8 : vector<64x1xf32>
    %10 = vector.broadcast %9 : vector<64x1xf32> to vector<64x128xf32>
    %11 = arith.subf %1, %10 : vector<64x128xf32>
    %12 = arith.mulf %11, %11 : vector<64x128xf32>
    %cst_7 = arith.constant dense<0.000000e+00> : vector<64xf32>
    %13 = vector.multi_reduction <add>, %12, %cst_7 [1] : vector<64x128xf32> to vector<64xf32>
    %14 = vector.shape_cast %13 : vector<64xf32> to vector<64x1xf32>
    %cst_8 = arith.constant 1.280000e+02 : f32
    %15 = vector.broadcast %cst_8 : f32 to vector<64x1xf32>
    %16 = arith.divf %14, %15 : vector<64x1xf32>
    %17 = vector.broadcast %9 : vector<64x1xf32> to vector<64x128xf32>
    %18 = arith.subf %1, %17 : vector<64x128xf32>
    %cst_9 = arith.constant 9.99999974E-6 : f32
    %19 = vector.broadcast %cst_9 : f32 to vector<64x1xf32>
    %20 = arith.addf %16, %19 : vector<64x1xf32>
    %21 = math.rsqrt %20 : vector<64x1xf32>
    %22 = vector.broadcast %21 : vector<64x1xf32> to vector<64x128xf32>
    %23 = arith.mulf %18, %22 : vector<64x128xf32>
    %24 = vector.shape_cast %3 : vector<128xf32> to vector<1x128xf32>
    %25 = vector.broadcast %24 : vector<1x128xf32> to vector<64x128xf32>
    %26 = arith.mulf %23, %25 : vector<64x128xf32>
    %27 = vector.shape_cast %5 : vector<128xf32> to vector<1x128xf32>
    %28 = vector.broadcast %27 : vector<1x128xf32> to vector<64x128xf32>
    %29 = arith.addf %26, %28 : vector<64x128xf32>
    %30 = arith.truncf %29 : vector<64x128xf32> to vector<64x128xbf16>
    %c0_10 = arith.constant 0 : index
    %c0_11 = arith.constant 0 : index
    %31 = vector.load %arg5[%c0_10, %c0_11] : memref<128x384xbf16, #tpu.memory_space<vmem>>, vector<128x384xbf16>
    %cst_12 = arith.constant dense<0.000000e+00> : vector<64x384xf32>
    %32 = tpu.matmul %30, %31, %cst_12 {dimension_numbers = #tpu.dot_dimension_numbers<[1], [0], [0], [1], [0, 0, 1, 1], [], []>} : vector<64x128xbf16>, vector<128x384xbf16>, vector<64x384xf32> -> vector<64x384xf32>
    %c0_13 = arith.constant 0 : index
    %c0_14 = arith.constant 0 : index
    %33 = vector.load %arg6[%c0_13, %c0_14] : memref<1x384xf32, #tpu.memory_space<vmem>>, vector<1x384xf32>
    %34 = vector.shape_cast %33 : vector<1x384xf32> to vector<384xf32>
    %35 = vector.shape_cast %34 : vector<384xf32> to vector<1x384xf32>
    %36 = vector.broadcast %35 : vector<1x384xf32> to vector<64x384xf32>
    %37 = arith.addf %32, %36 : vector<64x384xf32>
    %38 = vector.extract_strided_slice %37 {offsets = [0, 0], sizes = [64, 64], strides = [1, 1]} : vector<64x384xf32> to vector<64x64xf32>
    %39 = vector.shape_cast %38 : vector<64x64xf32> to vector<4x1x16x64xf32>
    %40 = vector.extract_strided_slice %37 {offsets = [0, 64], sizes = [64, 64], strides = [1, 1]} : vector<64x384xf32> to vector<64x64xf32>
    %41 = vector.shape_cast %40 : vector<64x64xf32> to vector<4x1x16x64xf32>
    %42 = tpu.concatenate %39, %41 in 1 : vector<4x1x16x64xf32>, vector<4x1x16x64xf32> -> vector<4x2x16x64xf32>
    %43 = vector.shape_cast %42 : vector<4x2x16x64xf32> to vector<8x16x64xf32>
    %44 = arith.truncf %43 : vector<8x16x64xf32> to vector<8x16x64xbf16>
    %45 = vector.extract_strided_slice %37 {offsets = [0, 128], sizes = [64, 64], strides = [1, 1]} : vector<64x384xf32> to vector<64x64xf32>
    %46 = vector.shape_cast %45 : vector<64x64xf32> to vector<4x1x16x64xf32>
    %47 = vector.extract_strided_slice %37 {offsets = [0, 192], sizes = [64, 64], strides = [1, 1]} : vector<64x384xf32> to vector<64x64xf32>
    %48 = vector.shape_cast %47 : vector<64x64xf32> to vector<4x1x16x64xf32>
    %49 = tpu.concatenate %46, %48 in 1 : vector<4x1x16x64xf32>, vector<4x1x16x64xf32> -> vector<4x2x16x64xf32>
    %50 = vector.shape_cast %49 : vector<4x2x16x64xf32> to vector<8x16x64xf32>
    %51 = arith.truncf %50 : vector<8x16x64xf32> to vector<8x16x64xbf16>
    %52 = vector.extract_strided_slice %37 {offsets = [0, 256], sizes = [64, 64], strides = [1, 1]} : vector<64x384xf32> to vector<64x64xf32>
    %53 = vector.shape_cast %52 : vector<64x64xf32> to vector<4x1x16x64xf32>
    %54 = vector.extract_strided_slice %37 {offsets = [0, 320], sizes = [64, 64], strides = [1, 1]} : vector<64x384xf32> to vector<64x64xf32>
    %55 = vector.shape_cast %54 : vector<64x64xf32> to vector<4x1x16x64xf32>
    %56 = tpu.concatenate %53, %55 in 1 : vector<4x1x16x64xf32>, vector<4x1x16x64xf32> -> vector<4x2x16x64xf32>
    %57 = vector.shape_cast %56 : vector<4x2x16x64xf32> to vector<8x16x64xf32>
    %58 = arith.truncf %57 : vector<8x16x64xf32> to vector<8x16x64xbf16>
    "tpu.trace_start"() <{level = 10 : i32, message = "bqe,bke->bqk"}> : () -> ()
    %cst_15 = arith.constant dense<0.000000e+00> : vector<8x16x16xf32>
    %59 = tpu.matmul %44, %51, %cst_15 {dimension_numbers = #tpu.dot_dimension_numbers<[2], [2], [1], [1], [0, 0, 0, 1, 1, 1], [0], [0]>} : vector<8x16x64xbf16>, vector<8x16x64xbf16>, vector<8x16x16xf32> -> vector<8x16x16xf32>
    "tpu.trace_stop"() : () -> ()
    %c0_16 = arith.constant 0 : index
    %c0_17 = arith.constant 0 : index
    %60 = vector.load %arg2[%c0_16, %c0_17] : memref<16x16xf32, #tpu.memory_space<vmem>>, vector<16x16xf32>
    %61 = vector.shape_cast %60 : vector<16x16xf32> to vector<1x16x16xf32>
    %62 = vector.broadcast %61 : vector<1x16x16xf32> to vector<8x16x16xf32>
    %63 = arith.addf %59, %62 : vector<8x16x16xf32>
    %cst_18 = arith.constant dense<0xFF800000> : vector<8x16xf32>
    %64 = vector.multi_reduction <maximumf>, %63, %cst_18 [2] : vector<8x16x16xf32> to vector<8x16xf32>
    %65 = vector.shape_cast %64 : vector<8x16xf32> to vector<8x16x1xf32>
    %66 = vector.broadcast %65 : vector<8x16x1xf32> to vector<8x16x16xf32>
    %67 = arith.subf %63, %66 : vector<8x16x16xf32>
    %68 = math.exp %67 : vector<8x16x16xf32>
    %cst_19 = arith.constant dense<0.000000e+00> : vector<8x16xf32>
    %69 = vector.multi_reduction <add>, %68, %cst_19 [2] : vector<8x16x16xf32> to vector<8x16xf32>
    %70 = vector.shape_cast %69 : vector<8x16xf32> to vector<8x16x1xf32>
    %71 = tpu.reciprocal %70 {approx = true} : vector<8x16x1xf32> -> vector<8x16x1xf32>
    %72 = vector.broadcast %71 : vector<8x16x1xf32> to vector<8x16x16xf32>
    %73 = arith.mulf %68, %72 : vector<8x16x16xf32>
    %74 = arith.truncf %73 : vector<8x16x16xf32> to vector<8x16x16xbf16>
    "tpu.trace_start"() <{level = 10 : i32, message = "bqk,bke->bqe"}> : () -> ()
    %cst_20 = arith.constant dense<0.000000e+00> : vector<8x16x64xf32>
    %75 = tpu.matmul %74, %58, %cst_20 {dimension_numbers = #tpu.dot_dimension_numbers<[2], [1], [1], [2], [0, 0, 0, 1, 1, 2], [0], [0]>} : vector<8x16x16xbf16>, vector<8x16x64xbf16>, vector<8x16x64xf32> -> vector<8x16x64xf32>
    "tpu.trace_stop"() : () -> ()
    %76 = vector.shape_cast %75 : vector<8x16x64xf32> to vector<4x2x16x64xf32>
    %77 = vector.extract_strided_slice %76 {offsets = [0, 0, 0, 0], sizes = [4, 1, 16, 64], strides = [1, 1, 1, 1]} : vector<4x2x16x64xf32> to vector<4x1x16x64xf32>
    %78 = vector.shape_cast %77 : vector<4x1x16x64xf32> to vector<4x16x64xf32>
    %79 = vector.extract_strided_slice %76 {offsets = [0, 1, 0, 0], sizes = [4, 1, 16, 64], strides = [1, 1, 1, 1]} : vector<4x2x16x64xf32> to vector<4x1x16x64xf32>
    %80 = vector.shape_cast %79 : vector<4x1x16x64xf32> to vector<4x16x64xf32>
    %81 = tpu.concatenate %78, %80 in 2 : vector<4x16x64xf32>, vector<4x16x64xf32> -> vector<4x16x128xf32>
    %82 = vector.shape_cast %81 : vector<4x16x128xf32> to vector<64x128xf32>
    %83 = arith.truncf %82 : vector<64x128xf32> to vector<64x128xbf16>
    %c0_21 = arith.constant 0 : index
    %c0_22 = arith.constant 0 : index
    %84 = vector.load %arg7[%c0_21, %c0_22] : memref<128x128xbf16, #tpu.memory_space<vmem>>, vector<128x128xbf16>
    %cst_23 = arith.constant dense<0.000000e+00> : vector<64x128xf32>
    %85 = tpu.matmul %83, %84, %cst_23 {dimension_numbers = #tpu.dot_dimension_numbers<[1], [0], [0], [1], [0, 0, 1, 1], [], []>} : vector<64x128xbf16>, vector<128x128xbf16>, vector<64x128xf32> -> vector<64x128xf32>
    %86 = arith.addf %1, %85 : vector<64x128xf32>
    %c0_24 = arith.constant 0 : index
    %c0_25 = arith.constant 0 : index
    %87 = vector.load %arg8[%c0_24, %c0_25] : memref<1x128xf32, #tpu.memory_space<vmem>>, vector<1x128xf32>
    %88 = vector.shape_cast %87 : vector<1x128xf32> to vector<128xf32>
    %89 = vector.shape_cast %88 : vector<128xf32> to vector<1x128xf32>
    %90 = vector.broadcast %89 : vector<1x128xf32> to vector<64x128xf32>
    %91 = arith.addf %86, %90 : vector<64x128xf32>
    %c0_26 = arith.constant 0 : index
    %c0_27 = arith.constant 0 : index
    %92 = vector.load %arg9[%c0_26, %c0_27] : memref<1x128xf32, #tpu.memory_space<vmem>>, vector<1x128xf32>
    %93 = vector.shape_cast %92 : vector<1x128xf32> to vector<128xf32>
    %c0_28 = arith.constant 0 : index
    %c0_29 = arith.constant 0 : index
    %94 = vector.load %arg10[%c0_28, %c0_29] : memref<1x128xf32, #tpu.memory_space<vmem>>, vector<1x128xf32>
    %95 = vector.shape_cast %94 : vector<1x128xf32> to vector<128xf32>
    %cst_30 = arith.constant dense<0.000000e+00> : vector<64xf32>
    %96 = vector.multi_reduction <add>, %91, %cst_30 [1] : vector<64x128xf32> to vector<64xf32>
    %97 = vector.shape_cast %96 : vector<64xf32> to vector<64x1xf32>
    %cst_31 = arith.constant 1.280000e+02 : f32
    %98 = vector.broadcast %cst_31 : f32 to vector<64x1xf32>
    %99 = arith.divf %97, %98 : vector<64x1xf32>
    %100 = vector.broadcast %99 : vector<64x1xf32> to vector<64x128xf32>
    %101 = arith.subf %91, %100 : vector<64x128xf32>
    %102 = arith.mulf %101, %101 : vector<64x128xf32>
    %cst_32 = arith.constant dense<0.000000e+00> : vector<64xf32>
    %103 = vector.multi_reduction <add>, %102, %cst_32 [1] : vector<64x128xf32> to vector<64xf32>
    %104 = vector.shape_cast %103 : vector<64xf32> to vector<64x1xf32>
    %cst_33 = arith.constant 1.280000e+02 : f32
    %105 = vector.broadcast %cst_33 : f32 to vector<64x1xf32>
    %106 = arith.divf %104, %105 : vector<64x1xf32>
    %107 = vector.broadcast %99 : vector<64x1xf32> to vector<64x128xf32>
    %108 = arith.subf %91, %107 : vector<64x128xf32>
    %cst_34 = arith.constant 9.99999974E-6 : f32
    %109 = vector.broadcast %cst_34 : f32 to vector<64x1xf32>
    %110 = arith.addf %106, %109 : vector<64x1xf32>
    %111 = math.rsqrt %110 : vector<64x1xf32>
    %112 = vector.broadcast %111 : vector<64x1xf32> to vector<64x128xf32>
    %113 = arith.mulf %108, %112 : vector<64x128xf32>
    %114 = vector.shape_cast %93 : vector<128xf32> to vector<1x128xf32>
    %115 = vector.broadcast %114 : vector<1x128xf32> to vector<64x128xf32>
    %116 = arith.mulf %113, %115 : vector<64x128xf32>
    %117 = vector.shape_cast %95 : vector<128xf32> to vector<1x128xf32>
    %118 = vector.broadcast %117 : vector<1x128xf32> to vector<64x128xf32>
    %119 = arith.addf %116, %118 : vector<64x128xf32>
    %120 = arith.truncf %119 : vector<64x128xf32> to vector<64x128xbf16>
    %c0_35 = arith.constant 0 : index
    %c0_36 = arith.constant 0 : index
    %121 = vector.load %arg11[%c0_35, %c0_36] : memref<128x512xbf16, #tpu.memory_space<vmem>>, vector<128x512xbf16>
    %cst_37 = arith.constant dense<0.000000e+00> : vector<64x512xf32>
    %122 = tpu.matmul %120, %121, %cst_37 {dimension_numbers = #tpu.dot_dimension_numbers<[1], [0], [0], [1], [0, 0, 1, 1], [], []>} : vector<64x128xbf16>, vector<128x512xbf16>, vector<64x512xf32> -> vector<64x512xf32>
    %c0_38 = arith.constant 0 : index
    %c0_39 = arith.constant 0 : index
    %123 = vector.load %arg12[%c0_38, %c0_39] : memref<1x512xf32, #tpu.memory_space<vmem>>, vector<1x512xf32>
    %124 = vector.shape_cast %123 : vector<1x512xf32> to vector<512xf32>
    %125 = vector.shape_cast %124 : vector<512xf32> to vector<1x512xf32>
    %126 = vector.broadcast %125 : vector<1x512xf32> to vector<64x512xf32>
    %127 = arith.addf %122, %126 : vector<64x512xf32>
    %cst_40 = arith.constant 1.702000e+00 : f32
    %128 = vector.broadcast %cst_40 : f32 to vector<64x512xf32>
    %129 = arith.mulf %128, %127 : vector<64x512xf32>
    %130 = arith.negf %129 : vector<64x512xf32>
    %131 = math.exp %130 : vector<64x512xf32>
    %cst_41 = arith.constant 1.000000e+00 : f32
    %132 = vector.broadcast %cst_41 : f32 to vector<64x512xf32>
    %133 = arith.addf %132, %131 : vector<64x512xf32>
    %134 = arith.divf %132, %133 : vector<64x512xf32>
    %135 = arith.mulf %127, %134 : vector<64x512xf32>
    %136 = arith.truncf %135 : vector<64x512xf32> to vector<64x512xbf16>
    %c0_42 = arith.constant 0 : index
    %c0_43 = arith.constant 0 : index
    %137 = vector.load %arg13[%c0_42, %c0_43] : memref<512x128xbf16, #tpu.memory_space<vmem>>, vector<512x128xbf16>
    %cst_44 = arith.constant dense<0.000000e+00> : vector<64x128xf32>
    %138 = tpu.matmul %136, %137, %cst_44 {dimension_numbers = #tpu.dot_dimension_numbers<[1], [0], [0], [1], [0, 0, 1, 1], [], []>} : vector<64x512xbf16>, vector<512x128xbf16>, vector<64x128xf32> -> vector<64x128xf32>
    %c0_45 = arith.constant 0 : index
    %c0_46 = arith.constant 0 : index
    %139 = vector.load %arg14[%c0_45, %c0_46] : memref<1x128xf32, #tpu.memory_space<vmem>>, vector<1x128xf32>
    %140 = vector.shape_cast %139 : vector<1x128xf32> to vector<128xf32>
    %141 = vector.shape_cast %140 : vector<128xf32> to vector<1x128xf32>
    %142 = vector.broadcast %141 : vector<1x128xf32> to vector<64x128xf32>
    %143 = arith.addf %138, %142 : vector<64x128xf32>
    %144 = arith.addf %91, %143 : vector<64x128xf32>
    %145 = vector.shape_cast %144 : vector<64x128xf32> to vector<4x16x128xf32>
    %c0_47 = arith.constant 0 : index
    %c0_48 = arith.constant 0 : index
    %c0_49 = arith.constant 0 : index
    %146 = vector.load %arg15[%c0_47, %c0_48, %c0_49] : memref<4x16x128xf32, #tpu.memory_space<vmem>>, vector<4x16x128xf32>
    tpu.vector_store %arg15[%c0_47, %c0_48, %c0_49], %145 {strides = array<i32>} : memref<4x16x128xf32, #tpu.memory_space<vmem>>, vector<4x16x128xf32>,
    return
  }
  func.func @transform_0(%arg0: i32) -> (i32, i32, i32) {
    %c0_i32 = arith.constant 0 : i32
    %c0_i32_0 = arith.constant 0 : i32
    %c0_i32_1 = arith.constant 0 : i32
    return %arg0, %c0_i32, %c0_i32_0 : i32, i32, i32
  }
  func.func @transform_1(%arg0: i32) -> (i32, i32) {
    %c0_i32 = arith.constant 0 : i32
    %c0_i32_0 = arith.constant 0 : i32
    %c0_i32_1 = arith.constant 0 : i32
    return %c0_i32, %c0_i32_0 : i32, i32
  }
  func.func @transform_2(%arg0: i32) -> (i32, i32) {
    %c0_i32 = arith.constant 0 : i32
    %c0_i32_0 = arith.constant 0 : i32
    %c0_i32_1 = arith.constant 0 : i32
    return %c0_i32, %c0_i32_0 : i32, i32
  }
  func.func @transform_3(%arg0: i32) -> (i32, i32) {
    %c0_i32 = arith.constant 0 : i32
    %c0_i32_0 = arith.constant 0 : i32
    %c0_i32_1 = arith.constant 0 : i32
    return %c0_i32, %c0_i32_0 : i32, i32
  }
  func.func @transform_4(%arg0: i32) -> (i32, i32) {
    %c0_i32 = arith.constant 0 : i32
    %c0_i32_0 = arith.constant 0 : i32
    %c0_i32_1 = arith.constant 0 : i32
    return %c0_i32, %c0_i32_0 : i32, i32
  }
  func.func @transform_5(%arg0: i32) -> (i32, i32) {
    %c0_i32 = arith.constant 0 : i32
    %c0_i32_0 = arith.constant 0 : i32
    %c0_i32_1 = arith.constant 0 : i32
    return %c0_i32, %c0_i32_0 : i32, i32
  }
  func.func @transform_6(%arg0: i32) -> (i32, i32) {
    %c0_i32 = arith.constant 0 : i32
    %c0_i32_0 = arith.constant 0 : i32
    %c0_i32_1 = arith.constant 0 : i32
    return %c0_i32, %c0_i32_0 : i32, i32
  }
  func.func @transform_7(%arg0: i32) -> (i32, i32) {
    %c0_i32 = arith.constant 0 : i32
    %c0_i32_0 = arith.constant 0 : i32
    %c0_i32_1 = arith.constant 0 : i32
    return %c0_i32, %c0_i32_0 : i32, i32
  }
  func.func @transform_8(%arg0: i32) -> (i32, i32) {
    %c0_i32 = arith.constant 0 : i32
    %c0_i32_0 = arith.constant 0 : i32
    %c0_i32_1 = arith.constant 0 : i32
    return %c0_i32, %c0_i32_0 : i32, i32
  }
  func.func @transform_9(%arg0: i32) -> (i32, i32) {
    %c0_i32 = arith.constant 0 : i32
    %c0_i32_0 = arith.constant 0 : i32
    %c0_i32_1 = arith.constant 0 : i32
    return %c0_i32, %c0_i32_0 : i32, i32
  }
  func.func @transform_10(%arg0: i32) -> (i32, i32) {
    %c0_i32 = arith.constant 0 : i32
    %c0_i32_0 = arith.constant 0 : i32
    %c0_i32_1 = arith.constant 0 : i32
    return %c0_i32, %c0_i32_0 : i32, i32
  }
  func.func @transform_11(%arg0: i32) -> (i32, i32) {
    %c0_i32 = arith.constant 0 : i32
    %c0_i32_0 = arith.constant 0 : i32
    %c0_i32_1 = arith.constant 0 : i32
    return %c0_i32, %c0_i32_0 : i32, i32
  }
  func.func @transform_12(%arg0: i32) -> (i32, i32) {
    %c0_i32 = arith.constant 0 : i32
    %c0_i32_0 = arith.constant 0 : i32
    %c0_i32_1 = arith.constant 0 : i32
    return %c0_i32, %c0_i32_0 : i32, i32
  }
  func.func @transform_13(%arg0: i32) -> (i32, i32) {
    %c0_i32 = arith.constant 0 : i32
    %c0_i32_0 = arith.constant 0 : i32
    %c0_i32_1 = arith.constant 0 : i32
    return %c0_i32, %c0_i32_0 : i32, i32
  }
  func.func @transform_14(%arg0: i32) -> (i32, i32, i32) {
    %c0_i32 = arith.constant 0 : i32
    %c0_i32_0 = arith.constant 0 : i32
    %c0_i32_1 = arith.constant 0 : i32
    return %arg0, %c0_i32, %c0_i32_0 : i32, i32, i32
  }
}

module attributes {stable_mosaic.version = 11 : i64} {
  func.func @clip_layer_kernel(%arg0: i32, %arg1: memref<4x16x128xf32, #tpu.memory_space<vmem>>, %arg2: memref<16x16xf32, #tpu.memory_space<vmem>>, %arg3: memref<1x128xf32, #tpu.memory_space<vmem>>, %arg4: memref<1x128xf32, #tpu.memory_space<vmem>>, %arg5: memref<128x384xbf16, #tpu.memory_space<vmem>>, %arg6: memref<1x384xf32, #tpu.memory_space<vmem>>, %arg7: memref<128x128xbf16, #tpu.memory_space<vmem>>, %arg8: memref<1x128xf32, #tpu.memory_space<vmem>>, %arg9: memref<1x128xf32, #tpu.memory_space<vmem>>, %arg10: memref<1x128xf32, #tpu.memory_space<vmem>>, %arg11: memref<128x512xbf16, #tpu.memory_space<vmem>>, %arg12: memref<1x512xf32, #tpu.memory_space<vmem>>, %arg13: memref<512x128xbf16, #tpu.memory_space<vmem>>, %arg14: memref<1x128xf32, #tpu.memory_space<vmem>>, %arg15: memref<4x16x128xf32, #tpu.memory_space<vmem>>) attributes {dimension_semantics = [#tpu.dimension_semantics<parallel>], iteration_bounds = array<i64: 2>, scalar_prefetch = 0 : i64, scratch_operands = 0 : i64, tpu.core_type = #tpu.core_type<tc>, window_params = [{transform_indices = @transform_0, window_bounds = array<i64: 4, 16, 128>}, {pipeline_mode = #tpu.pipeline_mode<synchronous>, transform_indices = @transform_1, window_bounds = array<i64: 16, 16>}, {pipeline_mode = #tpu.pipeline_mode<synchronous>, transform_indices = @transform_2, window_bounds = array<i64: 1, 128>}, {pipeline_mode = #tpu.pipeline_mode<synchronous>, transform_indices = @transform_3, window_bounds = array<i64: 1, 128>}, {pipeline_mode = #tpu.pipeline_mode<synchronous>, transform_indices = @transform_4, window_bounds = array<i64: 128, 384>}, {pipeline_mode = #tpu.pipeline_mode<synchronous>, transform_indices = @transform_5, window_bounds = array<i64: 1, 384>}, {pipeline_mode = #tpu.pipeline_mode<synchronous>, transform_indices = @transform_6, window_bounds = array<i64: 128, 128>}, {pipeline_mode = #tpu.pipeline_mode<synchronous>, transform_indices = @transform_7, window_bounds = array<i64: 1, 128>}, {pipeline_mode = #tpu.pipeline_mode<synchronous>, transform_indices = @transform_8, window_bounds = array<i64: 1, 128>}, {pipeline_mode = #tpu.pipeline_mode<synchronous>, transform_indices = @transform_9, window_bounds = array<i64: 1, 128>}, {pipeline_mode = #tpu.pipeline_mode<synchronous>, transform_indices = @transform_10, window_bounds = array<i64: 128, 512>}, {pipeline_mode = #tpu.pipeline_mode<synchronous>, transform_indices = @transform_11, window_bounds = array<i64: 1, 512>}, {pipeline_mode = #tpu.pipeline_mode<synchronous>, transform_indices = @transform_12, window_bounds = array<i64: 512, 128>}, {pipeline_mode = #tpu.pipeline_mode<synchronous>, transform_indices = @transform_13, window_bounds = array<i64: 1, 128>}, {transform_indices = @transform_14, window_bounds = array<i64: 4, 16, 128>}]} {
    %c0 = arith.constant 0 : index
    %c0_0 = arith.constant 0 : index
    %c0_1 = arith.constant 0 : index
    %0 = vector.load %arg1[%c0, %c0_0, %c0_1] : memref<4x16x128xf32, #tpu.memory_space<vmem>>, vector<4x16x128xf32>
    %1 = vector.shape_cast %0 : vector<4x16x128xf32> to vector<64x128xf32>
    %c0_2 = arith.constant 0 : index
    %c0_3 = arith.constant 0 : index
    %2 = vector.load %arg3[%c0_2, %c0_3] : memref<1x128xf32, #tpu.memory_space<vmem>>, vector<1x128xf32>
    %3 = vector.shape_cast %2 : vector<1x128xf32> to vector<128xf32>
    %c0_4 = arith.constant 0 : index
    %c0_5 = arith.constant 0 : index
    %4 = vector.load %arg4[%c0_4, %c0_5] : memref<1x128xf32, #tpu.memory_space<vmem>>, vector<1x128xf32>
    %5 = vector.shape_cast %4 : vector<1x128xf32> to vector<128xf32>
    %cst = arith.constant dense<0.000000e+00> : vector<64xf32>
    %6 = vector.multi_reduction <add>, %1, %cst [1] : vector<64x128xf32> to vector<64xf32>
    %7 = vector.shape_cast %6 : vector<64xf32> to vector<64x1xf32>
    %cst_6 = arith.constant 1.280000e+02 : f32
    %8 = vector.broadcast %cst_6 : f32 to vector<64x1xf32>
    %9 = arith.divf %7, %8 : vector<64x1xf32>
    %10 = vector.broadcast %9 : vector<64x1xf32> to vector<64x128xf32>
    %11 = arith.subf %1, %10 : vector<64x128xf32>
    %12 = arith.mulf %11, %11 : vector<64x128xf32>
    %cst_7 = arith.constant dense<0.000000e+00> : vector<64xf32>
    %13 = vector.multi_reduction <add>, %12, %cst_7 [1] : vector<64x128xf32> to vector<64xf32>
    %14 = vector.shape_cast %13 : vector<64xf32> to vector<64x1xf32>
    %cst_8 = arith.constant 1.280000e+02 : f32
    %15 = vector.broadcast %cst_8 : f32 to vector<64x1xf32>
    %16 = arith.divf %14, %15 : vector<64x1xf32>
    %17 = vector.broadcast %9 : vector<64x1xf32> to vector<64x128xf32>
    %18 = arith.subf %1, %17 : vector<64x128xf32>
    %cst_9 = arith.constant 9.99999974E-6 : f32
    %19 = vector.broadcast %cst_9 : f32 to vector<64x1xf32>
    %20 = arith.addf %16, %19 : vector<64x1xf32>
    %21 = math.rsqrt %20 : vector<64x1xf32>
    %22 = vector.broadcast %21 : vector<64x1xf32> to vector<64x128xf32>
    %23 = arith.mulf %18, %22 : vector<64x128xf32>
    %24 = vector.shape_cast %3 : vector<128xf32> to vector<1x128xf32>
    %25 = vector.broadcast %24 : vector<1x128xf32> to vector<64x128xf32>
    %26 = arith.mulf %23, %25 : vector<64x128xf32>
    %27 = vector.shape_cast %5 : vector<128xf32> to vector<1x128xf32>
    %28 = vector.broadcast %27 : vector<1x128xf32> to vector<64x128xf32>
    %29 = arith.addf %26, %28 : vector<64x128xf32>
    %30 = arith.truncf %29 : vector<64x128xf32> to vector<64x128xbf16>
    %c0_10 = arith.constant 0 : index
    %c0_11 = arith.constant 0 : index
    %31 = vector.load %arg5[%c0_10, %c0_11] : memref<128x384xbf16, #tpu.memory_space<vmem>>, vector<128x384xbf16>
    %cst_12 = arith.constant dense<0.000000e+00> : vector<64x384xf32>
    %32 = tpu.matmul %30, %31, %cst_12 {dimension_numbers = #tpu.dot_dimension_numbers<[1], [0], [0], [1], [0, 0, 1, 1], [], []>} : vector<64x128xbf16>, vector<128x384xbf16>, vector<64x384xf32> -> vector<64x384xf32>
    %c0_13 = arith.constant 0 : index
    %c0_14 = arith.constant 0 : index
    %33 = vector.load %arg6[%c0_13, %c0_14] : memref<1x384xf32, #tpu.memory_space<vmem>>, vector<1x384xf32>
    %34 = vector.shape_cast %33 : vector<1x384xf32> to vector<384xf32>
    %35 = vector.shape_cast %34 : vector<384xf32> to vector<1x384xf32>
    %36 = vector.broadcast %35 : vector<1x384xf32> to vector<64x384xf32>
    %37 = arith.addf %32, %36 : vector<64x384xf32>
    %38 = vector.extract_strided_slice %37 {offsets = [0, 0], sizes = [64, 64], strides = [1, 1]} : vector<64x384xf32> to vector<64x64xf32>
    %39 = vector.shape_cast %38 : vector<64x64xf32> to vector<4x1x16x64xf32>
    %40 = vector.extract_strided_slice %37 {offsets = [0, 64], sizes = [64, 64], strides = [1, 1]} : vector<64x384xf32> to vector<64x64xf32>
    %41 = vector.shape_cast %40 : vector<64x64xf32> to vector<4x1x16x64xf32>
    %42 = tpu.concatenate %39, %41 in 1 : vector<4x1x16x64xf32>, vector<4x1x16x64xf32> -> vector<4x2x16x64xf32>
    %43 = vector.shape_cast %42 : vector<4x2x16x64xf32> to vector<8x16x64xf32>
    %44 = arith.truncf %43 : vector<8x16x64xf32> to vector<8x16x64xbf16>
    %45 = vector.extract_strided_slice %37 {offsets = [0, 128], sizes = [64, 64], strides = [1, 1]} : vector<64x384xf32> to vector<64x64xf32>
    %46 = vector.shape_cast %45 : vector<64x64xf32> to vector<4x1x16x64xf32>
    %47 = vector.extract_strided_slice %37 {offsets = [0, 192], sizes = [64, 64], strides = [1, 1]} : vector<64x384xf32> to vector<64x64xf32>
    %48 = vector.shape_cast %47 : vector<64x64xf32> to vector<4x1x16x64xf32>
    %49 = tpu.concatenate %46, %48 in 1 : vector<4x1x16x64xf32>, vector<4x1x16x64xf32> -> vector<4x2x16x64xf32>
    %50 = vector.shape_cast %49 : vector<4x2x16x64xf32> to vector<8x16x64xf32>
    %51 = arith.truncf %50 : vector<8x16x64xf32> to vector<8x16x64xbf16>
    %52 = vector.extract_strided_slice %37 {offsets = [0, 256], sizes = [64, 64], strides = [1, 1]} : vector<64x384xf32> to vector<64x64xf32>
    %53 = vector.shape_cast %52 : vector<64x64xf32> to vector<4x1x16x64xf32>
    %54 = vector.extract_strided_slice %37 {offsets = [0, 320], sizes = [64, 64], strides = [1, 1]} : vector<64x384xf32> to vector<64x64xf32>
    %55 = vector.shape_cast %54 : vector<64x64xf32> to vector<4x1x16x64xf32>
    %56 = tpu.concatenate %53, %55 in 1 : vector<4x1x16x64xf32>, vector<4x1x16x64xf32> -> vector<4x2x16x64xf32>
    %57 = vector.shape_cast %56 : vector<4x2x16x64xf32> to vector<8x16x64xf32>
    %58 = arith.truncf %57 : vector<8x16x64xf32> to vector<8x16x64xbf16>
    "tpu.trace_start"() <{level = 10 : i32, message = "bqe,bke->bqk"}> : () -> ()
    %cst_15 = arith.constant dense<0.000000e+00> : vector<8x16x16xf32>
    %59 = tpu.matmul %44, %51, %cst_15 {dimension_numbers = #tpu.dot_dimension_numbers<[2], [2], [1], [1], [0, 0, 0, 1, 1, 1], [0], [0]>} : vector<8x16x64xbf16>, vector<8x16x64xbf16>, vector<8x16x16xf32> -> vector<8x16x16xf32>
    "tpu.trace_stop"() : () -> ()
    %c0_16 = arith.constant 0 : index
    %c0_17 = arith.constant 0 : index
    %60 = vector.load %arg2[%c0_16, %c0_17] : memref<16x16xf32, #tpu.memory_space<vmem>>, vector<16x16xf32>
    %61 = vector.shape_cast %60 : vector<16x16xf32> to vector<1x16x16xf32>
    %62 = vector.broadcast %61 : vector<1x16x16xf32> to vector<8x16x16xf32>
    %63 = arith.addf %59, %62 : vector<8x16x16xf32>
    %cst_18 = arith.constant dense<0xFF800000> : vector<8x16xf32>
    %64 = vector.multi_reduction <maximumf>, %63, %cst_18 [2] : vector<8x16x16xf32> to vector<8x16xf32>
    %65 = vector.shape_cast %64 : vector<8x16xf32> to vector<8x16x1xf32>
    %66 = vector.broadcast %65 : vector<8x16x1xf32> to vector<8x16x16xf32>
    %67 = arith.subf %63, %66 : vector<8x16x16xf32>
    %68 = math.exp %67 : vector<8x16x16xf32>
    %cst_19 = arith.constant dense<0.000000e+00> : vector<8x16xf32>
    %69 = vector.multi_reduction <add>, %68, %cst_19 [2] : vector<8x16x16xf32> to vector<8x16xf32>
    %70 = vector.shape_cast %69 : vector<8x16xf32> to vector<8x16x1xf32>
    %71 = tpu.reciprocal %70 {approx = true} : vector<8x16x1xf32> -> vector<8x16x1xf32>
    %72 = vector.broadcast %71 : vector<8x16x1xf32> to vector<8x16x16xf32>
    %73 = arith.mulf %68, %72 : vector<8x16x16xf32>
    %74 = arith.truncf %73 : vector<8x16x16xf32> to vector<8x16x16xbf16>
    "tpu.trace_start"() <{level = 10 : i32, message = "bqk,bke->bqe"}> : () -> ()
    %cst_20 = arith.constant dense<0.000000e+00> : vector<8x16x64xf32>
    %75 = tpu.matmul %74, %58, %cst_20 {dimension_numbers = #tpu.dot_dimension_numbers<[2], [1], [1], [2], [0, 0, 0, 1, 1, 2], [0], [0]>} : vector<8x16x16xbf16>, vector<8x16x64xbf16>, vector<8x16x64xf32> -> vector<8x16x64xf32>
    "tpu.trace_stop"() : () -> ()
    %76 = vector.shape_cast %75 : vector<8x16x64xf32> to vector<4x2x16x64xf32>
    %77 = vector.extract_strided_slice %76 {offsets = [0, 0, 0, 0], sizes = [4, 1, 16, 64], strides = [1, 1, 1, 1]} : vector<4x2x16x64xf32> to vector<4x1x16x64xf32>
    %78 = vector.shape_cast %77 : vector<4x1x16x64xf32> to vector<4x16x64xf32>
    %79 = vector.extract_strided_slice %76 {offsets = [0, 1, 0, 0], sizes = [4, 1, 16, 64], strides = [1, 1, 1, 1]} : vector<4x2x16x64xf32> to vector<4x1x16x64xf32>
    %80 = vector.shape_cast %79 : vector<4x1x16x64xf32> to vector<4x16x64xf32>
    %81 = tpu.concatenate %78, %80 in 2 : vector<4x16x64xf32>, vector<4x16x64xf32> -> vector<4x16x128xf32>
    %82 = vector.shape_cast %81 : vector<4x16x128xf32> to vector<64x128xf32>
    %83 = arith.truncf %82 : vector<64x128xf32> to vector<64x128xbf16>
    %c0_21 = arith.constant 0 : index
    %c0_22 = arith.constant 0 : index
    %84 = vector.load %arg7[%c0_21, %c0_22] : memref<128x128xbf16, #tpu.memory_space<vmem>>, vector<128x128xbf16>
    %cst_23 = arith.constant dense<0.000000e+00> : vector<64x128xf32>
    %85 = tpu.matmul %83, %84, %cst_23 {dimension_numbers = #tpu.dot_dimension_numbers<[1], [0], [0], [1], [0, 0, 1, 1], [], []>} : vector<64x128xbf16>, vector<128x128xbf16>, vector<64x128xf32> -> vector<64x128xf32>
    %86 = arith.addf %1, %85 : vector<64x128xf32>
    %c0_24 = arith.constant 0 : index
    %c0_25 = arith.constant 0 : index
    %87 = vector.load %arg8[%c0_24, %c0_25] : memref<1x128xf32, #tpu.memory_space<vmem>>, vector<1x128xf32>
    %88 = vector.shape_cast %87 : vector<1x128xf32> to vector<128xf32>
    %89 = vector.shape_cast %88 : vector<128xf32> to vector<1x128xf32>
    %90 = vector.broadcast %89 : vector<1x128xf32> to vector<64x128xf32>
    %91 = arith.addf %86, %90 : vector<64x128xf32>
    %c0_26 = arith.constant 0 : index
    %c0_27 = arith.constant 0 : index
    %92 = vector.load %arg9[%c0_26, %c0_27] : memref<1x128xf32, #tpu.memory_space<vmem>>, vector<1x128xf32>
    %93 = vector.shape_cast %92 : vector<1x128xf32> to vector<128xf32>
    %c0_28 = arith.constant 0 : index
    %c0_29 = arith.constant 0 : index
    %94 = vector.load %arg10[%c0_28, %c0_29] : memref<1x128xf32, #tpu.memory_space<vmem>>, vector<1x128xf32>
    %95 = vector.shape_cast %94 : vector<1x128xf32> to vector<128xf32>
    %cst_30 = arith.constant dense<0.000000e+00> : vector<64xf32>
    %96 = vector.multi_reduction <add>, %91, %cst_30 [1] : vector<64x128xf32> to vector<64xf32>
    %97 = vector.shape_cast %96 : vector<64xf32> to vector<64x1xf32>
    %cst_31 = arith.constant 1.280000e+02 : f32
    %98 = vector.broadcast %cst_31 : f32 to vector<64x1xf32>
    %99 = arith.divf %97, %98 : vector<64x1xf32>
    %100 = vector.broadcast %99 : vector<64x1xf32> to vector<64x128xf32>
    %101 = arith.subf %91, %100 : vector<64x128xf32>
    %102 = arith.mulf %101, %101 : vector<64x128xf32>
    %cst_32 = arith.constant dense<0.000000e+00> : vector<64xf32>
    %103 = vector.multi_reduction <add>, %102, %cst_32 [1] : vector<64x128xf32> to vector<64xf32>
    %104 = vector.shape_cast %103 : vector<64xf32> to vector<64x1xf32>
    %cst_33 = arith.constant 1.280000e+02 : f32
    %105 = vector.broadcast %cst_33 : f32 to vector<64x1xf32>
    %106 = arith.divf %104, %105 : vector<64x1xf32>
    %107 = vector.broadcast %99 : vector<64x1xf32> to vector<64x128xf32>
    %108 = arith.subf %91, %107 : vector<64x128xf32>
    %cst_34 = arith.constant 9.99999974E-6 : f32
    %109 = vector.broadcast %cst_34 : f32 to vector<64x1xf32>
    %110 = arith.addf %106, %109 : vector<64x1xf32>
    %111 = math.rsqrt %110 : vector<64x1xf32>
    %112 = vector.broadcast %111 : vector<64x1xf32> to vector<64x128xf32>
    %113 = arith.mulf %108, %112 : vector<64x128xf32>
    %114 = vector.shape_cast %93 : vector<128xf32> to vector<1x128xf32>
    %115 = vector.broadcast %114 : vector<1x128xf32> to vector<64x128xf32>
    %116 = arith.mulf %113, %115 : vector<64x128xf32>
    %117 = vector.shape_cast %95 : vector<128xf32> to vector<1x128xf32>
    %118 = vector.broadcast %117 : vector<1x128xf32> to vector<64x128xf32>
    %119 = arith.addf %116, %118 : vector<64x128xf32>
    %120 = arith.truncf %119 : vector<64x128xf32> to vector<64x128xbf16>
    %c0_35 = arith.constant 0 : index
    %c0_36 = arith.constant 0 : index
    %121 = vector.load %arg11[%c0_35, %c0_36] : memref<128x512xbf16, #tpu.memory_space<vmem>>, vector<128x512xbf16>
    %cst_37 = arith.constant dense<0.000000e+00> : vector<64x512xf32>
    %122 = tpu.matmul %120, %121, %cst_37 {dimension_numbers = #tpu.dot_dimension_numbers<[1], [0], [0], [1], [0, 0, 1, 1], [], []>} : vector<64x128xbf16>, vector<128x512xbf16>, vector<64x512xf32> -> vector<64x512xf32>
    %c0_38 = arith.constant 0 : index
    %c0_39 = arith.constant 0 : index
    %123 = vector.load %arg12[%c0_38, %c0_39] : memref<1x512xf32, #tpu.memory_space<vmem>>, vector<1x512xf32>
    %124 = vector.shape_cast %123 : vector<1x512xf32> to vector<512xf32>
    %125 = vector.shape_cast %124 : vector<512xf32> to vector<1x512xf32>
    %126 = vector.broadcast %125 : vector<1x512xf32> to vector<64x512xf32>
    %127 = arith.addf %122, %126 : vector<64x512xf32>
    %cst_40 = arith.constant 1.702000e+00 : f32
    %128 = vector.broadcast %cst_40 : f32 to vector<64x512xf32>
    %129 = arith.mulf %128, %127 : vector<64x512xf32>
    %130 = arith.negf %129 : vector<64x512xf32>
    %131 = math.exp %130 : vector<64x512xf32>
    %cst_41 = arith.constant 1.000000e+00 : f32
    %132 = vector.broadcast %cst_41 : f32 to vector<64x512xf32>
    %133 = arith.addf %132, %131 : vector<64x512xf32>
    %134 = arith.divf %132, %133 : vector<64x512xf32>
    %135 = arith.mulf %127, %134 : vector<64x512xf32>
    %136 = arith.truncf %135 : vector<64x512xf32> to vector<64x512xbf16>
    %c0_42 = arith.constant 0 : index
    %c0_43 = arith.constant 0 : index
    %137 = vector.load %arg13[%c0_42, %c0_43] : memref<512x128xbf16, #tpu.memory_space<vmem>>, vector<512x128xbf16>
    %cst_44 = arith.constant dense<0.000000e+00> : vector<64x128xf32>
    %138 = tpu.matmul %136, %137, %cst_44 {dimension_numbers = #tpu.dot_dimension_numbers<[1], [0], [0], [1], [0, 0, 1, 1], [], []>} : vector<64x512xbf16>, vector<512x128xbf16>, vector<64x128xf32> -> vector<64x128xf32>
    %c0_45 = arith.constant 0 : index
    %c0_46 = arith.constant 0 : index
    %139 = vector.load %arg14[%c0_45, %c0_46] : memref<1x128xf32, #tpu.memory_space<vmem>>, vector<1x128xf32>
    %140 = vector.shape_cast %139 : vector<1x128xf32> to vector<128xf32>
    %141 = vector.shape_cast %140 : vector<128xf32> to vector<1x128xf32>
    %142 = vector.broadcast %141 : vector<1x128xf32> to vector<64x128xf32>
    %143 = arith.addf %138, %142 : vector<64x128xf32>
    %144 = arith.addf %91, %143 : vector<64x128xf32>
    %145 = vector.shape_cast %144 : vector<64x128xf32> to vector<4x16x128xf32>
    %c0_47 = arith.constant 0 : index
    %c0_48 = arith.constant 0 : index
    %c0_49 = arith.constant 0 : index
    %146 = vector.load %arg15[%c0_47, %c0_48, %c0_49] : memref<4x16x128xf32, #tpu.memory_space<vmem>>, vector<4x16x128xf32>
    tpu.vector_store %arg15[%c0_47, %c0_48, %c0_49], %145 {strides = array<i32>} : memref<4x16x128xf32, #tpu.memory_space<vmem>>, vector<4x16x128xf32>,
    return
  }
  func.func @transform_0(%arg0: i32) -> (i32, i32, i32) {
    %c0_i32 = arith.constant 0 : i32
    %c0_i32_0 = arith.constant 0 : i32
    %c0_i32_1 = arith.constant 0 : i32
    return %arg0, %c0_i32, %c0_i32_0 : i32, i32, i32
  }
  func.func @transform_1(%arg0: i32) -> (i32, i32) {
    %c0_i32 = arith.constant 0 : i32
    %c0_i32_0 = arith.constant 0 : i32
    %c0_i32_1 = arith.constant 0 : i32
    return %c0_i32, %c0_i32_0 : i32, i32
  }
  func.func @transform_2(%arg0: i32) -> (i32, i32) {
    %c0_i32 = arith.constant 0 : i32
    %c0_i32_0 = arith.constant 0 : i32
    %c0_i32_1 = arith.constant 0 : i32
    return %c0_i32, %c0_i32_0 : i32, i32
  }
  func.func @transform_3(%arg0: i32) -> (i32, i32) {
    %c0_i32 = arith.constant 0 : i32
    %c0_i32_0 = arith.constant 0 : i32
    %c0_i32_1 = arith.constant 0 : i32
    return %c0_i32, %c0_i32_0 : i32, i32
  }
  func.func @transform_4(%arg0: i32) -> (i32, i32) {
    %c0_i32 = arith.constant 0 : i32
    %c0_i32_0 = arith.constant 0 : i32
    %c0_i32_1 = arith.constant 0 : i32
    return %c0_i32, %c0_i32_0 : i32, i32
  }
  func.func @transform_5(%arg0: i32) -> (i32, i32) {
    %c0_i32 = arith.constant 0 : i32
    %c0_i32_0 = arith.constant 0 : i32
    %c0_i32_1 = arith.constant 0 : i32
    return %c0_i32, %c0_i32_0 : i32, i32
  }
  func.func @transform_6(%arg0: i32) -> (i32, i32) {
    %c0_i32 = arith.constant 0 : i32
    %c0_i32_0 = arith.constant 0 : i32
    %c0_i32_1 = arith.constant 0 : i32
    return %c0_i32, %c0_i32_0 : i32, i32
  }
  func.func @transform_7(%arg0: i32) -> (i32, i32) {
    %c0_i32 = arith.constant 0 : i32
    %c0_i32_0 = arith.constant 0 : i32
    %c0_i32_1 = arith.constant 0 : i32
    return %c0_i32, %c0_i32_0 : i32, i32
  }
  func.func @transform_8(%arg0: i32) -> (i32, i32) {
    %c0_i32 = arith.constant 0 : i32
    %c0_i32_0 = arith.constant 0 : i32
    %c0_i32_1 = arith.constant 0 : i32
    return %c0_i32, %c0_i32_0 : i32, i32
  }
  func.func @transform_9(%arg0: i32) -> (i32, i32) {
    %c0_i32 = arith.constant 0 : i32
    %c0_i32_0 = arith.constant 0 : i32
    %c0_i32_1 = arith.constant 0 : i32
    return %c0_i32, %c0_i32_0 : i32, i32
  }
  func.func @transform_10(%arg0: i32) -> (i32, i32) {
    %c0_i32 = arith.constant 0 : i32
    %c0_i32_0 = arith.constant 0 : i32
    %c0_i32_1 = arith.constant 0 : i32
    return %c0_i32, %c0_i32_0 : i32, i32
  }
  func.func @transform_11(%arg0: i32) -> (i32, i32) {
    %c0_i32 = arith.constant 0 : i32
    %c0_i32_0 = arith.constant 0 : i32
    %c0_i32_1 = arith.constant 0 : i32
    return %c0_i32, %c0_i32_0 : i32, i32
  }
  func.func @transform_12(%arg0: i32) -> (i32, i32) {
    %c0_i32 = arith.constant 0 : i32
    %c0_i32_0 = arith.constant 0 : i32
    %c0_i32_1 = arith.constant 0 : i32
    return %c0_i32, %c0_i32_0 : i32, i32
  }
  func.func @transform_13(%arg0: i32) -> (i32, i32) {
    %c0_i32 = arith.constant 0 : i32
    %c0_i32_0 = arith.constant 0 : i32
    %c0_i32_1 = arith.constant 0 : i32
    return %c0_i32, %c0_i32_0 : i32, i32
  }
  func.func @transform_14(%arg0: i32) -> (i32, i32, i32) {
    %c0_i32 = arith.constant 0 : i32
    %c0_i32_0 = arith.constant 0 : i32
    %c0_i32_1 = arith.constant 0 : i32
    return %arg0, %c0_i32, %c0_i32_0 : i32, i32, i32
  }
}

</mosaic_0001>

<bundles_post_ra>
// kernel: tpu_custom_call.1
= control target key start
LH: loop header
LB: loop body
LE: loop exit
PB: predicated region body
PF: predicated region fallthrough
CT: control target
= control target key end

     0   :  { %s6125_s0 = inlined_call_operand.hbm [shape: f32[8,16,128], index: 0, kind: input, shape index: {}]   ;;  %s6126_s1 = inlined_call_operand.hbm [shape: f32[16,16], index: 1, kind: input, shape index: {}]   ;;  %s6127_s2 = inlined_call_operand.hbm [shape: f32[1,128], index: 2, kind: input, shape index: {}]   ;;  %s6128_s3 = inlined_call_operand.vmem [shape: f32[1,128], index: 3, kind: input, shape index: {}]   ;;  %s6129_s4 = inlined_call_operand.hbm [shape: bf16[128,384], index: 4, kind: input, shape index: {}]   ;;  %s6130_s5 = inlined_call_operand.vmem [shape: f32[1,384], index: 5, kind: input, shape index: {}]   ;;  %s6131_s6 = inlined_call_operand.hbm [shape: bf16[128,128], index: 6, kind: input, shape index: {}]   ;;  %s6132_s7 = inlined_call_operand.vmem [shape: f32[1,128], index: 7, kind: input, shape index: {}]   ;;  %s6133_s8 = inlined_call_operand.vmem [shape: f32[1,128], index: 8, kind: input, shape index: {}]   ;;  %s6134_s9 = inlined_call_operand.vmem [shape: f32[1,128], index: 9, kind: input, shape index: {}]   ;;  %s6135_s10 = inlined_call_operand.hbm [shape: bf16[128,512], index: 10, kind: input, shape index: {}]   ;;  %s6136_s11 = inlined_call_operand.vmem [shape: f32[1,512], index: 11, kind: input, shape index: {}]   ;;  %s6137_s12 = inlined_call_operand.hbm [shape: bf16[512,128], index: 12, kind: input, shape index: {}]   ;;  %s6138_s13 = inlined_call_operand.vmem [shape: f32[1,128], index: 13, kind: input, shape index: {}]   ;;  %s6139_s14 = inlined_call_operand.hbm [shape: f32[8,16,128], index: 14, kind: output, shape index: {}]  }
   0x1   :  { %6167 = sst [smem:[#allocation41_spill]] %s6126_s1 }
   0x2   :  { %6168 = sst [smem:[#allocation42_spill]] %s6129_s4 }
   0x3   :  { %6169 = sst [smem:[#allocation43_spill]] %s6132_s7 }
   0x4   :  { %6170 = sst [smem:[#allocation44_spill]] %s6133_s8 }
   0x5   :  { %6171 = sst [smem:[#allocation45_spill]] %s6134_s9 }
   0x6   :  { %6172 = sst [smem:[#allocation46_spill]] %s6136_s11 }
   0x7   :  { %6173 = sst [smem:[#allocation47_spill]] %s6138_s13 }
   0x8   :  { %6174 = sst [smem:[#allocation48_spill]] %s6139_s14 }
   0x9   :  { %19 = vsyncpa [#allocation3], 0 }
   0xa   :  { %21 = vsyncpa [#allocation3 + $0x1], 0 }
   0xb   :  { %22 = vsyncpa [#allocation6], 0 }
   0xc   :  { %23 = vsyncpa [#allocation9], 0 }
   0xd   :  { %24 = vsyncpa [#allocation12], 0 }
   0xe   :  { %25 = vsyncpa [#allocation4], 0 }
   0xf   :  { %27 = vsyncpa [#allocation4 + $0x1], 0  ;;  %s4967_s29 = smov 0   ;;  %s4969_s30 = smov 0  }
  0x10   :  { %s4971_s15 = smov 0   ;;  %s4973_s16 = smov 0  }
  0x11 LB: > { %s4870_s17 = smov [#allocation5]   ;;  %s4988_s19 = sadd.s32 4294967295, %s4868_s16   ;;  %s4868_s16 = sphi %s4973_s16, %s6249_s16   ;;  %s4864_s15 = sphi %s4971_s15, %s6248_s15   ;;  %s4860_s30 = sphi %s4969_s30, %s6247_s30   ;;  %s4856_s29 = sphi %s4967_s29, %s6246_s29  }
  0x12   : > { %s375_s18 = sshll.u32 %s4870_s17, 4  ;;  %p3562_p0 = scmp.ge.s32.totalorder %s4868_s16, 1  ;;  %s4993_s18 = int_to_ptr.vmem [resolvable:$true] %s375_s18 }
  0x13   : > { %p6142_p1 = scmp.eq.s32.totalorder %s4988_s19, 0  ;;  %p363_p2 = scmp.lt.s32.totalorder %s4868_s16, 3 }
  0x14   : > { %s4871_s21 = smov [#allocation8]   ;;  %s4872_s24 = smov [#allocation11]  }
  0x15   : > { %p4995_p3 = pnand %p3562_p0, %p363_p2  ;;  %s402_s22 = sshll.u32 %s4871_s21, 4  ;;  %s5008_s22 = int_to_ptr.vmem [resolvable:$true] %s402_s22 }
  0x16   : > { %s5010_s25 = sshll.u32 %s4872_s24, 4  ;;  %s6177_s1 = sld [smem:[#allocation41_spill]]  ;;  %s441_s25 = int_to_ptr.vmem [resolvable:$true] %s5010_s25 }
  0x17   : > { %s6175_s20 = scalar_select %p4995_p3, 1, 0 }
  0x18   : > { %p4067_p5 = pneg %p4995_p3 }
  0x1a   : > { %p5004_p6 = pnand %p4067_p5, %p6142_p1 }
  0x1c   : > { %s4592_s28 = scalar_lea.hbm %s6177_s1, 256  ;;  %p5020_p8 = pneg %p5004_p6 }
  0x1d   : > { %p4593_p7 = scmp.ne.s32.totalorder %s6177_s1, %s4592_s28  ;;  %p4599_p11 = scmp.lt.u32.totalorder %s4592_s28, %s6177_s1 }
  0x1f   : > { %p4595_p9 = pnand %p5020_p8, %p4593_p7 }
  0x21   : > { %p4596_p10 = pneg %p4595_p9 }
  0x23   : > { %p4601_p12 = pnand %p4599_p11, %p4596_p10 }
  0x25   : > { %4604 = shalt.err (!%p4601_p12)
}
  0x26   : > { %s4605_s14 = scalar_lea.vmem %s4993_s18, 256  ;;  %p4613_p5 = scmp.lt.s32.totalorder %s4993_s18, %s4993_s18 }
  0x27   : > { %p4606_p13 = scmp.ne.s32.totalorder %s4993_s18, %s4605_s14  ;;  %p4614_p4 = scmp.lt.s32.totalorder %s4605_s14, %s4605_s14 }
  0x29   : > { %p4608_p0 = pnand %p4606_p13, %p5020_p8  ;;  %p4615_p7 = por %p4614_p4, %p4613_p5 }
  0x2b   : > { %p4609_p2 = pneg %p4608_p0 }
  0x2d   : > { %p4616_p9 = pnand %p4615_p7, %p4609_p2 }
  0x2f   : > { %4619 = shalt.err (!%p4616_p9)
}
  0x30   : > { %s6141_s26 = smov 128   ;;  %s6144_s13 = smov 8  }
  0x31   : > { %4070 = dma.hbm_to_vmem [thread:$0]  (!%p5004_p6), %s6177_s1, 256, %s4993_s18, [#allocation6], %s6141_s26, %s6141_s26, %s6144_s13  }
  0x32   : > { %s6179_s4 = sld [smem:[#allocation42_spill]] }
  0x38   : > { %s4620_s14 = scalar_lea.hbm %s6179_s4, 3072 }
  0x39   : > { %p4621_p4 = scmp.ne.s32.totalorder %s6179_s4, %s4620_s14  ;;  %p4627_p12 = scmp.lt.u32.totalorder %s4620_s14, %s6179_s4 }
  0x3b   : > { %p4623_p10 = pnand %p4621_p4, %p5020_p8 }
  0x3d   : > { %p4624_p11 = pneg %p4623_p10 }
  0x3f   : > { %p4629_p13 = pnand %p4627_p12, %p4624_p11 }
  0x41   : > { %4632 = shalt.err (!%p4629_p13)
}
  0x42   : > { %s4633_s18 = scalar_lea.vmem %s5008_s22, 3072  ;;  %p4641_p7 = scmp.lt.s32.totalorder %s5008_s22, %s5008_s22 }
  0x43   : > { %p4634_p0 = scmp.ne.s32.totalorder %s5008_s22, %s4633_s18  ;;  %p4642_p9 = scmp.lt.s32.totalorder %s4633_s18, %s4633_s18 }
  0x45   : > { %p4636_p2 = pnand %p4634_p0, %p5020_p8  ;;  %p4643_p4 = por %p4642_p9, %p4641_p7 }
  0x47   : > { %p4637_p5 = pneg %p4636_p2 }
  0x49   : > { %p4644_p10 = pnand %p4643_p4, %p4637_p5 }
  0x4b   : > { %4647 = shalt.err (!%p4644_p10)
}
  0x4c   : > { %s4875_s9 = smov 192   ;;  %s4876_s7 = smov 12  }
  0x4d   : > { %4076 = dma.hbm_to_vmem [thread:$0]  (!%p5004_p6), %s6179_s4, 3072, %s5008_s22, [#allocation9], %s4875_s9, %s4875_s9, %s4876_s7  }
  0x4e   : > { %s4648_s17 = scalar_lea.hbm %s6135_s10, 4096 }
  0x4f   : > { %p4649_p11 = scmp.ne.s32.totalorder %s6135_s10, %s4648_s17  ;;  %p4655_p0 = scmp.lt.u32.totalorder %s4648_s17, %s6135_s10 }
  0x51   : > { %p4651_p12 = pnand %p4649_p11, %p5020_p8 }
  0x53   : > { %p4652_p13 = pneg %p4651_p12 }
  0x55   : > { %p4657_p2 = pnand %p4655_p0, %p4652_p13 }
  0x57   : > { %4660 = shalt.err (!%p4657_p2)
}
  0x58   : > { %s4661_s8 = scalar_lea.vmem %s441_s25, 4096  ;;  %p4669_p4 = scmp.lt.s32.totalorder %s441_s25, %s441_s25 }
  0x59   : > { %p4662_p5 = scmp.ne.s32.totalorder %s441_s25, %s4661_s8  ;;  %p4670_p10 = scmp.lt.s32.totalorder %s4661_s8, %s4661_s8 }
  0x5b   : > { %p4664_p7 = pnand %p4662_p5, %p5020_p8  ;;  %p4671_p1 = por %p4670_p10, %p4669_p4 }
  0x5d   : > { %p4665_p9 = pneg %p4664_p7 }
  0x5f   : > { %p4672_p3 = pnand %p4671_p1, %p4665_p9 }
  0x61   : > { %4675 = shalt.err (!%p4672_p3)
}
  0x62   : > { %s4877_s22 = smov 256   ;;  %s4878_s9 = smov 16  }
  0x63   : > { %4082 = dma.hbm_to_vmem [thread:$0]  (!%p5004_p6), %s6135_s10, 4096, %s441_s25, [#allocation12], %s4877_s22, %s4877_s22, %s4878_s9  }
  0x64   : > { %s4879_s11 = smov [#allocation7]   ;;  %s4880_s28 = smov [#allocation10]  }
  0x65   : > { %s389_s27 = sshll.u32 %s4879_s11, 4  ;;  %s418_s17 = sshll.u32 %s4880_s28, 4  ;;  %s390_s27 = int_to_ptr.vmem [resolvable:$true] %s389_s27  ;;  %s419_s17 = int_to_ptr.vmem [resolvable:$true] %s418_s17 }
  0x66   : > { %s4676_s18 = scalar_lea.hbm %s6127_s2, 16 }
  0x67   : > { %p4677_p1 = scmp.ne.s32.totalorder %s6127_s2, %s4676_s18  ;;  %p4683_p12 = scmp.lt.u32.totalorder %s4676_s18, %s6127_s2 }
  0x69   : > { %p4679_p3 = pnand %p4677_p1, %p5020_p8 }
  0x6b   : > { %p4680_p11 = pneg %p4679_p3 }
  0x6d   : > { %p4685_p13 = pnand %p4683_p12, %p4680_p11 }
  0x6f   : > { %4688 = shalt.err (!%p4685_p13)
}
  0x70   : > { %s4689_s25 = scalar_lea.vmem %s390_s27, 16  ;;  %s4696_s22 = scalar_lea.vmem %s390_s27, 32 }
  0x71   : > { %p4690_p0 = scmp.ne.s32.totalorder %s390_s27, %s4689_s25  ;;  %p4697_p7 = scmp.lt.s32.totalorder %s390_s27, %s390_s27 }
  0x72   : > { %p4698_p9 = scmp.lt.s32.totalorder %s4696_s22, %s4689_s25 }
  0x73   : > { %p4692_p2 = pnand %p4690_p0, %p5020_p8 }
  0x74   : > { %p4699_p4 = por %p4698_p9, %p4697_p7 }
  0x75   : > { %p4693_p5 = pneg %p4692_p2 }
  0x77   : > { %p4700_p10 = pnand %p4699_p4, %p4693_p5 }
  0x79   : > { %4703 = shalt.err (!%p4700_p10)
}
  0x7a   : > { %4073 = dma.hbm_to_vmem [thread:$0]  (!%p5004_p6), %s6127_s2, 16, %s390_s27, [#allocation6]  }
  0x7b   : > { %s4704_s26 = scalar_lea.hbm %s6131_s6, 1024 }
  0x7c   : > { %p4705_p1 = scmp.ne.s32.totalorder %s6131_s6, %s4704_s26  ;;  %p4711_p12 = scmp.lt.u32.totalorder %s4704_s26, %s6131_s6 }
  0x7e   : > { %p4707_p3 = pnand %p4705_p1, %p5020_p8 }
  0x80   : > { %p4708_p11 = pneg %p4707_p3 }
  0x82   : > { %p4713_p13 = pnand %p4711_p12, %p4708_p11 }
  0x84   : > { %4716 = shalt.err (!%p4713_p13)
}
  0x85   : > { %s4717_s14 = scalar_lea.vmem %s419_s17, 1024  ;;  %p4725_p7 = scmp.lt.s32.totalorder %s419_s17, %s419_s17 }
  0x86   : > { %p4718_p0 = scmp.ne.s32.totalorder %s419_s17, %s4717_s14  ;;  %p4726_p9 = scmp.lt.s32.totalorder %s4717_s14, %s4717_s14 }
  0x88   : > { %p4720_p2 = pnand %p4718_p0, %p5020_p8  ;;  %p4727_p4 = por %p4726_p9, %p4725_p7 }
  0x8a   : > { %p4721_p5 = pneg %p4720_p2 }
  0x8c   : > { %p4728_p10 = pnand %p4727_p4, %p4721_p5 }
  0x8e   : > { %4731 = shalt.err (!%p4728_p10)
}
  0x8f   : > { %s4881_s27 = smov 64   ;;  %s4882_s18 = smov 4  }
  0x90   : > { %4079 = dma.hbm_to_vmem [thread:$0]  (!%p5004_p6), %s6131_s6, 1024, %s419_s17, [#allocation9], %s4881_s27, %s4881_s27, %s4882_s18  }
  0x91   : > { %s4883_s22 = smov [#allocation13]   ;;  %s4732_s4 = scalar_lea.hbm %s6137_s12, 4096 }
  0x92   : > { %s456_s13 = sshll.u32 %s4883_s22, 4  ;;  %p4733_p1 = scmp.ne.s32.totalorder %s6137_s12, %s4732_s4  ;;  %s457_s13 = int_to_ptr.vmem [resolvable:$true] %s456_s13 }
  0x93   : > { %p4739_p12 = scmp.lt.u32.totalorder %s4732_s4, %s6137_s12 }
  0x94   : > { %p4735_p3 = pnand %p4733_p1, %p5020_p8 }
  0x96   : > { %p4736_p11 = pneg %p4735_p3 }
  0x98   : > { %p4741_p13 = pnand %p4739_p12, %p4736_p11 }
  0x9a   : > { %4744 = shalt.err (!%p4741_p13)
}
  0x9b   : > { %s4745_s17 = scalar_lea.vmem %s457_s13, 4096  ;;  %p4753_p7 = scmp.lt.s32.totalorder %s457_s13, %s457_s13 }
  0x9c   : > { %p4746_p0 = scmp.ne.s32.totalorder %s457_s13, %s4745_s17  ;;  %p4754_p9 = scmp.lt.s32.totalorder %s4745_s17, %s4745_s17 }
  0x9e   : > { %p4748_p2 = pnand %p4746_p0, %p5020_p8  ;;  %p4755_p4 = por %p4754_p9, %p4753_p7 }
  0xa0   : > { %p4749_p5 = pneg %p4748_p2 }
  0xa2   : > { %p4756_p10 = pnand %p4755_p4, %p4749_p5 }
  0xa4   : > { %4759 = shalt.err (!%p4756_p10)
}
  0xa5   : > { %4085 = dma.hbm_to_vmem [thread:$0]  (!%p5004_p6), %s6137_s12, 4096, %s457_s13, [#allocation12], %s4881_s27, %s4881_s27, %s4882_s18  }
  0xa6   : > { %s3561_s21 = sadd.s32 4294967294, %s4868_s16   ;;  %s5142_s23 = sadd.s32 1, %s4868_s16  }
  0xa7   : > { %s37_s8 = ssub.s32 %s4868_s16, %s5142_s23  ;;  %s40_s25 = sadd.s32 1, %s4864_s15 }
  0xa8   : > { %p38_p8 = scmp.eq.s32.totalorder %s37_s8, 0  ;;  %p47_p1 = scmp.ne.s32.totalorder %s4864_s15, %s4860_s30 }
  0xa9   : > { %p48_p3 = scmp.eq.s32.totalorder %s4868_s16, 0  ;;  %p53_p11 = scmp.ne.s32.totalorder %s4860_s30, %s4856_s29 }
  0xaa   : > { %s5153_s22 = scalar_select %p38_p8, %s4864_s15, %s40_s25  }
  0xab   : > { %p5155_p12 = por %p48_p3, %p47_p1  ;;  %p6181_p13 = scmp.eq.s32.totalorder %s4988_s19, 0 }
  0xac   : > { %p350_p0 = scmp.eq.s32.totalorder %s4988_s19, 1  ;;  %p356_p2 = scmp.eq.s32.totalorder %s3561_s21, 1 }
  0xad   : > { %p5161_p6 = por %p6181_p13, %p53_p11  ;;  %p4100_p5 = scmp.lt.s32.totalorder %s4868_s16, 2 }
  0xae   : > { %s473_s18 = sand.u32 1, %s4864_s15   ;;  %p5168_p7 = por %p350_p0, %p47_p1 }
  0xaf   : > { %p5172_p9 = por %p356_p2, %p53_p11  ;;  %s3570_s4 = sshll.u32 %s473_s18, 6 }
  0xb0   : > { %s6183_s13 = scalar_select %p5168_p7, 1, 0 }
  0xb1   : > { %s6184_s1 = scalar_select %p5172_p9, 1, 0 }
  0xb2   : > { %s3740_s26 = sshll.u32 %s4868_s16, 10  ;;  %s477_s17 = scalar_lea.vmem [#allocation2], %s3570_s4 }
  0xb3   : > { %s5180_s28 = scalar_lea.hbm %s6125_s0, %s3740_s26  ;;  %s485_s24 = sshll.u32 %s477_s17, 4  ;;  %s5182_s24 = int_to_ptr.vmem [resolvable:$true] %s485_s24 }
  0xb4   : > { %p5186_p4 = pnand %p4100_p5, %p5155_p12  ;;  %s5190_s21 = scalar_lea.sflag [#allocation3], %s473_s18 }
  0xb5   : > { %s4760_s8 = scalar_lea.hbm %s5180_s28, 1024  ;;  %s4765_s9 = scalar_lea.hbm %s6125_s0, 2048 }
  0xb6   : > { %p4761_p10 = scmp.ne.s32.totalorder %s5180_s28, %s4760_s8  ;;  %p4762_p8 = pneg %p5186_p4 }
  0xb7   : > { %p4766_p11 = scmp.lt.u32.totalorder %s5180_s28, %s6125_s0  ;;  %p4767_p12 = scmp.lt.u32.totalorder %s4765_s9, %s4760_s8 }
  0xb8   : > { %p4763_p1 = pnand %p4762_p8, %p4761_p10  ;;  %p4769_p0 = scmp.lt.u32.totalorder %s4760_s8, %s5180_s28 }
  0xb9   : > { %p4768_p13 = por %p4767_p12, %p4766_p11 }
  0xba   : > { %p4764_p3 = pneg %p4763_p1 }
  0xbb   : > { %p4770_p2 = por %p4769_p0, %p4768_p13 }
  0xbd   : > { %p4771_p5 = pnand %p4770_p2, %p4764_p3 }
  0xbf   : > { %4774 = shalt.err (!%p4771_p5)
}
  0xc0   : > { %s4775_s18 = scalar_lea.vmem %s5182_s24, 1024  ;;  %s4884_s11 = smov [#allocation2]  }
  0xc1   : > { %p4776_p10 = scmp.ne.s32.totalorder %s5182_s24, %s4775_s18  ;;  %s4780_s17 = sshll.u32 %s4884_s11, 4  ;;  %s4781_s17 = int_to_ptr.vmem [resolvable:$false] %s4780_s17 }
  0xc2   : > { %s4782_s25 = scalar_lea.vmem %s4781_s17, 2048  ;;  %p4783_p7 = scmp.lt.s32.totalorder %s5182_s24, %s4781_s17 }
  0xc3   : > { %p4778_p1 = pnand %p4776_p10, %p4762_p8  ;;  %p4784_p11 = scmp.lt.s32.totalorder %s4782_s25, %s4775_s18 }
  0xc5   : > { %p4779_p9 = pneg %p4778_p1  ;;  %p4785_p12 = por %p4784_p11, %p4783_p7 }
  0xc7   : > { %p4786_p13 = pnand %p4785_p12, %p4779_p9 }
  0xc9   : > { %4789 = shalt.err (!%p4786_p13)
}
  0xca   : > { %s6186_s8 = smov 8   ;;  %s6187_s4 = smov 128  }
  0xcb   : > { %4089 = dma.hbm_to_vmem [thread:$0]  (!%p5186_p4), %s5180_s28, 1024, %s5182_s24, %s5190_s21, %s6187_s4, %s6187_s4, %s6186_s8  }
  0xcc   : > { %p6188_p8 = scmp.ne.s32.totalorder %s6175_s20, 0 }
  0xce   : > { %497 = sbr.rel (%p6188_p8) target bundleno = 2856 (0xb28), region = 76 }
  0xd5   : > { %s5224_s9 = sand.u32 1, %s4860_s30  }
  0xd6   : > { %s3575_s26 = sshll.u32 %s5224_s9, 6  ;;  %s500_s7 = scalar_lea.sflag [#allocation3], %s5224_s9 }
  0xd7   : > { %s5230_s14 = scalar_lea.vmem [#allocation2], %s3575_s26 }
  0xd8   : > { %4835 = dma.done.wait (%p5161_p6), %s500_s7, 1024  }
  0xd9   : > { %4837 = vsyncadd (%p5161_p6), %s500_s7, 4294966272  ;;  %p6189_p7 = scmp.eq.s32.totalorder %s4988_s19, 0 }
  0xdb   : > { %4839 = dma.done.wait (%p6189_p7), [#allocation6], 272   ;;  %p6190_p9 = pmov %p6189_p7 }
  0xdc   : > { %p6191_p4 = pmov %p6189_p7 }
  0xdd   : > { %4841 = vsyncadd (%p6190_p9), [#allocation6], 4294967024 }
  0xde   : > { %4843 = dma.done.wait (%p6191_p4), [#allocation9], 4096   ;;  %p6192_p3 = pmov %p6191_p4 }
  0xe0   : > { %4845 = vsyncadd (%p6192_p3), [#allocation9], 4294963200  ;;  %p6193_p0 = pmov %p6192_p3 }
  0xe2   : > { %4847 = dma.done.wait (%p6193_p0), [#allocation12], 8192   ;;  %p6194_p2 = pmov %p6193_p0 }
  0xe3   : > { %v575_v0 = vld [vmem:[%s5230_s14] sm:$0xff]  ;;  %v577_v1 = vld [vmem:[%s5230_s14 + $0x10] sm:$0xff]  ;;  %v576_v2 = vld [vmem:[%s5230_s14 + $0x8] sm:$0xff]  ;;  %v4885_v63 = vmov 0   ;;  %vm4887_vm0 = vmmov 0   ;;  %vm1143_vm1 = vcmask 523264  }
  0xe4   : > { %4849 = vsyncadd (%p6194_p2), [#allocation12], 4294959104  ;;  %585 = vadd.xlane.f32.xlu0 %v575_v0  ;;  %589 = vadd.xlane.f32.xlu1 %v577_v1  ;;  %v578_v3 = vld [vmem:[%s5230_s14 + $0x18] sm:$0xff]  ;;  %v579_v4 = vld [vmem:[%s5230_s14 + $0x20] sm:$0xff]  ;;  %s4888_s21 = smov 64   ;;  %vm1520_vm2 = vcmask 130048  }
  0xe5   : > { %v580_v5 = vld [vmem:[%s5230_s14 + $0x28] sm:$0xff]  ;;  %v581_v6 = vld [vmem:[%s5230_s14 + $0x30] sm:$0xff]  ;;  %v582_v7 = vld [vmem:[%s5230_s14 + $0x38] sm:$0xff]  ;;  %915 = vmatprep.mubr.bf16.mxu0 %v4885_v63  ;;  %s6195_s17 = sld [smem:[#allocation43_spill]]  ;;  %s6204_s4 = sld [smem:[#allocation44_spill]] }
  0xe6   : > { %v4240_v8 = vld [vmem:[#allocation8 + $0x4] ss:$12 sps:$4 sm:$0xff]   ;;  %v4242_v9 = vld [vmem:[#allocation8] ss:$12 sps:$4 sm:$0xff]   ;;  %v4243_v10 = vld [vmem:[#allocation8 + $0x1c] ss:$12 sps:$4 sm:$0xff]  }
  0xe7   : > { %v4245_v11 = vld [vmem:[#allocation8 + $0x8] ss:$12 sps:$4 sm:$0xff]   ;;  %883 = vmatprep.subr.bf16.mxu0 %v4240_v8  ;;  %v4246_v44 = vld [vmem:[#allocation8 + $0x18] ss:$12 sps:$4 sm:$0xff]   ;;  %v4249_v46 = vld [vmem:[#allocation8 + $0x20] ss:$12 sps:$4 sm:$0xff]  }
  0xe8   : > { %587 = vadd.xlane.f32.xlu0 %v576_v2  ;;  %591 = vadd.xlane.f32.xlu1 %v578_v3  ;;  %v4247_v45 = vld [vmem:[#allocation8 + $0x34] ss:$12 sps:$4 sm:$0xff]   ;;  %v4250_v47 = vld [vmem:[#allocation8 + $0x30] ss:$12 sps:$4 sm:$0xff]   ;;  %v4251_v48 = vld [vmem:[#allocation8 + $0x4c] ss:$12 sps:$4 sm:$0xff]  }
  0xe9   : > { %884 = vmatpush1.bf16.msra.mxu0 %v4242_v9  ;;  %3879 = vmatprep.subr.bf16.mxu1 %v4245_v11  ;;  %v4253_v49 = vld [vmem:[#allocation8 + $0x38] ss:$12 sps:$4 sm:$0xff]   ;;  %v4254_v50 = vld [vmem:[#allocation8 + $0x48] ss:$12 sps:$4 sm:$0xff]   ;;  %v4257_v52 = vld [vmem:[#allocation8 + $0x50] ss:$12 sps:$4 sm:$0xff]  }
  0xea   : > { %885 = vmatprep.subr.bf16.mxu0 %v4243_v10  ;;  %3880 = vmatpush3.bf16.msra.mxu1 %v4245_v11  ;;  %v4255_v51 = vld [vmem:[#allocation8 + $0x64] ss:$12 sps:$4 sm:$0xff]   ;;  %v4258_v53 = vld [vmem:[#allocation8 + $0x60] ss:$12 sps:$4 sm:$0xff]   ;;  %v4259_v54 = vld [vmem:[#allocation8 + $0x7c] ss:$12 sps:$4 sm:$0xff]  }
  0xeb   : > { %3881 = vmatprep.subr.bf16.mxu1 %v4249_v46  ;;  %v4261_v55 = vld [vmem:[#allocation8 + $0x68] ss:$12 sps:$4 sm:$0xff]   ;;  %v4262_v56 = vld [vmem:[#allocation8 + $0x78] ss:$12 sps:$4 sm:$0xff]   ;;  %v4265_v58 = vld [vmem:[#allocation8 + $0x80] ss:$12 sps:$4 sm:$0xff]  }
  0xec   : > { %593 = vadd.xlane.f32.xlu0 %v579_v4  ;;  %595 = vadd.xlane.f32.xlu1 %v580_v5  ;;  %v4263_v57 = vld [vmem:[#allocation8 + $0x94] ss:$12 sps:$4 sm:$0xff]   ;;  %v4266_v59 = vld [vmem:[#allocation8 + $0x90] ss:$12 sps:$4 sm:$0xff]   ;;  %v4267_v60 = vld [vmem:[#allocation8 + $0xac] ss:$12 sps:$4 sm:$0xff]  }
  0xed   : > { %886 = vmatpush1.bf16.msra.mxu0 %v4246_v44  ;;  %v4269_v61 = vld [vmem:[#allocation8 + $0x98] ss:$12 sps:$4 sm:$0xff]   ;;  %v4270_v62 = vld [vmem:[#allocation8 + $0xa8] ss:$12 sps:$4 sm:$0xff]   ;;  %s6205_s20 = sld [smem:[#allocation45_spill]]  ;;  %s6213_s24 = sld [smem:[#allocation46_spill]] }
  0xee   : > { %887 = vmatprep.subr.bf16.mxu0 %v4247_v45  ;;  %3882 = vmatpush3.bf16.msra.mxu1 %v4249_v46  ;;  %s6233_s11 = sld [smem:[#allocation47_spill]]  ;;  %s6241_s7 = sld [smem:[#allocation48_spill]] }
  0xef   : > { %3883 = vmatprep.subr.bf16.mxu1 %v4253_v49  ;;  %p6243_p5 = scmp.ne.s32.totalorder %s6183_s13, 0  ;;  %s4889_s27 = smov [#allocation14]  }
  0xf0   : > { %597 = vadd.xlane.f32.xlu0 %v581_v6  ;;  %599 = vadd.xlane.f32.xlu1 %v582_v7  ;;  %s4794_s28 = sshll.u32 %s4889_s27, 4  ;;  %s4795_s28 = int_to_ptr.vmem [resolvable:$false] %s4794_s28 }
  0xf1   : > { %888 = vmatpush1.bf16.msra.mxu0 %v4250_v47 }
  0xf2   : > { %889 = vmatprep.subr.bf16.mxu0 %v4251_v48  ;;  %3884 = vmatpush3.bf16.msra.mxu1 %v4253_v49 }
  0xf3   : > { %3885 = vmatprep.subr.bf16.mxu1 %v4257_v52 }
  0xf5   : > { %890 = vmatpush1.bf16.msra.mxu0 %v4254_v50 }
  0xf6   : > { %891 = vmatprep.subr.bf16.mxu0 %v4255_v51  ;;  %3886 = vmatpush3.bf16.msra.mxu1 %v4257_v52 }
  0xf7   : > { %3887 = vmatprep.subr.bf16.mxu1 %v4261_v55 }
  0xf9   : > { %892 = vmatpush1.bf16.msra.mxu0 %v4258_v53 }
  0xfa   : > { %893 = vmatprep.subr.bf16.mxu0 %v4259_v54  ;;  %3888 = vmatpush3.bf16.msra.mxu1 %v4261_v55 }
  0xfb   : > { %3889 = vmatprep.subr.bf16.mxu1 %v4265_v58 }
  0xfd   : > { %894 = vmatpush1.bf16.msra.mxu0 %v4262_v56 }
  0xfe   : > { %895 = vmatprep.subr.bf16.mxu0 %v4263_v57  ;;  %3890 = vmatpush3.bf16.msra.mxu1 %v4265_v58 }
  0xff   : > { %3891 = vmatprep.subr.bf16.mxu1 %v4269_v61 }
 0x101   : > { %896 = vmatpush1.bf16.msra.mxu0 %v4266_v59 }
 0x102   : > { %897 = vmatprep.subr.bf16.mxu0 %v4267_v60  ;;  %3892 = vmatpush3.bf16.msra.mxu1 %v4269_v61 }
 0x105   : > { %898 = vmatpush1.bf16.msra.mxu0 %v4270_v62 }
 0x171   : > { %v586_v12 = vpop.xlane.xlu0 %585  ;;  %v590_v13 = vpop.xlane.xlu1 %589 }
 0x172   : > { %v602_v14 = vmul.f32 0.0078125, %v586_v12  ;;  %v604_v15 = vmul.f32 0.0078125, %v590_v13 }
 0x174   : > { %v5256_v16 = vsub.f32 %v575_v0, %v602_v14  ;;  %v5258_v17 = vsub.f32 %v577_v1, %v604_v15  ;;  %v4271_v0 = vld [vmem:[#allocation8 + $0xb0] ss:$12 sps:$4 sm:$0xff]  }
 0x175   : > { %v588_v18 = vpop.xlane.xlu0 %587  ;;  %v592_v19 = vpop.xlane.xlu1 %591  ;;  %3893 = vmatprep.subr.bf16.mxu1 %v4271_v0 }
 0x176   : > { %v603_v20 = vmul.f32 0.0078125, %v588_v18  ;;  %v618_v21 = vmul.f32 %v5256_v16, %v5256_v16  ;;  %v605_v22 = vmul.f32 0.0078125, %v592_v19  ;;  %v620_v25 = vmul.f32 %v5258_v17, %v5258_v17  ;;  %3894 = vmatpush3.bf16.msra.mxu1 %v4271_v0 }
 0x178   : > { %v5262_v23 = vsub.f32 %v576_v2, %v603_v20  ;;  %626 = vadd.xlane.f32.xlu0 %v618_v21  ;;  %v5264_v24 = vsub.f32 %v578_v3, %v605_v22 }
 0x179   : > { %v594_v26 = vpop.xlane.xlu0 %593  ;;  %v596_v27 = vpop.xlane.xlu1 %595 }
 0x17a   : > { %v606_v28 = vmul.f32 0.0078125, %v594_v26  ;;  %v619_v29 = vmul.f32 %v5262_v23, %v5262_v23  ;;  %v607_v30 = vmul.f32 0.0078125, %v596_v27  ;;  %v621_v33 = vmul.f32 %v5264_v24, %v5264_v24 }
 0x17c   : > { %v5270_v31 = vsub.f32 %v579_v4, %v606_v28  ;;  %630 = vadd.xlane.f32.xlu0 %v620_v25  ;;  %628 = vadd.xlane.f32.xlu1 %v619_v29  ;;  %v5272_v32 = vsub.f32 %v580_v5, %v607_v30  ;;  %v3583_v30 = vld [vmem:[#allocation7] ss:$0 sm:$0xff] }
 0x17d   : > { %v598_v34 = vpop.xlane.xlu0 %597  ;;  %v600_v35 = vpop.xlane.xlu1 %599 }
 0x17e   : > { %v608_v36 = vmul.f32 0.0078125, %v598_v34  ;;  %v622_v37 = vmul.f32 %v5270_v31, %v5270_v31  ;;  %v609_v38 = vmul.f32 0.0078125, %v600_v35  ;;  %v623_v41 = vmul.f32 %v5272_v32, %v5272_v32 }
 0x180   : > { %v5278_v39 = vsub.f32 %v581_v6, %v608_v36  ;;  %632 = vadd.xlane.f32.xlu1 %v621_v33  ;;  %634 = vadd.xlane.f32.xlu0 %v622_v37  ;;  %v5280_v40 = vsub.f32 %v582_v7, %v609_v38  ;;  %v3584_v38 = vld [vmem:[%s6128_s3] ss:$0 sm:$0xff] }
 0x182   : > { %v624_v42 = vmul.f32 %v5278_v39, %v5278_v39  ;;  %v625_v43 = vmul.f32 %v5280_v40, %v5280_v40 }
 0x184   : > { %636 = vadd.xlane.f32.xlu1 %v623_v41  ;;  %638 = vadd.xlane.f32.xlu0 %v624_v42 }
 0x188   : > { %640 = vadd.xlane.f32.xlu1 %v625_v43 }
 0x205   : > { %v627_v1 = vpop.xlane.xlu0 %626 }
 0x206   : > { %v642_v2 = vmul.f32 0.0078125, %v627_v1 }
 0x208   : > { %v650_v3 = vadd.f32 1e-05, %v642_v2 }
 0x209   : > { %v629_v4 = vpop.xlane.xlu1 %628  ;;  %v631_v5 = vpop.xlane.xlu0 %630 }
 0x20a   : > { %4360 = vrsqrt.f32 %v650_v3  ;;  %v643_v6 = vmul.f32 0.0078125, %v629_v4  ;;  %v644_v7 = vmul.f32 0.0078125, %v631_v5  ;;  %v738_v4 = vld [vmem:[%s6130_s5] sm:$0x7] }
 0x20c   : > { %v651_v8 = vadd.f32 1e-05, %v643_v6  ;;  %v652_v9 = vadd.f32 1e-05, %v644_v7 }
 0x20d   : > { %v633_v10 = vpop.xlane.xlu1 %632  ;;  %v635_v11 = vpop.xlane.xlu0 %634 }
 0x20e   : > { %4362 = vrsqrt.f32 %v651_v8  ;;  %v645_v12 = vmul.f32 0.0078125, %v633_v10  ;;  %v646_v13 = vmul.f32 0.0078125, %v635_v11 }
 0x20f   : > { %4364 = vrsqrt.f32 %v652_v9 }
 0x210   : > { %v653_v14 = vadd.f32 1e-05, %v645_v12  ;;  %v654_v15 = vadd.f32 1e-05, %v646_v13 }
 0x211   : > { %v637_v18 = vpop.xlane.xlu1 %636  ;;  %v639_v19 = vpop.xlane.xlu0 %638 }
 0x212   : > { %4366 = vrsqrt.f32 %v653_v14  ;;  %v647_v20 = vmul.f32 0.0078125, %v637_v18  ;;  %v648_v21 = vmul.f32 0.0078125, %v639_v19 }
 0x213   : > { %4368 = vrsqrt.f32 %v654_v15 }
 0x214   : > { %v4361_v22 = vpop.eup %4360  ;;  %v655_v25 = vadd.f32 1e-05, %v647_v20  ;;  %v656_v26 = vadd.f32 1e-05, %v648_v21 }
 0x215   : > { %v641_v27 = vpop.xlane.xlu1 %640  ;;  %v666_v28 = vmul.f32 %v4361_v22, %v5256_v16 }
 0x216   : > { %4370 = vrsqrt.f32 %v655_v25  ;;  %v649_v29 = vmul.f32 0.0078125, %v641_v27 }
 0x217   : > { %4372 = vrsqrt.f32 %v656_v26  ;;  %v680_v37 = vmul.f32 %v3583_v30, %v666_v28 }
 0x218   : > { %v4363_v33 = vpop.eup %4362  ;;  %v657_v34 = vadd.f32 1e-05, %v649_v29 }
 0x219   : > { %v4365_v35 = vpop.eup %4364  ;;  %v667_v36 = vmul.f32 %v4363_v33, %v5262_v23  ;;  %v694_v45 = vadd.f32 %v3584_v38, %v680_v37 }
 0x21a   : > { %4374 = vrsqrt.f32 %v657_v34  ;;  %v668_v41 = vmul.f32 %v4365_v35, %v5258_v17 }
 0x21b   : > { %v681_v42 = vmul.f32 %v3583_v30, %v667_v36 }
 0x21c   : > { %v4367_v43 = vpop.eup %4366  ;;  %v682_v16 = vmul.f32 %v3583_v30, %v668_v41 }
 0x21d   : > { %v4369_v44 = vpop.eup %4368  ;;  %v695_v46 = vadd.f32 %v3584_v38, %v681_v42  ;;  %v669_v47 = vmul.f32 %v4367_v43, %v5264_v24 }
 0x21e   : > { %v670_v48 = vmul.f32 %v4369_v44, %v5270_v31  ;;  %v696_v51 = vadd.f32 %v3584_v38, %v682_v16 }
 0x21f   : > { %v702_v49 = vpack.c.bf16 %v695_v46, %v694_v45  ;;  %v683_v23 = vmul.f32 %v3583_v30, %v669_v47 }
 0x220   : > { %v4371_v50 = vpop.eup %4370  ;;  %v684_v54 = vmul.f32 %v3583_v30, %v670_v48 }
 0x221   : > { %v4373_v52 = vpop.eup %4372  ;;  %916 = vmatmul.mubr.bf16.vlgmr.msra.gmra.mrb[0].mxu0 %v702_v49  ;;  %3895 = vmatprep.mubr.bf16.mxu1 %v702_v49  ;;  %v697_v53 = vadd.f32 %v3584_v38, %v683_v23  ;;  %v671_v17 = vmul.f32 %v4371_v50, %v5272_v32 }
 0x222   : > { %925 = vmatprep.mubr.bf16.mxu0 %v4885_v63  ;;  %v672_v55 = vmul.f32 %v4373_v52, %v5278_v39  ;;  %v698_v31 = vadd.f32 %v3584_v38, %v684_v54  ;;  %v4886_v39 = vmov 0.0  }
 0x223   : > { %v703_v56 = vpack.c.bf16 %v697_v53, %v696_v51  ;;  %v685_v57 = vmul.f32 %v3583_v30, %v671_v17  ;;  %3903 = vmatprep.subr.bf16.mxu1 %v4886_v39  ;;  %3915 = vmatprep.subr.bf16.mxu0 %v4886_v39 }
 0x224   : > { %v4375_v24 = vpop.eup %4374  ;;  %v686_v60 = vmul.f32 %v3583_v30, %v672_v55 }
 0x225   : > { %3896 = vmatmul.mubr.bf16.vlgmr.msra.gmra.mrb[0].mxu1 %v703_v56  ;;  %v699_v58 = vadd.f32 %v3584_v38, %v685_v57  ;;  %v673_v59 = vmul.f32 %v4375_v24, %v5280_v40  ;;  %v740_v40 = vlaneseq }
 0x226   : > { %v700_v0 = vadd.f32 %v3584_v38, %v686_v60 }
 0x227   : > { %v704_v61 = vpack.c.bf16 %v699_v58, %v698_v31  ;;  %v687_v62 = vmul.f32 %v3583_v30, %v673_v59  ;;  %v5309_v2 = vshrl.u32 %v740_v40, 7 }
 0x229   : > { %926 = vmatmul.mubr.bf16.gmra.mrb[4].mxu0 %v703_v56  ;;  %3899 = vmatprep.mubr.bf16.mxu1 %v704_v61  ;;  %v701_v32 = vadd.f32 %v3584_v38, %v687_v62  ;;  %v742_v3 = vsub.s32 0, %v5309_v2  ;;  %v746_v5 = vsub.s32 1, %v5309_v2  ;;  %v750_v6 = vsub.s32 2, %v5309_v2 }
 0x22a   : > { %935 = vmatprep.mubr.bf16.mxu0 %v4885_v63 }
 0x22b   : > { %v705_v1 = vpack.c.bf16 %v701_v32, %v700_v0  ;;  %v5319_v7 = vrot.slane %v738_v4, %v742_v3  ;;  %v5323_v9 = vrot.slane %v738_v4, %v746_v5  ;;  %v751_v11 = vrot.slane %v738_v4, %v750_v6 }
 0x22d   : > { %3900 = vmatmul.mubr.bf16.gmra.mrb[4].mxu1 %v705_v1 }
 0x22e   : > { %3905 = vmatprep.mubr.msk.bf16.mxu1 %vm4887_vm0, %v4886_v39 }
 0x231   : > { %936 = vmatmul.mubr.bf16.gmra.mrb[8].mxu0 %v704_v61 }
 0x232   : > { %945 = vmatprep.mubr.bf16.mxu0 %v4885_v63 }
 0x239   : > { %946 = vmatmul.mubr.bf16.gmra.mrb[12].mxu0 %v705_v1 }
 0x23a   : > { %3917 = vmatprep.mubr.msk.bf16.mxu0 %vm4887_vm0, %v4886_v39 }
 0x2f4   : > { %v917_v8 = vpop.f32.mrb[0].mxu0 }
 0x2f5   : > { %v919_v10 = vpop.f32.mrb[1].mxu0  ;;  %v918_v13 = vadd.f32 %v917_v8, %v5319_v7 }
 0x2f6   : > { %v921_v12 = vpop.f32.mrb[2].mxu0  ;;  %v920_v18 = vadd.f32 %v919_v10, %v5323_v9 }
 0x2f7   : > { %v922_v14 = vadd.f32 %v921_v12, %v5319_v7  ;;  %v923_v15 = vpop.f32.mrb[3].mxu0 }
 0x2f8   : > { %v924_v19 = vadd.f32 %v923_v15, %v5323_v9  ;;  %v3897_v20 = vpop.f32.mrb[0].mxu1 }
 0x2f9   : > { %v4165_v21 = vpack.i.bf16 %v922_v14, %v918_v13  ;;  %v1053_v22 = vpack.c.bf16 %v922_v14, %v918_v13  ;;  %v5331_v25 = vadd.f32 %v3897_v20, %v751_v11  ;;  %v990_v26 = vpop.f32.mrb[1].mxu1 }
 0x2fa   : > { %v4160_v27 = vpack.i.bf16 %v924_v19, %v920_v18  ;;  %v1093_v28 = vpack.c.bf16 %v924_v19, %v920_v18  ;;  %v3898_v29 = vpop.f32.mrb[2].mxu1  ;;  %v5336_v34 = vadd.f32 %v990_v26, %v751_v11 }
 0x2fb   : > { %v5333_v30 = vadd.f32 %v3898_v29, %v751_v11  ;;  %4166 = vrot.lane.b32.xlu1 %v4165_v21, %s4888_s21  ;;  %v993_v33 = vpop.f32.mrb[3].mxu1 }
 0x2fc   : > { %v5338_v35 = vadd.f32 %v993_v33, %v751_v11  ;;  %4161 = vrot.lane.b32.xlu0 %v4160_v27, %s4888_s21  ;;  %v927_v36 = vpop.f32.mrb[4].mxu0  ;;  %v1148_v37 = vsel %vm1143_vm1, %v1093_v28, 0 }
 0x2fd   : > { %v4205_v38 = vpack.i.bf16 %v5333_v30, %v5331_v25  ;;  %v1135_v41 = vpack.c.bf16 %v5333_v30, %v5331_v25  ;;  %v929_v42 = vpop.f32.mrb[5].mxu0  ;;  %3904 = vmatpush3.bf16.xpose.msra.mxu1 %v1148_v37  ;;  %v928_v45 = vadd.f32 %v927_v36, %v5319_v7 }
 0x2fe   : > { %v4200_v43 = vpack.i.bf16 %v5338_v35, %v5336_v34  ;;  %v1133_v16 = vpack.c.bf16 %v5338_v35, %v5336_v34  ;;  %v931_v44 = vpop.f32.mrb[6].mxu0  ;;  %3909 = vmatprep.subr.bf16.mxu1 %v4886_v39  ;;  %v930_v48 = vadd.f32 %v929_v42, %v5323_v9 }
 0x2ff   : > { %v932_v46 = vadd.f32 %v931_v44, %v5319_v7  ;;  %v933_v47 = vpop.f32.mrb[7].mxu0 }
 0x300   : > { %v934_v49 = vadd.f32 %v933_v47, %v5323_v9  ;;  %v3901_v23 = vpop.f32.mrb[4].mxu1 }
 0x301   : > { %v4175_v50 = vpack.i.bf16 %v932_v46, %v928_v45  ;;  %v1055_v51 = vpack.c.bf16 %v932_v46, %v928_v45  ;;  %v5355_v52 = vadd.f32 %v3901_v23, %v751_v11  ;;  %v1006_v53 = vpop.f32.mrb[5].mxu1 }
 0x302   : > { %v4170_v17 = vpack.i.bf16 %v934_v49, %v930_v48  ;;  %v1095_v54 = vpack.c.bf16 %v934_v49, %v930_v48  ;;  %v5357_v55 = vadd.f32 %v1006_v53, %v751_v11  ;;  %v3902_v56 = vpop.f32.mrb[6].mxu1 }
 0x303   : > { %v5359_v57 = vadd.f32 %v3902_v56, %v751_v11  ;;  %v1009_v24 = vpop.f32.mrb[7].mxu1 }
 0x304   : > { %v5361_v31 = vadd.f32 %v1009_v24, %v751_v11  ;;  %4171 = vrot.lane.b32.xlu1 %v4170_v17, %s4888_s21  ;;  %v937_v58 = vpop.f32.mrb[8].mxu0  ;;  %3906 = vmatmul.mubr.msk.bf16.vlgmr.msra.gmra.mrb[8].mxu1 %vm1143_vm1, %v1053_v22  ;;  %v1242_v59 = vsel %vm1143_vm1, %v1095_v54, 0 }
 0x305   : > { %v4215_v60 = vpack.i.bf16 %v5359_v57, %v5355_v52  ;;  %v1139_v61 = vpack.c.bf16 %v5359_v57, %v5355_v52  ;;  %v939_v62 = vpop.f32.mrb[9].mxu0  ;;  %3916 = vmatpush3.bf16.xpose.msra.mxu0 %v1242_v59  ;;  %3911 = vmatprep.mubr.msk.bf16.mxu1 %vm4887_vm0, %v4886_v39  ;;  %v938_v40 = vadd.f32 %v937_v58, %v5319_v7  ;;  %v4276_v52 = vld [vmem:[#allocation10 + $0x20] sm:$0xff]   ;;  %v4278_v57 = vld [vmem:[#allocation10 + $0x30] sm:$0xff]  }
 0x306   : > { %v4210_v0 = vpack.i.bf16 %v5361_v31, %v5357_v55  ;;  %v1137_v32 = vpack.c.bf16 %v5361_v31, %v5357_v55  ;;  %v941_v1 = vpop.f32.mrb[10].mxu0  ;;  %3927 = vmatprep.subr.bf16.mxu0 %v4886_v39  ;;  %v940_v10 = vadd.f32 %v939_v62, %v5323_v9 }
 0x307   : > { %v942_v4 = vadd.f32 %v941_v1, %v5319_v7  ;;  %v943_v8 = vpop.f32.mrb[11].mxu0 }
 0x308   : > { %v944_v11 = vadd.f32 %v943_v8, %v5323_v9  ;;  %4176 = vrot.lane.b32.xlu1 %v4175_v50, %s4888_s21 }
 0x309   : > { %v4185_v12 = vpack.i.bf16 %v942_v4, %v938_v40  ;;  %v1057_v13 = vpack.c.bf16 %v942_v4, %v938_v40 }
 0x30a   : > { %v4180_v14 = vpack.i.bf16 %v944_v11, %v940_v10  ;;  %v1097_v15 = vpack.c.bf16 %v944_v11, %v940_v10 }
 0x30c   : > { %4181 = vrot.lane.b32.xlu0 %v4180_v14, %s4888_s21  ;;  %4186 = vrot.lane.b32.xlu1 %v4185_v12, %s4888_s21  ;;  %v947_v18 = vpop.f32.mrb[12].mxu0  ;;  %v1336_v19 = vsel %vm1143_vm1, %v1097_v15, 0 }
 0x30d   : > { %3918 = vmatmul.mubr.msk.bf16.vlgmr.msra.gmra.mrb[16].mxu0 %vm1143_vm1, %v1055_v51  ;;  %v949_v20 = vpop.f32.mrb[13].mxu0  ;;  %v948_v22 = vadd.f32 %v947_v18, %v5319_v7 }
 0x30e   : > { %3928 = vmatpush3.bf16.xpose.msra.mxu0 %v1336_v19  ;;  %v951_v21 = vpop.f32.mrb[14].mxu0  ;;  %3929 = vmatprep.mubr.msk.bf16.mxu0 %vm4887_vm0, %v4886_v39  ;;  %v950_v28 = vadd.f32 %v949_v20, %v5323_v9 }
 0x30f   : > { %v952_v26 = vadd.f32 %v951_v21, %v5319_v7  ;;  %v953_v27 = vpop.f32.mrb[15].mxu0  ;;  %3939 = vmatprep.subr.bf16.mxu0 %v4886_v39 }
 0x310   : > { %v954_v29 = vadd.f32 %v953_v27, %v5323_v9 }
 0x311   : > { %v4195_v33 = vpack.i.bf16 %v952_v26, %v948_v22  ;;  %v1059_v36 = vpack.c.bf16 %v952_v26, %v948_v22 }
 0x312   : > { %v4190_v37 = vpack.i.bf16 %v954_v29, %v950_v28  ;;  %v1099_v42 = vpack.c.bf16 %v954_v29, %v950_v28 }
 0x313   : > { %4196 = vrot.lane.b32.xlu1 %v4195_v33, %s4888_s21 }
 0x314   : > { %4191 = vrot.lane.b32.xlu0 %v4190_v37, %s4888_s21  ;;  %v1430_v44 = vsel %vm1143_vm1, %v1099_v42, 0 }
 0x315   : > { %3930 = vmatmul.mubr.msk.bf16.vlgmr.msra.gmra.mrb[20].mxu0 %vm1143_vm1, %v1057_v13 }
 0x316   : > { %3940 = vmatpush3.bf16.xpose.msra.mxu0 %v1430_v44  ;;  %3941 = vmatprep.mubr.msk.bf16.mxu0 %vm4887_vm0, %v4886_v39 }
 0x317   : > { %3951 = vmatprep.subr.bf16.mxu0 %v4886_v39 }
 0x31d   : > { %3942 = vmatmul.mubr.msk.bf16.vlgmr.msra.gmra.mrb[24].mxu0 %vm1143_vm1, %v1059_v36 }
 0x31e   : > { %3952 = vmatpush3.bf16.msra.mxu0 %v1133_v16  ;;  %3953 = vmatprep.mubr.msk.bf16.mxu0 %vm4887_vm0, %v4886_v39 }
 0x31f   : > { %3963 = vmatprep.subr.bf16.mxu0 %v4886_v39 }
 0x36d   : > { %v4167_v47 = vpop.permute.xlu1 %4166 }
 0x36e   : > { %v4162_v7 = vpop.permute.xlu0 %4161  ;;  %v4169_v49 = vunpack.i.h.bf16 %v4167_v47  ;;  %v4168_v23 = vunpack.i.l.bf16 %v4167_v47 }
 0x36f   : > { %v4164_v9 = vunpack.i.h.bf16 %v4162_v7  ;;  %v4163_v45 = vunpack.i.l.bf16 %v4162_v7 }
 0x370   : > { %v1054_v53 = vpack.c.bf16 %v4169_v49, %v4168_v23 }
 0x371   : > { %v1094_v46 = vpack.c.bf16 %v4164_v9, %v4163_v45 }
 0x373   : > { %v1195_v48 = vsel %vm1143_vm1, %v1094_v46, 0 }
 0x374   : > { %3910 = vmatpush3.bf16.xpose.msra.mxu1 %v1195_v48 }
 0x375   : > { %3921 = vmatprep.subr.bf16.mxu1 %v4886_v39 }
 0x376   : > { %v4172_v50 = vpop.permute.xlu1 %4171 }
 0x377   : > { %v4174_v51 = vunpack.i.h.bf16 %v4172_v50  ;;  %v4173_v16 = vunpack.i.l.bf16 %v4172_v50 }
 0x379   : > { %v1096_v17 = vpack.c.bf16 %v4174_v51, %v4173_v16  ;;  %v1141_v51 = vld [vmem:[#allocation5] sm:$0xff] }
 0x37a   : > { %v4177_v54 = vpop.permute.xlu1 %4176 }
 0x37b   : > { %3912 = vmatmul.mubr.msk.bf16.vlgmr.msra.gmra.mrb[12].mxu1 %vm1143_vm1, %v1054_v53  ;;  %v1289_v56 = vsel %vm1143_vm1, %v1096_v17, 0  ;;  %v4179_v24 = vunpack.i.h.bf16 %v4177_v54  ;;  %v4178_v58 = vunpack.i.l.bf16 %v4177_v54  ;;  %v1142_v54 = vld [vmem:[#allocation5 + $0x8] sm:$0xff] }
 0x37c   : > { %3922 = vmatpush3.bf16.xpose.msra.mxu1 %v1289_v56  ;;  %3923 = vmatprep.mubr.msk.bf16.mxu1 %vm4887_vm0, %v4886_v39 }
 0x37d   : > { %3933 = vmatprep.subr.bf16.mxu1 %v4886_v39  ;;  %v1056_v40 = vpack.c.bf16 %v4179_v24, %v4178_v58 }
 0x37e   : > { %v4182_v59 = vpop.permute.xlu0 %4181  ;;  %v4187_v8 = vpop.permute.xlu1 %4186 }
 0x37f   : > { %v4184_v62 = vunpack.i.h.bf16 %v4182_v59  ;;  %v4183_v1 = vunpack.i.l.bf16 %v4182_v59  ;;  %v4189_v11 = vunpack.i.h.bf16 %v4187_v8  ;;  %v4188_v12 = vunpack.i.l.bf16 %v4187_v8 }
 0x381   : > { %v1098_v4 = vpack.c.bf16 %v4184_v62, %v4183_v1  ;;  %v1058_v18 = vpack.c.bf16 %v4189_v11, %v4188_v12 }
 0x383   : > { %3924 = vmatmul.mubr.msk.bf16.vlgmr.msra.gmra.mrb[16].mxu1 %vm1143_vm1, %v1056_v40  ;;  %v1383_v10 = vsel %vm1143_vm1, %v1098_v4, 0 }
 0x384   : > { %3934 = vmatpush3.bf16.xpose.msra.mxu1 %v1383_v10  ;;  %3935 = vmatprep.mubr.msk.bf16.mxu1 %vm4887_vm0, %v4886_v39 }
 0x385   : > { %3945 = vmatprep.subr.bf16.mxu1 %v4886_v39  ;;  %v4197_v20 = vpop.permute.xlu1 %4196 }
 0x386   : > { %v4192_v13 = vpop.permute.xlu0 %4191  ;;  %v4199_v22 = vunpack.i.h.bf16 %v4197_v20  ;;  %v4198_v26 = vunpack.i.l.bf16 %v4197_v20 }
 0x387   : > { %v4194_v14 = vunpack.i.h.bf16 %v4192_v13  ;;  %v4193_v15 = vunpack.i.l.bf16 %v4192_v13 }
 0x388   : > { %v1060_v27 = vpack.c.bf16 %v4199_v22, %v4198_v26 }
 0x389   : > { %v1100_v19 = vpack.c.bf16 %v4194_v14, %v4193_v15 }
 0x38b   : > { %3936 = vmatmul.mubr.msk.bf16.vlgmr.msra.gmra.mrb[20].mxu1 %vm1143_vm1, %v1058_v18  ;;  %v1477_v21 = vsel %vm1143_vm1, %v1100_v19, 0 }
 0x38c   : > { %3946 = vmatpush3.bf16.xpose.msra.mxu1 %v1477_v21  ;;  %3947 = vmatprep.mubr.msk.bf16.mxu1 %vm4887_vm0, %v4886_v39 }
 0x38d   : > { %3957 = vmatprep.subr.bf16.mxu1 %v4886_v39 }
 0x393   : > { %3948 = vmatmul.mubr.msk.bf16.vlgmr.msra.gmra.mrb[24].mxu1 %vm1143_vm1, %v1060_v27 }
 0x394   : > { %3959 = vmatprep.mubr.msk.bf16.mxu1 %vm4887_vm0, %v4886_v39 }
 0x3d7   : > { %v1184_v28 = vpop.f32.mrb[8].mxu1 }
 0x3d8   : > { %v3907_v29 = vpop.f32.mrb[9].mxu1  ;;  %v5453_v19 = vadd.f32 %v1184_v28, %v1141_v51 }
 0x3d9   : > { %v1187_v33 = vpop.f32.mrb[10].mxu1 }
 0x3da   : > { %v3908_v36 = vpop.f32.mrb[11].mxu1  ;;  %v5437_v62 = vadd.f32 %v1187_v33, %v1142_v54 }
 0x3db   : > { %v1521_v36 = vsel %vm1520_vm2, %v5453_v19, -inf }
 0x3dc   : > { %v1524_v11 = vsel %vm1520_vm2, %v5437_v62, -inf }
 0x3e0   : > { %v1278_v37 = vpop.f32.mrb[16].mxu0 }
 0x3e1   : > { %v3919_v42 = vpop.f32.mrb[17].mxu0 }
 0x3e2   : > { %v1281_v44 = vpop.f32.mrb[18].mxu0 }
 0x3e3   : > { %v3920_v7 = vpop.f32.mrb[19].mxu0  ;;  %v5441_v4 = vadd.f32 %v1281_v44, %v1142_v54  ;;  %v5467_v44 = vadd.f32 %v1278_v37, %v1141_v51 }
 0x3e5   : > { %v1536_v18 = vsel %vm1520_vm2, %v5441_v4, -inf  ;;  %v1533_v37 = vsel %vm1520_vm2, %v5467_v44, -inf }
 0x3e8   : > { %v5427_v9 = vpop.f32.mrb[20].mxu0 }
 0x3e9   : > { %v3931_v45 = vpop.f32.mrb[21].mxu0 }
 0x3ea   : > { %v1375_v46 = vpop.f32.mrb[22].mxu0 }
 0x3eb   : > { %v3932_v47 = vpop.f32.mrb[23].mxu0  ;;  %v5463_v42 = vadd.f32 %v1375_v46, %v1142_v54 }
 0x3f0   : > { %v5429_v48 = vpop.f32.mrb[24].mxu0 }
 0x3f1   : > { %v3943_v49 = vpop.f32.mrb[25].mxu0 }
 0x3f2   : > { %v1469_v23 = vpop.f32.mrb[26].mxu0 }
 0x3f3   : > { %v3944_v50 = vpop.f32.mrb[27].mxu0  ;;  %v5471_v47 = vadd.f32 %v1469_v23, %v1142_v54  ;;  %v5484_v23 = vadd.f32 %v5427_v9, %v1141_v51 }
 0x3f4   : > { %v1548_v50 = vsel %vm1520_vm2, %v5463_v42, -inf }
 0x44e   : > { %v1231_v16 = vpop.f32.mrb[12].mxu1 }
 0x44f   : > { %v5431_v53 = vadd.f32 %v1231_v16, %v1141_v51  ;;  %v3913_v17 = vpop.f32.mrb[13].mxu1 }
 0x450   : > { %v1234_v56 = vpop.f32.mrb[14].mxu1 }
 0x451   : > { %v5433_v24 = vadd.f32 %v1234_v56, %v1142_v54  ;;  %v3914_v58 = vpop.f32.mrb[15].mxu1  ;;  %v1527_v59 = vsel %vm1520_vm2, %v5431_v53, -inf }
 0x452   : > { %1528 = vmax.xlane.f32.xlu0 %v1527_v59  ;;  %v1560_v58 = vsel %vm1520_vm2, %v5471_v47, -inf }
 0x453   : > { %v1530_v1 = vsel %vm1520_vm2, %v5433_v24, -inf }
 0x454   : > { %1531 = vmax.xlane.f32.xlu1 %v1530_v1 }
 0x456   : > { %v1325_v40 = vpop.f32.mrb[16].mxu1 }
 0x457   : > { %v5443_v8 = vadd.f32 %v1325_v40, %v1141_v51  ;;  %v3925_v10 = vpop.f32.mrb[17].mxu1  ;;  %v5491_v40 = vadd.f32 %v5429_v48, %v1141_v51 }
 0x458   : > { %1525 = vmax.xlane.f32.xlu1 %v1524_v11  ;;  %v1328_v12 = vpop.f32.mrb[18].mxu1 }
 0x459   : > { %v5447_v13 = vadd.f32 %v1328_v12, %v1142_v54  ;;  %v3926_v14 = vpop.f32.mrb[19].mxu1  ;;  %v1539_v15 = vsel %vm1520_vm2, %v5443_v8, -inf  ;;  %v1557_v10 = vsel %vm1520_vm2, %v5491_v40, -inf }
 0x45a   : > { %1540 = vmax.xlane.f32.xlu0 %v1539_v15 }
 0x45b   : > { %v1542_v20 = vsel %vm1520_vm2, %v5447_v13, -inf }
 0x45c   : > { %1537 = vmax.xlane.f32.xlu1 %v1536_v18 }
 0x45e   : > { %1543 = vmax.xlane.f32.xlu0 %v1542_v20  ;;  %v1419_v21 = vpop.f32.mrb[20].mxu1 }
 0x45f   : > { %v3937_v22 = vpop.f32.mrb[21].mxu1  ;;  %v5457_v27 = vadd.f32 %v1419_v21, %v1141_v51 }
 0x460   : > { %v1422_v26 = vpop.f32.mrb[22].mxu1 }
 0x461   : > { %v5459_v29 = vadd.f32 %v1422_v26, %v1142_v54  ;;  %v3938_v33 = vpop.f32.mrb[23].mxu1  ;;  %v1551_v7 = vsel %vm1520_vm2, %v5457_v27, -inf }
 0x462   : > { %1522 = vmax.xlane.f32.xlu0 %v1521_v36 }
 0x463   : > { %v1554_v28 = vsel %vm1520_vm2, %v5459_v29, -inf }
 0x464   : > { %1555 = vmax.xlane.f32.xlu1 %v1554_v28 }
 0x466   : > { %1552 = vmax.xlane.f32.xlu0 %v1551_v7  ;;  %v1513_v45 = vpop.f32.mrb[24].mxu1 }
 0x467   : > { %v3949_v49 = vpop.f32.mrb[25].mxu1  ;;  %v5475_v16 = vadd.f32 %v1513_v45, %v1141_v51 }
 0x468   : > { %1549 = vmax.xlane.f32.xlu1 %v1548_v50  ;;  %v1516_v46 = vpop.f32.mrb[26].mxu1 }
 0x469   : > { %v3950_v17 = vpop.f32.mrb[27].mxu1  ;;  %v5479_v56 = vadd.f32 %v1516_v46, %v1142_v54  ;;  %v1563_v59 = vsel %vm1520_vm2, %v5475_v16, -inf  ;;  %v1545_v54 = vsel %vm1520_vm2, %v5484_v23, -inf }
 0x46a   : > { %1534 = vmax.xlane.f32.xlu0 %v1533_v37 }
 0x46b   : > { %v1566_v1 = vsel %vm1520_vm2, %v5479_v56, -inf }
 0x46c   : > { %1561 = vmax.xlane.f32.xlu1 %v1560_v58 }
 0x46e   : > { %1564 = vmax.xlane.f32.xlu0 %v1563_v59 }
 0x470   : > { %1567 = vmax.xlane.f32.xlu1 %v1566_v1 }
 0x472   : > { %1546 = vmax.xlane.f32.xlu0 %v1545_v54 }
 0x476   : > { %1558 = vmax.xlane.f32.xlu0 %v1557_v10 }
 0x481   : > { %4206 = vrot.lane.b32.xlu1 %v4205_v38, %s4888_s21 }
 0x48c   : > { %4201 = vrot.lane.b32.xlu0 %v4200_v43, %s4888_s21 }
 0x4df   : > { %v1529_v9 = vpop.xlane.xlu0 %1528 }
 0x4e0   : > { %v1571_v48 = vsub.f32 %v5431_v53, %v1529_v9 }
 0x4e1   : > { %v1532_v51 = vpop.xlane.xlu1 %1531 }
 0x4e2   : > { %v1589_v11 = vmul.f32 1.442695, %v1571_v48  ;;  %v1572_v12 = vsub.f32 %v5433_v24, %v1532_v51 }
 0x4e4   : > { %4376 = vpow2.f32 %v1589_v11  ;;  %v1591_v14 = vmul.f32 1.442695, %v1572_v12 }
 0x4e5   : > { %v5507_v15 = vpop.xlane.xlu1 %1525 }
 0x4e6   : > { %4378 = vpow2.f32 %v1591_v14 }
 0x4e7   : > { %v1541_v18 = vpop.xlane.xlu0 %1540 }
 0x4e8   : > { %v1575_v38 = vsub.f32 %v5443_v8, %v1541_v18 }
 0x4e9   : > { %v5511_v35 = vpop.xlane.xlu1 %1537 }
 0x4ea   : > { %v1597_v20 = vmul.f32 1.442695, %v1575_v38 }
 0x4eb   : > { %v1544_v21 = vpop.xlane.xlu0 %1543 }
 0x4ec   : > { %4380 = vpow2.f32 %v1597_v20  ;;  %v1576_v34 = vsub.f32 %v5447_v13, %v1544_v21 }
 0x4ee   : > { %v5513_v43 = vpop.eup %4376  ;;  %v1599_v53 = vmul.f32 1.442695, %v1576_v34 }
 0x4ef   : > { %v1523_v22 = vpop.xlane.xlu0 %1522  ;;  %v1623_v24 = vsel %vm1520_vm2, %v5513_v43, 0.0 }
 0x4f0   : > { %v5517_v26 = vpop.eup %4378  ;;  %4382 = vpow2.f32 %v1599_v53  ;;  %1624 = vadd.xlane.f32.xlu0 %v1623_v24 }
 0x4f1   : > { %v1556_v33 = vpop.xlane.xlu1 %1555  ;;  %v1626_v8 = vsel %vm1520_vm2, %v5517_v26, 0.0 }
 0x4f2   : > { %v1580_v36 = vsub.f32 %v5459_v29, %v1556_v33  ;;  %1627 = vadd.xlane.f32.xlu1 %v1626_v8  ;;  %v1569_v33 = vsub.f32 %v5453_v19, %v1523_v22 }
 0x4f3   : > { %v1553_v13 = vpop.xlane.xlu0 %1552 }
 0x4f4   : > { %v1607_v28 = vmul.f32 1.442695, %v1580_v36  ;;  %v1579_v7 = vsub.f32 %v5457_v27, %v1553_v13  ;;  %v1585_v8 = vmul.f32 1.442695, %v1569_v33  ;;  %v1574_v13 = vsub.f32 %v5441_v4, %v5511_v35 }
 0x4f5   : > { %v1550_v45 = vpop.xlane.xlu1 %1549 }
 0x4f6   : > { %v5523_v49 = vpop.eup %4380  ;;  %4384 = vpow2.f32 %v1607_v28  ;;  %v1605_v50 = vmul.f32 1.442695, %v1579_v7  ;;  %v1570_v7 = vsub.f32 %v5437_v62, %v5507_v15 }
 0x4f7   : > { %v1535_v46 = vpop.xlane.xlu0 %1534  ;;  %v1635_v17 = vsel %vm1520_vm2, %v5523_v49, 0.0 }
 0x4f8   : > { %4386 = vpow2.f32 %v1605_v50  ;;  %1636 = vadd.xlane.f32.xlu0 %v1635_v17  ;;  %v1573_v36 = vsub.f32 %v5467_v44, %v1535_v46  ;;  %v1595_v50 = vmul.f32 1.442695, %v1574_v13  ;;  %v1587_v17 = vmul.f32 1.442695, %v1570_v7 }
 0x4f9   : > { %v1562_v37 = vpop.xlane.xlu1 %1561 }
 0x4fa   : > { %v5527_v58 = vpop.eup %4382  ;;  %v1593_v28 = vmul.f32 1.442695, %v1573_v36  ;;  %v1582_v35 = vsub.f32 %v5471_v47, %v1562_v37 }
 0x4fb   : > { %v1565_v29 = vpop.xlane.xlu0 %1564  ;;  %v1638_v59 = vsel %vm1520_vm2, %v5527_v58, 0.0 }
 0x4fc   : > { %v1583_v27 = vsub.f32 %v5475_v16, %v1565_v29  ;;  %1639 = vadd.xlane.f32.xlu1 %v1638_v59 }
 0x4fd   : > { %v1568_v1 = vpop.xlane.xlu1 %1567 }
 0x4fe   : > { %v1613_v54 = vmul.f32 1.442695, %v1583_v27  ;;  %v1584_v10 = vsub.f32 %v5479_v56, %v1568_v1 }
 0x4ff   : > { %v1547_v9 = vpop.xlane.xlu0 %1546 }
 0x500   : > { %v5533_v48 = vpop.eup %4384  ;;  %4388 = vpow2.f32 %v1613_v54  ;;  %v1615_v51 = vmul.f32 1.442695, %v1584_v10 }
 0x501   : > { %v1650_v11 = vsel %vm1520_vm2, %v5533_v48, 0.0 }
 0x502   : > { %v5537_v12 = vpop.eup %4386  ;;  %4390 = vpow2.f32 %v1615_v51  ;;  %1651 = vadd.xlane.f32.xlu1 %v1650_v11  ;;  %v4207_v11 = vpop.permute.xlu1 %4206 }
 0x503   : > { %v1559_v14 = vpop.xlane.xlu0 %1558  ;;  %v1647_v16 = vsel %vm1520_vm2, %v5537_v12, 0.0  ;;  %4392 = vpow2.f32 %v1585_v8 }
 0x504   : > { %1648 = vadd.xlane.f32.xlu0 %v1647_v16  ;;  %4394 = vpow2.f32 %v1593_v28  ;;  %v1581_v22 = vsub.f32 %v5491_v40, %v1559_v14 }
 0x505   : > { %4396 = vpow2.f32 %v1595_v50 }
 0x506   : > { %4398 = vpow2.f32 %v1587_v17  ;;  %v1609_v46 = vmul.f32 1.442695, %v1581_v22 }
 0x507   : > { %v4202_v18 = vpop.permute.xlu0 %4201 }
 0x508   : > { %v4204_v38 = vunpack.i.h.bf16 %v4202_v18  ;;  %v4203_v56 = vunpack.i.l.bf16 %v4202_v18 }
 0x50a   : > { %v5541_v20 = vpop.eup %4388  ;;  %v1134_v21 = vpack.c.bf16 %v4204_v38, %v4203_v56 }
 0x50b   : > { %v1659_v34 = vsel %vm1520_vm2, %v5541_v20, 0.0 }
 0x50c   : > { %v5545_v53 = vpop.eup %4390  ;;  %3958 = vmatpush3.bf16.msra.mxu1 %v1134_v21  ;;  %1660 = vadd.xlane.f32.xlu1 %v1659_v34  ;;  %v4209_v34 = vunpack.i.h.bf16 %v4207_v11 }
 0x50d   : > { %3969 = vmatprep.subr.bf16.mxu1 %v4886_v39  ;;  %v1662_v24 = vsel %vm1520_vm2, %v5545_v53, 0.0  ;;  %v5567_v44 = vpop.eup %4392 }
 0x50e   : > { %v1617_v62 = vsel %vm1520_vm2, %v5567_v44, 0.0  ;;  %v5572_v15 = vpop.eup %4394 }
 0x50f   : > { %v5576_v40 = vpop.eup %4396 }
 0x510   : > { %1663 = vadd.xlane.f32.xlu1 %v1662_v24  ;;  %v1632_v47 = vsel %vm1520_vm2, %v5576_v40, 0.0  ;;  %v4208_v24 = vunpack.i.l.bf16 %v4207_v11 }
 0x512   : > { %v1136_v13 = vpack.c.bf16 %v4209_v34, %v4208_v24 }
 0x51a   : > { %4211 = vrot.lane.b32.xlu0 %v4210_v0, %s4888_s21  ;;  %v1577_v0 = vsub.f32 %v5484_v23, %v1547_v9  ;;  %v1629_v23 = vsel %vm1520_vm2, %v5572_v15, 0.0 }
 0x51c   : > { %v1601_v19 = vmul.f32 1.442695, %v1577_v0 }
 0x51e   : > { %4400 = vpow2.f32 %v1601_v19 }
 0x521   : > { %4216 = vrot.lane.b32.xlu1 %v4215_v60, %s4888_s21  ;;  %v1578_v60 = vsub.f32 %v5463_v42, %v1550_v45  ;;  %v1611_v42 = vmul.f32 1.442695, %v1582_v35  ;;  %v5578_v45 = vpop.eup %4398 }
 0x522   : > { %v1620_v27 = vsel %vm1520_vm2, %v5578_v45, 0.0 }
 0x523   : > { %v1603_v4 = vmul.f32 1.442695, %v1578_v60 }
 0x525   : > { %4402 = vpow2.f32 %v1603_v4 }
 0x526   : > { %4404 = vpow2.f32 %v1609_v46 }
 0x527   : > { %4406 = vpow2.f32 %v1611_v42 }
 0x528   : > { %v5582_v37 = vpop.eup %4400 }
 0x529   : > { %v1641_v59 = vsel %vm1520_vm2, %v5582_v37, 0.0 }
 0x52f   : > { %v5584_v29 = vpop.eup %4402 }
 0x530   : > { %v5590_v1 = vpop.eup %4404  ;;  %v1644_v10 = vsel %vm1520_vm2, %v5584_v29, 0.0 }
 0x531   : > { %v1653_v54 = vsel %vm1520_vm2, %v5590_v1, 0.0  ;;  %v5596_v9 = vpop.eup %4406 }
 0x532   : > { %v1656_v51 = vsel %vm1520_vm2, %v5596_v9, 0.0 }
 0x539   : > { %1618 = vadd.xlane.f32.xlu0 %v1617_v62 }
 0x53d   : > { %1630 = vadd.xlane.f32.xlu0 %v1629_v23 }
 0x541   : > { %1633 = vadd.xlane.f32.xlu0 %v1632_v47 }
 0x545   : > { %1642 = vadd.xlane.f32.xlu0 %v1641_v59  ;;  %1621 = vadd.xlane.f32.xlu1 %v1620_v27 }
 0x549   : > { %1654 = vadd.xlane.f32.xlu0 %v1653_v54  ;;  %1645 = vadd.xlane.f32.xlu1 %v1644_v10 }
 0x54d   : > { %1657 = vadd.xlane.f32.xlu1 %v1656_v51 }
 0x57d   : > { %v1625_v14 = vpop.xlane.xlu0 %1624 }
 0x57e   : > { %4408 = vrcp.f32 %v1625_v14 }
 0x57f   : > { %v1628_v16 = vpop.xlane.xlu1 %1627 }
 0x580   : > { %4410 = vrcp.f32 %v1628_v16 }
 0x585   : > { %v1637_v18 = vpop.xlane.xlu0 %1636 }
 0x586   : > { %4412 = vrcp.f32 %v1637_v18 }
 0x588   : > { %v4409_v38 = vpop.eup %4408 }
 0x589   : > { %v1640_v56 = vpop.xlane.xlu1 %1639  ;;  %v1683_v33 = vmul.f32 %v4409_v38, %v5513_v43 }
 0x58a   : > { %v4411_v21 = vpop.eup %4410  ;;  %4414 = vrcp.f32 %v1640_v56 }
 0x58b   : > { %v1684_v8 = vmul.f32 %v4411_v21, %v5517_v26 }
 0x58d   : > { %v1698_v36 = vpack.c.bf16 %v1684_v8, %v1683_v33 }
 0x58f   : > { %3960 = vmatmul.mubr.msk.bf16.vlgmr.msra.gmra.mrb[28].mxu1 %vm1520_vm2, %v1698_v36  ;;  %v1652_v28 = vpop.xlane.xlu1 %1651 }
 0x590   : > { %4416 = vrcp.f32 %v1652_v28  ;;  %3970 = vmatpush3.bf16.msra.mxu1 %v1136_v13  ;;  %3971 = vmatprep.mubr.msk.bf16.mxu1 %vm4887_vm0, %v4886_v39  ;;  %v4413_v50 = vpop.eup %4412 }
 0x591   : > { %v1649_v7 = vpop.xlane.xlu0 %1648  ;;  %3981 = vmatprep.subr.bf16.mxu1 %v4886_v39  ;;  %v1687_v43 = vmul.f32 %v4413_v50, %v5523_v49 }
 0x592   : > { %4418 = vrcp.f32 %v1649_v7 }
 0x594   : > { %v4415_v0 = vpop.eup %4414 }
 0x595   : > { %v1688_v26 = vmul.f32 %v4415_v0, %v5527_v58  ;;  %v4212_v17 = vpop.permute.xlu0 %4211 }
 0x596   : > { %v4214_v60 = vunpack.i.h.bf16 %v4212_v17  ;;  %v4213_v19 = vunpack.i.l.bf16 %v4212_v17 }
 0x597   : > { %v1700_v22 = vpack.c.bf16 %v1688_v26, %v1687_v43  ;;  %v4274_v43 = vld [vmem:[#allocation10 + $0x10] sm:$0xff]   ;;  %v4275_v26 = vld [vmem:[#allocation10 + $0x18] sm:$0xff]  }
 0x598   : > { %v1138_v4 = vpack.c.bf16 %v4214_v60, %v4213_v19  ;;  %v4279_v19 = vld [vmem:[#allocation10 + $0x38] sm:$0xff]  }
 0x599   : > { %v1661_v35 = vpop.xlane.xlu1 %1660  ;;  %3972 = vmatmul.mubr.msk.bf16.vlgmr.msra.gmra.mrb[32].mxu1 %vm1520_vm2, %v1700_v22 }
 0x59a   : > { %v4417_v46 = vpop.eup %4416  ;;  %3982 = vmatpush3.bf16.msra.mxu1 %v1138_v4  ;;  %3983 = vmatprep.mubr.msk.bf16.mxu1 %vm4887_vm0, %v4886_v39  ;;  %4420 = vrcp.f32 %v1661_v35 }
 0x59b   : > { %3993 = vmatprep.subr.bf16.mxu1 %v4886_v39  ;;  %v1692_v49 = vmul.f32 %v4417_v46, %v5533_v48 }
 0x59c   : > { %v4419_v62 = vpop.eup %4418 }
 0x59d   : > { %v1691_v58 = vmul.f32 %v4419_v62, %v5537_v12  ;;  %v1664_v42 = vpop.xlane.xlu1 %1663 }
 0x59e   : > { %4422 = vrcp.f32 %v1664_v42 }
 0x59f   : > { %v1702_v23 = vpack.c.bf16 %v1692_v49, %v1691_v58 }
 0x5a1   : > { %v4217_v47 = vpop.permute.xlu1 %4216  ;;  %3984 = vmatmul.mubr.msk.bf16.vlgmr.msra.gmra.mrb[36].mxu1 %vm1520_vm2, %v1702_v23 }
 0x5a2   : > { %v4219_v59 = vunpack.i.h.bf16 %v4217_v47  ;;  %v4218_v27 = vunpack.i.l.bf16 %v4217_v47  ;;  %3995 = vmatprep.mubr.msk.bf16.mxu1 %vm4887_vm0, %v4886_v39 }
 0x5a4   : > { %v1140_v54 = vpack.c.bf16 %v4219_v59, %v4218_v27  ;;  %v4421_v10 = vpop.eup %4420 }
 0x5a5   : > { %v1695_v11 = vmul.f32 %v4421_v10, %v5541_v20 }
 0x5a6   : > { %3994 = vmatpush3.bf16.msra.mxu1 %v1140_v54 }
 0x5a8   : > { %v4423_v51 = vpop.eup %4422 }
 0x5a9   : > { %v1696_v48 = vmul.f32 %v4423_v51, %v5545_v53 }
 0x5ab   : > { %v1704_v12 = vpack.c.bf16 %v1696_v48, %v1695_v11 }
 0x5ad   : > { %3996 = vmatmul.mubr.msk.bf16.vlgmr.msra.gmra.mrb[40].mxu1 %vm1520_vm2, %v1704_v12 }
 0x5ae   : > { %2621 = vmatprep.mubr.bf16.mxu1 %v4885_v63 }
 0x5c6   : > { %v1619_v14 = vpop.xlane.xlu0 %1618 }
 0x5c7   : > { %4424 = vrcp.f32 %v1619_v14 }
 0x5ca   : > { %v1631_v16 = vpop.xlane.xlu0 %1630 }
 0x5ce   : > { %v1634_v38 = vpop.xlane.xlu0 %1633 }
 0x5d1   : > { %v4425_v56 = vpop.eup %4424 }
 0x5d2   : > { %v1622_v18 = vpop.xlane.xlu1 %1621  ;;  %v1681_v20 = vmul.f32 %v4425_v56, %v5567_v44  ;;  %v1643_v24 = vpop.xlane.xlu0 %1642 }
 0x5d3   : > { %4426 = vrcp.f32 %v1622_v18 }
 0x5d4   : > { %4428 = vrcp.f32 %v1634_v38 }
 0x5d5   : > { %4430 = vrcp.f32 %v1631_v16 }
 0x5d6   : > { %v1646_v21 = vpop.xlane.xlu1 %1645  ;;  %v1655_v28 = vpop.xlane.xlu0 %1654 }
 0x5d7   : > { %4432 = vrcp.f32 %v1646_v21 }
 0x5d8   : > { %4434 = vrcp.f32 %v1643_v24 }
 0x5da   : > { %v1658_v44 = vpop.xlane.xlu1 %1657 }
 0x5db   : > { %4436 = vrcp.f32 %v1658_v44 }
 0x5dc   : > { %4438 = vrcp.f32 %v1655_v28 }
 0x5dd   : > { %v4427_v34 = vpop.eup %4426 }
 0x5de   : > { %v1682_v53 = vmul.f32 %v4427_v34, %v5578_v45  ;;  %v4429_v8 = vpop.eup %4428 }
 0x5df   : > { %v4431_v36 = vpop.eup %4430  ;;  %v1686_v13 = vmul.f32 %v4429_v8, %v5576_v40 }
 0x5e0   : > { %v1697_v33 = vpack.c.bf16 %v1682_v53, %v1681_v20  ;;  %v1685_v45 = vmul.f32 %v4431_v36, %v5572_v15 }
 0x5e1   : > { %v4433_v50 = vpop.eup %4432 }
 0x5e2   : > { %3954 = vmatmul.mubr.msk.bf16.vlgmr.msra.gmra.mrb[28].mxu0 %vm1520_vm2, %v1697_v33  ;;  %v1699_v7 = vpack.c.bf16 %v1686_v13, %v1685_v45  ;;  %v4435_v0 = vpop.eup %4434  ;;  %v1690_v25 = vmul.f32 %v4433_v50, %v5584_v29  ;;  %v4273_v29 = vld [vmem:[#allocation10 + $0x8] sm:$0xff]  }
 0x5e3   : > { %3964 = vmatpush3.bf16.msra.mxu0 %v1135_v41  ;;  %3965 = vmatprep.mubr.msk.bf16.mxu0 %vm4887_vm0, %v4886_v39  ;;  %v1689_v30 = vmul.f32 %v4435_v0, %v5582_v37  ;;  %v4272_v37 = vld [vmem:[#allocation10] sm:$0xff]  }
 0x5e4   : > { %3975 = vmatprep.subr.bf16.mxu0 %v4886_v39 }
 0x5e5   : > { %v1701_v41 = vpack.c.bf16 %v1690_v25, %v1689_v30  ;;  %v4437_v15 = vpop.eup %4436 }
 0x5e6   : > { %v4439_v40 = vpop.eup %4438  ;;  %v1694_v55 = vmul.f32 %v4437_v15, %v5596_v9 }
 0x5e7   : > { %v1693_v31 = vmul.f32 %v4439_v40, %v5590_v1 }
 0x5ea   : > { %3966 = vmatmul.mubr.msk.bf16.vlgmr.msra.gmra.mrb[32].mxu0 %vm1520_vm2, %v1699_v7 }
 0x5eb   : > { %3976 = vmatpush3.bf16.msra.mxu0 %v1137_v32  ;;  %3977 = vmatprep.mubr.msk.bf16.mxu0 %vm4887_vm0, %v4886_v39  ;;  %v1703_v32 = vpack.c.bf16 %v1694_v55, %v1693_v31 }
 0x5ec   : > { %3987 = vmatprep.subr.bf16.mxu0 %v4886_v39 }
 0x5f2   : > { %3978 = vmatmul.mubr.msk.bf16.vlgmr.msra.gmra.mrb[36].mxu0 %vm1520_vm2, %v1701_v41 }
 0x5f3   : > { %3988 = vmatpush3.bf16.msra.mxu0 %v1139_v61  ;;  %3989 = vmatprep.mubr.msk.bf16.mxu0 %vm4887_vm0, %v4886_v39  ;;  %v4277_v39 = vld [vmem:[#allocation10 + $0x28] sm:$0xff]  }
 0x5f4   : > { %3999 = vmatprep.subr.bf16.mxu0 %v4272_v37 }
 0x5fa   : > { %3990 = vmatmul.mubr.msk.bf16.vlgmr.msra.gmra.mrb[40].mxu0 %vm1520_vm2, %v1703_v32 }
 0x5fb   : > { %4000 = vmatpush3.bf16.msra.mxu0 %v4272_v37 }
 0x5fc   : > { %4001 = vmatprep.subr.bf16.mxu0 %v4273_v29 }
 0x5ff   : > { %4002 = vmatpush3.bf16.msra.mxu0 %v4273_v29 }
 0x600   : > { %4003 = vmatprep.subr.bf16.mxu0 %v4274_v43 }
 0x603   : > { %4004 = vmatpush3.bf16.msra.mxu0 %v4274_v43 }
 0x604   : > { %4005 = vmatprep.subr.bf16.mxu0 %v4275_v26 }
 0x607   : > { %4006 = vmatpush3.bf16.msra.mxu0 %v4275_v26 }
 0x608   : > { %4007 = vmatprep.subr.bf16.mxu0 %v4276_v52 }
 0x60b   : > { %4008 = vmatpush3.bf16.msra.mxu0 %v4276_v52 }
 0x60c   : > { %4009 = vmatprep.subr.bf16.mxu0 %v4277_v39 }
 0x60f   : > { %4010 = vmatpush3.bf16.msra.mxu0 %v4277_v39 }
 0x610   : > { %4011 = vmatprep.subr.bf16.mxu0 %v4278_v57 }
 0x613   : > { %4012 = vmatpush3.bf16.msra.mxu0 %v4278_v57 }
 0x614   : > { %4013 = vmatprep.subr.bf16.mxu0 %v4279_v19 }
 0x617   : > { %4014 = vmatpush3.bf16.msra.mxu0 %v4279_v19  ;;  %v4584_v19 = vld [vmem:[%s5230_s14] sm:$0xff] }
 0x662   : > { %v1786_v61 = vpop.f32.mrb[28].mxu1 }
 0x663   : > { %v3961_v1 = vpop.f32.mrb[29].mxu1 }
 0x664   : > { %v1789_v9 = vpop.f32.mrb[30].mxu1 }
 0x665   : > { %v4220_v17 = vpack.i.bf16 %v1789_v9, %v1786_v61  ;;  %v3962_v60 = vpop.f32.mrb[31].mxu1 }
 0x667   : > { %4221 = vrot.lane.b32.xlu0 %v4220_v17, %s4888_s21  ;;  %v3633_v17 = vld [vmem:[%s6195_s17] ss:$0 sm:$0xff]  ;;  %s6051_s17 = scalar_lea.vmem [#allocation14], %s3575_s26  ;;  %s3742_s26 = sshll.u32 %s4988_s19, 10 }
 0x668   : > { %s3431_s25 = sshll.u32 %s6051_s17, 4  ;;  %s6078_s25 = int_to_ptr.vmem [resolvable:$true] %s3431_s25 }
 0x669   : > { %s4790_s19 = scalar_lea.vmem %s6078_s25, 1024  ;;  %p4797_p11 = scmp.lt.s32.totalorder %s6078_s25, %s4795_s28 }
 0x66a   : > { %p4791_p6 = scmp.ne.s32.totalorder %s6078_s25, %s4790_s19 }
 0x66c   : > { %v1874_v22 = vpop.f32.mrb[32].mxu1  ;;  %p4792_p10 = pnand %p4791_p6, %p6243_p5 }
 0x66d   : > { %v3973_v4 = vpop.f32.mrb[33].mxu1 }
 0x66e   : > { %v1877_v35 = vpop.f32.mrb[34].mxu1  ;;  %p4793_p1 = pneg %p4792_p10 }
 0x66f   : > { %v4225_v46 = vpack.i.bf16 %v1877_v35, %v1874_v22  ;;  %v3974_v62 = vpop.f32.mrb[35].mxu1 }
 0x671   : > { %4226 = vrot.lane.b32.xlu1 %v4225_v46, %s4888_s21  ;;  %v4585_v46 = vld [vmem:[%s5230_s14 + $0x10] sm:$0xff] }
 0x674   : > { %v1962_v49 = vpop.f32.mrb[36].mxu1 }
 0x675   : > { %v3985_v58 = vpop.f32.mrb[37].mxu1 }
 0x676   : > { %v1965_v42 = vpop.f32.mrb[38].mxu1  ;;  %v4586_v58 = vld [vmem:[%s5230_s14 + $0x8] sm:$0xff] }
 0x677   : > { %v4230_v23 = vpack.i.bf16 %v1965_v42, %v1962_v49  ;;  %v3986_v47 = vpop.f32.mrb[39].mxu1 }
 0x679   : > { %4231 = vrot.lane.b32.xlu1 %v4230_v23, %s4888_s21 }
 0x680   : > { %v2050_v59 = vpop.f32.mrb[40].mxu1 }
 0x681   : > { %v3997_v27 = vpop.f32.mrb[41].mxu1 }
 0x682   : > { %v2053_v54 = vpop.f32.mrb[42].mxu1 }
 0x683   : > { %v4235_v10 = vpack.i.bf16 %v2053_v54, %v2050_v59  ;;  %v3998_v51 = vpop.f32.mrb[43].mxu1  ;;  %v4587_v59 = vld [vmem:[%s5230_s14 + $0x18] sm:$0xff] }
 0x685   : > { %4236 = vrot.lane.b32.xlu1 %v4235_v10, %s4888_s21 }
 0x6b5   : > { %v1742_v11 = vpop.f32.mrb[28].mxu0 }
 0x6b6   : > { %v3955_v48 = vpop.f32.mrb[29].mxu0 }
 0x6b7   : > { %v1745_v12 = vpop.f32.mrb[30].mxu0 }
 0x6b8   : > { %v3956_v14 = vpop.f32.mrb[31].mxu0 }
 0x6bd   : > { %v1830_v16 = vpop.f32.mrb[32].mxu0 }
 0x6be   : > { %v3967_v18 = vpop.f32.mrb[33].mxu0 }
 0x6bf   : > { %v1833_v38 = vpop.f32.mrb[34].mxu0 }
 0x6c0   : > { %v3968_v56 = vpop.f32.mrb[35].mxu0 }
 0x6c1   : > { %v4590_v56 = vld [vmem:[%s5230_s14 + $0x28] sm:$0xff] }
 0x6c5   : > { %v1918_v21 = vpop.f32.mrb[36].mxu0 }
 0x6c6   : > { %v3979_v34 = vpop.f32.mrb[37].mxu0 }
 0x6c7   : > { %v1921_v20 = vpop.f32.mrb[38].mxu0  ;;  %v4591_v34 = vld [vmem:[%s5230_s14 + $0x38] sm:$0xff] }
 0x6c8   : > { %v3980_v24 = vpop.f32.mrb[39].mxu0 }
 0x6cd   : > { %v2006_v53 = vpop.f32.mrb[40].mxu0 }
 0x6ce   : > { %v3991_v33 = vpop.f32.mrb[41].mxu0 }
 0x6cf   : > { %v2009_v8 = vpop.f32.mrb[42].mxu0 }
 0x6d0   : > { %v3992_v36 = vpop.f32.mrb[43].mxu0 }
 0x6d1   : > { %v4282_v36 = vld [vmem:[#allocation11 + $0x4] ss:$16 sps:$4 sm:$0xff]  }
 0x6d2   : > { %2589 = vmatprep.subr.bf16.mxu1 %v4282_v36  ;;  %v4312_v36 = vld [vmem:[#allocation11 + $0xa4] ss:$16 sps:$4 sm:$0xff]  }
 0x6d9   : > { %v4222_v13 = vpop.permute.xlu0 %4221 }
 0x6da   : > { %v4224_v44 = vunpack.i.h.bf16 %v4222_v13  ;;  %v4223_v45 = vunpack.i.l.bf16 %v4222_v13  ;;  %v4283_v13 = vld [vmem:[#allocation11 + $0x8] ss:$16 sps:$4 sm:$0xff]  }
 0x6dc   : > { %v2089_v28 = vsel %vm1143_vm1, %v1742_v11, %v4223_v45  ;;  %v2090_v7 = vsel %vm1143_vm1, %v1745_v12, %v4224_v44  ;;  %v4588_v11 = vld [vmem:[%s5230_s14 + $0x20] sm:$0xff] }
 0x6dd   : > { %v2097_v50 = vpack.c.bf16 %v2090_v7, %v2089_v28  ;;  %v4285_v44 = vld [vmem:[#allocation11 + $0xc] ss:$16 sps:$4 sm:$0xff]   ;;  %v4288_v45 = vld [vmem:[#allocation11 + $0x24] ss:$16 sps:$4 sm:$0xff]   ;;  %v4286_v7 = vld [vmem:[#allocation11 + $0x20] ss:$16 sps:$4 sm:$0xff]  }
 0x6de   : > { %v4291_v28 = vld [vmem:[#allocation11 + $0x2c] ss:$16 sps:$4 sm:$0xff]   ;;  %2662 = vmatprep.subr.bf16.mxu0 %v4285_v44  ;;  %v4310_v44 = vld [vmem:[#allocation11 + $0xa0] ss:$16 sps:$4 sm:$0xff]  }
 0x6df   : > { %4015 = vmatprep.mubr.bf16.mxu0 %v2097_v50  ;;  %v4289_v50 = vld [vmem:[#allocation11 + $0x28] ss:$16 sps:$4 sm:$0xff]  }
 0x6e3   : > { %v4227_v0 = vpop.permute.xlu1 %4226 }
 0x6e4   : > { %v4229_v25 = vunpack.i.h.bf16 %v4227_v0  ;;  %v4228_v30 = vunpack.i.l.bf16 %v4227_v0 }
 0x6e6   : > { %v2092_v41 = vsel %vm1143_vm1, %v1833_v38, %v4229_v25  ;;  %v2091_v15 = vsel %vm1143_vm1, %v1830_v16, %v4228_v30  ;;  %v4589_v16 = vld [vmem:[%s5230_s14 + $0x30] sm:$0xff]  ;;  %s6076_s14 = scalar_lea.hbm %s6241_s7, %s3742_s26 }
 0x6e7   : > { %v2098_v40 = vpack.c.bf16 %v2092_v41, %v2091_v15 }
 0x6e9   : > { %4016 = vmatmul.mubr.bf16.vlgmr.msra.gmra.mrb[44].mxu0 %v2098_v40 }
 0x6ea   : > { %2663 = vmatpush1.bf16.msra.mxu0 %v4283_v13  ;;  %v4315_v13 = vld [vmem:[#allocation11 + $0xac] ss:$16 sps:$4 sm:$0xff]  }
 0x6eb   : > { %v4232_v55 = vpop.permute.xlu1 %4231  ;;  %2664 = vmatprep.subr.bf16.mxu0 %v4291_v28  ;;  %v4316_v28 = vld [vmem:[#allocation11 + $0xc0] ss:$16 sps:$4 sm:$0xff]  }
 0x6ec   : > { %v4234_v31 = vunpack.i.h.bf16 %v4232_v55  ;;  %v4233_v32 = vunpack.i.l.bf16 %v4232_v55 }
 0x6ee   : > { %v2093_v37 = vsel %vm1143_vm1, %v1918_v21, %v4233_v32  ;;  %v2094_v29 = vsel %vm1143_vm1, %v1921_v20, %v4234_v31  ;;  %2665 = vmatpush1.bf16.msra.mxu0 %v4289_v50  ;;  %v4319_v50 = vld [vmem:[#allocation11 + $0xc8] ss:$16 sps:$4 sm:$0xff]  }
 0x6ef   : > { %v2099_v43 = vpack.c.bf16 %v2094_v29, %v2093_v37 }
 0x6f1   : > { %4019 = vmatprep.mubr.bf16.mxu0 %v2099_v43 }
 0x6f7   : > { %v4237_v26 = vpop.permute.xlu1 %4236 }
 0x6f8   : > { %v4239_v52 = vunpack.i.h.bf16 %v4237_v26  ;;  %v4238_v39 = vunpack.i.l.bf16 %v4237_v26 }
 0x6fa   : > { %v2095_v57 = vsel %vm1143_vm1, %v2006_v53, %v4238_v39  ;;  %v2096_v61 = vsel %vm1143_vm1, %v2009_v8, %v4239_v52  ;;  %v4280_v8 = vld [vmem:[#allocation11] ss:$16 sps:$4 sm:$0xff]  }
 0x6fb   : > { %v2100_v1 = vpack.c.bf16 %v2096_v61, %v2095_v57  ;;  %2590 = vmatpush1.bf16.msra.mxu1 %v4280_v8  ;;  %v4307_v8 = vld [vmem:[#allocation11 + $0x88] ss:$16 sps:$4 sm:$0xff]  }
 0x6fc   : > { %2591 = vmatprep.subr.bf16.mxu1 %v4288_v45  ;;  %v4313_v45 = vld [vmem:[#allocation11 + $0xa8] ss:$16 sps:$4 sm:$0xff]  }
 0x6fd   : > { %4020 = vmatmul.mubr.bf16.gmra.mrb[48].mxu0 %v2100_v1 }
 0x6fe   : > { %2694 = vmatprep.mubr.bf16.mxu0 %v4885_v63 }
 0x6ff   : > { %2592 = vmatpush1.bf16.msra.mxu1 %v4286_v7  ;;  %v4318_v7 = vld [vmem:[#allocation11 + $0xc4] ss:$16 sps:$4 sm:$0xff]  }
 0x7bc   : > { %v4017_v9 = vpop.f32.mrb[44].mxu0 }
 0x7bd   : > { %v2199_v60 = vpop.f32.mrb[45].mxu0  ;;  %v2232_v62 = vadd.f32 %v4585_v46, %v4017_v9 }
 0x7be   : > { %v2230_v22 = vadd.f32 %v4584_v19, %v2199_v60  ;;  %v4018_v4 = vpop.f32.mrb[46].mxu0  ;;  %v4297_v60 = vld [vmem:[#allocation11 + $0x4c] ss:$16 sps:$4 sm:$0xff]  }
 0x7bf   : > { %v2202_v35 = vpop.f32.mrb[47].mxu0  ;;  %v5674_v47 = vadd.f32 %v3633_v17, %v2232_v62  ;;  %v2233_v27 = vadd.f32 %v4587_v59, %v4018_v4  ;;  %v4292_v4 = vld [vmem:[#allocation11 + $0x40] ss:$16 sps:$4 sm:$0xff]   ;;  %2666 = vmatprep.subr.bf16.mxu0 %v4297_v60 }
 0x7c0   : > { %v5668_v49 = vadd.f32 %v3633_v17, %v2230_v22  ;;  %v2231_v42 = vadd.f32 %v4586_v58, %v2202_v35  ;;  %v4295_v35 = vld [vmem:[#allocation11 + $0x48] ss:$16 sps:$4 sm:$0xff]  }
 0x7c1   : > { %6198 = vst [vmem:[#allocation22_spill] sm:$0xff] %v5674_v47  ;;  %v5679_v54 = vadd.f32 %v3633_v17, %v2233_v27  ;;  %2667 = vmatpush1.bf16.msra.mxu0 %v4295_v35  ;;  %v4300_v27 = vld [vmem:[#allocation11 + $0x64] ss:$16 sps:$4 sm:$0xff]  }
 0x7c2   : > { %6196 = vst [vmem:[#allocation20_spill] sm:$0xff] %v5668_v49  ;;  %v5671_v23 = vadd.f32 %v3633_v17, %v2231_v42  ;;  %2255 = vadd.xlane.f32.xlu0 %v5668_v49 }
 0x7c3   : > { %6199 = vst [vmem:[#allocation23_spill] sm:$0xff] %v5679_v54 }
 0x7c4   : > { %6197 = vst [vmem:[#allocation21_spill] sm:$0xff] %v5671_v23  ;;  %2257 = vadd.xlane.f32.xlu1 %v5671_v23 }
 0x7c6   : > { %2259 = vadd.xlane.f32.xlu0 %v5674_v47 }
 0x7ca   : > { %2261 = vadd.xlane.f32.xlu0 %v5679_v54 }
 0x7d0   : > { %v4021_v10 = vpop.f32.mrb[48].mxu0 }
 0x7d1   : > { %v2215_v51 = vpop.f32.mrb[49].mxu0  ;;  %v2236_v18 = vadd.f32 %v4589_v16, %v4021_v10  ;;  %v4303_v10 = vld [vmem:[#allocation11 + $0x6c] ss:$16 sps:$4 sm:$0xff]  }
 0x7d2   : > { %v2234_v48 = vadd.f32 %v4588_v11, %v2215_v51  ;;  %v4022_v12 = vpop.f32.mrb[50].mxu0  ;;  %2668 = vmatprep.subr.bf16.mxu0 %v4303_v10 }
 0x7d3   : > { %v2218_v14 = vpop.f32.mrb[51].mxu0  ;;  %v2237_v20 = vadd.f32 %v4591_v34, %v4022_v12  ;;  %v5691_v53 = vadd.f32 %v3633_v17, %v2236_v18  ;;  %v4298_v12 = vld [vmem:[#allocation11 + $0x60] ss:$16 sps:$4 sm:$0xff]  }
 0x7d4   : > { %v5684_v38 = vadd.f32 %v3633_v17, %v2234_v48  ;;  %v2235_v21 = vadd.f32 %v4590_v56, %v2218_v14  ;;  %v4301_v14 = vld [vmem:[#allocation11 + $0x68] ss:$16 sps:$4 sm:$0xff]   ;;  %v4306_v56 = vld [vmem:[#allocation11 + $0x84] ss:$16 sps:$4 sm:$0xff]  }
 0x7d5   : > { %6202 = vst [vmem:[#allocation26_spill] sm:$0xff] %v5691_v53  ;;  %v5694_v33 = vadd.f32 %v3633_v17, %v2237_v20  ;;  %2669 = vmatpush1.bf16.msra.mxu0 %v4301_v14  ;;  %v4304_v20 = vld [vmem:[#allocation11 + $0x80] ss:$16 sps:$4 sm:$0xff]  }
 0x7d6   : > { %6200 = vst [vmem:[#allocation24_spill] sm:$0xff] %v5684_v38  ;;  %v5688_v24 = vadd.f32 %v3633_v17, %v2235_v21  ;;  %2263 = vadd.xlane.f32.xlu0 %v5684_v38  ;;  %v4294_v17 = vld [vmem:[#allocation11 + $0x44] ss:$16 sps:$4 sm:$0xff]   ;;  %v4309_v21 = vld [vmem:[#allocation11 + $0x8c] ss:$16 sps:$4 sm:$0xff]  }
 0x7d7   : > { %6203 = vst [vmem:[#allocation27_spill] sm:$0xff] %v5694_v33  ;;  %2593 = vmatprep.subr.bf16.mxu1 %v4294_v17  ;;  %2670 = vmatprep.subr.bf16.mxu0 %v4309_v21 }
 0x7d8   : > { %6201 = vst [vmem:[#allocation25_spill] sm:$0xff] %v5688_v24  ;;  %2265 = vadd.xlane.f32.xlu1 %v5688_v24  ;;  %2594 = vmatpush1.bf16.msra.mxu1 %v4292_v4  ;;  %v3634_v4 = vld [vmem:[%s6204_s4] ss:$0 sm:$0xff] }
 0x7d9   : > { %2595 = vmatprep.subr.bf16.mxu1 %v4300_v27  ;;  %2671 = vmatpush1.bf16.msra.mxu0 %v4307_v8  ;;  %v3635_v27 = vld [vmem:[%s6205_s20] ss:$0 sm:$0xff]  ;;  %s3417_s20 = scalar_lea.sflag [#allocation4], %s5224_s9 }
 0x7da   : > { %2267 = vadd.xlane.f32.xlu0 %v5691_v53  ;;  %2672 = vmatprep.subr.bf16.mxu0 %v4315_v13 }
 0x7dc   : > { %2269 = vadd.xlane.f32.xlu1 %v5694_v33  ;;  %2596 = vmatpush1.bf16.msra.mxu1 %v4298_v12 }
 0x7dd   : > { %2597 = vmatprep.subr.bf16.mxu1 %v4306_v56  ;;  %2673 = vmatpush1.bf16.msra.mxu0 %v4313_v45 }
 0x7e0   : > { %2598 = vmatpush1.bf16.msra.mxu1 %v4304_v20 }
 0x7e1   : > { %2599 = vmatprep.subr.bf16.mxu1 %v4312_v36 }
 0x7e4   : > { %2600 = vmatpush1.bf16.msra.mxu1 %v4310_v44 }
 0x7e5   : > { %2601 = vmatprep.subr.bf16.mxu1 %v4318_v7 }
 0x7e8   : > { %2602 = vmatpush1.bf16.msra.mxu1 %v4316_v28 }
 0x84f   : > { %v2256_v0 = vpop.xlane.xlu0 %2255 }
 0x850   : > { %v2271_v25 = vmul.f32 0.0078125, %v2256_v0  ;;  %v4321_v0 = vld [vmem:[#allocation11 + $0xcc] ss:$16 sps:$4 sm:$0xff]  }
 0x851   : > { %v2258_v30 = vpop.xlane.xlu1 %2257  ;;  %2674 = vmatprep.subr.bf16.mxu0 %v4321_v0 }
 0x852   : > { %v5699_v41 = vsub.f32 %v5668_v49, %v2271_v25  ;;  %v2272_v15 = vmul.f32 0.0078125, %v2258_v30  ;;  %2675 = vmatpush1.bf16.msra.mxu0 %v4319_v50  ;;  %v4324_v25 = vld [vmem:[#allocation11 + $0xe4] ss:$16 sps:$4 sm:$0xff]   ;;  %v4327_v30 = vld [vmem:[#allocation11 + $0xec] ss:$16 sps:$4 sm:$0xff]  }
 0x853   : > { %v2260_v40 = vpop.xlane.xlu0 %2259  ;;  %2603 = vmatprep.subr.bf16.mxu1 %v4324_v25  ;;  %2676 = vmatprep.subr.bf16.mxu0 %v4327_v30 }
 0x854   : > { %v5702_v55 = vsub.f32 %v5671_v23, %v2272_v15  ;;  %v2273_v31 = vmul.f32 0.0078125, %v2260_v40  ;;  %v2287_v32 = vmul.f32 %v5699_v41, %v5699_v41  ;;  %v4322_v15 = vld [vmem:[#allocation11 + $0xe0] ss:$16 sps:$4 sm:$0xff]   ;;  %v4325_v40 = vld [vmem:[#allocation11 + $0xe8] ss:$16 sps:$4 sm:$0xff]  }
 0x855   : > { %2604 = vmatpush1.bf16.msra.mxu1 %v4322_v15 }
 0x856   : > { %v5707_v37 = vsub.f32 %v5674_v47, %v2273_v31  ;;  %2295 = vadd.xlane.f32.xlu0 %v2287_v32  ;;  %v2288_v29 = vmul.f32 %v5702_v55, %v5702_v55  ;;  %2677 = vmatpush1.bf16.msra.mxu0 %v4325_v40 }
 0x857   : > { %v2262_v43 = vpop.xlane.xlu0 %2261 }
 0x858   : > { %v2274_v26 = vmul.f32 0.0078125, %v2262_v43  ;;  %2297 = vadd.xlane.f32.xlu1 %v2288_v29  ;;  %v2289_v52 = vmul.f32 %v5707_v37, %v5707_v37 }
 0x85a   : > { %v5714_v39 = vsub.f32 %v5679_v54, %v2274_v26  ;;  %2299 = vadd.xlane.f32.xlu0 %v2289_v52 }
 0x85c   : > { %v2290_v57 = vmul.f32 %v5714_v39, %v5714_v39 }
 0x85e   : > { %2301 = vadd.xlane.f32.xlu1 %v2290_v57 }
 0x863   : > { %v2264_v61 = vpop.xlane.xlu0 %2263 }
 0x864   : > { %v2275_v1 = vmul.f32 0.0078125, %v2264_v61 }
 0x865   : > { %v2266_v9 = vpop.xlane.xlu1 %2265 }
 0x866   : > { %v5719_v19 = vsub.f32 %v5684_v38, %v2275_v1  ;;  %v2276_v22 = vmul.f32 0.0078125, %v2266_v9 }
 0x867   : > { %v2268_v46 = vpop.xlane.xlu0 %2267 }
 0x868   : > { %v5722_v62 = vsub.f32 %v5688_v24, %v2276_v22  ;;  %v2277_v58 = vmul.f32 0.0078125, %v2268_v46  ;;  %v2291_v42 = vmul.f32 %v5719_v19, %v5719_v19 }
 0x869   : > { %v2270_v59 = vpop.xlane.xlu1 %2269 }
 0x86a   : > { %v5727_v51 = vsub.f32 %v5691_v53, %v2277_v58  ;;  %v2278_v11 = vmul.f32 0.0078125, %v2270_v59  ;;  %2303 = vadd.xlane.f32.xlu0 %v2291_v42  ;;  %v2292_v48 = vmul.f32 %v5722_v62, %v5722_v62 }
 0x86c   : > { %v5732_v16 = vsub.f32 %v5694_v33, %v2278_v11  ;;  %2305 = vadd.xlane.f32.xlu1 %v2292_v48  ;;  %v2293_v18 = vmul.f32 %v5727_v51, %v5727_v51 }
 0x86e   : > { %2307 = vadd.xlane.f32.xlu0 %v2293_v18  ;;  %v2294_v34 = vmul.f32 %v5732_v16, %v5732_v16 }
 0x870   : > { %2309 = vadd.xlane.f32.xlu1 %v2294_v34 }
 0x8e3   : > { %v2296_v31 = vpop.xlane.xlu0 %2295 }
 0x8e4   : > { %v2311_v32 = vmul.f32 0.0078125, %v2296_v31 }
 0x8e5   : > { %v2298_v29 = vpop.xlane.xlu1 %2297 }
 0x8e6   : > { %v2319_v43 = vadd.f32 1e-05, %v2311_v32  ;;  %v2312_v26 = vmul.f32 0.0078125, %v2298_v29 }
 0x8e7   : > { %v2300_v52 = vpop.xlane.xlu0 %2299 }
 0x8e8   : > { %4440 = vrsqrt.f32 %v2319_v43  ;;  %v2320_v57 = vadd.f32 1e-05, %v2312_v26  ;;  %v2313_v61 = vmul.f32 0.0078125, %v2300_v52 }
 0x8ea   : > { %4442 = vrsqrt.f32 %v2320_v57  ;;  %v2321_v1 = vadd.f32 1e-05, %v2313_v61 }
 0x8eb   : > { %v2302_v9 = vpop.xlane.xlu1 %2301 }
 0x8ec   : > { %4444 = vrsqrt.f32 %v2321_v1  ;;  %v2314_v17 = vmul.f32 0.0078125, %v2302_v9 }
 0x8ee   : > { %v2322_v60 = vadd.f32 1e-05, %v2314_v17 }
 0x8f0   : > { %4446 = vrsqrt.f32 %v2322_v60 }
 0x8f2   : > { %v4441_v22 = vpop.eup %4440 }
 0x8f3   : > { %v2335_v35 = vmul.f32 %v4441_v22, %v5699_v41 }
 0x8f4   : > { %v4443_v46 = vpop.eup %4442 }
 0x8f5   : > { %v2336_v58 = vmul.f32 %v4443_v46, %v5702_v55  ;;  %v2349_v42 = vmul.f32 %v3634_v4, %v2335_v35  ;;  %v4328_v35 = vld [vmem:[#allocation13 + $0x40] sm:$0xff]  }
 0x8f6   : > { %v4445_v59 = vpop.eup %4444  ;;  %v4329_v46 = vld [vmem:[#allocation13 + $0xc0] sm:$0xff]   ;;  %3799 = vmatprep.subr.bf16.mxu1 %v4328_v35 }
 0x8f7   : > { %v2304_v10 = vpop.xlane.xlu0 %2303  ;;  %v2350_v11 = vmul.f32 %v3634_v4, %v2336_v58  ;;  %v2363_v14 = vadd.f32 %v3635_v27, %v2349_v42  ;;  %v2337_v56 = vmul.f32 %v4445_v59, %v5707_v37  ;;  %v4330_v58 = vld [vmem:[#allocation13] sm:$0xff]   ;;  %3839 = vmatprep.subr.bf16.mxu0 %v4329_v46  ;;  %v4334_v42 = vld [vmem:[#allocation13 + $0x8] sm:$0xff]   ;;  %v4336_v59 = vld [vmem:[#allocation13 + $0x50] sm:$0xff]  }
 0x8f8   : > { %v2315_v48 = vmul.f32 0.0078125, %v2304_v10  ;;  %v4338_v10 = vld [vmem:[#allocation13 + $0x10] sm:$0xff]  }
 0x8f9   : > { %v2306_v12 = vpop.xlane.xlu1 %2305  ;;  %v2364_v18 = vadd.f32 %v3635_v27, %v2350_v11  ;;  %v2351_v45 = vmul.f32 %v3634_v4, %v2337_v56  ;;  %v5769_v11 = vld [vmem:[#allocation13 + $0x90] sm:$0xff]   ;;  %v4344_v56 = vld [vmem:[#allocation13 + $0x60] sm:$0xff]  }
 0x8fa   : > { %v4447_v21 = vpop.eup %4446  ;;  %v2323_v34 = vadd.f32 1e-05, %v2315_v48  ;;  %v2316_v41 = vmul.f32 0.0078125, %v2306_v12  ;;  %v4340_v48 = vld [vmem:[#allocation13 + $0x58] sm:$0xff]  }
 0x8fb   : > { %v2308_v20 = vpop.xlane.xlu0 %2307  ;;  %v2371_v8 = vpack.c.bf16 %v2364_v18, %v2363_v14  ;;  %v2338_v55 = vmul.f32 %v4447_v21, %v5714_v39  ;;  %v2365_v25 = vadd.f32 %v3635_v27, %v2351_v45  ;;  %v5773_v12 = vld [vmem:[#allocation13 + $0xd8] sm:$0xff]   ;;  %v5779_v21 = vld [vmem:[#allocation13 + $0xe0] sm:$0xff]   ;;  %v4354_v45 = vld [vmem:[#allocation13 + $0x30] sm:$0xff]  }
 0x8fc   : > { %4448 = vrsqrt.f32 %v2323_v34  ;;  %v2324_v36 = vadd.f32 1e-05, %v2316_v41  ;;  %v2317_v13 = vmul.f32 0.0078125, %v2308_v20  ;;  %v4342_v14 = vld [vmem:[#allocation13 + $0x18] sm:$0xff]   ;;  %v4346_v34 = vld [vmem:[#allocation13 + $0x20] sm:$0xff]   ;;  %v4348_v20 = vld [vmem:[#allocation13 + $0x68] sm:$0xff]  }
 0x8fd   : > { %2622 = vmatmul.mubr.bf16.vlgmr.msra.gmra.mrb[44].mxu1 %v2371_v8  ;;  %2695 = vmatmul.mubr.bf16.vlgmr.msra.gmra.mrb[52].mxu0 %v2371_v8  ;;  %v2310_v44 = vpop.xlane.xlu1 %2309  ;;  %v2352_v28 = vmul.f32 %v3634_v4, %v2338_v55  ;;  %v5775_v18 = vld [vmem:[#allocation13 + $0x98] sm:$0xff]   ;;  %v5781_v41 = vld [vmem:[#allocation13 + $0xa0] sm:$0xff]   ;;  %v5785_v8 = vld [vmem:[#allocation13 + $0xe8] sm:$0xff]  }
 0x8fe   : > { %4450 = vrsqrt.f32 %v2324_v36  ;;  %v2325_v7 = vadd.f32 1e-05, %v2317_v13  ;;  %v2318_v50 = vmul.f32 0.0078125, %v2310_v44  ;;  %2631 = vmatprep.mubr.bf16.mxu1 %v4885_v63  ;;  %2704 = vmatprep.mubr.bf16.mxu0 %v4885_v63  ;;  %6206 = vst [vmem:[#allocation28_spill] sm:$0xff] %v5781_v41  ;;  %6207 = vst [vmem:[#allocation29_spill] sm:$0xff] %v5785_v8  ;;  %v4350_v55 = vld [vmem:[#allocation13 + $0x28] sm:$0xff]  }
 0x8ff   : > { %v2366_v37 = vadd.f32 %v3635_v27, %v2352_v28  ;;  %3800 = vmatpush3.bf16.msra.mxu1 %v4330_v58  ;;  %v5787_v36 = vld [vmem:[#allocation13 + $0xa8] sm:$0xff]   ;;  %v4352_v13 = vld [vmem:[#allocation13 + $0x70] sm:$0xff]  }
 0x900   : > { %4452 = vrsqrt.f32 %v2325_v7  ;;  %v2326_v0 = vadd.f32 1e-05, %v2318_v50  ;;  %6208 = vst [vmem:[#allocation30_spill] sm:$0xff] %v5787_v36  ;;  %v5791_v44 = vld [vmem:[#allocation13 + $0xf0] sm:$0xff]   ;;  %v4356_v7 = vld [vmem:[#allocation13 + $0x78] sm:$0xff]  }
 0x901   : > { %v2372_v39 = vpack.c.bf16 %v2366_v37, %v2365_v25  ;;  %6209 = vst [vmem:[#allocation31_spill] sm:$0xff] %v5791_v44  ;;  %v5793_v28 = vld [vmem:[#allocation13 + $0xb0] sm:$0xff]   ;;  %v5797_v50 = vld [vmem:[#allocation13 + $0xf8] sm:$0xff]  }
 0x902   : > { %4454 = vrsqrt.f32 %v2326_v0  ;;  %6210 = vst [vmem:[#allocation32_spill] sm:$0xff] %v5793_v28  ;;  %6211 = vst [vmem:[#allocation33_spill] sm:$0xff] %v5797_v50  ;;  %v4358_v37 = vld [vmem:[#allocation13 + $0x38] sm:$0xff]   ;;  %v2407_v25 = vld [vmem:[%s6213_s24] sm:$0xf]  ;;  %s4796_s24 = scalar_lea.vmem %s4795_s28, 2048 }
 0x903   : > { %v5799_v0 = vld [vmem:[#allocation13 + $0xb8] sm:$0xff]   ;;  %p4798_p12 = scmp.lt.s32.totalorder %s4796_s24, %s4790_s19 }
 0x904   : > { %6212 = vst [vmem:[#allocation34_spill] sm:$0xff] %v5799_v0 }
 0x905   : > { %2632 = vmatmul.mubr.bf16.gmra.mrb[48].mxu1 %v2372_v39  ;;  %2705 = vmatmul.mubr.bf16.gmra.mrb[56].mxu0 %v2372_v39  ;;  %v2423_v39 = vsub.s32 3, %v5309_v2  ;;  %p4799_p13 = por %p4798_p12, %p4797_p11 }
 0x906   : > { %v4449_v30 = vpop.eup %4448  ;;  %2641 = vmatprep.mubr.bf16.mxu1 %v4885_v63  ;;  %2714 = vmatprep.mubr.bf16.mxu0 %v4885_v63 }
 0x907   : > { %v2339_v15 = vmul.f32 %v4449_v30, %v5719_v19  ;;  %v5809_v30 = vrot.slane %v2407_v25, %v742_v3  ;;  %p4800_p8 = pnand %p4799_p13, %p4793_p1 }
 0x908   : > { %v4451_v40 = vpop.eup %4450 }
 0x909   : > { %v2340_v31 = vmul.f32 %v4451_v40, %v5722_v62  ;;  %v2353_v32 = vmul.f32 %v3634_v4, %v2339_v15  ;;  %v5813_v15 = vrot.slane %v2407_v25, %v750_v6  ;;  %v5817_v40 = vrot.slane %v2407_v25, %v746_v5 }
 0x90a   : > { %v4453_v29 = vpop.eup %4452 }
 0x90b   : > { %v2354_v43 = vmul.f32 %v3634_v4, %v2340_v31  ;;  %v2367_v52 = vadd.f32 %v3635_v27, %v2353_v32  ;;  %v2341_v61 = vmul.f32 %v4453_v29, %v5727_v51  ;;  %v5758_v51 = vld [vmem:[#allocation13 + $0x80] sm:$0xff]   ;;  %v5819_v31 = vrot.slane %v2407_v25, %v2423_v39 }
 0x90c   : > { %v4455_v26 = vpop.eup %4454  ;;  %3840 = vmatpush3.bf16.msra.mxu0 %v5758_v51 }
 0x90d   : > { %v2368_v57 = vadd.f32 %v3635_v27, %v2354_v43  ;;  %v2342_v1 = vmul.f32 %v4455_v26, %v5732_v16  ;;  %v2355_v60 = vmul.f32 %v3634_v4, %v2341_v61  ;;  %v4332_v16 = vld [vmem:[#allocation13 + $0x48] sm:$0xff]  }
 0x90e   : > { %3801 = vmatprep.subr.bf16.mxu1 %v4332_v16 }
 0x90f   : > { %v2373_v9 = vpack.c.bf16 %v2368_v57, %v2367_v52  ;;  %v2356_v17 = vmul.f32 %v3634_v4, %v2342_v1  ;;  %v2369_v62 = vadd.f32 %v3635_v27, %v2355_v60  ;;  %v5761_v4 = vld [vmem:[#allocation13 + $0xc8] sm:$0xff]   ;;  %3802 = vmatpush3.bf16.msra.mxu1 %v4334_v42 }
 0x910   : > { %3841 = vmatprep.subr.bf16.mxu0 %v5761_v4  ;;  %3803 = vmatprep.subr.bf16.mxu1 %v4336_v59 }
 0x911   : > { %2642 = vmatmul.mubr.bf16.gmra.mrb[52].mxu1 %v2373_v9  ;;  %2715 = vmatmul.mubr.bf16.gmra.mrb[60].mxu0 %v2373_v9  ;;  %v2370_v19 = vadd.f32 %v3635_v27, %v2356_v17  ;;  %v5767_v27 = vld [vmem:[#allocation13 + $0xd0] sm:$0xff]  }
 0x912   : > { %2651 = vmatprep.mubr.bf16.mxu1 %v4885_v63  ;;  %2724 = vmatprep.mubr.bf16.mxu0 %v4885_v63  ;;  %v5763_v63 = vld [vmem:[#allocation13 + $0x88] sm:$0xff]  }
 0x913   : > { %v2374_v22 = vpack.c.bf16 %v2370_v19, %v2369_v62  ;;  %3842 = vmatpush3.bf16.msra.mxu0 %v5763_v63  ;;  %3804 = vmatpush3.bf16.msra.mxu1 %v4338_v10 }
 0x914   : > { %3843 = vmatprep.subr.bf16.mxu0 %v5767_v27  ;;  %3805 = vmatprep.subr.bf16.mxu1 %v4340_v48 }
 0x917   : > { %3844 = vmatpush3.bf16.msra.mxu0 %v5769_v11  ;;  %3806 = vmatpush3.bf16.msra.mxu1 %v4342_v14 }
 0x918   : > { %3845 = vmatprep.subr.bf16.mxu0 %v5773_v12  ;;  %3807 = vmatprep.subr.bf16.mxu1 %v4344_v56 }
 0x919   : > { %2652 = vmatmul.mubr.bf16.gmra.mrb[56].mxu1 %v2374_v22  ;;  %2725 = vmatmul.mubr.bf16.gmra.mrb[64].mxu0 %v2374_v22 }
 0x91b   : > { %3846 = vmatpush3.bf16.msra.mxu0 %v5775_v18  ;;  %3808 = vmatpush3.bf16.msra.mxu1 %v4346_v34 }
 0x91c   : > { %3847 = vmatprep.subr.bf16.mxu0 %v5779_v21  ;;  %3809 = vmatprep.subr.bf16.mxu1 %v4348_v20 }
 0x91f   : > { %3848 = vmatpush3.bf16.msra.mxu0 %v5781_v41  ;;  %3810 = vmatpush3.bf16.msra.mxu1 %v4350_v55 }
 0x920   : > { %3849 = vmatprep.subr.bf16.mxu0 %v5785_v8  ;;  %3811 = vmatprep.subr.bf16.mxu1 %v4352_v13 }
 0x923   : > { %3850 = vmatpush3.bf16.msra.mxu0 %v5787_v36  ;;  %3812 = vmatpush3.bf16.msra.mxu1 %v4354_v45 }
 0x924   : > { %3851 = vmatprep.subr.bf16.mxu0 %v5791_v44  ;;  %3813 = vmatprep.subr.bf16.mxu1 %v4356_v7 }
 0x927   : > { %3852 = vmatpush3.bf16.msra.mxu0 %v5793_v28  ;;  %3814 = vmatpush3.bf16.msra.mxu1 %v4358_v37 }
 0x928   : > { %3853 = vmatprep.subr.bf16.mxu0 %v5797_v50  ;;  %4023 = vmatprep.subr.bf16.mxu1 %v4329_v46 }
 0x92b   : > { %3854 = vmatpush3.bf16.msra.mxu0 %v5799_v0 }
 0x9d0   : > { %v2623_v32 = vpop.f32.mrb[44].mxu1  ;;  %v2696_v29 = vpop.f32.mrb[52].mxu0 }
 0x9d1   : > { %v5822_v43 = vadd.f32 %v2623_v32, %v5809_v30  ;;  %v5825_v26 = vadd.f32 %v2696_v29, %v5813_v15  ;;  %v2625_v3 = vpop.f32.mrb[45].mxu1  ;;  %v2698_v52 = vpop.f32.mrb[53].mxu0 }
 0x9d2   : > { %v5828_v57 = vadd.f32 %v2625_v3, %v5817_v40  ;;  %v5831_v6 = vadd.f32 %v2698_v52, %v5819_v31  ;;  %v2627_v2 = vpop.f32.mrb[46].mxu1  ;;  %v2700_v5 = vpop.f32.mrb[54].mxu0 }
 0x9d3   : > { %v3668_v61 = vmul.f32 -1.702, %v5822_v43  ;;  %v3670_v1 = vmul.f32 -1.702, %v5825_v26  ;;  %v5836_v9 = vadd.f32 %v2627_v2, %v5809_v30  ;;  %v5839_v17 = vadd.f32 %v2700_v5, %v5813_v15  ;;  %v2629_v60 = vpop.f32.mrb[47].mxu1  ;;  %v2702_v19 = vpop.f32.mrb[55].mxu0 }
 0x9d4   : > { %v3669_v62 = vmul.f32 -1.702, %v5828_v57  ;;  %v3671_v22 = vmul.f32 -1.702, %v5831_v6  ;;  %v5844_v35 = vadd.f32 %v2629_v60, %v5817_v40  ;;  %v5847_v46 = vadd.f32 %v2702_v19, %v5819_v31 }
 0x9d5   : > { %v2799_v58 = vmul.f32 1.442695, %v3668_v61  ;;  %v2803_v16 = vmul.f32 1.442695, %v3670_v1  ;;  %v3672_v42 = vmul.f32 -1.702, %v5836_v9 }
 0x9d6   : > { %v2801_v59 = vmul.f32 1.442695, %v3669_v62  ;;  %v2805_v10 = vmul.f32 1.442695, %v3671_v22  ;;  %v3674_v48 = vmul.f32 -1.702, %v5839_v17 }
 0x9d7   : > { %4456 = vpow2.f32 %v2799_v58  ;;  %v2807_v14 = vmul.f32 1.442695, %v3672_v42  ;;  %v3673_v56 = vmul.f32 -1.702, %v5844_v35  ;;  %v3675_v34 = vmul.f32 -1.702, %v5847_v46 }
 0x9d8   : > { %4458 = vpow2.f32 %v2803_v16  ;;  %v2811_v20 = vmul.f32 1.442695, %v3674_v48  ;;  %v2633_v55 = vpop.f32.mrb[48].mxu1  ;;  %v2706_v13 = vpop.f32.mrb[56].mxu0 }
 0x9d9   : > { %4460 = vpow2.f32 %v2801_v59  ;;  %v2809_v45 = vmul.f32 1.442695, %v3673_v56  ;;  %v2813_v7 = vmul.f32 1.442695, %v3675_v34  ;;  %v5854_v37 = vadd.f32 %v2633_v55, %v5809_v30  ;;  %v2635_v25 = vpop.f32.mrb[49].mxu1  ;;  %v2708_v39 = vpop.f32.mrb[57].mxu0 }
 0x9da   : > { %4462 = vpow2.f32 %v2805_v10  ;;  %v5857_v32 = vadd.f32 %v2706_v13, %v5813_v15  ;;  %v5860_v29 = vadd.f32 %v2635_v25, %v5817_v40  ;;  %v5863_v3 = vadd.f32 %v2708_v39, %v5819_v31  ;;  %v2637_v52 = vpop.f32.mrb[50].mxu1  ;;  %v2710_v2 = vpop.f32.mrb[58].mxu0 }
 0x9db   : > { %4464 = vpow2.f32 %v2807_v14  ;;  %v3676_v5 = vmul.f32 -1.702, %v5854_v37  ;;  %v5867_v61 = vadd.f32 %v2637_v52, %v5809_v30  ;;  %v2639_v1 = vpop.f32.mrb[51].mxu1  ;;  %v2712_v60 = vpop.f32.mrb[59].mxu0  ;;  %v5874_v14 = vadd.f32 %v2710_v2, %v5813_v15 }
 0x9dc   : > { %4466 = vpow2.f32 %v2811_v20  ;;  %v3678_v19 = vmul.f32 -1.702, %v5857_v32  ;;  %v3677_v62 = vmul.f32 -1.702, %v5860_v29  ;;  %v3679_v22 = vmul.f32 -1.702, %v5863_v3 }
 0x9dd   : > { %4468 = vpow2.f32 %v2809_v45  ;;  %v2815_v58 = vmul.f32 1.442695, %v3676_v5  ;;  %v3680_v16 = vmul.f32 -1.702, %v5867_v61  ;;  %v5877_v34 = vadd.f32 %v2639_v1, %v5817_v40 }
 0x9de   : > { %4470 = vpow2.f32 %v2813_v7  ;;  %v2819_v42 = vmul.f32 1.442695, %v3678_v19  ;;  %v2817_v59 = vmul.f32 1.442695, %v3677_v62  ;;  %v2821_v10 = vmul.f32 1.442695, %v3679_v22 }
 0x9df   : > { %4472 = vpow2.f32 %v2815_v58  ;;  %v2823_v48 = vmul.f32 1.442695, %v3680_v16  ;;  %v5880_v13 = vadd.f32 %v2712_v60, %v5819_v31  ;;  %v3682_v52 = vmul.f32 -1.702, %v5874_v14 }
 0x9e0   : > { %4474 = vpow2.f32 %v2819_v42  ;;  %v3681_v62 = vmul.f32 -1.702, %v5877_v34 }
 0x9e1   : > { %v4457_v56 = vpop.eup %4456  ;;  %4476 = vpow2.f32 %v2817_v59  ;;  %v3683_v42 = vmul.f32 -1.702, %v5880_v13  ;;  %v2827_v33 = vmul.f32 1.442695, %v3682_v52 }
 0x9e2   : > { %v4459_v20 = vpop.eup %4458  ;;  %v2863_v55 = vadd.f32 1.0, %v4457_v56  ;;  %4478 = vpow2.f32 %v2821_v10  ;;  %v2825_v24 = vmul.f32 1.442695, %v3681_v62 }
 0x9e3   : > { %v4461_v45 = vpop.eup %4460  ;;  %v2865_v7 = vadd.f32 1.0, %v4459_v20  ;;  %4480 = vpow2.f32 %v2823_v48 }
 0x9e4   : > { %v4463_v25 = vpop.eup %4462  ;;  %4482 = vrcp.f32 %v2863_v55  ;;  %v2864_v39 = vadd.f32 1.0, %v4461_v45  ;;  %v2643_v2 = vpop.f32.mrb[52].mxu1 }
 0x9e5   : > { %v2716_v5 = vpop.f32.mrb[60].mxu0  ;;  %v4465_v19 = vpop.eup %4464  ;;  %4484 = vrcp.f32 %v2865_v7  ;;  %v2866_v1 = vadd.f32 1.0, %v4463_v25  ;;  %v5886_v59 = vadd.f32 %v2643_v2, %v5809_v30 }
 0x9e6   : > { %v2645_v22 = vpop.f32.mrb[53].mxu1  ;;  %v2718_v58 = vpop.f32.mrb[61].mxu0  ;;  %4486 = vrcp.f32 %v2864_v39  ;;  %v2867_v60 = vadd.f32 1.0, %v4465_v19  ;;  %v5889_v55 = vadd.f32 %v2716_v5, %v5813_v15 }
 0x9e7   : > { %v4467_v16 = vpop.eup %4466  ;;  %v2647_v10 = vpop.f32.mrb[54].mxu1  ;;  %4488 = vrcp.f32 %v2866_v1  ;;  %v5892_v39 = vadd.f32 %v2645_v22, %v5817_v40  ;;  %v5895_v38 = vadd.f32 %v2718_v58, %v5819_v31  ;;  %v3684_v54 = vmul.f32 -1.702, %v5886_v59 }
 0x9e8   : > { %v2720_v48 = vpop.f32.mrb[62].mxu0  ;;  %v4469_v56 = vpop.eup %4468  ;;  %v2869_v20 = vadd.f32 1.0, %v4467_v16  ;;  %6214 = vst [vmem:[#allocation35_spill] sm:$0xff] %v5889_v55  ;;  %4490 = vrcp.f32 %v2867_v60  ;;  %v2829_v16 = vmul.f32 1.442695, %v3683_v42 }
 0x9e9   : > { %v2649_v45 = vpop.f32.mrb[55].mxu1  ;;  %v4471_v7 = vpop.eup %4470  ;;  %v2868_v25 = vadd.f32 1.0, %v4469_v56  ;;  %6215 = vst [vmem:[#allocation36_spill] sm:$0xff] %v5892_v39  ;;  %6216 = vst [vmem:[#allocation37_spill] sm:$0xff] %v5895_v38  ;;  %v3686_v22 = vmul.f32 -1.702, %v5889_v55  ;;  %v5900_v56 = vadd.f32 %v2647_v10, %v5809_v30 }
 0x9ea   : > { %v2722_v19 = vpop.f32.mrb[63].mxu0  ;;  %v4473_v53 = vpop.eup %4472  ;;  %4492 = vrcp.f32 %v2869_v20  ;;  %v2870_v2 = vadd.f32 1.0, %v4471_v7  ;;  %v3685_v58 = vmul.f32 -1.702, %v5892_v39  ;;  %v3687_v42 = vmul.f32 -1.702, %v5895_v38 }
 0x9eb   : > { %v4475_v1 = vpop.eup %4474  ;;  %4494 = vrcp.f32 %v2868_v25  ;;  %v2871_v5 = vadd.f32 1.0, %v4473_v53  ;;  %v3688_v0 = vmul.f32 -1.702, %v5900_v56 }
 0x9ec   : > { %v4477_v60 = vpop.eup %4476  ;;  %4496 = vrcp.f32 %v2870_v2  ;;  %v2873_v52 = vadd.f32 1.0, %v4475_v1  ;;  %v2653_v7 = vpop.f32.mrb[56].mxu1  ;;  %v5905_v2 = vadd.f32 %v2720_v48, %v5813_v15  ;;  %v2837_v38 = vmul.f32 1.442695, %v3687_v42 }
 0x9ed   : > { %v4479_v20 = vpop.eup %4478  ;;  %4498 = vrcp.f32 %v2871_v5  ;;  %v2872_v62 = vadd.f32 1.0, %v4477_v60  ;;  %v2726_v47 = vpop.f32.mrb[64].mxu0  ;;  %v5910_v5 = vadd.f32 %v2649_v45, %v5817_v40  ;;  %v5913_v60 = vadd.f32 %v2722_v19, %v5819_v31 }
 0x9ee   : > { %v4481_v25 = vpop.eup %4480  ;;  %4500 = vrcp.f32 %v2873_v52  ;;  %v2874_v53 = vadd.f32 1.0, %v4479_v20  ;;  %6217 = vst [vmem:[#allocation38_spill] sm:$0xff] %v5905_v2  ;;  %v5907_v1 = vpop.f32.mrb[57].mxu1  ;;  %v2831_v20 = vmul.f32 1.442695, %v3684_v54  ;;  %v5928_v54 = vadd.f32 %v2653_v7, %v5809_v30 }
 0x9ef   : > { %v4483_v23 = vpop.eup %4482  ;;  %4502 = vrcp.f32 %v2872_v62  ;;  %v2875_v10 = vadd.f32 1.0, %v4481_v25  ;;  %6218 = vst [vmem:[#allocation39_spill] sm:$0xff] %v5910_v5  ;;  %6219 = vst [vmem:[#allocation40_spill] sm:$0xff] %v5913_v60  ;;  %v5915_v49 = vpop.f32.mrb[65].mxu0  ;;  %v2835_v62 = vmul.f32 1.442695, %v3686_v22 }
 0x9f0   : > { %v4485_v52 = vpop.eup %4484  ;;  %4504 = vrcp.f32 %v2874_v53  ;;  %v5918_v48 = vpop.f32.mrb[58].mxu1  ;;  %v2833_v25 = vmul.f32 1.442695, %v3685_v58  ;;  %v3690_v36 = vmul.f32 -1.702, %v5905_v2  ;;  %v5931_v53 = vadd.f32 %v2726_v47, %v5813_v15 }
 0x9f1   : > { %v5920_v50 = vpop.f32.mrb[66].mxu0  ;;  %v4487_v28 = vpop.eup %4486  ;;  %4506 = vrcp.f32 %v2875_v10  ;;  %v3689_v22 = vmul.f32 -1.702, %v5910_v5  ;;  %v3691_v58 = vmul.f32 -1.702, %v5913_v60  ;;  %v5936_v41 = vmul.f32 %v4483_v23, %v5822_v43 }
 0x9f2   : > { %v5922_v45 = vpop.f32.mrb[59].mxu1  ;;  %v5924_v44 = vpop.f32.mrb[67].mxu0  ;;  %4508 = vpow2.f32 %v2827_v33  ;;  %v2839_v39 = vmul.f32 1.442695, %v3688_v0  ;;  %v2961_v2 = vmul.f32 %v4485_v52, %v5825_v26  ;;  %v2843_v60 = vmul.f32 1.442695, %v3690_v36 }
 0x9f3   : > { %v4489_v19 = vpop.eup %4488  ;;  %4510 = vpow2.f32 %v2825_v24  ;;  %v3692_v24 = vmul.f32 -1.702, %v5928_v54  ;;  %v3694_v23 = vmul.f32 -1.702, %v5931_v53  ;;  %v2845_v26 = vmul.f32 1.442695, %v3691_v58 }
 0x9f4   : > { %v4491_v8 = vpop.eup %4490  ;;  %4512 = vpow2.f32 %v2829_v16 }
 0x9f5   : > { %v4493_v10 = vpop.eup %4492  ;;  %v2963_v33 = vmul.f32 %v4491_v8, %v5836_v9  ;;  %4514 = vpow2.f32 %v2831_v20  ;;  %v2841_v8 = vmul.f32 1.442695, %v3689_v22 }
 0x9f6   : > { %v4495_v7 = vpop.eup %4494  ;;  %v2965_v47 = vmul.f32 %v4493_v10, %v5839_v17  ;;  %4516 = vpow2.f32 %v2835_v62  ;;  %v2847_v17 = vmul.f32 1.442695, %v3692_v24 }
 0x9f7   : > { %v4497_v42 = vpop.eup %4496  ;;  %v2991_v5 = vpack.c.bf16 %v2963_v33, %v5936_v41  ;;  %4518 = vpow2.f32 %v2833_v25  ;;  %v2851_v41 = vmul.f32 1.442695, %v3694_v23  ;;  %v2964_v36 = vmul.f32 %v4495_v7, %v5844_v35 }
 0x9f8   : > { %v4499_v43 = vpop.eup %4498  ;;  %v2993_v55 = vpack.c.bf16 %v2965_v47, %v2961_v2  ;;  %4520 = vpow2.f32 %v2837_v38  ;;  %v2966_v20 = vmul.f32 %v4497_v42, %v5847_v46  ;;  %v2960_v25 = vmul.f32 %v4487_v28, %v5828_v57 }
 0x9f9   : > { %v5944_v0 = vpop.eup %4500  ;;  %4522 = vpow2.f32 %v2839_v39  ;;  %v2962_v39 = vmul.f32 %v4489_v19, %v5831_v6  ;;  %v5958_v58 = vmul.f32 %v4499_v43, %v5854_v37  ;;  %v5962_v28 = vadd.f32 %v5907_v1, %v5817_v40 }
 0x9fa   : > { %v5946_v9 = vpop.eup %4502  ;;  %4524 = vpow2.f32 %v2843_v60  ;;  %v2992_v33 = vpack.c.bf16 %v2964_v36, %v2960_v25  ;;  %v5968_v19 = vadd.f32 %v5915_v49, %v5819_v31  ;;  %v5972_v23 = vadd.f32 %v5918_v48, %v5809_v30 }
 0x9fb   : > { %v5948_v16 = vpop.eup %4504  ;;  %4526 = vpow2.f32 %v2841_v8  ;;  %v5976_v8 = vadd.f32 %v5920_v50, %v5813_v15  ;;  %v5982_v30 = vadd.f32 %v5922_v45, %v5817_v40  ;;  %v5988_v50 = vadd.f32 %v5924_v44, %v5819_v31 }
 0x9fc   : > { %v4507_v52 = vpop.eup %4506  ;;  %4528 = vpow2.f32 %v2845_v26  ;;  %3302 = vmatprep.mubr.bf16.mxu1 %v2992_v33  ;;  %v3695_v48 = vmul.f32 -1.702, %v5968_v19  ;;  %v2969_v25 = vmul.f32 %v5944_v0, %v5857_v32 }
 0x9fd   : > { %v4509_v2 = vpop.eup %4508  ;;  %v5953_v62 = vmul.f32 %v4507_v52, %v5867_v61  ;;  %4530 = vpow2.f32 %v2847_v17  ;;  %v2994_v61 = vpack.c.bf16 %v2966_v20, %v2962_v39  ;;  %3303 = vmatmul.mubr.bf16.vlgmr.msra.gmra.mrb[60].mxu1 %v2991_v5  ;;  %v3693_v17 = vmul.f32 -1.702, %v5962_v28 }
 0x9fe   : > { %v4511_v38 = vpop.eup %4510  ;;  %v2877_v22 = vadd.f32 1.0, %v4509_v2  ;;  %4532 = vpow2.f32 %v2851_v41  ;;  %4031 = vmatpush3.bf16.msra.mxu1 %v5758_v51  ;;  %v3696_v41 = vmul.f32 -1.702, %v5972_v23  ;;  %v3698_v45 = vmul.f32 -1.702, %v5976_v8 }
 0x9ff   : > { %v4513_v60 = vpop.eup %4512  ;;  %v2876_v35 = vadd.f32 1.0, %v4511_v38  ;;  %v2995_v57 = vpack.c.bf16 %v5953_v62, %v5958_v58  ;;  %3367 = vmatprep.mubr.bf16.mxu0 %v2994_v61  ;;  %4024 = vmatprep.subr.bf16.mxu1 %v5761_v4  ;;  %v2849_v36 = vmul.f32 1.442695, %v3693_v17  ;;  %v3697_v20 = vmul.f32 -1.702, %v5982_v30  ;;  %v6223_v58 = vld [vmem:[#allocation39_spill] sm:$0xff] }
 0xa00   : > { %v4515_v46 = vpop.eup %4514  ;;  %4534 = vrcp.f32 %v2877_v22  ;;  %v2878_v10 = vadd.f32 1.0, %v4513_v60  ;;  %3368 = vmatmul.mubr.bf16.vlgmr.msra.gmra.mrb[68].mxu0 %v2993_v55  ;;  %v2853_v31 = vmul.f32 1.442695, %v3695_v48  ;;  %v3699_v2 = vmul.f32 -1.702, %v5988_v50 }
 0xa01   : > { %v4517_v7 = vpop.eup %4516  ;;  %4536 = vrcp.f32 %v2876_v35  ;;  %v2879_v47 = vadd.f32 1.0, %v4515_v46  ;;  %v2855_v22 = vmul.f32 1.442695, %v3696_v41  ;;  %v2968_v60 = vmul.f32 %v5946_v9, %v5860_v29 }
 0xa02   : > { %v4519_v6 = vpop.eup %4518  ;;  %4538 = vrcp.f32 %v2878_v10  ;;  %v2881_v37 = vadd.f32 1.0, %v4517_v7  ;;  %4032 = vmatpush3.bf16.msra.mxu1 %v5763_v63  ;;  %v2970_v35 = vmul.f32 %v5948_v16, %v5863_v3  ;;  %v2859_v46 = vmul.f32 1.442695, %v3698_v45 }
 0xa03   : > { %v4521_v24 = vpop.eup %4520  ;;  %4540 = vrcp.f32 %v2879_v47  ;;  %v2880_v42 = vadd.f32 1.0, %v4519_v6  ;;  %4025 = vmatprep.subr.bf16.mxu1 %v5767_v27  ;;  %v2857_v32 = vmul.f32 1.442695, %v3697_v20  ;;  %v2861_v61 = vmul.f32 1.442695, %v3699_v2  ;;  %v6220_v47 = vld [vmem:[#allocation35_spill] sm:$0xff] }
 0xa04   : > { %v4523_v1 = vpop.eup %4522  ;;  %4542 = vrcp.f32 %v2881_v37  ;;  %v2882_v43 = vadd.f32 1.0, %v4521_v24  ;;  %v6229_v20 = vld [vmem:[#allocation31_spill] sm:$0xff] }
 0xa05   : > { %v4525_v49 = vpop.eup %4524  ;;  %4544 = vrcp.f32 %v2880_v42  ;;  %v2883_v26 = vadd.f32 1.0, %v4523_v1  ;;  %v6222_v42 = vld [vmem:[#allocation36_spill] sm:$0xff] }
 0xa06   : > { %v4527_v55 = vpop.eup %4526  ;;  %4546 = vrcp.f32 %v2882_v43  ;;  %v2885_v5 = vadd.f32 1.0, %v4525_v49  ;;  %4033 = vmatpush3.bf16.msra.mxu1 %v5769_v11  ;;  %v6224_v43 = vld [vmem:[#allocation28_spill] sm:$0xff] }
 0xa07   : > { %v4529_v51 = vpop.eup %4528  ;;  %4548 = vrcp.f32 %v2883_v26  ;;  %v2884_v15 = vadd.f32 1.0, %v4527_v55  ;;  %4026 = vmatprep.subr.bf16.mxu1 %v5773_v12  ;;  %v6226_v26 = vld [vmem:[#allocation40_spill] sm:$0xff] }
 0xa08   : > { %v4531_v52 = vpop.eup %4530  ;;  %4550 = vrcp.f32 %v2885_v5  ;;  %v2886_v40 = vadd.f32 1.0, %v4529_v51  ;;  %v6227_v5 = vld [vmem:[#allocation29_spill] sm:$0xff] }
 0xa09   : > { %v4533_v4 = vpop.eup %4532  ;;  %4552 = vrcp.f32 %v2884_v15  ;;  %v2887_v1 = vadd.f32 1.0, %v4531_v52  ;;  %v6228_v52 = vld [vmem:[#allocation30_spill] sm:$0xff] }
 0xa0a   : > { %v4535_v44 = vpop.eup %4534  ;;  %4554 = vrcp.f32 %v2886_v40  ;;  %4034 = vmatpush3.bf16.msra.mxu1 %v5775_v18  ;;  %v6221_v18 = vld [vmem:[#allocation38_spill] sm:$0xff]  ;;  %v2889_v55 = vadd.f32 1.0, %v4533_v4 }
 0xa0b   : > { %v4537_v38 = vpop.eup %4536  ;;  %v2973_v39 = vmul.f32 %v4535_v44, %v5874_v14  ;;  %4556 = vpow2.f32 %v2849_v36  ;;  %4027 = vmatprep.subr.bf16.mxu1 %v5779_v21 }
 0xa0c   : > { %v4539_v63 = vpop.eup %4538  ;;  %v2972_v27 = vmul.f32 %v4537_v38, %v5877_v34  ;;  %4558 = vpow2.f32 %v2853_v31 }
 0xa0d   : > { %v4541_v10 = vpop.eup %4540  ;;  %v2974_v33 = vmul.f32 %v4539_v63, %v5880_v13  ;;  %v2997_v0 = vpack.c.bf16 %v2973_v39, %v2969_v25  ;;  %4560 = vpow2.f32 %v2855_v22  ;;  %v6230_v39 = vld [vmem:[#allocation32_spill] sm:$0xff]  ;;  %v6231_v63 = vld [vmem:[#allocation33_spill] sm:$0xff] }
 0xa0e   : > { %v4543_v14 = vpop.eup %4542  ;;  %v2996_v29 = vpack.c.bf16 %v2972_v27, %v2968_v60  ;;  %4562 = vpow2.f32 %v2859_v46  ;;  %v2975_v34 = vmul.f32 %v4541_v10, %v5886_v59  ;;  %4035 = vmatpush3.bf16.msra.mxu1 %v6224_v43  ;;  %v6232_v60 = vld [vmem:[#allocation34_spill] sm:$0xff] }
 0xa0f   : > { %v4545_v9 = vpop.eup %4544  ;;  %v2998_v3 = vpack.c.bf16 %v2974_v33, %v2970_v35  ;;  %4564 = vpow2.f32 %v2857_v32  ;;  %v6015_v6 = vmul.f32 %v4543_v14, %v6220_v47  ;;  %4028 = vmatprep.subr.bf16.mxu1 %v6227_v5 }
 0xa10   : > { %v4547_v16 = vpop.eup %4546  ;;  %3310 = vmatprep.mubr.bf16.mxu1 %v2996_v29  ;;  %4566 = vpow2.f32 %v2861_v61  ;;  %v2976_v62 = vmul.f32 %v4545_v9, %v6222_v42 }
 0xa11   : > { %v4549_v11 = vpop.eup %4548  ;;  %3375 = vmatprep.mubr.bf16.mxu0 %v2998_v3  ;;  %3311 = vmatmul.mubr.bf16.gmra.mrb[64].mxu1 %v2995_v57  ;;  %4568 = vrcp.f32 %v2887_v1 }
 0xa12   : > { %v4551_v12 = vpop.eup %4550  ;;  %v2979_v13 = vmul.f32 %v4549_v11, %v5900_v56  ;;  %3376 = vmatmul.mubr.bf16.gmra.mrb[72].mxu0 %v2997_v0  ;;  %v6225_v56 = vld [vmem:[#allocation37_spill] sm:$0xff]  ;;  %4036 = vmatpush3.bf16.msra.mxu1 %v6228_v52  ;;  %4570 = vrcp.f32 %v2889_v55 }
 0xa13   : > { %v4553_v7 = vpop.eup %4552  ;;  %v6018_v37 = vmul.f32 %v4551_v12, %v6221_v18  ;;  %v2978_v49 = vmul.f32 %v4547_v16, %v6225_v56  ;;  %4029 = vmatprep.subr.bf16.mxu1 %v6229_v20 }
 0xa14   : > { %v4555_v24 = vpop.eup %4554  ;;  %v2980_v57 = vmul.f32 %v4553_v7, %v6223_v58  ;;  %v2999_v59 = vpack.c.bf16 %v2979_v13, %v2975_v34 }
 0xa15   : > { %v3001_v21 = vpack.c.bf16 %v6018_v37, %v6015_v6  ;;  %v2982_v17 = vmul.f32 %v4555_v24, %v6226_v26  ;;  %v4557_v51 = vpop.eup %4556 }
 0xa16   : > { %v3000_v48 = vpack.c.bf16 %v2980_v57, %v2976_v62  ;;  %v4559_v41 = vpop.eup %4558  ;;  %v2888_v40 = vadd.f32 1.0, %v4557_v51  ;;  %4037 = vmatpush3.bf16.msra.mxu1 %v6230_v39 }
 0xa17   : > { %v3002_v15 = vpack.c.bf16 %v2982_v17, %v2978_v49  ;;  %v4561_v45 = vpop.eup %4560  ;;  %v2890_v36 = vadd.f32 1.0, %v4559_v41  ;;  %4030 = vmatprep.subr.bf16.mxu1 %v6231_v63  ;;  %v6235_v49 = vld [vmem:[#allocation21_spill] sm:$0xff] }
 0xa18   : > { %3318 = vmatprep.mubr.bf16.mxu1 %v3000_v48  ;;  %v4563_v44 = vpop.eup %4562  ;;  %4572 = vrcp.f32 %v2888_v40  ;;  %v2891_v4 = vadd.f32 1.0, %v4561_v45 }
 0xa19   : > { %3319 = vmatmul.mubr.bf16.gmra.mrb[68].mxu1 %v2999_v59  ;;  %v4565_v31 = vpop.eup %4564  ;;  %4574 = vrcp.f32 %v2890_v36  ;;  %v2893_v2 = vadd.f32 1.0, %v4563_v44  ;;  %v6234_v59 = vld [vmem:[#allocation20_spill] sm:$0xff] }
 0xa1a   : > { %v4567_v38 = vpop.eup %4566  ;;  %4576 = vrcp.f32 %v2891_v4  ;;  %v2892_v25 = vadd.f32 1.0, %v4565_v31  ;;  %4038 = vmatpush3.bf16.msra.mxu1 %v6232_v60  ;;  %v6236_v31 = vld [vmem:[#allocation22_spill] sm:$0xff] }
 0xa1b   : > { %4578 = vrcp.f32 %v2893_v2  ;;  %v2894_v22 = vadd.f32 1.0, %v4567_v38  ;;  %v4569_v35 = vpop.eup %4568 }
 0xa1c   : > { %4580 = vrcp.f32 %v2892_v25  ;;  %v4571_v27 = vpop.eup %4570  ;;  %v2983_v0 = vmul.f32 %v4569_v35, %v5928_v54 }
 0xa1d   : > { %4582 = vrcp.f32 %v2894_v22  ;;  %v2985_v29 = vmul.f32 %v4571_v27, %v5931_v53  ;;  %v6237_v22 = vld [vmem:[#allocation23_spill] sm:$0xff] }
 0xa22   : > { %v4573_v46 = vpop.eup %4572 }
 0xa23   : > { %v4575_v10 = vpop.eup %4574  ;;  %v2984_v16 = vmul.f32 %v4573_v46, %v5962_v28  ;;  %v6044_v28 = vld [vmem:[%s6233_s11] ss:$0 sm:$0xff] }
 0xa24   : > { %v4577_v33 = vpop.eup %4576  ;;  %v2986_v34 = vmul.f32 %v4575_v10, %v5968_v19 }
 0xa25   : > { %v4579_v32 = vpop.eup %4578  ;;  %v2987_v14 = vmul.f32 %v4577_v33, %v5972_v23 }
 0xa26   : > { %v4581_v61 = vpop.eup %4580  ;;  %v2989_v9 = vmul.f32 %v4579_v32, %v5976_v8 }
 0xa27   : > { %v4583_v3 = vpop.eup %4582  ;;  %v2988_v11 = vmul.f32 %v4581_v61, %v5982_v30  ;;  %v3003_v12 = vpack.c.bf16 %v2987_v14, %v2983_v0 }
 0xa28   : > { %v2990_v13 = vmul.f32 %v4583_v3, %v5988_v50  ;;  %v3005_v7 = vpack.c.bf16 %v2989_v9, %v2985_v29 }
 0xa29   : > { %v3004_v47 = vpack.c.bf16 %v2988_v11, %v2984_v16 }
 0xa2a   : > { %v3006_v54 = vpack.c.bf16 %v2990_v13, %v2986_v34 }
 0xa2b   : > { %3326 = vmatprep.mubr.bf16.mxu1 %v3004_v47  ;;  %v6238_v47 = vld [vmem:[#allocation24_spill] sm:$0xff] }
 0xa2c   : > { %3327 = vmatmul.mubr.bf16.gmra.mrb[72].mxu1 %v3003_v12 }
 0xa2d   : > { %3383 = vmatprep.mubr.bf16.mxu1 %v3002_v15 }
 0xa34   : > { %3384 = vmatmul.mubr.bf16.vlgmr.msra.gmra.mrb[76].mxu1 %v3001_v21 }
 0xa35   : > { %3391 = vmatprep.mubr.bf16.mxu1 %v3006_v54 }
 0xa3c   : > { %3392 = vmatmul.mubr.bf16.gmra.mrb[80].mxu1 %v3005_v7 }
 0xad0   : > { %v3815_v53 = vpop.f32.mrb[60].mxu1 }
 0xad1   : > { %v3816_v19 = vpop.f32.mrb[61].mxu1 }
 0xad2   : > { %v3817_v30 = vadd.f32 %v3816_v19, %v3815_v53  ;;  %v3818_v6 = vpop.f32.mrb[62].mxu1 }
 0xad3   : > { %v3855_v23 = vpop.f32.mrb[68].mxu0  ;;  %v3819_v37 = vpop.f32.mrb[63].mxu1 }
 0xad4   : > { %v3856_v8 = vpop.f32.mrb[69].mxu0  ;;  %v3305_v42 = vadd.f32 %v3817_v30, %v6044_v28  ;;  %v3820_v62 = vadd.f32 %v3819_v37, %v3818_v6 }
 0xad5   : > { %v3857_v50 = vadd.f32 %v3856_v8, %v3855_v23  ;;  %v3858_v18 = vpop.f32.mrb[70].mxu0  ;;  %v6239_v23 = vld [vmem:[#allocation25_spill] sm:$0xff] }
 0xad6   : > { %v3859_v24 = vpop.f32.mrb[71].mxu0  ;;  %v3308_v1 = vadd.f32 %v3820_v62, %v6044_v28 }
 0xad7   : > { %v3860_v58 = vadd.f32 %v3859_v24, %v3858_v18  ;;  %v3370_v57 = vadd.f32 %v3857_v50, %v3305_v42 }
 0xad9   : > { %v3400_v43 = vadd.f32 %v3370_v57, %v6234_v59  ;;  %v3373_v56 = vadd.f32 %v3860_v58, %v3308_v1  ;;  %v6240_v58 = vld [vmem:[#allocation26_spill] sm:$0xff]  ;;  %v6242_v59 = vld [vmem:[#allocation27_spill] sm:$0xff] }
 0xadb   : > { %3408 = vst [vmem:[%s6051_s17] sm:$0xff] %v3400_v43  ;;  %v3401_v21 = vadd.f32 %v3373_v56, %v6235_v49 }
 0xadd   : > { %3409 = vst [vmem:[%s6051_s17 + $0x8] sm:$0xff] %v3401_v21 }
 0xae4   : > { %v3821_v26 = vpop.f32.mrb[64].mxu1 }
 0xae5   : > { %v3861_v17 = vpop.f32.mrb[72].mxu0  ;;  %v3822_v55 = vpop.f32.mrb[65].mxu1 }
 0xae6   : > { %v3823_v5 = vadd.f32 %v3822_v55, %v3821_v26  ;;  %v3862_v48 = vpop.f32.mrb[73].mxu0  ;;  %v3824_v51 = vpop.f32.mrb[66].mxu1 }
 0xae7   : > { %v3863_v15 = vadd.f32 %v3862_v48, %v3861_v17  ;;  %v3864_v41 = vpop.f32.mrb[74].mxu0  ;;  %v3825_v40 = vpop.f32.mrb[67].mxu1 }
 0xae8   : > { %v3313_v52 = vadd.f32 %v3823_v5, %v6044_v28  ;;  %v3826_v45 = vadd.f32 %v3825_v40, %v3824_v51  ;;  %v3865_v36 = vpop.f32.mrb[75].mxu0 }
 0xae9   : > { %v3866_v20 = vadd.f32 %v3865_v36, %v3864_v41 }
 0xaea   : > { %v3378_v44 = vadd.f32 %v3863_v15, %v3313_v52  ;;  %v3316_v4 = vadd.f32 %v3826_v45, %v6044_v28 }
 0xaec   : > { %v3402_v2 = vadd.f32 %v3378_v44, %v6236_v31  ;;  %v3381_v38 = vadd.f32 %v3866_v20, %v3316_v4  ;;  %v3827_v25 = vpop.f32.mrb[68].mxu1 }
 0xaed   : > { %v3828_v39 = vpop.f32.mrb[69].mxu1 }
 0xaee   : > { %3410 = vst [vmem:[%s6051_s17 + $0x10] sm:$0xff] %v3402_v2  ;;  %v3403_v63 = vadd.f32 %v3381_v38, %v6237_v22  ;;  %v3829_v60 = vadd.f32 %v3828_v39, %v3827_v25  ;;  %v3830_v35 = vpop.f32.mrb[70].mxu1 }
 0xaef   : > { %v3831_v27 = vpop.f32.mrb[71].mxu1 }
 0xaf0   : > { %3411 = vst [vmem:[%s6051_s17 + $0x18] sm:$0xff] %v3403_v63  ;;  %v3832_v46 = vadd.f32 %v3831_v27, %v3830_v35  ;;  %v3321_v3 = vadd.f32 %v3829_v60, %v6044_v28 }
 0xaf2   : > { %v3324_v34 = vadd.f32 %v3832_v46, %v6044_v28 }
 0xaff   : > { %v3833_v10 = vpop.f32.mrb[72].mxu1 }
 0xb00   : > { %v3834_v33 = vpop.f32.mrb[73].mxu1 }
 0xb01   : > { %v3835_v32 = vadd.f32 %v3834_v33, %v3833_v10  ;;  %v3836_v0 = vpop.f32.mrb[74].mxu1 }
 0xb02   : > { %v3837_v14 = vpop.f32.mrb[75].mxu1 }
 0xb03   : > { %v3838_v61 = vadd.f32 %v3837_v14, %v3836_v0  ;;  %v3329_v50 = vadd.f32 %v3835_v32, %v6044_v28 }
 0xb05   : > { %v3332_v24 = vadd.f32 %v3838_v61, %v6044_v28 }
 0xb07   : > { %v3867_v29 = vpop.f32.mrb[76].mxu1 }
 0xb08   : > { %v3868_v9 = vpop.f32.mrb[77].mxu1 }
 0xb09   : > { %v3869_v16 = vadd.f32 %v3868_v9, %v3867_v29  ;;  %v3870_v11 = vpop.f32.mrb[78].mxu1 }
 0xb0a   : > { %v3871_v12 = vpop.f32.mrb[79].mxu1 }
 0xb0b   : > { %v3386_v13 = vadd.f32 %v3869_v16, %v3321_v3  ;;  %v3872_v7 = vadd.f32 %v3871_v12, %v3870_v11 }
 0xb0d   : > { %v3404_v54 = vadd.f32 %v3386_v13, %v6238_v47  ;;  %v3389_v53 = vadd.f32 %v3872_v7, %v3324_v34 }
 0xb0f   : > { %3412 = vst [vmem:[%s6051_s17 + $0x20] sm:$0xff] %v3404_v54  ;;  %v3405_v19 = vadd.f32 %v3389_v53, %v6239_v23  ;;  %v3873_v8 = vpop.f32.mrb[80].mxu1 }
 0xb10   : > { %v3874_v30 = vpop.f32.mrb[81].mxu1 }
 0xb11   : > { %3413 = vst [vmem:[%s6051_s17 + $0x28] sm:$0xff] %v3405_v19  ;;  %v3875_v6 = vadd.f32 %v3874_v30, %v3873_v8  ;;  %v3876_v18 = vpop.f32.mrb[82].mxu1 }
 0xb12   : > { %v3877_v37 = vpop.f32.mrb[83].mxu1 }
 0xb13   : > { %v3394_v42 = vadd.f32 %v3875_v6, %v3329_v50  ;;  %v3878_v62 = vadd.f32 %v3877_v37, %v3876_v18 }
 0xb15   : > { %v3406_v57 = vadd.f32 %v3394_v42, %v6240_v58  ;;  %v3397_v1 = vadd.f32 %v3878_v62, %v3332_v24 }
 0xb17   : > { %3414 = vst [vmem:[%s6051_s17 + $0x30] sm:$0xff] %v3406_v57  ;;  %v3407_v28 = vadd.f32 %v3397_v1, %v6242_v59 }
 0xb19   : > { %3415 = vst [vmem:[%s6051_s17 + $0x38] sm:$0xff] %v3407_v28 }
 0xb1a   : > { %4803 = shalt.err (!%p4800_p8)
}
 0xb1b   : > { %s4804_s21 = scalar_lea.hbm %s6076_s14, 1024  ;;  %s4808_s17 = scalar_lea.hbm %s6241_s7, 2048 }
 0xb1c   : > { %p4805_p7 = scmp.ne.s32.totalorder %s6076_s14, %s4804_s21  ;;  %p4809_p3 = scmp.lt.u32.totalorder %s6076_s14, %s6241_s7 }
 0xb1d   : > { %p4810_p0 = scmp.lt.u32.totalorder %s4808_s17, %s4804_s21  ;;  %p4812_p6 = scmp.lt.u32.totalorder %s4804_s21, %s6076_s14 }
 0xb1e   : > { %p4806_p9 = pnand %p4805_p7, %p6243_p5 }
 0xb1f   : > { %p4811_p2 = por %p4810_p0, %p4809_p3 }
 0xb20   : > { %p4807_p4 = pneg %p4806_p9 }
 0xb21   : > { %p4813_p10 = por %p4812_p6, %p4811_p2 }
 0xb23   : > { %p4814_p1 = pnand %p4813_p10, %p4807_p4 }
 0xb25   : > { %4817 = shalt.err (!%p4814_p1)
}
 0xb26   : > { %s4890_s4 = smov 128   ;;  %s4891_s19 = smov 8  }
 0xb27   : > { %4065 = dma.vmem_to_hbm [thread:$0]  (%p6243_p5), %s6078_s25, 1024, %s6076_s14, %s3417_s20, %s4890_s4, %s4890_s4, %s4891_s19  }
 0xb28 PF: > { %s3446_s27 = sand.u32 1, %s4856_s29   ;;  %p6244_p11 = scmp.ne.s32.totalorder %s6184_s1, 0 }
 0xb29   : > { %p6245_p12 = scmp.ge.s32.totalorder %s4868_s16, 2  ;;  %s3447_s28 = scalar_lea.sflag [#allocation4], %s3446_s27 }
 0xb2b   : > { %p4091_p13 = pnand %p6245_p12, %p6244_p11 }
 0xb2d   : > { %4851 = dma.done.wait (!%p4091_p13), %s3447_s28, 1024  }
 0xb2e   : > { %4853 = vsyncadd (!%p4091_p13), %s3447_s28, 4294966272  ;;  %p30_p8 = scmp.ge.s32.totalorder %s5142_s23, 4   ;;  %s6246_s29 = smov %s4860_s30 }
 0xb2f   : > { %s6247_s30 = smov %s4864_s15  ;;  %s6248_s15 = smov %s5153_s22 }
 0xb30   : > { %s6249_s16 = smov %s5142_s23  ;;  %32 = sbr.rel (!%p30_p8) target bundleno = 17 (0x11), region = 145 }
 0xb37   :  { %3452 = vsyncpa [#allocation3], 1 }
 0xb38   :  { %3454 = vsyncpa [#allocation3 + $0x1], 1 }
 0xb39   :  { %3455 = vsyncpa [#allocation6], 1 }
 0xb3a   :  { %3456 = vsyncpa [#allocation9], 1 }
 0xb3b   :  { %3457 = vsyncpa [#allocation12], 1 }
 0xb3c   :  { %3458 = vsyncpa [#allocation4], 1 }
 0xb3d   :  { %3460 = vsyncpa [#allocation4 + $0x1], 1 }

// kernel: tpu_custom_call.1
= control target key start
LH: loop header
LB: loop body
LE: loop exit
PB: predicated region body
PF: predicated region fallthrough
CT: control target
= control target key end

     0   :  { %s6125_s0 = inlined_call_operand.hbm [shape: f32[8,16,128], index: 0, kind: input, shape index: {}]   ;;  %s6126_s1 = inlined_call_operand.hbm [shape: f32[16,16], index: 1, kind: input, shape index: {}]   ;;  %s6127_s2 = inlined_call_operand.hbm [shape: f32[1,128], index: 2, kind: input, shape index: {}]   ;;  %s6128_s3 = inlined_call_operand.vmem [shape: f32[1,128], index: 3, kind: input, shape index: {}]   ;;  %s6129_s4 = inlined_call_operand.hbm [shape: bf16[128,384], index: 4, kind: input, shape index: {}]   ;;  %s6130_s5 = inlined_call_operand.vmem [shape: f32[1,384], index: 5, kind: input, shape index: {}]   ;;  %s6131_s6 = inlined_call_operand.hbm [shape: bf16[128,128], index: 6, kind: input, shape index: {}]   ;;  %s6132_s7 = inlined_call_operand.vmem [shape: f32[1,128], index: 7, kind: input, shape index: {}]   ;;  %s6133_s8 = inlined_call_operand.vmem [shape: f32[1,128], index: 8, kind: input, shape index: {}]   ;;  %s6134_s9 = inlined_call_operand.vmem [shape: f32[1,128], index: 9, kind: input, shape index: {}]   ;;  %s6135_s10 = inlined_call_operand.hbm [shape: bf16[128,512], index: 10, kind: input, shape index: {}]   ;;  %s6136_s11 = inlined_call_operand.vmem [shape: f32[1,512], index: 11, kind: input, shape index: {}]   ;;  %s6137_s12 = inlined_call_operand.hbm [shape: bf16[512,128], index: 12, kind: input, shape index: {}]   ;;  %s6138_s13 = inlined_call_operand.vmem [shape: f32[1,128], index: 13, kind: input, shape index: {}]   ;;  %s6139_s14 = inlined_call_operand.hbm [shape: f32[8,16,128], index: 14, kind: output, shape index: {}]  }
   0x1   :  { %6167 = sst [smem:[#allocation41_spill]] %s6126_s1 }
   0x2   :  { %6168 = sst [smem:[#allocation42_spill]] %s6129_s4 }
   0x3   :  { %6169 = sst [smem:[#allocation43_spill]] %s6132_s7 }
   0x4   :  { %6170 = sst [smem:[#allocation44_spill]] %s6133_s8 }
   0x5   :  { %6171 = sst [smem:[#allocation45_spill]] %s6134_s9 }
   0x6   :  { %6172 = sst [smem:[#allocation46_spill]] %s6136_s11 }
   0x7   :  { %6173 = sst [smem:[#allocation47_spill]] %s6138_s13 }
   0x8   :  { %6174 = sst [smem:[#allocation48_spill]] %s6139_s14 }
   0x9   :  { %19 = vsyncpa [#allocation3], 0 }
   0xa   :  { %21 = vsyncpa [#allocation3 + $0x1], 0 }
   0xb   :  { %22 = vsyncpa [#allocation6], 0 }
   0xc   :  { %23 = vsyncpa [#allocation9], 0 }
   0xd   :  { %24 = vsyncpa [#allocation12], 0 }
   0xe   :  { %25 = vsyncpa [#allocation4], 0 }
   0xf   :  { %27 = vsyncpa [#allocation4 + $0x1], 0  ;;  %s4967_s29 = smov 0   ;;  %s4969_s30 = smov 0  }
  0x10   :  { %s4971_s15 = smov 0   ;;  %s4973_s16 = smov 0  }
  0x11 LB: > { %s4870_s17 = smov [#allocation5]   ;;  %s4988_s19 = sadd.s32 4294967295, %s4868_s16   ;;  %s4868_s16 = sphi %s4973_s16, %s6249_s16   ;;  %s4864_s15 = sphi %s4971_s15, %s6248_s15   ;;  %s4860_s30 = sphi %s4969_s30, %s6247_s30   ;;  %s4856_s29 = sphi %s4967_s29, %s6246_s29  }
  0x12   : > { %s375_s18 = sshll.u32 %s4870_s17, 4  ;;  %p3562_p0 = scmp.ge.s32.totalorder %s4868_s16, 1  ;;  %s4993_s18 = int_to_ptr.vmem [resolvable:$true] %s375_s18 }
  0x13   : > { %p6142_p1 = scmp.eq.s32.totalorder %s4988_s19, 0  ;;  %p363_p2 = scmp.lt.s32.totalorder %s4868_s16, 3 }
  0x14   : > { %s4871_s21 = smov [#allocation8]   ;;  %s4872_s24 = smov [#allocation11]  }
  0x15   : > { %p4995_p3 = pnand %p3562_p0, %p363_p2  ;;  %s402_s22 = sshll.u32 %s4871_s21, 4  ;;  %s5008_s22 = int_to_ptr.vmem [resolvable:$true] %s402_s22 }
  0x16   : > { %s5010_s25 = sshll.u32 %s4872_s24, 4  ;;  %s6177_s1 = sld [smem:[#allocation41_spill]]  ;;  %s441_s25 = int_to_ptr.vmem [resolvable:$true] %s5010_s25 }
  0x17   : > { %s6175_s20 = scalar_select %p4995_p3, 1, 0 }
  0x18   : > { %p4067_p5 = pneg %p4995_p3 }
  0x1a   : > { %p5004_p6 = pnand %p4067_p5, %p6142_p1 }
  0x1c   : > { %s4592_s28 = scalar_lea.hbm %s6177_s1, 256  ;;  %p5020_p8 = pneg %p5004_p6 }
  0x1d   : > { %p4593_p7 = scmp.ne.s32.totalorder %s6177_s1, %s4592_s28  ;;  %p4599_p11 = scmp.lt.u32.totalorder %s4592_s28, %s6177_s1 }
  0x1f   : > { %p4595_p9 = pnand %p5020_p8, %p4593_p7 }
  0x21   : > { %p4596_p10 = pneg %p4595_p9 }
  0x23   : > { %p4601_p12 = pnand %p4599_p11, %p4596_p10 }
  0x25   : > { %4604 = shalt.err (!%p4601_p12)
}
  0x26   : > { %s4605_s14 = scalar_lea.vmem %s4993_s18, 256  ;;  %p4613_p5 = scmp.lt.s32.totalorder %s4993_s18, %s4993_s18 }
  0x27   : > { %p4606_p13 = scmp.ne.s32.totalorder %s4993_s18, %s4605_s14  ;;  %p4614_p4 = scmp.lt.s32.totalorder %s4605_s14, %s4605_s14 }
  0x29   : > { %p4608_p0 = pnand %p4606_p13, %p5020_p8  ;;  %p4615_p7 = por %p4614_p4, %p4613_p5 }
  0x2b   : > { %p4609_p2 = pneg %p4608_p0 }
  0x2d   : > { %p4616_p9 = pnand %p4615_p7, %p4609_p2 }
  0x2f   : > { %4619 = shalt.err (!%p4616_p9)
}
  0x30   : > { %s6141_s26 = smov 128   ;;  %s6144_s13 = smov 8  }
  0x31   : > { %4070 = dma.hbm_to_vmem [thread:$0]  (!%p5004_p6), %s6177_s1, 256, %s4993_s18, [#allocation6], %s6141_s26, %s6141_s26, %s6144_s13  }
  0x32   : > { %s6179_s4 = sld [smem:[#allocation42_spill]] }
  0x38   : > { %s4620_s14 = scalar_lea.hbm %s6179_s4, 3072 }
  0x39   : > { %p4621_p4 = scmp.ne.s32.totalorder %s6179_s4, %s4620_s14  ;;  %p4627_p12 = scmp.lt.u32.totalorder %s4620_s14, %s6179_s4 }
  0x3b   : > { %p4623_p10 = pnand %p4621_p4, %p5020_p8 }
  0x3d   : > { %p4624_p11 = pneg %p4623_p10 }
  0x3f   : > { %p4629_p13 = pnand %p4627_p12, %p4624_p11 }
  0x41   : > { %4632 = shalt.err (!%p4629_p13)
}
  0x42   : > { %s4633_s18 = scalar_lea.vmem %s5008_s22, 3072  ;;  %p4641_p7 = scmp.lt.s32.totalorder %s5008_s22, %s5008_s22 }
  0x43   : > { %p4634_p0 = scmp.ne.s32.totalorder %s5008_s22, %s4633_s18  ;;  %p4642_p9 = scmp.lt.s32.totalorder %s4633_s18, %s4633_s18 }
  0x45   : > { %p4636_p2 = pnand %p4634_p0, %p5020_p8  ;;  %p4643_p4 = por %p4642_p9, %p4641_p7 }
  0x47   : > { %p4637_p5 = pneg %p4636_p2 }
  0x49   : > { %p4644_p10 = pnand %p4643_p4, %p4637_p5 }
  0x4b   : > { %4647 = shalt.err (!%p4644_p10)
}
  0x4c   : > { %s4875_s9 = smov 192   ;;  %s4876_s7 = smov 12  }
  0x4d   : > { %4076 = dma.hbm_to_vmem [thread:$0]  (!%p5004_p6), %s6179_s4, 3072, %s5008_s22, [#allocation9], %s4875_s9, %s4875_s9, %s4876_s7  }
  0x4e   : > { %s4648_s17 = scalar_lea.hbm %s6135_s10, 4096 }
  0x4f   : > { %p4649_p11 = scmp.ne.s32.totalorder %s6135_s10, %s4648_s17  ;;  %p4655_p0 = scmp.lt.u32.totalorder %s4648_s17, %s6135_s10 }
  0x51   : > { %p4651_p12 = pnand %p4649_p11, %p5020_p8 }
  0x53   : > { %p4652_p13 = pneg %p4651_p12 }
  0x55   : > { %p4657_p2 = pnand %p4655_p0, %p4652_p13 }
  0x57   : > { %4660 = shalt.err (!%p4657_p2)
}
  0x58   : > { %s4661_s8 = scalar_lea.vmem %s441_s25, 4096  ;;  %p4669_p4 = scmp.lt.s32.totalorder %s441_s25, %s441_s25 }
  0x59   : > { %p4662_p5 = scmp.ne.s32.totalorder %s441_s25, %s4661_s8  ;;  %p4670_p10 = scmp.lt.s32.totalorder %s4661_s8, %s4661_s8 }
  0x5b   : > { %p4664_p7 = pnand %p4662_p5, %p5020_p8  ;;  %p4671_p1 = por %p4670_p10, %p4669_p4 }
  0x5d   : > { %p4665_p9 = pneg %p4664_p7 }
  0x5f   : > { %p4672_p3 = pnand %p4671_p1, %p4665_p9 }
  0x61   : > { %4675 = shalt.err (!%p4672_p3)
}
  0x62   : > { %s4877_s22 = smov 256   ;;  %s4878_s9 = smov 16  }
  0x63   : > { %4082 = dma.hbm_to_vmem [thread:$0]  (!%p5004_p6), %s6135_s10, 4096, %s441_s25, [#allocation12], %s4877_s22, %s4877_s22, %s4878_s9  }
  0x64   : > { %s4879_s11 = smov [#allocation7]   ;;  %s4880_s28 = smov [#allocation10]  }
  0x65   : > { %s389_s27 = sshll.u32 %s4879_s11, 4  ;;  %s418_s17 = sshll.u32 %s4880_s28, 4  ;;  %s390_s27 = int_to_ptr.vmem [resolvable:$true] %s389_s27  ;;  %s419_s17 = int_to_ptr.vmem [resolvable:$true] %s418_s17 }
  0x66   : > { %s4676_s18 = scalar_lea.hbm %s6127_s2, 16 }
  0x67   : > { %p4677_p1 = scmp.ne.s32.totalorder %s6127_s2, %s4676_s18  ;;  %p4683_p12 = scmp.lt.u32.totalorder %s4676_s18, %s6127_s2 }
  0x69   : > { %p4679_p3 = pnand %p4677_p1, %p5020_p8 }
  0x6b   : > { %p4680_p11 = pneg %p4679_p3 }
  0x6d   : > { %p4685_p13 = pnand %p4683_p12, %p4680_p11 }
  0x6f   : > { %4688 = shalt.err (!%p4685_p13)
}
  0x70   : > { %s4689_s25 = scalar_lea.vmem %s390_s27, 16  ;;  %s4696_s22 = scalar_lea.vmem %s390_s27, 32 }
  0x71   : > { %p4690_p0 = scmp.ne.s32.totalorder %s390_s27, %s4689_s25  ;;  %p4697_p7 = scmp.lt.s32.totalorder %s390_s27, %s390_s27 }
  0x72   : > { %p4698_p9 = scmp.lt.s32.totalorder %s4696_s22, %s4689_s25 }
  0x73   : > { %p4692_p2 = pnand %p4690_p0, %p5020_p8 }
  0x74   : > { %p4699_p4 = por %p4698_p9, %p4697_p7 }
  0x75   : > { %p4693_p5 = pneg %p4692_p2 }
  0x77   : > { %p4700_p10 = pnand %p4699_p4, %p4693_p5 }
  0x79   : > { %4703 = shalt.err (!%p4700_p10)
}
  0x7a   : > { %4073 = dma.hbm_to_vmem [thread:$0]  (!%p5004_p6), %s6127_s2, 16, %s390_s27, [#allocation6]  }
  0x7b   : > { %s4704_s26 = scalar_lea.hbm %s6131_s6, 1024 }
  0x7c   : > { %p4705_p1 = scmp.ne.s32.totalorder %s6131_s6, %s4704_s26  ;;  %p4711_p12 = scmp.lt.u32.totalorder %s4704_s26, %s6131_s6 }
  0x7e   : > { %p4707_p3 = pnand %p4705_p1, %p5020_p8 }
  0x80   : > { %p4708_p11 = pneg %p4707_p3 }
  0x82   : > { %p4713_p13 = pnand %p4711_p12, %p4708_p11 }
  0x84   : > { %4716 = shalt.err (!%p4713_p13)
}
  0x85   : > { %s4717_s14 = scalar_lea.vmem %s419_s17, 1024  ;;  %p4725_p7 = scmp.lt.s32.totalorder %s419_s17, %s419_s17 }
  0x86   : > { %p4718_p0 = scmp.ne.s32.totalorder %s419_s17, %s4717_s14  ;;  %p4726_p9 = scmp.lt.s32.totalorder %s4717_s14, %s4717_s14 }
  0x88   : > { %p4720_p2 = pnand %p4718_p0, %p5020_p8  ;;  %p4727_p4 = por %p4726_p9, %p4725_p7 }
  0x8a   : > { %p4721_p5 = pneg %p4720_p2 }
  0x8c   : > { %p4728_p10 = pnand %p4727_p4, %p4721_p5 }
  0x8e   : > { %4731 = shalt.err (!%p4728_p10)
}
  0x8f   : > { %s4881_s27 = smov 64   ;;  %s4882_s18 = smov 4  }
  0x90   : > { %4079 = dma.hbm_to_vmem [thread:$0]  (!%p5004_p6), %s6131_s6, 1024, %s419_s17, [#allocation9], %s4881_s27, %s4881_s27, %s4882_s18  }
  0x91   : > { %s4883_s22 = smov [#allocation13]   ;;  %s4732_s4 = scalar_lea.hbm %s6137_s12, 4096 }
  0x92   : > { %s456_s13 = sshll.u32 %s4883_s22, 4  ;;  %p4733_p1 = scmp.ne.s32.totalorder %s6137_s12, %s4732_s4  ;;  %s457_s13 = int_to_ptr.vmem [resolvable:$true] %s456_s13 }
  0x93   : > { %p4739_p12 = scmp.lt.u32.totalorder %s4732_s4, %s6137_s12 }
  0x94   : > { %p4735_p3 = pnand %p4733_p1, %p5020_p8 }
  0x96   : > { %p4736_p11 = pneg %p4735_p3 }
  0x98   : > { %p4741_p13 = pnand %p4739_p12, %p4736_p11 }
  0x9a   : > { %4744 = shalt.err (!%p4741_p13)
}
  0x9b   : > { %s4745_s17 = scalar_lea.vmem %s457_s13, 4096  ;;  %p4753_p7 = scmp.lt.s32.totalorder %s457_s13, %s457_s13 }
  0x9c   : > { %p4746_p0 = scmp.ne.s32.totalorder %s457_s13, %s4745_s17  ;;  %p4754_p9 = scmp.lt.s32.totalorder %s4745_s17, %s4745_s17 }
  0x9e   : > { %p4748_p2 = pnand %p4746_p0, %p5020_p8  ;;  %p4755_p4 = por %p4754_p9, %p4753_p7 }
  0xa0   : > { %p4749_p5 = pneg %p4748_p2 }
  0xa2   : > { %p4756_p10 = pnand %p4755_p4, %p4749_p5 }
  0xa4   : > { %4759 = shalt.err (!%p4756_p10)
}
  0xa5   : > { %4085 = dma.hbm_to_vmem [thread:$0]  (!%p5004_p6), %s6137_s12, 4096, %s457_s13, [#allocation12], %s4881_s27, %s4881_s27, %s4882_s18  }
  0xa6   : > { %s3561_s21 = sadd.s32 4294967294, %s4868_s16   ;;  %s5142_s23 = sadd.s32 1, %s4868_s16  }
  0xa7   : > { %s37_s8 = ssub.s32 %s4868_s16, %s5142_s23  ;;  %s40_s25 = sadd.s32 1, %s4864_s15 }
  0xa8   : > { %p38_p8 = scmp.eq.s32.totalorder %s37_s8, 0  ;;  %p47_p1 = scmp.ne.s32.totalorder %s4864_s15, %s4860_s30 }
  0xa9   : > { %p48_p3 = scmp.eq.s32.totalorder %s4868_s16, 0  ;;  %p53_p11 = scmp.ne.s32.totalorder %s4860_s30, %s4856_s29 }
  0xaa   : > { %s5153_s22 = scalar_select %p38_p8, %s4864_s15, %s40_s25  }
  0xab   : > { %p5155_p12 = por %p48_p3, %p47_p1  ;;  %p6181_p13 = scmp.eq.s32.totalorder %s4988_s19, 0 }
  0xac   : > { %p350_p0 = scmp.eq.s32.totalorder %s4988_s19, 1  ;;  %p356_p2 = scmp.eq.s32.totalorder %s3561_s21, 1 }
  0xad   : > { %p5161_p6 = por %p6181_p13, %p53_p11  ;;  %p4100_p5 = scmp.lt.s32.totalorder %s4868_s16, 2 }
  0xae   : > { %s473_s18 = sand.u32 1, %s4864_s15   ;;  %p5168_p7 = por %p350_p0, %p47_p1 }
  0xaf   : > { %p5172_p9 = por %p356_p2, %p53_p11  ;;  %s3570_s4 = sshll.u32 %s473_s18, 6 }
  0xb0   : > { %s6183_s13 = scalar_select %p5168_p7, 1, 0 }
  0xb1   : > { %s6184_s1 = scalar_select %p5172_p9, 1, 0 }
  0xb2   : > { %s3740_s26 = sshll.u32 %s4868_s16, 10  ;;  %s477_s17 = scalar_lea.vmem [#allocation2], %s3570_s4 }
  0xb3   : > { %s5180_s28 = scalar_lea.hbm %s6125_s0, %s3740_s26  ;;  %s485_s24 = sshll.u32 %s477_s17, 4  ;;  %s5182_s24 = int_to_ptr.vmem [resolvable:$true] %s485_s24 }
  0xb4   : > { %p5186_p4 = pnand %p4100_p5, %p5155_p12  ;;  %s5190_s21 = scalar_lea.sflag [#allocation3], %s473_s18 }
  0xb5   : > { %s4760_s8 = scalar_lea.hbm %s5180_s28, 1024  ;;  %s4765_s9 = scalar_lea.hbm %s6125_s0, 2048 }
  0xb6   : > { %p4761_p10 = scmp.ne.s32.totalorder %s5180_s28, %s4760_s8  ;;  %p4762_p8 = pneg %p5186_p4 }
  0xb7   : > { %p4766_p11 = scmp.lt.u32.totalorder %s5180_s28, %s6125_s0  ;;  %p4767_p12 = scmp.lt.u32.totalorder %s4765_s9, %s4760_s8 }
  0xb8   : > { %p4763_p1 = pnand %p4762_p8, %p4761_p10  ;;  %p4769_p0 = scmp.lt.u32.totalorder %s4760_s8, %s5180_s28 }
  0xb9   : > { %p4768_p13 = por %p4767_p12, %p4766_p11 }
  0xba   : > { %p4764_p3 = pneg %p4763_p1 }
  0xbb   : > { %p4770_p2 = por %p4769_p0, %p4768_p13 }
  0xbd   : > { %p4771_p5 = pnand %p4770_p2, %p4764_p3 }
  0xbf   : > { %4774 = shalt.err (!%p4771_p5)
}
  0xc0   : > { %s4775_s18 = scalar_lea.vmem %s5182_s24, 1024  ;;  %s4884_s11 = smov [#allocation2]  }
  0xc1   : > { %p4776_p10 = scmp.ne.s32.totalorder %s5182_s24, %s4775_s18  ;;  %s4780_s17 = sshll.u32 %s4884_s11, 4  ;;  %s4781_s17 = int_to_ptr.vmem [resolvable:$false] %s4780_s17 }
  0xc2   : > { %s4782_s25 = scalar_lea.vmem %s4781_s17, 2048  ;;  %p4783_p7 = scmp.lt.s32.totalorder %s5182_s24, %s4781_s17 }
  0xc3   : > { %p4778_p1 = pnand %p4776_p10, %p4762_p8  ;;  %p4784_p11 = scmp.lt.s32.totalorder %s4782_s25, %s4775_s18 }
  0xc5   : > { %p4779_p9 = pneg %p4778_p1  ;;  %p4785_p12 = por %p4784_p11, %p4783_p7 }
  0xc7   : > { %p4786_p13 = pnand %p4785_p12, %p4779_p9 }
  0xc9   : > { %4789 = shalt.err (!%p4786_p13)
}
  0xca   : > { %s6186_s8 = smov 8   ;;  %s6187_s4 = smov 128  }
  0xcb   : > { %4089 = dma.hbm_to_vmem [thread:$0]  (!%p5186_p4), %s5180_s28, 1024, %s5182_s24, %s5190_s21, %s6187_s4, %s6187_s4, %s6186_s8  }
  0xcc   : > { %p6188_p8 = scmp.ne.s32.totalorder %s6175_s20, 0 }
  0xce   : > { %497 = sbr.rel (%p6188_p8) target bundleno = 2856 (0xb28), region = 76 }
  0xd5   : > { %s5224_s9 = sand.u32 1, %s4860_s30  }
  0xd6   : > { %s3575_s26 = sshll.u32 %s5224_s9, 6  ;;  %s500_s7 = scalar_lea.sflag [#allocation3], %s5224_s9 }
  0xd7   : > { %s5230_s14 = scalar_lea.vmem [#allocation2], %s3575_s26 }
  0xd8   : > { %4835 = dma.done.wait (%p5161_p6), %s500_s7, 1024  }
  0xd9   : > { %4837 = vsyncadd (%p5161_p6), %s500_s7, 4294966272  ;;  %p6189_p7 = scmp.eq.s32.totalorder %s4988_s19, 0 }
  0xdb   : > { %4839 = dma.done.wait (%p6189_p7), [#allocation6], 272   ;;  %p6190_p9 = pmov %p6189_p7 }
  0xdc   : > { %p6191_p4 = pmov %p6189_p7 }
  0xdd   : > { %4841 = vsyncadd (%p6190_p9), [#allocation6], 4294967024 }
  0xde   : > { %4843 = dma.done.wait (%p6191_p4), [#allocation9], 4096   ;;  %p6192_p3 = pmov %p6191_p4 }
  0xe0   : > { %4845 = vsyncadd (%p6192_p3), [#allocation9], 4294963200  ;;  %p6193_p0 = pmov %p6192_p3 }
  0xe2   : > { %4847 = dma.done.wait (%p6193_p0), [#allocation12], 8192   ;;  %p6194_p2 = pmov %p6193_p0 }
  0xe3   : > { %v575_v0 = vld [vmem:[%s5230_s14] sm:$0xff]  ;;  %v577_v1 = vld [vmem:[%s5230_s14 + $0x10] sm:$0xff]  ;;  %v576_v2 = vld [vmem:[%s5230_s14 + $0x8] sm:$0xff]  ;;  %v4885_v63 = vmov 0   ;;  %vm4887_vm0 = vmmov 0   ;;  %vm1143_vm1 = vcmask 523264  }
  0xe4   : > { %4849 = vsyncadd (%p6194_p2), [#allocation12], 4294959104  ;;  %585 = vadd.xlane.f32.xlu0 %v575_v0  ;;  %589 = vadd.xlane.f32.xlu1 %v577_v1  ;;  %v578_v3 = vld [vmem:[%s5230_s14 + $0x18] sm:$0xff]  ;;  %v579_v4 = vld [vmem:[%s5230_s14 + $0x20] sm:$0xff]  ;;  %s4888_s21 = smov 64   ;;  %vm1520_vm2 = vcmask 130048  }
  0xe5   : > { %v580_v5 = vld [vmem:[%s5230_s14 + $0x28] sm:$0xff]  ;;  %v581_v6 = vld [vmem:[%s5230_s14 + $0x30] sm:$0xff]  ;;  %v582_v7 = vld [vmem:[%s5230_s14 + $0x38] sm:$0xff]  ;;  %915 = vmatprep.mubr.bf16.mxu0 %v4885_v63  ;;  %s6195_s17 = sld [smem:[#allocation43_spill]]  ;;  %s6204_s4 = sld [smem:[#allocation44_spill]] }
  0xe6   : > { %v4240_v8 = vld [vmem:[#allocation8 + $0x4] ss:$12 sps:$4 sm:$0xff]   ;;  %v4242_v9 = vld [vmem:[#allocation8] ss:$12 sps:$4 sm:$0xff]   ;;  %v4243_v10 = vld [vmem:[#allocation8 + $0x1c] ss:$12 sps:$4 sm:$0xff]  }
  0xe7   : > { %v4245_v11 = vld [vmem:[#allocation8 + $0x8] ss:$12 sps:$4 sm:$0xff]   ;;  %883 = vmatprep.subr.bf16.mxu0 %v4240_v8  ;;  %v4246_v44 = vld [vmem:[#allocation8 + $0x18] ss:$12 sps:$4 sm:$0xff]   ;;  %v4249_v46 = vld [vmem:[#allocation8 + $0x20] ss:$12 sps:$4 sm:$0xff]  }
  0xe8   : > { %587 = vadd.xlane.f32.xlu0 %v576_v2  ;;  %591 = vadd.xlane.f32.xlu1 %v578_v3  ;;  %v4247_v45 = vld [vmem:[#allocation8 + $0x34] ss:$12 sps:$4 sm:$0xff]   ;;  %v4250_v47 = vld [vmem:[#allocation8 + $0x30] ss:$12 sps:$4 sm:$0xff]   ;;  %v4251_v48 = vld [vmem:[#allocation8 + $0x4c] ss:$12 sps:$4 sm:$0xff]  }
  0xe9   : > { %884 = vmatpush1.bf16.msra.mxu0 %v4242_v9  ;;  %3879 = vmatprep.subr.bf16.mxu1 %v4245_v11  ;;  %v4253_v49 = vld [vmem:[#allocation8 + $0x38] ss:$12 sps:$4 sm:$0xff]   ;;  %v4254_v50 = vld [vmem:[#allocation8 + $0x48] ss:$12 sps:$4 sm:$0xff]   ;;  %v4257_v52 = vld [vmem:[#allocation8 + $0x50] ss:$12 sps:$4 sm:$0xff]  }
  0xea   : > { %885 = vmatprep.subr.bf16.mxu0 %v4243_v10  ;;  %3880 = vmatpush3.bf16.msra.mxu1 %v4245_v11  ;;  %v4255_v51 = vld [vmem:[#allocation8 + $0x64] ss:$12 sps:$4 sm:$0xff]   ;;  %v4258_v53 = vld [vmem:[#allocation8 + $0x60] ss:$12 sps:$4 sm:$0xff]   ;;  %v4259_v54 = vld [vmem:[#allocation8 + $0x7c] ss:$12 sps:$4 sm:$0xff]  }
  0xeb   : > { %3881 = vmatprep.subr.bf16.mxu1 %v4249_v46  ;;  %v4261_v55 = vld [vmem:[#allocation8 + $0x68] ss:$12 sps:$4 sm:$0xff]   ;;  %v4262_v56 = vld [vmem:[#allocation8 + $0x78] ss:$12 sps:$4 sm:$0xff]   ;;  %v4265_v58 = vld [vmem:[#allocation8 + $0x80] ss:$12 sps:$4 sm:$0xff]  }
  0xec   : > { %593 = vadd.xlane.f32.xlu0 %v579_v4  ;;  %595 = vadd.xlane.f32.xlu1 %v580_v5  ;;  %v4263_v57 = vld [vmem:[#allocation8 + $0x94] ss:$12 sps:$4 sm:$0xff]   ;;  %v4266_v59 = vld [vmem:[#allocation8 + $0x90] ss:$12 sps:$4 sm:$0xff]   ;;  %v4267_v60 = vld [vmem:[#allocation8 + $0xac] ss:$12 sps:$4 sm:$0xff]  }
  0xed   : > { %886 = vmatpush1.bf16.msra.mxu0 %v4246_v44  ;;  %v4269_v61 = vld [vmem:[#allocation8 + $0x98] ss:$12 sps:$4 sm:$0xff]   ;;  %v4270_v62 = vld [vmem:[#allocation8 + $0xa8] ss:$12 sps:$4 sm:$0xff]   ;;  %s6205_s20 = sld [smem:[#allocation45_spill]]  ;;  %s6213_s24 = sld [smem:[#allocation46_spill]] }
  0xee   : > { %887 = vmatprep.subr.bf16.mxu0 %v4247_v45  ;;  %3882 = vmatpush3.bf16.msra.mxu1 %v4249_v46  ;;  %s6233_s11 = sld [smem:[#allocation47_spill]]  ;;  %s6241_s7 = sld [smem:[#allocation48_spill]] }
  0xef   : > { %3883 = vmatprep.subr.bf16.mxu1 %v4253_v49  ;;  %p6243_p5 = scmp.ne.s32.totalorder %s6183_s13, 0  ;;  %s4889_s27 = smov [#allocation14]  }
  0xf0   : > { %597 = vadd.xlane.f32.xlu0 %v581_v6  ;;  %599 = vadd.xlane.f32.xlu1 %v582_v7  ;;  %s4794_s28 = sshll.u32 %s4889_s27, 4  ;;  %s4795_s28 = int_to_ptr.vmem [resolvable:$false] %s4794_s28 }
  0xf1   : > { %888 = vmatpush1.bf16.msra.mxu0 %v4250_v47 }
  0xf2   : > { %889 = vmatprep.subr.bf16.mxu0 %v4251_v48  ;;  %3884 = vmatpush3.bf16.msra.mxu1 %v4253_v49 }
  0xf3   : > { %3885 = vmatprep.subr.bf16.mxu1 %v4257_v52 }
  0xf5   : > { %890 = vmatpush1.bf16.msra.mxu0 %v4254_v50 }
  0xf6   : > { %891 = vmatprep.subr.bf16.mxu0 %v4255_v51  ;;  %3886 = vmatpush3.bf16.msra.mxu1 %v4257_v52 }
  0xf7   : > { %3887 = vmatprep.subr.bf16.mxu1 %v4261_v55 }
  0xf9   : > { %892 = vmatpush1.bf16.msra.mxu0 %v4258_v53 }
  0xfa   : > { %893 = vmatprep.subr.bf16.mxu0 %v4259_v54  ;;  %3888 = vmatpush3.bf16.msra.mxu1 %v4261_v55 }
  0xfb   : > { %3889 = vmatprep.subr.bf16.mxu1 %v4265_v58 }
  0xfd   : > { %894 = vmatpush1.bf16.msra.mxu0 %v4262_v56 }
  0xfe   : > { %895 = vmatprep.subr.bf16.mxu0 %v4263_v57  ;;  %3890 = vmatpush3.bf16.msra.mxu1 %v4265_v58 }
  0xff   : > { %3891 = vmatprep.subr.bf16.mxu1 %v4269_v61 }
 0x101   : > { %896 = vmatpush1.bf16.msra.mxu0 %v4266_v59 }
 0x102   : > { %897 = vmatprep.subr.bf16.mxu0 %v4267_v60  ;;  %3892 = vmatpush3.bf16.msra.mxu1 %v4269_v61 }
 0x105   : > { %898 = vmatpush1.bf16.msra.mxu0 %v4270_v62 }
 0x171   : > { %v586_v12 = vpop.xlane.xlu0 %585  ;;  %v590_v13 = vpop.xlane.xlu1 %589 }
 0x172   : > { %v602_v14 = vmul.f32 0.0078125, %v586_v12  ;;  %v604_v15 = vmul.f32 0.0078125, %v590_v13 }
 0x174   : > { %v5256_v16 = vsub.f32 %v575_v0, %v602_v14  ;;  %v5258_v17 = vsub.f32 %v577_v1, %v604_v15  ;;  %v4271_v0 = vld [vmem:[#allocation8 + $0xb0] ss:$12 sps:$4 sm:$0xff]  }
 0x175   : > { %v588_v18 = vpop.xlane.xlu0 %587  ;;  %v592_v19 = vpop.xlane.xlu1 %591  ;;  %3893 = vmatprep.subr.bf16.mxu1 %v4271_v0 }
 0x176   : > { %v603_v20 = vmul.f32 0.0078125, %v588_v18  ;;  %v618_v21 = vmul.f32 %v5256_v16, %v5256_v16  ;;  %v605_v22 = vmul.f32 0.0078125, %v592_v19  ;;  %v620_v25 = vmul.f32 %v5258_v17, %v5258_v17  ;;  %3894 = vmatpush3.bf16.msra.mxu1 %v4271_v0 }
 0x178   : > { %v5262_v23 = vsub.f32 %v576_v2, %v603_v20  ;;  %626 = vadd.xlane.f32.xlu0 %v618_v21  ;;  %v5264_v24 = vsub.f32 %v578_v3, %v605_v22 }
 0x179   : > { %v594_v26 = vpop.xlane.xlu0 %593  ;;  %v596_v27 = vpop.xlane.xlu1 %595 }
 0x17a   : > { %v606_v28 = vmul.f32 0.0078125, %v594_v26  ;;  %v619_v29 = vmul.f32 %v5262_v23, %v5262_v23  ;;  %v607_v30 = vmul.f32 0.0078125, %v596_v27  ;;  %v621_v33 = vmul.f32 %v5264_v24, %v5264_v24 }
 0x17c   : > { %v5270_v31 = vsub.f32 %v579_v4, %v606_v28  ;;  %630 = vadd.xlane.f32.xlu0 %v620_v25  ;;  %628 = vadd.xlane.f32.xlu1 %v619_v29  ;;  %v5272_v32 = vsub.f32 %v580_v5, %v607_v30  ;;  %v3583_v30 = vld [vmem:[#allocation7] ss:$0 sm:$0xff] }
 0x17d   : > { %v598_v34 = vpop.xlane.xlu0 %597  ;;  %v600_v35 = vpop.xlane.xlu1 %599 }
 0x17e   : > { %v608_v36 = vmul.f32 0.0078125, %v598_v34  ;;  %v622_v37 = vmul.f32 %v5270_v31, %v5270_v31  ;;  %v609_v38 = vmul.f32 0.0078125, %v600_v35  ;;  %v623_v41 = vmul.f32 %v5272_v32, %v5272_v32 }
 0x180   : > { %v5278_v39 = vsub.f32 %v581_v6, %v608_v36  ;;  %632 = vadd.xlane.f32.xlu1 %v621_v33  ;;  %634 = vadd.xlane.f32.xlu0 %v622_v37  ;;  %v5280_v40 = vsub.f32 %v582_v7, %v609_v38  ;;  %v3584_v38 = vld [vmem:[%s6128_s3] ss:$0 sm:$0xff] }
 0x182   : > { %v624_v42 = vmul.f32 %v5278_v39, %v5278_v39  ;;  %v625_v43 = vmul.f32 %v5280_v40, %v5280_v40 }
 0x184   : > { %636 = vadd.xlane.f32.xlu1 %v623_v41  ;;  %638 = vadd.xlane.f32.xlu0 %v624_v42 }
 0x188   : > { %640 = vadd.xlane.f32.xlu1 %v625_v43 }
 0x205   : > { %v627_v1 = vpop.xlane.xlu0 %626 }
 0x206   : > { %v642_v2 = vmul.f32 0.0078125, %v627_v1 }
 0x208   : > { %v650_v3 = vadd.f32 1e-05, %v642_v2 }
 0x209   : > { %v629_v4 = vpop.xlane.xlu1 %628  ;;  %v631_v5 = vpop.xlane.xlu0 %630 }
 0x20a   : > { %4360 = vrsqrt.f32 %v650_v3  ;;  %v643_v6 = vmul.f32 0.0078125, %v629_v4  ;;  %v644_v7 = vmul.f32 0.0078125, %v631_v5  ;;  %v738_v4 = vld [vmem:[%s6130_s5] sm:$0x7] }
 0x20c   : > { %v651_v8 = vadd.f32 1e-05, %v643_v6  ;;  %v652_v9 = vadd.f32 1e-05, %v644_v7 }
 0x20d   : > { %v633_v10 = vpop.xlane.xlu1 %632  ;;  %v635_v11 = vpop.xlane.xlu0 %634 }
 0x20e   : > { %4362 = vrsqrt.f32 %v651_v8  ;;  %v645_v12 = vmul.f32 0.0078125, %v633_v10  ;;  %v646_v13 = vmul.f32 0.0078125, %v635_v11 }
 0x20f   : > { %4364 = vrsqrt.f32 %v652_v9 }
 0x210   : > { %v653_v14 = vadd.f32 1e-05, %v645_v12  ;;  %v654_v15 = vadd.f32 1e-05, %v646_v13 }
 0x211   : > { %v637_v18 = vpop.xlane.xlu1 %636  ;;  %v639_v19 = vpop.xlane.xlu0 %638 }
 0x212   : > { %4366 = vrsqrt.f32 %v653_v14  ;;  %v647_v20 = vmul.f32 0.0078125, %v637_v18  ;;  %v648_v21 = vmul.f32 0.0078125, %v639_v19 }
 0x213   : > { %4368 = vrsqrt.f32 %v654_v15 }
 0x214   : > { %v4361_v22 = vpop.eup %4360  ;;  %v655_v25 = vadd.f32 1e-05, %v647_v20  ;;  %v656_v26 = vadd.f32 1e-05, %v648_v21 }
 0x215   : > { %v641_v27 = vpop.xlane.xlu1 %640  ;;  %v666_v28 = vmul.f32 %v4361_v22, %v5256_v16 }
 0x216   : > { %4370 = vrsqrt.f32 %v655_v25  ;;  %v649_v29 = vmul.f32 0.0078125, %v641_v27 }
 0x217   : > { %4372 = vrsqrt.f32 %v656_v26  ;;  %v680_v37 = vmul.f32 %v3583_v30, %v666_v28 }
 0x218   : > { %v4363_v33 = vpop.eup %4362  ;;  %v657_v34 = vadd.f32 1e-05, %v649_v29 }
 0x219   : > { %v4365_v35 = vpop.eup %4364  ;;  %v667_v36 = vmul.f32 %v4363_v33, %v5262_v23  ;;  %v694_v45 = vadd.f32 %v3584_v38, %v680_v37 }
 0x21a   : > { %4374 = vrsqrt.f32 %v657_v34  ;;  %v668_v41 = vmul.f32 %v4365_v35, %v5258_v17 }
 0x21b   : > { %v681_v42 = vmul.f32 %v3583_v30, %v667_v36 }
 0x21c   : > { %v4367_v43 = vpop.eup %4366  ;;  %v682_v16 = vmul.f32 %v3583_v30, %v668_v41 }
 0x21d   : > { %v4369_v44 = vpop.eup %4368  ;;  %v695_v46 = vadd.f32 %v3584_v38, %v681_v42  ;;  %v669_v47 = vmul.f32 %v4367_v43, %v5264_v24 }
 0x21e   : > { %v670_v48 = vmul.f32 %v4369_v44, %v5270_v31  ;;  %v696_v51 = vadd.f32 %v3584_v38, %v682_v16 }
 0x21f   : > { %v702_v49 = vpack.c.bf16 %v695_v46, %v694_v45  ;;  %v683_v23 = vmul.f32 %v3583_v30, %v669_v47 }
 0x220   : > { %v4371_v50 = vpop.eup %4370  ;;  %v684_v54 = vmul.f32 %v3583_v30, %v670_v48 }
 0x221   : > { %v4373_v52 = vpop.eup %4372  ;;  %916 = vmatmul.mubr.bf16.vlgmr.msra.gmra.mrb[0].mxu0 %v702_v49  ;;  %3895 = vmatprep.mubr.bf16.mxu1 %v702_v49  ;;  %v697_v53 = vadd.f32 %v3584_v38, %v683_v23  ;;  %v671_v17 = vmul.f32 %v4371_v50, %v5272_v32 }
 0x222   : > { %925 = vmatprep.mubr.bf16.mxu0 %v4885_v63  ;;  %v672_v55 = vmul.f32 %v4373_v52, %v5278_v39  ;;  %v698_v31 = vadd.f32 %v3584_v38, %v684_v54  ;;  %v4886_v39 = vmov 0.0  }
 0x223   : > { %v703_v56 = vpack.c.bf16 %v697_v53, %v696_v51  ;;  %v685_v57 = vmul.f32 %v3583_v30, %v671_v17  ;;  %3903 = vmatprep.subr.bf16.mxu1 %v4886_v39  ;;  %3915 = vmatprep.subr.bf16.mxu0 %v4886_v39 }
 0x224   : > { %v4375_v24 = vpop.eup %4374  ;;  %v686_v60 = vmul.f32 %v3583_v30, %v672_v55 }
 0x225   : > { %3896 = vmatmul.mubr.bf16.vlgmr.msra.gmra.mrb[0].mxu1 %v703_v56  ;;  %v699_v58 = vadd.f32 %v3584_v38, %v685_v57  ;;  %v673_v59 = vmul.f32 %v4375_v24, %v5280_v40  ;;  %v740_v40 = vlaneseq }
 0x226   : > { %v700_v0 = vadd.f32 %v3584_v38, %v686_v60 }
 0x227   : > { %v704_v61 = vpack.c.bf16 %v699_v58, %v698_v31  ;;  %v687_v62 = vmul.f32 %v3583_v30, %v673_v59  ;;  %v5309_v2 = vshrl.u32 %v740_v40, 7 }
 0x229   : > { %926 = vmatmul.mubr.bf16.gmra.mrb[4].mxu0 %v703_v56  ;;  %3899 = vmatprep.mubr.bf16.mxu1 %v704_v61  ;;  %v701_v32 = vadd.f32 %v3584_v38, %v687_v62  ;;  %v742_v3 = vsub.s32 0, %v5309_v2  ;;  %v746_v5 = vsub.s32 1, %v5309_v2  ;;  %v750_v6 = vsub.s32 2, %v5309_v2 }
 0x22a   : > { %935 = vmatprep.mubr.bf16.mxu0 %v4885_v63 }
 0x22b   : > { %v705_v1 = vpack.c.bf16 %v701_v32, %v700_v0  ;;  %v5319_v7 = vrot.slane %v738_v4, %v742_v3  ;;  %v5323_v9 = vrot.slane %v738_v4, %v746_v5  ;;  %v751_v11 = vrot.slane %v738_v4, %v750_v6 }
 0x22d   : > { %3900 = vmatmul.mubr.bf16.gmra.mrb[4].mxu1 %v705_v1 }
 0x22e   : > { %3905 = vmatprep.mubr.msk.bf16.mxu1 %vm4887_vm0, %v4886_v39 }
 0x231   : > { %936 = vmatmul.mubr.bf16.gmra.mrb[8].mxu0 %v704_v61 }
 0x232   : > { %945 = vmatprep.mubr.bf16.mxu0 %v4885_v63 }
 0x239   : > { %946 = vmatmul.mubr.bf16.gmra.mrb[12].mxu0 %v705_v1 }
 0x23a   : > { %3917 = vmatprep.mubr.msk.bf16.mxu0 %vm4887_vm0, %v4886_v39 }
 0x2f4   : > { %v917_v8 = vpop.f32.mrb[0].mxu0 }
 0x2f5   : > { %v919_v10 = vpop.f32.mrb[1].mxu0  ;;  %v918_v13 = vadd.f32 %v917_v8, %v5319_v7 }
 0x2f6   : > { %v921_v12 = vpop.f32.mrb[2].mxu0  ;;  %v920_v18 = vadd.f32 %v919_v10, %v5323_v9 }
 0x2f7   : > { %v922_v14 = vadd.f32 %v921_v12, %v5319_v7  ;;  %v923_v15 = vpop.f32.mrb[3].mxu0 }
 0x2f8   : > { %v924_v19 = vadd.f32 %v923_v15, %v5323_v9  ;;  %v3897_v20 = vpop.f32.mrb[0].mxu1 }
 0x2f9   : > { %v4165_v21 = vpack.i.bf16 %v922_v14, %v918_v13  ;;  %v1053_v22 = vpack.c.bf16 %v922_v14, %v918_v13  ;;  %v5331_v25 = vadd.f32 %v3897_v20, %v751_v11  ;;  %v990_v26 = vpop.f32.mrb[1].mxu1 }
 0x2fa   : > { %v4160_v27 = vpack.i.bf16 %v924_v19, %v920_v18  ;;  %v1093_v28 = vpack.c.bf16 %v924_v19, %v920_v18  ;;  %v3898_v29 = vpop.f32.mrb[2].mxu1  ;;  %v5336_v34 = vadd.f32 %v990_v26, %v751_v11 }
 0x2fb   : > { %v5333_v30 = vadd.f32 %v3898_v29, %v751_v11  ;;  %4166 = vrot.lane.b32.xlu1 %v4165_v21, %s4888_s21  ;;  %v993_v33 = vpop.f32.mrb[3].mxu1 }
 0x2fc   : > { %v5338_v35 = vadd.f32 %v993_v33, %v751_v11  ;;  %4161 = vrot.lane.b32.xlu0 %v4160_v27, %s4888_s21  ;;  %v927_v36 = vpop.f32.mrb[4].mxu0  ;;  %v1148_v37 = vsel %vm1143_vm1, %v1093_v28, 0 }
 0x2fd   : > { %v4205_v38 = vpack.i.bf16 %v5333_v30, %v5331_v25  ;;  %v1135_v41 = vpack.c.bf16 %v5333_v30, %v5331_v25  ;;  %v929_v42 = vpop.f32.mrb[5].mxu0  ;;  %3904 = vmatpush3.bf16.xpose.msra.mxu1 %v1148_v37  ;;  %v928_v45 = vadd.f32 %v927_v36, %v5319_v7 }
 0x2fe   : > { %v4200_v43 = vpack.i.bf16 %v5338_v35, %v5336_v34  ;;  %v1133_v16 = vpack.c.bf16 %v5338_v35, %v5336_v34  ;;  %v931_v44 = vpop.f32.mrb[6].mxu0  ;;  %3909 = vmatprep.subr.bf16.mxu1 %v4886_v39  ;;  %v930_v48 = vadd.f32 %v929_v42, %v5323_v9 }
 0x2ff   : > { %v932_v46 = vadd.f32 %v931_v44, %v5319_v7  ;;  %v933_v47 = vpop.f32.mrb[7].mxu0 }
 0x300   : > { %v934_v49 = vadd.f32 %v933_v47, %v5323_v9  ;;  %v3901_v23 = vpop.f32.mrb[4].mxu1 }
 0x301   : > { %v4175_v50 = vpack.i.bf16 %v932_v46, %v928_v45  ;;  %v1055_v51 = vpack.c.bf16 %v932_v46, %v928_v45  ;;  %v5355_v52 = vadd.f32 %v3901_v23, %v751_v11  ;;  %v1006_v53 = vpop.f32.mrb[5].mxu1 }
 0x302   : > { %v4170_v17 = vpack.i.bf16 %v934_v49, %v930_v48  ;;  %v1095_v54 = vpack.c.bf16 %v934_v49, %v930_v48  ;;  %v5357_v55 = vadd.f32 %v1006_v53, %v751_v11  ;;  %v3902_v56 = vpop.f32.mrb[6].mxu1 }
 0x303   : > { %v5359_v57 = vadd.f32 %v3902_v56, %v751_v11  ;;  %v1009_v24 = vpop.f32.mrb[7].mxu1 }
 0x304   : > { %v5361_v31 = vadd.f32 %v1009_v24, %v751_v11  ;;  %4171 = vrot.lane.b32.xlu1 %v4170_v17, %s4888_s21  ;;  %v937_v58 = vpop.f32.mrb[8].mxu0  ;;  %3906 = vmatmul.mubr.msk.bf16.vlgmr.msra.gmra.mrb[8].mxu1 %vm1143_vm1, %v1053_v22  ;;  %v1242_v59 = vsel %vm1143_vm1, %v1095_v54, 0 }
 0x305   : > { %v4215_v60 = vpack.i.bf16 %v5359_v57, %v5355_v52  ;;  %v1139_v61 = vpack.c.bf16 %v5359_v57, %v5355_v52  ;;  %v939_v62 = vpop.f32.mrb[9].mxu0  ;;  %3916 = vmatpush3.bf16.xpose.msra.mxu0 %v1242_v59  ;;  %3911 = vmatprep.mubr.msk.bf16.mxu1 %vm4887_vm0, %v4886_v39  ;;  %v938_v40 = vadd.f32 %v937_v58, %v5319_v7  ;;  %v4276_v52 = vld [vmem:[#allocation10 + $0x20] sm:$0xff]   ;;  %v4278_v57 = vld [vmem:[#allocation10 + $0x30] sm:$0xff]  }
 0x306   : > { %v4210_v0 = vpack.i.bf16 %v5361_v31, %v5357_v55  ;;  %v1137_v32 = vpack.c.bf16 %v5361_v31, %v5357_v55  ;;  %v941_v1 = vpop.f32.mrb[10].mxu0  ;;  %3927 = vmatprep.subr.bf16.mxu0 %v4886_v39  ;;  %v940_v10 = vadd.f32 %v939_v62, %v5323_v9 }
 0x307   : > { %v942_v4 = vadd.f32 %v941_v1, %v5319_v7  ;;  %v943_v8 = vpop.f32.mrb[11].mxu0 }
 0x308   : > { %v944_v11 = vadd.f32 %v943_v8, %v5323_v9  ;;  %4176 = vrot.lane.b32.xlu1 %v4175_v50, %s4888_s21 }
 0x309   : > { %v4185_v12 = vpack.i.bf16 %v942_v4, %v938_v40  ;;  %v1057_v13 = vpack.c.bf16 %v942_v4, %v938_v40 }
 0x30a   : > { %v4180_v14 = vpack.i.bf16 %v944_v11, %v940_v10  ;;  %v1097_v15 = vpack.c.bf16 %v944_v11, %v940_v10 }
 0x30c   : > { %4181 = vrot.lane.b32.xlu0 %v4180_v14, %s4888_s21  ;;  %4186 = vrot.lane.b32.xlu1 %v4185_v12, %s4888_s21  ;;  %v947_v18 = vpop.f32.mrb[12].mxu0  ;;  %v1336_v19 = vsel %vm1143_vm1, %v1097_v15, 0 }
 0x30d   : > { %3918 = vmatmul.mubr.msk.bf16.vlgmr.msra.gmra.mrb[16].mxu0 %vm1143_vm1, %v1055_v51  ;;  %v949_v20 = vpop.f32.mrb[13].mxu0  ;;  %v948_v22 = vadd.f32 %v947_v18, %v5319_v7 }
 0x30e   : > { %3928 = vmatpush3.bf16.xpose.msra.mxu0 %v1336_v19  ;;  %v951_v21 = vpop.f32.mrb[14].mxu0  ;;  %3929 = vmatprep.mubr.msk.bf16.mxu0 %vm4887_vm0, %v4886_v39  ;;  %v950_v28 = vadd.f32 %v949_v20, %v5323_v9 }
 0x30f   : > { %v952_v26 = vadd.f32 %v951_v21, %v5319_v7  ;;  %v953_v27 = vpop.f32.mrb[15].mxu0  ;;  %3939 = vmatprep.subr.bf16.mxu0 %v4886_v39 }
 0x310   : > { %v954_v29 = vadd.f32 %v953_v27, %v5323_v9 }
 0x311   : > { %v4195_v33 = vpack.i.bf16 %v952_v26, %v948_v22  ;;  %v1059_v36 = vpack.c.bf16 %v952_v26, %v948_v22 }
 0x312   : > { %v4190_v37 = vpack.i.bf16 %v954_v29, %v950_v28  ;;  %v1099_v42 = vpack.c.bf16 %v954_v29, %v950_v28 }
 0x313   : > { %4196 = vrot.lane.b32.xlu1 %v4195_v33, %s4888_s21 }
 0x314   : > { %4191 = vrot.lane.b32.xlu0 %v4190_v37, %s4888_s21  ;;  %v1430_v44 = vsel %vm1143_vm1, %v1099_v42, 0 }
 0x315   : > { %3930 = vmatmul.mubr.msk.bf16.vlgmr.msra.gmra.mrb[20].mxu0 %vm1143_vm1, %v1057_v13 }
 0x316   : > { %3940 = vmatpush3.bf16.xpose.msra.mxu0 %v1430_v44  ;;  %3941 = vmatprep.mubr.msk.bf16.mxu0 %vm4887_vm0, %v4886_v39 }
 0x317   : > { %3951 = vmatprep.subr.bf16.mxu0 %v4886_v39 }
 0x31d   : > { %3942 = vmatmul.mubr.msk.bf16.vlgmr.msra.gmra.mrb[24].mxu0 %vm1143_vm1, %v1059_v36 }
 0x31e   : > { %3952 = vmatpush3.bf16.msra.mxu0 %v1133_v16  ;;  %3953 = vmatprep.mubr.msk.bf16.mxu0 %vm4887_vm0, %v4886_v39 }
 0x31f   : > { %3963 = vmatprep.subr.bf16.mxu0 %v4886_v39 }
 0x36d   : > { %v4167_v47 = vpop.permute.xlu1 %4166 }
 0x36e   : > { %v4162_v7 = vpop.permute.xlu0 %4161  ;;  %v4169_v49 = vunpack.i.h.bf16 %v4167_v47  ;;  %v4168_v23 = vunpack.i.l.bf16 %v4167_v47 }
 0x36f   : > { %v4164_v9 = vunpack.i.h.bf16 %v4162_v7  ;;  %v4163_v45 = vunpack.i.l.bf16 %v4162_v7 }
 0x370   : > { %v1054_v53 = vpack.c.bf16 %v4169_v49, %v4168_v23 }
 0x371   : > { %v1094_v46 = vpack.c.bf16 %v4164_v9, %v4163_v45 }
 0x373   : > { %v1195_v48 = vsel %vm1143_vm1, %v1094_v46, 0 }
 0x374   : > { %3910 = vmatpush3.bf16.xpose.msra.mxu1 %v1195_v48 }
 0x375   : > { %3921 = vmatprep.subr.bf16.mxu1 %v4886_v39 }
 0x376   : > { %v4172_v50 = vpop.permute.xlu1 %4171 }
 0x377   : > { %v4174_v51 = vunpack.i.h.bf16 %v4172_v50  ;;  %v4173_v16 = vunpack.i.l.bf16 %v4172_v50 }
 0x379   : > { %v1096_v17 = vpack.c.bf16 %v4174_v51, %v4173_v16  ;;  %v1141_v51 = vld [vmem:[#allocation5] sm:$0xff] }
 0x37a   : > { %v4177_v54 = vpop.permute.xlu1 %4176 }
 0x37b   : > { %3912 = vmatmul.mubr.msk.bf16.vlgmr.msra.gmra.mrb[12].mxu1 %vm1143_vm1, %v1054_v53  ;;  %v1289_v56 = vsel %vm1143_vm1, %v1096_v17, 0  ;;  %v4179_v24 = vunpack.i.h.bf16 %v4177_v54  ;;  %v4178_v58 = vunpack.i.l.bf16 %v4177_v54  ;;  %v1142_v54 = vld [vmem:[#allocation5 + $0x8] sm:$0xff] }
 0x37c   : > { %3922 = vmatpush3.bf16.xpose.msra.mxu1 %v1289_v56  ;;  %3923 = vmatprep.mubr.msk.bf16.mxu1 %vm4887_vm0, %v4886_v39 }
 0x37d   : > { %3933 = vmatprep.subr.bf16.mxu1 %v4886_v39  ;;  %v1056_v40 = vpack.c.bf16 %v4179_v24, %v4178_v58 }
 0x37e   : > { %v4182_v59 = vpop.permute.xlu0 %4181  ;;  %v4187_v8 = vpop.permute.xlu1 %4186 }
 0x37f   : > { %v4184_v62 = vunpack.i.h.bf16 %v4182_v59  ;;  %v4183_v1 = vunpack.i.l.bf16 %v4182_v59  ;;  %v4189_v11 = vunpack.i.h.bf16 %v4187_v8  ;;  %v4188_v12 = vunpack.i.l.bf16 %v4187_v8 }
 0x381   : > { %v1098_v4 = vpack.c.bf16 %v4184_v62, %v4183_v1  ;;  %v1058_v18 = vpack.c.bf16 %v4189_v11, %v4188_v12 }
 0x383   : > { %3924 = vmatmul.mubr.msk.bf16.vlgmr.msra.gmra.mrb[16].mxu1 %vm1143_vm1, %v1056_v40  ;;  %v1383_v10 = vsel %vm1143_vm1, %v1098_v4, 0 }
 0x384   : > { %3934 = vmatpush3.bf16.xpose.msra.mxu1 %v1383_v10  ;;  %3935 = vmatprep.mubr.msk.bf16.mxu1 %vm4887_vm0, %v4886_v39 }
 0x385   : > { %3945 = vmatprep.subr.bf16.mxu1 %v4886_v39  ;;  %v4197_v20 = vpop.permute.xlu1 %4196 }
 0x386   : > { %v4192_v13 = vpop.permute.xlu0 %4191  ;;  %v4199_v22 = vunpack.i.h.bf16 %v4197_v20  ;;  %v4198_v26 = vunpack.i.l.bf16 %v4197_v20 }
 0x387   : > { %v4194_v14 = vunpack.i.h.bf16 %v4192_v13  ;;  %v4193_v15 = vunpack.i.l.bf16 %v4192_v13 }
 0x388   : > { %v1060_v27 = vpack.c.bf16 %v4199_v22, %v4198_v26 }
 0x389   : > { %v1100_v19 = vpack.c.bf16 %v4194_v14, %v4193_v15 }
 0x38b   : > { %3936 = vmatmul.mubr.msk.bf16.vlgmr.msra.gmra.mrb[20].mxu1 %vm1143_vm1, %v1058_v18  ;;  %v1477_v21 = vsel %vm1143_vm1, %v1100_v19, 0 }
 0x38c   : > { %3946 = vmatpush3.bf16.xpose.msra.mxu1 %v1477_v21  ;;  %3947 = vmatprep.mubr.msk.bf16.mxu1 %vm4887_vm0, %v4886_v39 }
 0x38d   : > { %3957 = vmatprep.subr.bf16.mxu1 %v4886_v39 }
 0x393   : > { %3948 = vmatmul.mubr.msk.bf16.vlgmr.msra.gmra.mrb[24].mxu1 %vm1143_vm1, %v1060_v27 }
 0x394   : > { %3959 = vmatprep.mubr.msk.bf16.mxu1 %vm4887_vm0, %v4886_v39 }
 0x3d7   : > { %v1184_v28 = vpop.f32.mrb[8].mxu1 }
 0x3d8   : > { %v3907_v29 = vpop.f32.mrb[9].mxu1  ;;  %v5453_v19 = vadd.f32 %v1184_v28, %v1141_v51 }
 0x3d9   : > { %v1187_v33 = vpop.f32.mrb[10].mxu1 }
 0x3da   : > { %v3908_v36 = vpop.f32.mrb[11].mxu1  ;;  %v5437_v62 = vadd.f32 %v1187_v33, %v1142_v54 }
 0x3db   : > { %v1521_v36 = vsel %vm1520_vm2, %v5453_v19, -inf }
 0x3dc   : > { %v1524_v11 = vsel %vm1520_vm2, %v5437_v62, -inf }
 0x3e0   : > { %v1278_v37 = vpop.f32.mrb[16].mxu0 }
 0x3e1   : > { %v3919_v42 = vpop.f32.mrb[17].mxu0 }
 0x3e2   : > { %v1281_v44 = vpop.f32.mrb[18].mxu0 }
 0x3e3   : > { %v3920_v7 = vpop.f32.mrb[19].mxu0  ;;  %v5441_v4 = vadd.f32 %v1281_v44, %v1142_v54  ;;  %v5467_v44 = vadd.f32 %v1278_v37, %v1141_v51 }
 0x3e5   : > { %v1536_v18 = vsel %vm1520_vm2, %v5441_v4, -inf  ;;  %v1533_v37 = vsel %vm1520_vm2, %v5467_v44, -inf }
 0x3e8   : > { %v5427_v9 = vpop.f32.mrb[20].mxu0 }
 0x3e9   : > { %v3931_v45 = vpop.f32.mrb[21].mxu0 }
 0x3ea   : > { %v1375_v46 = vpop.f32.mrb[22].mxu0 }
 0x3eb   : > { %v3932_v47 = vpop.f32.mrb[23].mxu0  ;;  %v5463_v42 = vadd.f32 %v1375_v46, %v1142_v54 }
 0x3f0   : > { %v5429_v48 = vpop.f32.mrb[24].mxu0 }
 0x3f1   : > { %v3943_v49 = vpop.f32.mrb[25].mxu0 }
 0x3f2   : > { %v1469_v23 = vpop.f32.mrb[26].mxu0 }
 0x3f3   : > { %v3944_v50 = vpop.f32.mrb[27].mxu0  ;;  %v5471_v47 = vadd.f32 %v1469_v23, %v1142_v54  ;;  %v5484_v23 = vadd.f32 %v5427_v9, %v1141_v51 }
 0x3f4   : > { %v1548_v50 = vsel %vm1520_vm2, %v5463_v42, -inf }
 0x44e   : > { %v1231_v16 = vpop.f32.mrb[12].mxu1 }
 0x44f   : > { %v5431_v53 = vadd.f32 %v1231_v16, %v1141_v51  ;;  %v3913_v17 = vpop.f32.mrb[13].mxu1 }
 0x450   : > { %v1234_v56 = vpop.f32.mrb[14].mxu1 }
 0x451   : > { %v5433_v24 = vadd.f32 %v1234_v56, %v1142_v54  ;;  %v3914_v58 = vpop.f32.mrb[15].mxu1  ;;  %v1527_v59 = vsel %vm1520_vm2, %v5431_v53, -inf }
 0x452   : > { %1528 = vmax.xlane.f32.xlu0 %v1527_v59  ;;  %v1560_v58 = vsel %vm1520_vm2, %v5471_v47, -inf }
 0x453   : > { %v1530_v1 = vsel %vm1520_vm2, %v5433_v24, -inf }
 0x454   : > { %1531 = vmax.xlane.f32.xlu1 %v1530_v1 }
 0x456   : > { %v1325_v40 = vpop.f32.mrb[16].mxu1 }
 0x457   : > { %v5443_v8 = vadd.f32 %v1325_v40, %v1141_v51  ;;  %v3925_v10 = vpop.f32.mrb[17].mxu1  ;;  %v5491_v40 = vadd.f32 %v5429_v48, %v1141_v51 }
 0x458   : > { %1525 = vmax.xlane.f32.xlu1 %v1524_v11  ;;  %v1328_v12 = vpop.f32.mrb[18].mxu1 }
 0x459   : > { %v5447_v13 = vadd.f32 %v1328_v12, %v1142_v54  ;;  %v3926_v14 = vpop.f32.mrb[19].mxu1  ;;  %v1539_v15 = vsel %vm1520_vm2, %v5443_v8, -inf  ;;  %v1557_v10 = vsel %vm1520_vm2, %v5491_v40, -inf }
 0x45a   : > { %1540 = vmax.xlane.f32.xlu0 %v1539_v15 }
 0x45b   : > { %v1542_v20 = vsel %vm1520_vm2, %v5447_v13, -inf }
 0x45c   : > { %1537 = vmax.xlane.f32.xlu1 %v1536_v18 }
 0x45e   : > { %1543 = vmax.xlane.f32.xlu0 %v1542_v20  ;;  %v1419_v21 = vpop.f32.mrb[20].mxu1 }
 0x45f   : > { %v3937_v22 = vpop.f32.mrb[21].mxu1  ;;  %v5457_v27 = vadd.f32 %v1419_v21, %v1141_v51 }
 0x460   : > { %v1422_v26 = vpop.f32.mrb[22].mxu1 }
 0x461   : > { %v5459_v29 = vadd.f32 %v1422_v26, %v1142_v54  ;;  %v3938_v33 = vpop.f32.mrb[23].mxu1  ;;  %v1551_v7 = vsel %vm1520_vm2, %v5457_v27, -inf }
 0x462   : > { %1522 = vmax.xlane.f32.xlu0 %v1521_v36 }
 0x463   : > { %v1554_v28 = vsel %vm1520_vm2, %v5459_v29, -inf }
 0x464   : > { %1555 = vmax.xlane.f32.xlu1 %v1554_v28 }
 0x466   : > { %1552 = vmax.xlane.f32.xlu0 %v1551_v7  ;;  %v1513_v45 = vpop.f32.mrb[24].mxu1 }
 0x467   : > { %v3949_v49 = vpop.f32.mrb[25].mxu1  ;;  %v5475_v16 = vadd.f32 %v1513_v45, %v1141_v51 }
 0x468   : > { %1549 = vmax.xlane.f32.xlu1 %v1548_v50  ;;  %v1516_v46 = vpop.f32.mrb[26].mxu1 }
 0x469   : > { %v3950_v17 = vpop.f32.mrb[27].mxu1  ;;  %v5479_v56 = vadd.f32 %v1516_v46, %v1142_v54  ;;  %v1563_v59 = vsel %vm1520_vm2, %v5475_v16, -inf  ;;  %v1545_v54 = vsel %vm1520_vm2, %v5484_v23, -inf }
 0x46a   : > { %1534 = vmax.xlane.f32.xlu0 %v1533_v37 }
 0x46b   : > { %v1566_v1 = vsel %vm1520_vm2, %v5479_v56, -inf }
 0x46c   : > { %1561 = vmax.xlane.f32.xlu1 %v1560_v58 }
 0x46e   : > { %1564 = vmax.xlane.f32.xlu0 %v1563_v59 }
 0x470   : > { %1567 = vmax.xlane.f32.xlu1 %v1566_v1 }
 0x472   : > { %1546 = vmax.xlane.f32.xlu0 %v1545_v54 }
 0x476   : > { %1558 = vmax.xlane.f32.xlu0 %v1557_v10 }
 0x481   : > { %4206 = vrot.lane.b32.xlu1 %v4205_v38, %s4888_s21 }
 0x48c   : > { %4201 = vrot.lane.b32.xlu0 %v4200_v43, %s4888_s21 }
 0x4df   : > { %v1529_v9 = vpop.xlane.xlu0 %1528 }
 0x4e0   : > { %v1571_v48 = vsub.f32 %v5431_v53, %v1529_v9 }
 0x4e1   : > { %v1532_v51 = vpop.xlane.xlu1 %1531 }
 0x4e2   : > { %v1589_v11 = vmul.f32 1.442695, %v1571_v48  ;;  %v1572_v12 = vsub.f32 %v5433_v24, %v1532_v51 }
 0x4e4   : > { %4376 = vpow2.f32 %v1589_v11  ;;  %v1591_v14 = vmul.f32 1.442695, %v1572_v12 }
 0x4e5   : > { %v5507_v15 = vpop.xlane.xlu1 %1525 }
 0x4e6   : > { %4378 = vpow2.f32 %v1591_v14 }
 0x4e7   : > { %v1541_v18 = vpop.xlane.xlu0 %1540 }
 0x4e8   : > { %v1575_v38 = vsub.f32 %v5443_v8, %v1541_v18 }
 0x4e9   : > { %v5511_v35 = vpop.xlane.xlu1 %1537 }
 0x4ea   : > { %v1597_v20 = vmul.f32 1.442695, %v1575_v38 }
 0x4eb   : > { %v1544_v21 = vpop.xlane.xlu0 %1543 }
 0x4ec   : > { %4380 = vpow2.f32 %v1597_v20  ;;  %v1576_v34 = vsub.f32 %v5447_v13, %v1544_v21 }
 0x4ee   : > { %v5513_v43 = vpop.eup %4376  ;;  %v1599_v53 = vmul.f32 1.442695, %v1576_v34 }
 0x4ef   : > { %v1523_v22 = vpop.xlane.xlu0 %1522  ;;  %v1623_v24 = vsel %vm1520_vm2, %v5513_v43, 0.0 }
 0x4f0   : > { %v5517_v26 = vpop.eup %4378  ;;  %4382 = vpow2.f32 %v1599_v53  ;;  %1624 = vadd.xlane.f32.xlu0 %v1623_v24 }
 0x4f1   : > { %v1556_v33 = vpop.xlane.xlu1 %1555  ;;  %v1626_v8 = vsel %vm1520_vm2, %v5517_v26, 0.0 }
 0x4f2   : > { %v1580_v36 = vsub.f32 %v5459_v29, %v1556_v33  ;;  %1627 = vadd.xlane.f32.xlu1 %v1626_v8  ;;  %v1569_v33 = vsub.f32 %v5453_v19, %v1523_v22 }
 0x4f3   : > { %v1553_v13 = vpop.xlane.xlu0 %1552 }
 0x4f4   : > { %v1607_v28 = vmul.f32 1.442695, %v1580_v36  ;;  %v1579_v7 = vsub.f32 %v5457_v27, %v1553_v13  ;;  %v1585_v8 = vmul.f32 1.442695, %v1569_v33  ;;  %v1574_v13 = vsub.f32 %v5441_v4, %v5511_v35 }
 0x4f5   : > { %v1550_v45 = vpop.xlane.xlu1 %1549 }
 0x4f6   : > { %v5523_v49 = vpop.eup %4380  ;;  %4384 = vpow2.f32 %v1607_v28  ;;  %v1605_v50 = vmul.f32 1.442695, %v1579_v7  ;;  %v1570_v7 = vsub.f32 %v5437_v62, %v5507_v15 }
 0x4f7   : > { %v1535_v46 = vpop.xlane.xlu0 %1534  ;;  %v1635_v17 = vsel %vm1520_vm2, %v5523_v49, 0.0 }
 0x4f8   : > { %4386 = vpow2.f32 %v1605_v50  ;;  %1636 = vadd.xlane.f32.xlu0 %v1635_v17  ;;  %v1573_v36 = vsub.f32 %v5467_v44, %v1535_v46  ;;  %v1595_v50 = vmul.f32 1.442695, %v1574_v13  ;;  %v1587_v17 = vmul.f32 1.442695, %v1570_v7 }
 0x4f9   : > { %v1562_v37 = vpop.xlane.xlu1 %1561 }
 0x4fa   : > { %v5527_v58 = vpop.eup %4382  ;;  %v1593_v28 = vmul.f32 1.442695, %v1573_v36  ;;  %v1582_v35 = vsub.f32 %v5471_v47, %v1562_v37 }
 0x4fb   : > { %v1565_v29 = vpop.xlane.xlu0 %1564  ;;  %v1638_v59 = vsel %vm1520_vm2, %v5527_v58, 0.0 }
 0x4fc   : > { %v1583_v27 = vsub.f32 %v5475_v16, %v1565_v29  ;;  %1639 = vadd.xlane.f32.xlu1 %v1638_v59 }
 0x4fd   : > { %v1568_v1 = vpop.xlane.xlu1 %1567 }
 0x4fe   : > { %v1613_v54 = vmul.f32 1.442695, %v1583_v27  ;;  %v1584_v10 = vsub.f32 %v5479_v56, %v1568_v1 }
 0x4ff   : > { %v1547_v9 = vpop.xlane.xlu0 %1546 }
 0x500   : > { %v5533_v48 = vpop.eup %4384  ;;  %4388 = vpow2.f32 %v1613_v54  ;;  %v1615_v51 = vmul.f32 1.442695, %v1584_v10 }
 0x501   : > { %v1650_v11 = vsel %vm1520_vm2, %v5533_v48, 0.0 }
 0x502   : > { %v5537_v12 = vpop.eup %4386  ;;  %4390 = vpow2.f32 %v1615_v51  ;;  %1651 = vadd.xlane.f32.xlu1 %v1650_v11  ;;  %v4207_v11 = vpop.permute.xlu1 %4206 }
 0x503   : > { %v1559_v14 = vpop.xlane.xlu0 %1558  ;;  %v1647_v16 = vsel %vm1520_vm2, %v5537_v12, 0.0  ;;  %4392 = vpow2.f32 %v1585_v8 }
 0x504   : > { %1648 = vadd.xlane.f32.xlu0 %v1647_v16  ;;  %4394 = vpow2.f32 %v1593_v28  ;;  %v1581_v22 = vsub.f32 %v5491_v40, %v1559_v14 }
 0x505   : > { %4396 = vpow2.f32 %v1595_v50 }
 0x506   : > { %4398 = vpow2.f32 %v1587_v17  ;;  %v1609_v46 = vmul.f32 1.442695, %v1581_v22 }
 0x507   : > { %v4202_v18 = vpop.permute.xlu0 %4201 }
 0x508   : > { %v4204_v38 = vunpack.i.h.bf16 %v4202_v18  ;;  %v4203_v56 = vunpack.i.l.bf16 %v4202_v18 }
 0x50a   : > { %v5541_v20 = vpop.eup %4388  ;;  %v1134_v21 = vpack.c.bf16 %v4204_v38, %v4203_v56 }
 0x50b   : > { %v1659_v34 = vsel %vm1520_vm2, %v5541_v20, 0.0 }
 0x50c   : > { %v5545_v53 = vpop.eup %4390  ;;  %3958 = vmatpush3.bf16.msra.mxu1 %v1134_v21  ;;  %1660 = vadd.xlane.f32.xlu1 %v1659_v34  ;;  %v4209_v34 = vunpack.i.h.bf16 %v4207_v11 }
 0x50d   : > { %3969 = vmatprep.subr.bf16.mxu1 %v4886_v39  ;;  %v1662_v24 = vsel %vm1520_vm2, %v5545_v53, 0.0  ;;  %v5567_v44 = vpop.eup %4392 }
 0x50e   : > { %v1617_v62 = vsel %vm1520_vm2, %v5567_v44, 0.0  ;;  %v5572_v15 = vpop.eup %4394 }
 0x50f   : > { %v5576_v40 = vpop.eup %4396 }
 0x510   : > { %1663 = vadd.xlane.f32.xlu1 %v1662_v24  ;;  %v1632_v47 = vsel %vm1520_vm2, %v5576_v40, 0.0  ;;  %v4208_v24 = vunpack.i.l.bf16 %v4207_v11 }
 0x512   : > { %v1136_v13 = vpack.c.bf16 %v4209_v34, %v4208_v24 }
 0x51a   : > { %4211 = vrot.lane.b32.xlu0 %v4210_v0, %s4888_s21  ;;  %v1577_v0 = vsub.f32 %v5484_v23, %v1547_v9  ;;  %v1629_v23 = vsel %vm1520_vm2, %v5572_v15, 0.0 }
 0x51c   : > { %v1601_v19 = vmul.f32 1.442695, %v1577_v0 }
 0x51e   : > { %4400 = vpow2.f32 %v1601_v19 }
 0x521   : > { %4216 = vrot.lane.b32.xlu1 %v4215_v60, %s4888_s21  ;;  %v1578_v60 = vsub.f32 %v5463_v42, %v1550_v45  ;;  %v1611_v42 = vmul.f32 1.442695, %v1582_v35  ;;  %v5578_v45 = vpop.eup %4398 }
 0x522   : > { %v1620_v27 = vsel %vm1520_vm2, %v5578_v45, 0.0 }
 0x523   : > { %v1603_v4 = vmul.f32 1.442695, %v1578_v60 }
 0x525   : > { %4402 = vpow2.f32 %v1603_v4 }
 0x526   : > { %4404 = vpow2.f32 %v1609_v46 }
 0x527   : > { %4406 = vpow2.f32 %v1611_v42 }
 0x528   : > { %v5582_v37 = vpop.eup %4400 }
 0x529   : > { %v1641_v59 = vsel %vm1520_vm2, %v5582_v37, 0.0 }
 0x52f   : > { %v5584_v29 = vpop.eup %4402 }
 0x530   : > { %v5590_v1 = vpop.eup %4404  ;;  %v1644_v10 = vsel %vm1520_vm2, %v5584_v29, 0.0 }
 0x531   : > { %v1653_v54 = vsel %vm1520_vm2, %v5590_v1, 0.0  ;;  %v5596_v9 = vpop.eup %4406 }
 0x532   : > { %v1656_v51 = vsel %vm1520_vm2, %v5596_v9, 0.0 }
 0x539   : > { %1618 = vadd.xlane.f32.xlu0 %v1617_v62 }
 0x53d   : > { %1630 = vadd.xlane.f32.xlu0 %v1629_v23 }
 0x541   : > { %1633 = vadd.xlane.f32.xlu0 %v1632_v47 }
 0x545   : > { %1642 = vadd.xlane.f32.xlu0 %v1641_v59  ;;  %1621 = vadd.xlane.f32.xlu1 %v1620_v27 }
 0x549   : > { %1654 = vadd.xlane.f32.xlu0 %v1653_v54  ;;  %1645 = vadd.xlane.f32.xlu1 %v1644_v10 }
 0x54d   : > { %1657 = vadd.xlane.f32.xlu1 %v1656_v51 }
 0x57d   : > { %v1625_v14 = vpop.xlane.xlu0 %1624 }
 0x57e   : > { %4408 = vrcp.f32 %v1625_v14 }
 0x57f   : > { %v1628_v16 = vpop.xlane.xlu1 %1627 }
 0x580   : > { %4410 = vrcp.f32 %v1628_v16 }
 0x585   : > { %v1637_v18 = vpop.xlane.xlu0 %1636 }
 0x586   : > { %4412 = vrcp.f32 %v1637_v18 }
 0x588   : > { %v4409_v38 = vpop.eup %4408 }
 0x589   : > { %v1640_v56 = vpop.xlane.xlu1 %1639  ;;  %v1683_v33 = vmul.f32 %v4409_v38, %v5513_v43 }
 0x58a   : > { %v4411_v21 = vpop.eup %4410  ;;  %4414 = vrcp.f32 %v1640_v56 }
 0x58b   : > { %v1684_v8 = vmul.f32 %v4411_v21, %v5517_v26 }
 0x58d   : > { %v1698_v36 = vpack.c.bf16 %v1684_v8, %v1683_v33 }
 0x58f   : > { %3960 = vmatmul.mubr.msk.bf16.vlgmr.msra.gmra.mrb[28].mxu1 %vm1520_vm2, %v1698_v36  ;;  %v1652_v28 = vpop.xlane.xlu1 %1651 }
 0x590   : > { %4416 = vrcp.f32 %v1652_v28  ;;  %3970 = vmatpush3.bf16.msra.mxu1 %v1136_v13  ;;  %3971 = vmatprep.mubr.msk.bf16.mxu1 %vm4887_vm0, %v4886_v39  ;;  %v4413_v50 = vpop.eup %4412 }
 0x591   : > { %v1649_v7 = vpop.xlane.xlu0 %1648  ;;  %3981 = vmatprep.subr.bf16.mxu1 %v4886_v39  ;;  %v1687_v43 = vmul.f32 %v4413_v50, %v5523_v49 }
 0x592   : > { %4418 = vrcp.f32 %v1649_v7 }
 0x594   : > { %v4415_v0 = vpop.eup %4414 }
 0x595   : > { %v1688_v26 = vmul.f32 %v4415_v0, %v5527_v58  ;;  %v4212_v17 = vpop.permute.xlu0 %4211 }
 0x596   : > { %v4214_v60 = vunpack.i.h.bf16 %v4212_v17  ;;  %v4213_v19 = vunpack.i.l.bf16 %v4212_v17 }
 0x597   : > { %v1700_v22 = vpack.c.bf16 %v1688_v26, %v1687_v43  ;;  %v4274_v43 = vld [vmem:[#allocation10 + $0x10] sm:$0xff]   ;;  %v4275_v26 = vld [vmem:[#allocation10 + $0x18] sm:$0xff]  }
 0x598   : > { %v1138_v4 = vpack.c.bf16 %v4214_v60, %v4213_v19  ;;  %v4279_v19 = vld [vmem:[#allocation10 + $0x38] sm:$0xff]  }
 0x599   : > { %v1661_v35 = vpop.xlane.xlu1 %1660  ;;  %3972 = vmatmul.mubr.msk.bf16.vlgmr.msra.gmra.mrb[32].mxu1 %vm1520_vm2, %v1700_v22 }
 0x59a   : > { %v4417_v46 = vpop.eup %4416  ;;  %3982 = vmatpush3.bf16.msra.mxu1 %v1138_v4  ;;  %3983 = vmatprep.mubr.msk.bf16.mxu1 %vm4887_vm0, %v4886_v39  ;;  %4420 = vrcp.f32 %v1661_v35 }
 0x59b   : > { %3993 = vmatprep.subr.bf16.mxu1 %v4886_v39  ;;  %v1692_v49 = vmul.f32 %v4417_v46, %v5533_v48 }
 0x59c   : > { %v4419_v62 = vpop.eup %4418 }
 0x59d   : > { %v1691_v58 = vmul.f32 %v4419_v62, %v5537_v12  ;;  %v1664_v42 = vpop.xlane.xlu1 %1663 }
 0x59e   : > { %4422 = vrcp.f32 %v1664_v42 }
 0x59f   : > { %v1702_v23 = vpack.c.bf16 %v1692_v49, %v1691_v58 }
 0x5a1   : > { %v4217_v47 = vpop.permute.xlu1 %4216  ;;  %3984 = vmatmul.mubr.msk.bf16.vlgmr.msra.gmra.mrb[36].mxu1 %vm1520_vm2, %v1702_v23 }
 0x5a2   : > { %v4219_v59 = vunpack.i.h.bf16 %v4217_v47  ;;  %v4218_v27 = vunpack.i.l.bf16 %v4217_v47  ;;  %3995 = vmatprep.mubr.msk.bf16.mxu1 %vm4887_vm0, %v4886_v39 }
 0x5a4   : > { %v1140_v54 = vpack.c.bf16 %v4219_v59, %v4218_v27  ;;  %v4421_v10 = vpop.eup %4420 }
 0x5a5   : > { %v1695_v11 = vmul.f32 %v4421_v10, %v5541_v20 }
 0x5a6   : > { %3994 = vmatpush3.bf16.msra.mxu1 %v1140_v54 }
 0x5a8   : > { %v4423_v51 = vpop.eup %4422 }
 0x5a9   : > { %v1696_v48 = vmul.f32 %v4423_v51, %v5545_v53 }
 0x5ab   : > { %v1704_v12 = vpack.c.bf16 %v1696_v48, %v1695_v11 }
 0x5ad   : > { %3996 = vmatmul.mubr.msk.bf16.vlgmr.msra.gmra.mrb[40].mxu1 %vm1520_vm2, %v1704_v12 }
 0x5ae   : > { %2621 = vmatprep.mubr.bf16.mxu1 %v4885_v63 }
 0x5c6   : > { %v1619_v14 = vpop.xlane.xlu0 %1618 }
 0x5c7   : > { %4424 = vrcp.f32 %v1619_v14 }
 0x5ca   : > { %v1631_v16 = vpop.xlane.xlu0 %1630 }
 0x5ce   : > { %v1634_v38 = vpop.xlane.xlu0 %1633 }
 0x5d1   : > { %v4425_v56 = vpop.eup %4424 }
 0x5d2   : > { %v1622_v18 = vpop.xlane.xlu1 %1621  ;;  %v1681_v20 = vmul.f32 %v4425_v56, %v5567_v44  ;;  %v1643_v24 = vpop.xlane.xlu0 %1642 }
 0x5d3   : > { %4426 = vrcp.f32 %v1622_v18 }
 0x5d4   : > { %4428 = vrcp.f32 %v1634_v38 }
 0x5d5   : > { %4430 = vrcp.f32 %v1631_v16 }
 0x5d6   : > { %v1646_v21 = vpop.xlane.xlu1 %1645  ;;  %v1655_v28 = vpop.xlane.xlu0 %1654 }
 0x5d7   : > { %4432 = vrcp.f32 %v1646_v21 }
 0x5d8   : > { %4434 = vrcp.f32 %v1643_v24 }
 0x5da   : > { %v1658_v44 = vpop.xlane.xlu1 %1657 }
 0x5db   : > { %4436 = vrcp.f32 %v1658_v44 }
 0x5dc   : > { %4438 = vrcp.f32 %v1655_v28 }
 0x5dd   : > { %v4427_v34 = vpop.eup %4426 }
 0x5de   : > { %v1682_v53 = vmul.f32 %v4427_v34, %v5578_v45  ;;  %v4429_v8 = vpop.eup %4428 }
 0x5df   : > { %v4431_v36 = vpop.eup %4430  ;;  %v1686_v13 = vmul.f32 %v4429_v8, %v5576_v40 }
 0x5e0   : > { %v1697_v33 = vpack.c.bf16 %v1682_v53, %v1681_v20  ;;  %v1685_v45 = vmul.f32 %v4431_v36, %v5572_v15 }
 0x5e1   : > { %v4433_v50 = vpop.eup %4432 }
 0x5e2   : > { %3954 = vmatmul.mubr.msk.bf16.vlgmr.msra.gmra.mrb[28].mxu0 %vm1520_vm2, %v1697_v33  ;;  %v1699_v7 = vpack.c.bf16 %v1686_v13, %v1685_v45  ;;  %v4435_v0 = vpop.eup %4434  ;;  %v1690_v25 = vmul.f32 %v4433_v50, %v5584_v29  ;;  %v4273_v29 = vld [vmem:[#allocation10 + $0x8] sm:$0xff]  }
 0x5e3   : > { %3964 = vmatpush3.bf16.msra.mxu0 %v1135_v41  ;;  %3965 = vmatprep.mubr.msk.bf16.mxu0 %vm4887_vm0, %v4886_v39  ;;  %v1689_v30 = vmul.f32 %v4435_v0, %v5582_v37  ;;  %v4272_v37 = vld [vmem:[#allocation10] sm:$0xff]  }
 0x5e4   : > { %3975 = vmatprep.subr.bf16.mxu0 %v4886_v39 }
 0x5e5   : > { %v1701_v41 = vpack.c.bf16 %v1690_v25, %v1689_v30  ;;  %v4437_v15 = vpop.eup %4436 }
 0x5e6   : > { %v4439_v40 = vpop.eup %4438  ;;  %v1694_v55 = vmul.f32 %v4437_v15, %v5596_v9 }
 0x5e7   : > { %v1693_v31 = vmul.f32 %v4439_v40, %v5590_v1 }
 0x5ea   : > { %3966 = vmatmul.mubr.msk.bf16.vlgmr.msra.gmra.mrb[32].mxu0 %vm1520_vm2, %v1699_v7 }
 0x5eb   : > { %3976 = vmatpush3.bf16.msra.mxu0 %v1137_v32  ;;  %3977 = vmatprep.mubr.msk.bf16.mxu0 %vm4887_vm0, %v4886_v39  ;;  %v1703_v32 = vpack.c.bf16 %v1694_v55, %v1693_v31 }
 0x5ec   : > { %3987 = vmatprep.subr.bf16.mxu0 %v4886_v39 }
 0x5f2   : > { %3978 = vmatmul.mubr.msk.bf16.vlgmr.msra.gmra.mrb[36].mxu0 %vm1520_vm2, %v1701_v41 }
 0x5f3   : > { %3988 = vmatpush3.bf16.msra.mxu0 %v1139_v61  ;;  %3989 = vmatprep.mubr.msk.bf16.mxu0 %vm4887_vm0, %v4886_v39  ;;  %v4277_v39 = vld [vmem:[#allocation10 + $0x28] sm:$0xff]  }
 0x5f4   : > { %3999 = vmatprep.subr.bf16.mxu0 %v4272_v37 }
 0x5fa   : > { %3990 = vmatmul.mubr.msk.bf16.vlgmr.msra.gmra.mrb[40].mxu0 %vm1520_vm2, %v1703_v32 }
 0x5fb   : > { %4000 = vmatpush3.bf16.msra.mxu0 %v4272_v37 }
 0x5fc   : > { %4001 = vmatprep.subr.bf16.mxu0 %v4273_v29 }
 0x5ff   : > { %4002 = vmatpush3.bf16.msra.mxu0 %v4273_v29 }
 0x600   : > { %4003 = vmatprep.subr.bf16.mxu0 %v4274_v43 }
 0x603   : > { %4004 = vmatpush3.bf16.msra.mxu0 %v4274_v43 }
 0x604   : > { %4005 = vmatprep.subr.bf16.mxu0 %v4275_v26 }
 0x607   : > { %4006 = vmatpush3.bf16.msra.mxu0 %v4275_v26 }
 0x608   : > { %4007 = vmatprep.subr.bf16.mxu0 %v4276_v52 }
 0x60b   : > { %4008 = vmatpush3.bf16.msra.mxu0 %v4276_v52 }
 0x60c   : > { %4009 = vmatprep.subr.bf16.mxu0 %v4277_v39 }
 0x60f   : > { %4010 = vmatpush3.bf16.msra.mxu0 %v4277_v39 }
 0x610   : > { %4011 = vmatprep.subr.bf16.mxu0 %v4278_v57 }
 0x613   : > { %4012 = vmatpush3.bf16.msra.mxu0 %v4278_v57 }
 0x614   : > { %4013 = vmatprep.subr.bf16.mxu0 %v4279_v19 }
 0x617   : > { %4014 = vmatpush3.bf16.msra.mxu0 %v4279_v19  ;;  %v4584_v19 = vld [vmem:[%s5230_s14] sm:$0xff] }
 0x662   : > { %v1786_v61 = vpop.f32.mrb[28].mxu1 }
 0x663   : > { %v3961_v1 = vpop.f32.mrb[29].mxu1 }
 0x664   : > { %v1789_v9 = vpop.f32.mrb[30].mxu1 }
 0x665   : > { %v4220_v17 = vpack.i.bf16 %v1789_v9, %v1786_v61  ;;  %v3962_v60 = vpop.f32.mrb[31].mxu1 }
 0x667   : > { %4221 = vrot.lane.b32.xlu0 %v4220_v17, %s4888_s21  ;;  %v3633_v17 = vld [vmem:[%s6195_s17] ss:$0 sm:$0xff]  ;;  %s6051_s17 = scalar_lea.vmem [#allocation14], %s3575_s26  ;;  %s3742_s26 = sshll.u32 %s4988_s19, 10 }
 0x668   : > { %s3431_s25 = sshll.u32 %s6051_s17, 4  ;;  %s6078_s25 = int_to_ptr.vmem [resolvable:$true] %s3431_s25 }
 0x669   : > { %s4790_s19 = scalar_lea.vmem %s6078_s25, 1024  ;;  %p4797_p11 = scmp.lt.s32.totalorder %s6078_s25, %s4795_s28 }
 0x66a   : > { %p4791_p6 = scmp.ne.s32.totalorder %s6078_s25, %s4790_s19 }
 0x66c   : > { %v1874_v22 = vpop.f32.mrb[32].mxu1  ;;  %p4792_p10 = pnand %p4791_p6, %p6243_p5 }
 0x66d   : > { %v3973_v4 = vpop.f32.mrb[33].mxu1 }
 0x66e   : > { %v1877_v35 = vpop.f32.mrb[34].mxu1  ;;  %p4793_p1 = pneg %p4792_p10 }
 0x66f   : > { %v4225_v46 = vpack.i.bf16 %v1877_v35, %v1874_v22  ;;  %v3974_v62 = vpop.f32.mrb[35].mxu1 }
 0x671   : > { %4226 = vrot.lane.b32.xlu1 %v4225_v46, %s4888_s21  ;;  %v4585_v46 = vld [vmem:[%s5230_s14 + $0x10] sm:$0xff] }
 0x674   : > { %v1962_v49 = vpop.f32.mrb[36].mxu1 }
 0x675   : > { %v3985_v58 = vpop.f32.mrb[37].mxu1 }
 0x676   : > { %v1965_v42 = vpop.f32.mrb[38].mxu1  ;;  %v4586_v58 = vld [vmem:[%s5230_s14 + $0x8] sm:$0xff] }
 0x677   : > { %v4230_v23 = vpack.i.bf16 %v1965_v42, %v1962_v49  ;;  %v3986_v47 = vpop.f32.mrb[39].mxu1 }
 0x679   : > { %4231 = vrot.lane.b32.xlu1 %v4230_v23, %s4888_s21 }
 0x680   : > { %v2050_v59 = vpop.f32.mrb[40].mxu1 }
 0x681   : > { %v3997_v27 = vpop.f32.mrb[41].mxu1 }
 0x682   : > { %v2053_v54 = vpop.f32.mrb[42].mxu1 }
 0x683   : > { %v4235_v10 = vpack.i.bf16 %v2053_v54, %v2050_v59  ;;  %v3998_v51 = vpop.f32.mrb[43].mxu1  ;;  %v4587_v59 = vld [vmem:[%s5230_s14 + $0x18] sm:$0xff] }
 0x685   : > { %4236 = vrot.lane.b32.xlu1 %v4235_v10, %s4888_s21 }
 0x6b5   : > { %v1742_v11 = vpop.f32.mrb[28].mxu0 }
 0x6b6   : > { %v3955_v48 = vpop.f32.mrb[29].mxu0 }
 0x6b7   : > { %v1745_v12 = vpop.f32.mrb[30].mxu0 }
 0x6b8   : > { %v3956_v14 = vpop.f32.mrb[31].mxu0 }
 0x6bd   : > { %v1830_v16 = vpop.f32.mrb[32].mxu0 }
 0x6be   : > { %v3967_v18 = vpop.f32.mrb[33].mxu0 }
 0x6bf   : > { %v1833_v38 = vpop.f32.mrb[34].mxu0 }
 0x6c0   : > { %v3968_v56 = vpop.f32.mrb[35].mxu0 }
 0x6c1   : > { %v4590_v56 = vld [vmem:[%s5230_s14 + $0x28] sm:$0xff] }
 0x6c5   : > { %v1918_v21 = vpop.f32.mrb[36].mxu0 }
 0x6c6   : > { %v3979_v34 = vpop.f32.mrb[37].mxu0 }
 0x6c7   : > { %v1921_v20 = vpop.f32.mrb[38].mxu0  ;;  %v4591_v34 = vld [vmem:[%s5230_s14 + $0x38] sm:$0xff] }
 0x6c8   : > { %v3980_v24 = vpop.f32.mrb[39].mxu0 }
 0x6cd   : > { %v2006_v53 = vpop.f32.mrb[40].mxu0 }
 0x6ce   : > { %v3991_v33 = vpop.f32.mrb[41].mxu0 }
 0x6cf   : > { %v2009_v8 = vpop.f32.mrb[42].mxu0 }
 0x6d0   : > { %v3992_v36 = vpop.f32.mrb[43].mxu0 }
 0x6d1   : > { %v4282_v36 = vld [vmem:[#allocation11 + $0x4] ss:$16 sps:$4 sm:$0xff]  }
 0x6d2   : > { %2589 = vmatprep.subr.bf16.mxu1 %v4282_v36  ;;  %v4312_v36 = vld [vmem:[#allocation11 + $0xa4] ss:$16 sps:$4 sm:$0xff]  }
 0x6d9   : > { %v4222_v13 = vpop.permute.xlu0 %4221 }
 0x6da   : > { %v4224_v44 = vunpack.i.h.bf16 %v4222_v13  ;;  %v4223_v45 = vunpack.i.l.bf16 %v4222_v13  ;;  %v4283_v13 = vld [vmem:[#allocation11 + $0x8] ss:$16 sps:$4 sm:$0xff]  }
 0x6dc   : > { %v2089_v28 = vsel %vm1143_vm1, %v1742_v11, %v4223_v45  ;;  %v2090_v7 = vsel %vm1143_vm1, %v1745_v12, %v4224_v44  ;;  %v4588_v11 = vld [vmem:[%s5230_s14 + $0x20] sm:$0xff] }
 0x6dd   : > { %v2097_v50 = vpack.c.bf16 %v2090_v7, %v2089_v28  ;;  %v4285_v44 = vld [vmem:[#allocation11 + $0xc] ss:$16 sps:$4 sm:$0xff]   ;;  %v4288_v45 = vld [vmem:[#allocation11 + $0x24] ss:$16 sps:$4 sm:$0xff]   ;;  %v4286_v7 = vld [vmem:[#allocation11 + $0x20] ss:$16 sps:$4 sm:$0xff]  }
 0x6de   : > { %v4291_v28 = vld [vmem:[#allocation11 + $0x2c] ss:$16 sps:$4 sm:$0xff]   ;;  %2662 = vmatprep.subr.bf16.mxu0 %v4285_v44  ;;  %v4310_v44 = vld [vmem:[#allocation11 + $0xa0] ss:$16 sps:$4 sm:$0xff]  }
 0x6df   : > { %4015 = vmatprep.mubr.bf16.mxu0 %v2097_v50  ;;  %v4289_v50 = vld [vmem:[#allocation11 + $0x28] ss:$16 sps:$4 sm:$0xff]  }
 0x6e3   : > { %v4227_v0 = vpop.permute.xlu1 %4226 }
 0x6e4   : > { %v4229_v25 = vunpack.i.h.bf16 %v4227_v0  ;;  %v4228_v30 = vunpack.i.l.bf16 %v4227_v0 }
 0x6e6   : > { %v2092_v41 = vsel %vm1143_vm1, %v1833_v38, %v4229_v25  ;;  %v2091_v15 = vsel %vm1143_vm1, %v1830_v16, %v4228_v30  ;;  %v4589_v16 = vld [vmem:[%s5230_s14 + $0x30] sm:$0xff]  ;;  %s6076_s14 = scalar_lea.hbm %s6241_s7, %s3742_s26 }
 0x6e7   : > { %v2098_v40 = vpack.c.bf16 %v2092_v41, %v2091_v15 }
 0x6e9   : > { %4016 = vmatmul.mubr.bf16.vlgmr.msra.gmra.mrb[44].mxu0 %v2098_v40 }
 0x6ea   : > { %2663 = vmatpush1.bf16.msra.mxu0 %v4283_v13  ;;  %v4315_v13 = vld [vmem:[#allocation11 + $0xac] ss:$16 sps:$4 sm:$0xff]  }
 0x6eb   : > { %v4232_v55 = vpop.permute.xlu1 %4231  ;;  %2664 = vmatprep.subr.bf16.mxu0 %v4291_v28  ;;  %v4316_v28 = vld [vmem:[#allocation11 + $0xc0] ss:$16 sps:$4 sm:$0xff]  }
 0x6ec   : > { %v4234_v31 = vunpack.i.h.bf16 %v4232_v55  ;;  %v4233_v32 = vunpack.i.l.bf16 %v4232_v55 }
 0x6ee   : > { %v2093_v37 = vsel %vm1143_vm1, %v1918_v21, %v4233_v32  ;;  %v2094_v29 = vsel %vm1143_vm1, %v1921_v20, %v4234_v31  ;;  %2665 = vmatpush1.bf16.msra.mxu0 %v4289_v50  ;;  %v4319_v50 = vld [vmem:[#allocation11 + $0xc8] ss:$16 sps:$4 sm:$0xff]  }
 0x6ef   : > { %v2099_v43 = vpack.c.bf16 %v2094_v29, %v2093_v37 }
 0x6f1   : > { %4019 = vmatprep.mubr.bf16.mxu0 %v2099_v43 }
 0x6f7   : > { %v4237_v26 = vpop.permute.xlu1 %4236 }
 0x6f8   : > { %v4239_v52 = vunpack.i.h.bf16 %v4237_v26  ;;  %v4238_v39 = vunpack.i.l.bf16 %v4237_v26 }
 0x6fa   : > { %v2095_v57 = vsel %vm1143_vm1, %v2006_v53, %v4238_v39  ;;  %v2096_v61 = vsel %vm1143_vm1, %v2009_v8, %v4239_v52  ;;  %v4280_v8 = vld [vmem:[#allocation11] ss:$16 sps:$4 sm:$0xff]  }
 0x6fb   : > { %v2100_v1 = vpack.c.bf16 %v2096_v61, %v2095_v57  ;;  %2590 = vmatpush1.bf16.msra.mxu1 %v4280_v8  ;;  %v4307_v8 = vld [vmem:[#allocation11 + $0x88] ss:$16 sps:$4 sm:$0xff]  }
 0x6fc   : > { %2591 = vmatprep.subr.bf16.mxu1 %v4288_v45  ;;  %v4313_v45 = vld [vmem:[#allocation11 + $0xa8] ss:$16 sps:$4 sm:$0xff]  }
 0x6fd   : > { %4020 = vmatmul.mubr.bf16.gmra.mrb[48].mxu0 %v2100_v1 }
 0x6fe   : > { %2694 = vmatprep.mubr.bf16.mxu0 %v4885_v63 }
 0x6ff   : > { %2592 = vmatpush1.bf16.msra.mxu1 %v4286_v7  ;;  %v4318_v7 = vld [vmem:[#allocation11 + $0xc4] ss:$16 sps:$4 sm:$0xff]  }
 0x7bc   : > { %v4017_v9 = vpop.f32.mrb[44].mxu0 }
 0x7bd   : > { %v2199_v60 = vpop.f32.mrb[45].mxu0  ;;  %v2232_v62 = vadd.f32 %v4585_v46, %v4017_v9 }
 0x7be   : > { %v2230_v22 = vadd.f32 %v4584_v19, %v2199_v60  ;;  %v4018_v4 = vpop.f32.mrb[46].mxu0  ;;  %v4297_v60 = vld [vmem:[#allocation11 + $0x4c] ss:$16 sps:$4 sm:$0xff]  }
 0x7bf   : > { %v2202_v35 = vpop.f32.mrb[47].mxu0  ;;  %v5674_v47 = vadd.f32 %v3633_v17, %v2232_v62  ;;  %v2233_v27 = vadd.f32 %v4587_v59, %v4018_v4  ;;  %v4292_v4 = vld [vmem:[#allocation11 + $0x40] ss:$16 sps:$4 sm:$0xff]   ;;  %2666 = vmatprep.subr.bf16.mxu0 %v4297_v60 }
 0x7c0   : > { %v5668_v49 = vadd.f32 %v3633_v17, %v2230_v22  ;;  %v2231_v42 = vadd.f32 %v4586_v58, %v2202_v35  ;;  %v4295_v35 = vld [vmem:[#allocation11 + $0x48] ss:$16 sps:$4 sm:$0xff]  }
 0x7c1   : > { %6198 = vst [vmem:[#allocation22_spill] sm:$0xff] %v5674_v47  ;;  %v5679_v54 = vadd.f32 %v3633_v17, %v2233_v27  ;;  %2667 = vmatpush1.bf16.msra.mxu0 %v4295_v35  ;;  %v4300_v27 = vld [vmem:[#allocation11 + $0x64] ss:$16 sps:$4 sm:$0xff]  }
 0x7c2   : > { %6196 = vst [vmem:[#allocation20_spill] sm:$0xff] %v5668_v49  ;;  %v5671_v23 = vadd.f32 %v3633_v17, %v2231_v42  ;;  %2255 = vadd.xlane.f32.xlu0 %v5668_v49 }
 0x7c3   : > { %6199 = vst [vmem:[#allocation23_spill] sm:$0xff] %v5679_v54 }
 0x7c4   : > { %6197 = vst [vmem:[#allocation21_spill] sm:$0xff] %v5671_v23  ;;  %2257 = vadd.xlane.f32.xlu1 %v5671_v23 }
 0x7c6   : > { %2259 = vadd.xlane.f32.xlu0 %v5674_v47 }
 0x7ca   : > { %2261 = vadd.xlane.f32.xlu0 %v5679_v54 }
 0x7d0   : > { %v4021_v10 = vpop.f32.mrb[48].mxu0 }
 0x7d1   : > { %v2215_v51 = vpop.f32.mrb[49].mxu0  ;;  %v2236_v18 = vadd.f32 %v4589_v16, %v4021_v10  ;;  %v4303_v10 = vld [vmem:[#allocation11 + $0x6c] ss:$16 sps:$4 sm:$0xff]  }
 0x7d2   : > { %v2234_v48 = vadd.f32 %v4588_v11, %v2215_v51  ;;  %v4022_v12 = vpop.f32.mrb[50].mxu0  ;;  %2668 = vmatprep.subr.bf16.mxu0 %v4303_v10 }
 0x7d3   : > { %v2218_v14 = vpop.f32.mrb[51].mxu0  ;;  %v2237_v20 = vadd.f32 %v4591_v34, %v4022_v12  ;;  %v5691_v53 = vadd.f32 %v3633_v17, %v2236_v18  ;;  %v4298_v12 = vld [vmem:[#allocation11 + $0x60] ss:$16 sps:$4 sm:$0xff]  }
 0x7d4   : > { %v5684_v38 = vadd.f32 %v3633_v17, %v2234_v48  ;;  %v2235_v21 = vadd.f32 %v4590_v56, %v2218_v14  ;;  %v4301_v14 = vld [vmem:[#allocation11 + $0x68] ss:$16 sps:$4 sm:$0xff]   ;;  %v4306_v56 = vld [vmem:[#allocation11 + $0x84] ss:$16 sps:$4 sm:$0xff]  }
 0x7d5   : > { %6202 = vst [vmem:[#allocation26_spill] sm:$0xff] %v5691_v53  ;;  %v5694_v33 = vadd.f32 %v3633_v17, %v2237_v20  ;;  %2669 = vmatpush1.bf16.msra.mxu0 %v4301_v14  ;;  %v4304_v20 = vld [vmem:[#allocation11 + $0x80] ss:$16 sps:$4 sm:$0xff]  }
 0x7d6   : > { %6200 = vst [vmem:[#allocation24_spill] sm:$0xff] %v5684_v38  ;;  %v5688_v24 = vadd.f32 %v3633_v17, %v2235_v21  ;;  %2263 = vadd.xlane.f32.xlu0 %v5684_v38  ;;  %v4294_v17 = vld [vmem:[#allocation11 + $0x44] ss:$16 sps:$4 sm:$0xff]   ;;  %v4309_v21 = vld [vmem:[#allocation11 + $0x8c] ss:$16 sps:$4 sm:$0xff]  }
 0x7d7   : > { %6203 = vst [vmem:[#allocation27_spill] sm:$0xff] %v5694_v33  ;;  %2593 = vmatprep.subr.bf16.mxu1 %v4294_v17  ;;  %2670 = vmatprep.subr.bf16.mxu0 %v4309_v21 }
 0x7d8   : > { %6201 = vst [vmem:[#allocation25_spill] sm:$0xff] %v5688_v24  ;;  %2265 = vadd.xlane.f32.xlu1 %v5688_v24  ;;  %2594 = vmatpush1.bf16.msra.mxu1 %v4292_v4  ;;  %v3634_v4 = vld [vmem:[%s6204_s4] ss:$0 sm:$0xff] }
 0x7d9   : > { %2595 = vmatprep.subr.bf16.mxu1 %v4300_v27  ;;  %2671 = vmatpush1.bf16.msra.mxu0 %v4307_v8  ;;  %v3635_v27 = vld [vmem:[%s6205_s20] ss:$0 sm:$0xff]  ;;  %s3417_s20 = scalar_lea.sflag [#allocation4], %s5224_s9 }
 0x7da   : > { %2267 = vadd.xlane.f32.xlu0 %v5691_v53  ;;  %2672 = vmatprep.subr.bf16.mxu0 %v4315_v13 }
 0x7dc   : > { %2269 = vadd.xlane.f32.xlu1 %v5694_v33  ;;  %2596 = vmatpush1.bf16.msra.mxu1 %v4298_v12 }
 0x7dd   : > { %2597 = vmatprep.subr.bf16.mxu1 %v4306_v56  ;;  %2673 = vmatpush1.bf16.msra.mxu0 %v4313_v45 }
 0x7e0   : > { %2598 = vmatpush1.bf16.msra.mxu1 %v4304_v20 }
 0x7e1   : > { %2599 = vmatprep.subr.bf16.mxu1 %v4312_v36 }
 0x7e4   : > { %2600 = vmatpush1.bf16.msra.mxu1 %v4310_v44 }
 0x7e5   : > { %2601 = vmatprep.subr.bf16.mxu1 %v4318_v7 }
 0x7e8   : > { %2602 = vmatpush1.bf16.msra.mxu1 %v4316_v28 }
 0x84f   : > { %v2256_v0 = vpop.xlane.xlu0 %2255 }
 0x850   : > { %v2271_v25 = vmul.f32 0.0078125, %v2256_v0  ;;  %v4321_v0 = vld [vmem:[#allocation11 + $0xcc] ss:$16 sps:$4 sm:$0xff]  }
 0x851   : > { %v2258_v30 = vpop.xlane.xlu1 %2257  ;;  %2674 = vmatprep.subr.bf16.mxu0 %v4321_v0 }
 0x852   : > { %v5699_v41 = vsub.f32 %v5668_v49, %v2271_v25  ;;  %v2272_v15 = vmul.f32 0.0078125, %v2258_v30  ;;  %2675 = vmatpush1.bf16.msra.mxu0 %v4319_v50  ;;  %v4324_v25 = vld [vmem:[#allocation11 + $0xe4] ss:$16 sps:$4 sm:$0xff]   ;;  %v4327_v30 = vld [vmem:[#allocation11 + $0xec] ss:$16 sps:$4 sm:$0xff]  }
 0x853   : > { %v2260_v40 = vpop.xlane.xlu0 %2259  ;;  %2603 = vmatprep.subr.bf16.mxu1 %v4324_v25  ;;  %2676 = vmatprep.subr.bf16.mxu0 %v4327_v30 }
 0x854   : > { %v5702_v55 = vsub.f32 %v5671_v23, %v2272_v15  ;;  %v2273_v31 = vmul.f32 0.0078125, %v2260_v40  ;;  %v2287_v32 = vmul.f32 %v5699_v41, %v5699_v41  ;;  %v4322_v15 = vld [vmem:[#allocation11 + $0xe0] ss:$16 sps:$4 sm:$0xff]   ;;  %v4325_v40 = vld [vmem:[#allocation11 + $0xe8] ss:$16 sps:$4 sm:$0xff]  }
 0x855   : > { %2604 = vmatpush1.bf16.msra.mxu1 %v4322_v15 }
 0x856   : > { %v5707_v37 = vsub.f32 %v5674_v47, %v2273_v31  ;;  %2295 = vadd.xlane.f32.xlu0 %v2287_v32  ;;  %v2288_v29 = vmul.f32 %v5702_v55, %v5702_v55  ;;  %2677 = vmatpush1.bf16.msra.mxu0 %v4325_v40 }
 0x857   : > { %v2262_v43 = vpop.xlane.xlu0 %2261 }
 0x858   : > { %v2274_v26 = vmul.f32 0.0078125, %v2262_v43  ;;  %2297 = vadd.xlane.f32.xlu1 %v2288_v29  ;;  %v2289_v52 = vmul.f32 %v5707_v37, %v5707_v37 }
 0x85a   : > { %v5714_v39 = vsub.f32 %v5679_v54, %v2274_v26  ;;  %2299 = vadd.xlane.f32.xlu0 %v2289_v52 }
 0x85c   : > { %v2290_v57 = vmul.f32 %v5714_v39, %v5714_v39 }
 0x85e   : > { %2301 = vadd.xlane.f32.xlu1 %v2290_v57 }
 0x863   : > { %v2264_v61 = vpop.xlane.xlu0 %2263 }
 0x864   : > { %v2275_v1 = vmul.f32 0.0078125, %v2264_v61 }
 0x865   : > { %v2266_v9 = vpop.xlane.xlu1 %2265 }
 0x866   : > { %v5719_v19 = vsub.f32 %v5684_v38, %v2275_v1  ;;  %v2276_v22 = vmul.f32 0.0078125, %v2266_v9 }
 0x867   : > { %v2268_v46 = vpop.xlane.xlu0 %2267 }
 0x868   : > { %v5722_v62 = vsub.f32 %v5688_v24, %v2276_v22  ;;  %v2277_v58 = vmul.f32 0.0078125, %v2268_v46  ;;  %v2291_v42 = vmul.f32 %v5719_v19, %v5719_v19 }
 0x869   : > { %v2270_v59 = vpop.xlane.xlu1 %2269 }
 0x86a   : > { %v5727_v51 = vsub.f32 %v5691_v53, %v2277_v58  ;;  %v2278_v11 = vmul.f32 0.0078125, %v2270_v59  ;;  %2303 = vadd.xlane.f32.xlu0 %v2291_v42  ;;  %v2292_v48 = vmul.f32 %v5722_v62, %v5722_v62 }
 0x86c   : > { %v5732_v16 = vsub.f32 %v5694_v33, %v2278_v11  ;;  %2305 = vadd.xlane.f32.xlu1 %v2292_v48  ;;  %v2293_v18 = vmul.f32 %v5727_v51, %v5727_v51 }
 0x86e   : > { %2307 = vadd.xlane.f32.xlu0 %v2293_v18  ;;  %v2294_v34 = vmul.f32 %v5732_v16, %v5732_v16 }
 0x870   : > { %2309 = vadd.xlane.f32.xlu1 %v2294_v34 }
 0x8e3   : > { %v2296_v31 = vpop.xlane.xlu0 %2295 }
 0x8e4   : > { %v2311_v32 = vmul.f32 0.0078125, %v2296_v31 }
 0x8e5   : > { %v2298_v29 = vpop.xlane.xlu1 %2297 }
 0x8e6   : > { %v2319_v43 = vadd.f32 1e-05, %v2311_v32  ;;  %v2312_v26 = vmul.f32 0.0078125, %v2298_v29 }
 0x8e7   : > { %v2300_v52 = vpop.xlane.xlu0 %2299 }
 0x8e8   : > { %4440 = vrsqrt.f32 %v2319_v43  ;;  %v2320_v57 = vadd.f32 1e-05, %v2312_v26  ;;  %v2313_v61 = vmul.f32 0.0078125, %v2300_v52 }
 0x8ea   : > { %4442 = vrsqrt.f32 %v2320_v57  ;;  %v2321_v1 = vadd.f32 1e-05, %v2313_v61 }
 0x8eb   : > { %v2302_v9 = vpop.xlane.xlu1 %2301 }
 0x8ec   : > { %4444 = vrsqrt.f32 %v2321_v1  ;;  %v2314_v17 = vmul.f32 0.0078125, %v2302_v9 }
 0x8ee   : > { %v2322_v60 = vadd.f32 1e-05, %v2314_v17 }
 0x8f0   : > { %4446 = vrsqrt.f32 %v2322_v60 }
 0x8f2   : > { %v4441_v22 = vpop.eup %4440 }
 0x8f3   : > { %v2335_v35 = vmul.f32 %v4441_v22, %v5699_v41 }
 0x8f4   : > { %v4443_v46 = vpop.eup %4442 }
 0x8f5   : > { %v2336_v58 = vmul.f32 %v4443_v46, %v5702_v55  ;;  %v2349_v42 = vmul.f32 %v3634_v4, %v2335_v35  ;;  %v4328_v35 = vld [vmem:[#allocation13 + $0x40] sm:$0xff]  }
 0x8f6   : > { %v4445_v59 = vpop.eup %4444  ;;  %v4329_v46 = vld [vmem:[#allocation13 + $0xc0] sm:$0xff]   ;;  %3799 = vmatprep.subr.bf16.mxu1 %v4328_v35 }
 0x8f7   : > { %v2304_v10 = vpop.xlane.xlu0 %2303  ;;  %v2350_v11 = vmul.f32 %v3634_v4, %v2336_v58  ;;  %v2363_v14 = vadd.f32 %v3635_v27, %v2349_v42  ;;  %v2337_v56 = vmul.f32 %v4445_v59, %v5707_v37  ;;  %v4330_v58 = vld [vmem:[#allocation13] sm:$0xff]   ;;  %3839 = vmatprep.subr.bf16.mxu0 %v4329_v46  ;;  %v4334_v42 = vld [vmem:[#allocation13 + $0x8] sm:$0xff]   ;;  %v4336_v59 = vld [vmem:[#allocation13 + $0x50] sm:$0xff]  }
 0x8f8   : > { %v2315_v48 = vmul.f32 0.0078125, %v2304_v10  ;;  %v4338_v10 = vld [vmem:[#allocation13 + $0x10] sm:$0xff]  }
 0x8f9   : > { %v2306_v12 = vpop.xlane.xlu1 %2305  ;;  %v2364_v18 = vadd.f32 %v3635_v27, %v2350_v11  ;;  %v2351_v45 = vmul.f32 %v3634_v4, %v2337_v56  ;;  %v5769_v11 = vld [vmem:[#allocation13 + $0x90] sm:$0xff]   ;;  %v4344_v56 = vld [vmem:[#allocation13 + $0x60] sm:$0xff]  }
 0x8fa   : > { %v4447_v21 = vpop.eup %4446  ;;  %v2323_v34 = vadd.f32 1e-05, %v2315_v48  ;;  %v2316_v41 = vmul.f32 0.0078125, %v2306_v12  ;;  %v4340_v48 = vld [vmem:[#allocation13 + $0x58] sm:$0xff]  }
 0x8fb   : > { %v2308_v20 = vpop.xlane.xlu0 %2307  ;;  %v2371_v8 = vpack.c.bf16 %v2364_v18, %v2363_v14  ;;  %v2338_v55 = vmul.f32 %v4447_v21, %v5714_v39  ;;  %v2365_v25 = vadd.f32 %v3635_v27, %v2351_v45  ;;  %v5773_v12 = vld [vmem:[#allocation13 + $0xd8] sm:$0xff]   ;;  %v5779_v21 = vld [vmem:[#allocation13 + $0xe0] sm:$0xff]   ;;  %v4354_v45 = vld [vmem:[#allocation13 + $0x30] sm:$0xff]  }
 0x8fc   : > { %4448 = vrsqrt.f32 %v2323_v34  ;;  %v2324_v36 = vadd.f32 1e-05, %v2316_v41  ;;  %v2317_v13 = vmul.f32 0.0078125, %v2308_v20  ;;  %v4342_v14 = vld [vmem:[#allocation13 + $0x18] sm:$0xff]   ;;  %v4346_v34 = vld [vmem:[#allocation13 + $0x20] sm:$0xff]   ;;  %v4348_v20 = vld [vmem:[#allocation13 + $0x68] sm:$0xff]  }
 0x8fd   : > { %2622 = vmatmul.mubr.bf16.vlgmr.msra.gmra.mrb[44].mxu1 %v2371_v8  ;;  %2695 = vmatmul.mubr.bf16.vlgmr.msra.gmra.mrb[52].mxu0 %v2371_v8  ;;  %v2310_v44 = vpop.xlane.xlu1 %2309  ;;  %v2352_v28 = vmul.f32 %v3634_v4, %v2338_v55  ;;  %v5775_v18 = vld [vmem:[#allocation13 + $0x98] sm:$0xff]   ;;  %v5781_v41 = vld [vmem:[#allocation13 + $0xa0] sm:$0xff]   ;;  %v5785_v8 = vld [vmem:[#allocation13 + $0xe8] sm:$0xff]  }
 0x8fe   : > { %4450 = vrsqrt.f32 %v2324_v36  ;;  %v2325_v7 = vadd.f32 1e-05, %v2317_v13  ;;  %v2318_v50 = vmul.f32 0.0078125, %v2310_v44  ;;  %2631 = vmatprep.mubr.bf16.mxu1 %v4885_v63  ;;  %2704 = vmatprep.mubr.bf16.mxu0 %v4885_v63  ;;  %6206 = vst [vmem:[#allocation28_spill] sm:$0xff] %v5781_v41  ;;  %6207 = vst [vmem:[#allocation29_spill] sm:$0xff] %v5785_v8  ;;  %v4350_v55 = vld [vmem:[#allocation13 + $0x28] sm:$0xff]  }
 0x8ff   : > { %v2366_v37 = vadd.f32 %v3635_v27, %v2352_v28  ;;  %3800 = vmatpush3.bf16.msra.mxu1 %v4330_v58  ;;  %v5787_v36 = vld [vmem:[#allocation13 + $0xa8] sm:$0xff]   ;;  %v4352_v13 = vld [vmem:[#allocation13 + $0x70] sm:$0xff]  }
 0x900   : > { %4452 = vrsqrt.f32 %v2325_v7  ;;  %v2326_v0 = vadd.f32 1e-05, %v2318_v50  ;;  %6208 = vst [vmem:[#allocation30_spill] sm:$0xff] %v5787_v36  ;;  %v5791_v44 = vld [vmem:[#allocation13 + $0xf0] sm:$0xff]   ;;  %v4356_v7 = vld [vmem:[#allocation13 + $0x78] sm:$0xff]  }
 0x901   : > { %v2372_v39 = vpack.c.bf16 %v2366_v37, %v2365_v25  ;;  %6209 = vst [vmem:[#allocation31_spill] sm:$0xff] %v5791_v44  ;;  %v5793_v28 = vld [vmem:[#allocation13 + $0xb0] sm:$0xff]   ;;  %v5797_v50 = vld [vmem:[#allocation13 + $0xf8] sm:$0xff]  }
 0x902   : > { %4454 = vrsqrt.f32 %v2326_v0  ;;  %6210 = vst [vmem:[#allocation32_spill] sm:$0xff] %v5793_v28  ;;  %6211 = vst [vmem:[#allocation33_spill] sm:$0xff] %v5797_v50  ;;  %v4358_v37 = vld [vmem:[#allocation13 + $0x38] sm:$0xff]   ;;  %v2407_v25 = vld [vmem:[%s6213_s24] sm:$0xf]  ;;  %s4796_s24 = scalar_lea.vmem %s4795_s28, 2048 }
 0x903   : > { %v5799_v0 = vld [vmem:[#allocation13 + $0xb8] sm:$0xff]   ;;  %p4798_p12 = scmp.lt.s32.totalorder %s4796_s24, %s4790_s19 }
 0x904   : > { %6212 = vst [vmem:[#allocation34_spill] sm:$0xff] %v5799_v0 }
 0x905   : > { %2632 = vmatmul.mubr.bf16.gmra.mrb[48].mxu1 %v2372_v39  ;;  %2705 = vmatmul.mubr.bf16.gmra.mrb[56].mxu0 %v2372_v39  ;;  %v2423_v39 = vsub.s32 3, %v5309_v2  ;;  %p4799_p13 = por %p4798_p12, %p4797_p11 }
 0x906   : > { %v4449_v30 = vpop.eup %4448  ;;  %2641 = vmatprep.mubr.bf16.mxu1 %v4885_v63  ;;  %2714 = vmatprep.mubr.bf16.mxu0 %v4885_v63 }
 0x907   : > { %v2339_v15 = vmul.f32 %v4449_v30, %v5719_v19  ;;  %v5809_v30 = vrot.slane %v2407_v25, %v742_v3  ;;  %p4800_p8 = pnand %p4799_p13, %p4793_p1 }
 0x908   : > { %v4451_v40 = vpop.eup %4450 }
 0x909   : > { %v2340_v31 = vmul.f32 %v4451_v40, %v5722_v62  ;;  %v2353_v32 = vmul.f32 %v3634_v4, %v2339_v15  ;;  %v5813_v15 = vrot.slane %v2407_v25, %v750_v6  ;;  %v5817_v40 = vrot.slane %v2407_v25, %v746_v5 }
 0x90a   : > { %v4453_v29 = vpop.eup %4452 }
 0x90b   : > { %v2354_v43 = vmul.f32 %v3634_v4, %v2340_v31  ;;  %v2367_v52 = vadd.f32 %v3635_v27, %v2353_v32  ;;  %v2341_v61 = vmul.f32 %v4453_v29, %v5727_v51  ;;  %v5758_v51 = vld [vmem:[#allocation13 + $0x80] sm:$0xff]   ;;  %v5819_v31 = vrot.slane %v2407_v25, %v2423_v39 }
 0x90c   : > { %v4455_v26 = vpop.eup %4454  ;;  %3840 = vmatpush3.bf16.msra.mxu0 %v5758_v51 }
 0x90d   : > { %v2368_v57 = vadd.f32 %v3635_v27, %v2354_v43  ;;  %v2342_v1 = vmul.f32 %v4455_v26, %v5732_v16  ;;  %v2355_v60 = vmul.f32 %v3634_v4, %v2341_v61  ;;  %v4332_v16 = vld [vmem:[#allocation13 + $0x48] sm:$0xff]  }
 0x90e   : > { %3801 = vmatprep.subr.bf16.mxu1 %v4332_v16 }
 0x90f   : > { %v2373_v9 = vpack.c.bf16 %v2368_v57, %v2367_v52  ;;  %v2356_v17 = vmul.f32 %v3634_v4, %v2342_v1  ;;  %v2369_v62 = vadd.f32 %v3635_v27, %v2355_v60  ;;  %v5761_v4 = vld [vmem:[#allocation13 + $0xc8] sm:$0xff]   ;;  %3802 = vmatpush3.bf16.msra.mxu1 %v4334_v42 }
 0x910   : > { %3841 = vmatprep.subr.bf16.mxu0 %v5761_v4  ;;  %3803 = vmatprep.subr.bf16.mxu1 %v4336_v59 }
 0x911   : > { %2642 = vmatmul.mubr.bf16.gmra.mrb[52].mxu1 %v2373_v9  ;;  %2715 = vmatmul.mubr.bf16.gmra.mrb[60].mxu0 %v2373_v9  ;;  %v2370_v19 = vadd.f32 %v3635_v27, %v2356_v17  ;;  %v5767_v27 = vld [vmem:[#allocation13 + $0xd0] sm:$0xff]  }
 0x912   : > { %2651 = vmatprep.mubr.bf16.mxu1 %v4885_v63  ;;  %2724 = vmatprep.mubr.bf16.mxu0 %v4885_v63  ;;  %v5763_v63 = vld [vmem:[#allocation13 + $0x88] sm:$0xff]  }
 0x913   : > { %v2374_v22 = vpack.c.bf16 %v2370_v19, %v2369_v62  ;;  %3842 = vmatpush3.bf16.msra.mxu0 %v5763_v63  ;;  %3804 = vmatpush3.bf16.msra.mxu1 %v4338_v10 }
 0x914   : > { %3843 = vmatprep.subr.bf16.mxu0 %v5767_v27  ;;  %3805 = vmatprep.subr.bf16.mxu1 %v4340_v48 }
 0x917   : > { %3844 = vmatpush3.bf16.msra.mxu0 %v5769_v11  ;;  %3806 = vmatpush3.bf16.msra.mxu1 %v4342_v14 }
 0x918   : > { %3845 = vmatprep.subr.bf16.mxu0 %v5773_v12  ;;  %3807 = vmatprep.subr.bf16.mxu1 %v4344_v56 }
 0x919   : > { %2652 = vmatmul.mubr.bf16.gmra.mrb[56].mxu1 %v2374_v22  ;;  %2725 = vmatmul.mubr.bf16.gmra.mrb[64].mxu0 %v2374_v22 }
 0x91b   : > { %3846 = vmatpush3.bf16.msra.mxu0 %v5775_v18  ;;  %3808 = vmatpush3.bf16.msra.mxu1 %v4346_v34 }
 0x91c   : > { %3847 = vmatprep.subr.bf16.mxu0 %v5779_v21  ;;  %3809 = vmatprep.subr.bf16.mxu1 %v4348_v20 }
 0x91f   : > { %3848 = vmatpush3.bf16.msra.mxu0 %v5781_v41  ;;  %3810 = vmatpush3.bf16.msra.mxu1 %v4350_v55 }
 0x920   : > { %3849 = vmatprep.subr.bf16.mxu0 %v5785_v8  ;;  %3811 = vmatprep.subr.bf16.mxu1 %v4352_v13 }
 0x923   : > { %3850 = vmatpush3.bf16.msra.mxu0 %v5787_v36  ;;  %3812 = vmatpush3.bf16.msra.mxu1 %v4354_v45 }
 0x924   : > { %3851 = vmatprep.subr.bf16.mxu0 %v5791_v44  ;;  %3813 = vmatprep.subr.bf16.mxu1 %v4356_v7 }
 0x927   : > { %3852 = vmatpush3.bf16.msra.mxu0 %v5793_v28  ;;  %3814 = vmatpush3.bf16.msra.mxu1 %v4358_v37 }
 0x928   : > { %3853 = vmatprep.subr.bf16.mxu0 %v5797_v50  ;;  %4023 = vmatprep.subr.bf16.mxu1 %v4329_v46 }
 0x92b   : > { %3854 = vmatpush3.bf16.msra.mxu0 %v5799_v0 }
 0x9d0   : > { %v2623_v32 = vpop.f32.mrb[44].mxu1  ;;  %v2696_v29 = vpop.f32.mrb[52].mxu0 }
 0x9d1   : > { %v5822_v43 = vadd.f32 %v2623_v32, %v5809_v30  ;;  %v5825_v26 = vadd.f32 %v2696_v29, %v5813_v15  ;;  %v2625_v3 = vpop.f32.mrb[45].mxu1  ;;  %v2698_v52 = vpop.f32.mrb[53].mxu0 }
 0x9d2   : > { %v5828_v57 = vadd.f32 %v2625_v3, %v5817_v40  ;;  %v5831_v6 = vadd.f32 %v2698_v52, %v5819_v31  ;;  %v2627_v2 = vpop.f32.mrb[46].mxu1  ;;  %v2700_v5 = vpop.f32.mrb[54].mxu0 }
 0x9d3   : > { %v3668_v61 = vmul.f32 -1.702, %v5822_v43  ;;  %v3670_v1 = vmul.f32 -1.702, %v5825_v26  ;;  %v5836_v9 = vadd.f32 %v2627_v2, %v5809_v30  ;;  %v5839_v17 = vadd.f32 %v2700_v5, %v5813_v15  ;;  %v2629_v60 = vpop.f32.mrb[47].mxu1  ;;  %v2702_v19 = vpop.f32.mrb[55].mxu0 }
 0x9d4   : > { %v3669_v62 = vmul.f32 -1.702, %v5828_v57  ;;  %v3671_v22 = vmul.f32 -1.702, %v5831_v6  ;;  %v5844_v35 = vadd.f32 %v2629_v60, %v5817_v40  ;;  %v5847_v46 = vadd.f32 %v2702_v19, %v5819_v31 }
 0x9d5   : > { %v2799_v58 = vmul.f32 1.442695, %v3668_v61  ;;  %v2803_v16 = vmul.f32 1.442695, %v3670_v1  ;;  %v3672_v42 = vmul.f32 -1.702, %v5836_v9 }
 0x9d6   : > { %v2801_v59 = vmul.f32 1.442695, %v3669_v62  ;;  %v2805_v10 = vmul.f32 1.442695, %v3671_v22  ;;  %v3674_v48 = vmul.f32 -1.702, %v5839_v17 }
 0x9d7   : > { %4456 = vpow2.f32 %v2799_v58  ;;  %v2807_v14 = vmul.f32 1.442695, %v3672_v42  ;;  %v3673_v56 = vmul.f32 -1.702, %v5844_v35  ;;  %v3675_v34 = vmul.f32 -1.702, %v5847_v46 }
 0x9d8   : > { %4458 = vpow2.f32 %v2803_v16  ;;  %v2811_v20 = vmul.f32 1.442695, %v3674_v48  ;;  %v2633_v55 = vpop.f32.mrb[48].mxu1  ;;  %v2706_v13 = vpop.f32.mrb[56].mxu0 }
 0x9d9   : > { %4460 = vpow2.f32 %v2801_v59  ;;  %v2809_v45 = vmul.f32 1.442695, %v3673_v56  ;;  %v2813_v7 = vmul.f32 1.442695, %v3675_v34  ;;  %v5854_v37 = vadd.f32 %v2633_v55, %v5809_v30  ;;  %v2635_v25 = vpop.f32.mrb[49].mxu1  ;;  %v2708_v39 = vpop.f32.mrb[57].mxu0 }
 0x9da   : > { %4462 = vpow2.f32 %v2805_v10  ;;  %v5857_v32 = vadd.f32 %v2706_v13, %v5813_v15  ;;  %v5860_v29 = vadd.f32 %v2635_v25, %v5817_v40  ;;  %v5863_v3 = vadd.f32 %v2708_v39, %v5819_v31  ;;  %v2637_v52 = vpop.f32.mrb[50].mxu1  ;;  %v2710_v2 = vpop.f32.mrb[58].mxu0 }
 0x9db   : > { %4464 = vpow2.f32 %v2807_v14  ;;  %v3676_v5 = vmul.f32 -1.702, %v5854_v37  ;;  %v5867_v61 = vadd.f32 %v2637_v52, %v5809_v30  ;;  %v2639_v1 = vpop.f32.mrb[51].mxu1  ;;  %v2712_v60 = vpop.f32.mrb[59].mxu0  ;;  %v5874_v14 = vadd.f32 %v2710_v2, %v5813_v15 }
 0x9dc   : > { %4466 = vpow2.f32 %v2811_v20  ;;  %v3678_v19 = vmul.f32 -1.702, %v5857_v32  ;;  %v3677_v62 = vmul.f32 -1.702, %v5860_v29  ;;  %v3679_v22 = vmul.f32 -1.702, %v5863_v3 }
 0x9dd   : > { %4468 = vpow2.f32 %v2809_v45  ;;  %v2815_v58 = vmul.f32 1.442695, %v3676_v5  ;;  %v3680_v16 = vmul.f32 -1.702, %v5867_v61  ;;  %v5877_v34 = vadd.f32 %v2639_v1, %v5817_v40 }
 0x9de   : > { %4470 = vpow2.f32 %v2813_v7  ;;  %v2819_v42 = vmul.f32 1.442695, %v3678_v19  ;;  %v2817_v59 = vmul.f32 1.442695, %v3677_v62  ;;  %v2821_v10 = vmul.f32 1.442695, %v3679_v22 }
 0x9df   : > { %4472 = vpow2.f32 %v2815_v58  ;;  %v2823_v48 = vmul.f32 1.442695, %v3680_v16  ;;  %v5880_v13 = vadd.f32 %v2712_v60, %v5819_v31  ;;  %v3682_v52 = vmul.f32 -1.702, %v5874_v14 }
 0x9e0   : > { %4474 = vpow2.f32 %v2819_v42  ;;  %v3681_v62 = vmul.f32 -1.702, %v5877_v34 }
 0x9e1   : > { %v4457_v56 = vpop.eup %4456  ;;  %4476 = vpow2.f32 %v2817_v59  ;;  %v3683_v42 = vmul.f32 -1.702, %v5880_v13  ;;  %v2827_v33 = vmul.f32 1.442695, %v3682_v52 }
 0x9e2   : > { %v4459_v20 = vpop.eup %4458  ;;  %v2863_v55 = vadd.f32 1.0, %v4457_v56  ;;  %4478 = vpow2.f32 %v2821_v10  ;;  %v2825_v24 = vmul.f32 1.442695, %v3681_v62 }
 0x9e3   : > { %v4461_v45 = vpop.eup %4460  ;;  %v2865_v7 = vadd.f32 1.0, %v4459_v20  ;;  %4480 = vpow2.f32 %v2823_v48 }
 0x9e4   : > { %v4463_v25 = vpop.eup %4462  ;;  %4482 = vrcp.f32 %v2863_v55  ;;  %v2864_v39 = vadd.f32 1.0, %v4461_v45  ;;  %v2643_v2 = vpop.f32.mrb[52].mxu1 }
 0x9e5   : > { %v2716_v5 = vpop.f32.mrb[60].mxu0  ;;  %v4465_v19 = vpop.eup %4464  ;;  %4484 = vrcp.f32 %v2865_v7  ;;  %v2866_v1 = vadd.f32 1.0, %v4463_v25  ;;  %v5886_v59 = vadd.f32 %v2643_v2, %v5809_v30 }
 0x9e6   : > { %v2645_v22 = vpop.f32.mrb[53].mxu1  ;;  %v2718_v58 = vpop.f32.mrb[61].mxu0  ;;  %4486 = vrcp.f32 %v2864_v39  ;;  %v2867_v60 = vadd.f32 1.0, %v4465_v19  ;;  %v5889_v55 = vadd.f32 %v2716_v5, %v5813_v15 }
 0x9e7   : > { %v4467_v16 = vpop.eup %4466  ;;  %v2647_v10 = vpop.f32.mrb[54].mxu1  ;;  %4488 = vrcp.f32 %v2866_v1  ;;  %v5892_v39 = vadd.f32 %v2645_v22, %v5817_v40  ;;  %v5895_v38 = vadd.f32 %v2718_v58, %v5819_v31  ;;  %v3684_v54 = vmul.f32 -1.702, %v5886_v59 }
 0x9e8   : > { %v2720_v48 = vpop.f32.mrb[62].mxu0  ;;  %v4469_v56 = vpop.eup %4468  ;;  %v2869_v20 = vadd.f32 1.0, %v4467_v16  ;;  %6214 = vst [vmem:[#allocation35_spill] sm:$0xff] %v5889_v55  ;;  %4490 = vrcp.f32 %v2867_v60  ;;  %v2829_v16 = vmul.f32 1.442695, %v3683_v42 }
 0x9e9   : > { %v2649_v45 = vpop.f32.mrb[55].mxu1  ;;  %v4471_v7 = vpop.eup %4470  ;;  %v2868_v25 = vadd.f32 1.0, %v4469_v56  ;;  %6215 = vst [vmem:[#allocation36_spill] sm:$0xff] %v5892_v39  ;;  %6216 = vst [vmem:[#allocation37_spill] sm:$0xff] %v5895_v38  ;;  %v3686_v22 = vmul.f32 -1.702, %v5889_v55  ;;  %v5900_v56 = vadd.f32 %v2647_v10, %v5809_v30 }
 0x9ea   : > { %v2722_v19 = vpop.f32.mrb[63].mxu0  ;;  %v4473_v53 = vpop.eup %4472  ;;  %4492 = vrcp.f32 %v2869_v20  ;;  %v2870_v2 = vadd.f32 1.0, %v4471_v7  ;;  %v3685_v58 = vmul.f32 -1.702, %v5892_v39  ;;  %v3687_v42 = vmul.f32 -1.702, %v5895_v38 }
 0x9eb   : > { %v4475_v1 = vpop.eup %4474  ;;  %4494 = vrcp.f32 %v2868_v25  ;;  %v2871_v5 = vadd.f32 1.0, %v4473_v53  ;;  %v3688_v0 = vmul.f32 -1.702, %v5900_v56 }
 0x9ec   : > { %v4477_v60 = vpop.eup %4476  ;;  %4496 = vrcp.f32 %v2870_v2  ;;  %v2873_v52 = vadd.f32 1.0, %v4475_v1  ;;  %v2653_v7 = vpop.f32.mrb[56].mxu1  ;;  %v5905_v2 = vadd.f32 %v2720_v48, %v5813_v15  ;;  %v2837_v38 = vmul.f32 1.442695, %v3687_v42 }
 0x9ed   : > { %v4479_v20 = vpop.eup %4478  ;;  %4498 = vrcp.f32 %v2871_v5  ;;  %v2872_v62 = vadd.f32 1.0, %v4477_v60  ;;  %v2726_v47 = vpop.f32.mrb[64].mxu0  ;;  %v5910_v5 = vadd.f32 %v2649_v45, %v5817_v40  ;;  %v5913_v60 = vadd.f32 %v2722_v19, %v5819_v31 }
 0x9ee   : > { %v4481_v25 = vpop.eup %4480  ;;  %4500 = vrcp.f32 %v2873_v52  ;;  %v2874_v53 = vadd.f32 1.0, %v4479_v20  ;;  %6217 = vst [vmem:[#allocation38_spill] sm:$0xff] %v5905_v2  ;;  %v5907_v1 = vpop.f32.mrb[57].mxu1  ;;  %v2831_v20 = vmul.f32 1.442695, %v3684_v54  ;;  %v5928_v54 = vadd.f32 %v2653_v7, %v5809_v30 }
 0x9ef   : > { %v4483_v23 = vpop.eup %4482  ;;  %4502 = vrcp.f32 %v2872_v62  ;;  %v2875_v10 = vadd.f32 1.0, %v4481_v25  ;;  %6218 = vst [vmem:[#allocation39_spill] sm:$0xff] %v5910_v5  ;;  %6219 = vst [vmem:[#allocation40_spill] sm:$0xff] %v5913_v60  ;;  %v5915_v49 = vpop.f32.mrb[65].mxu0  ;;  %v2835_v62 = vmul.f32 1.442695, %v3686_v22 }
 0x9f0   : > { %v4485_v52 = vpop.eup %4484  ;;  %4504 = vrcp.f32 %v2874_v53  ;;  %v5918_v48 = vpop.f32.mrb[58].mxu1  ;;  %v2833_v25 = vmul.f32 1.442695, %v3685_v58  ;;  %v3690_v36 = vmul.f32 -1.702, %v5905_v2  ;;  %v5931_v53 = vadd.f32 %v2726_v47, %v5813_v15 }
 0x9f1   : > { %v5920_v50 = vpop.f32.mrb[66].mxu0  ;;  %v4487_v28 = vpop.eup %4486  ;;  %4506 = vrcp.f32 %v2875_v10  ;;  %v3689_v22 = vmul.f32 -1.702, %v5910_v5  ;;  %v3691_v58 = vmul.f32 -1.702, %v5913_v60  ;;  %v5936_v41 = vmul.f32 %v4483_v23, %v5822_v43 }
 0x9f2   : > { %v5922_v45 = vpop.f32.mrb[59].mxu1  ;;  %v5924_v44 = vpop.f32.mrb[67].mxu0  ;;  %4508 = vpow2.f32 %v2827_v33  ;;  %v2839_v39 = vmul.f32 1.442695, %v3688_v0  ;;  %v2961_v2 = vmul.f32 %v4485_v52, %v5825_v26  ;;  %v2843_v60 = vmul.f32 1.442695, %v3690_v36 }
 0x9f3   : > { %v4489_v19 = vpop.eup %4488  ;;  %4510 = vpow2.f32 %v2825_v24  ;;  %v3692_v24 = vmul.f32 -1.702, %v5928_v54  ;;  %v3694_v23 = vmul.f32 -1.702, %v5931_v53  ;;  %v2845_v26 = vmul.f32 1.442695, %v3691_v58 }
 0x9f4   : > { %v4491_v8 = vpop.eup %4490  ;;  %4512 = vpow2.f32 %v2829_v16 }
 0x9f5   : > { %v4493_v10 = vpop.eup %4492  ;;  %v2963_v33 = vmul.f32 %v4491_v8, %v5836_v9  ;;  %4514 = vpow2.f32 %v2831_v20  ;;  %v2841_v8 = vmul.f32 1.442695, %v3689_v22 }
 0x9f6   : > { %v4495_v7 = vpop.eup %4494  ;;  %v2965_v47 = vmul.f32 %v4493_v10, %v5839_v17  ;;  %4516 = vpow2.f32 %v2835_v62  ;;  %v2847_v17 = vmul.f32 1.442695, %v3692_v24 }
 0x9f7   : > { %v4497_v42 = vpop.eup %4496  ;;  %v2991_v5 = vpack.c.bf16 %v2963_v33, %v5936_v41  ;;  %4518 = vpow2.f32 %v2833_v25  ;;  %v2851_v41 = vmul.f32 1.442695, %v3694_v23  ;;  %v2964_v36 = vmul.f32 %v4495_v7, %v5844_v35 }
 0x9f8   : > { %v4499_v43 = vpop.eup %4498  ;;  %v2993_v55 = vpack.c.bf16 %v2965_v47, %v2961_v2  ;;  %4520 = vpow2.f32 %v2837_v38  ;;  %v2966_v20 = vmul.f32 %v4497_v42, %v5847_v46  ;;  %v2960_v25 = vmul.f32 %v4487_v28, %v5828_v57 }
 0x9f9   : > { %v5944_v0 = vpop.eup %4500  ;;  %4522 = vpow2.f32 %v2839_v39  ;;  %v2962_v39 = vmul.f32 %v4489_v19, %v5831_v6  ;;  %v5958_v58 = vmul.f32 %v4499_v43, %v5854_v37  ;;  %v5962_v28 = vadd.f32 %v5907_v1, %v5817_v40 }
 0x9fa   : > { %v5946_v9 = vpop.eup %4502  ;;  %4524 = vpow2.f32 %v2843_v60  ;;  %v2992_v33 = vpack.c.bf16 %v2964_v36, %v2960_v25  ;;  %v5968_v19 = vadd.f32 %v5915_v49, %v5819_v31  ;;  %v5972_v23 = vadd.f32 %v5918_v48, %v5809_v30 }
 0x9fb   : > { %v5948_v16 = vpop.eup %4504  ;;  %4526 = vpow2.f32 %v2841_v8  ;;  %v5976_v8 = vadd.f32 %v5920_v50, %v5813_v15  ;;  %v5982_v30 = vadd.f32 %v5922_v45, %v5817_v40  ;;  %v5988_v50 = vadd.f32 %v5924_v44, %v5819_v31 }
 0x9fc   : > { %v4507_v52 = vpop.eup %4506  ;;  %4528 = vpow2.f32 %v2845_v26  ;;  %3302 = vmatprep.mubr.bf16.mxu1 %v2992_v33  ;;  %v3695_v48 = vmul.f32 -1.702, %v5968_v19  ;;  %v2969_v25 = vmul.f32 %v5944_v0, %v5857_v32 }
 0x9fd   : > { %v4509_v2 = vpop.eup %4508  ;;  %v5953_v62 = vmul.f32 %v4507_v52, %v5867_v61  ;;  %4530 = vpow2.f32 %v2847_v17  ;;  %v2994_v61 = vpack.c.bf16 %v2966_v20, %v2962_v39  ;;  %3303 = vmatmul.mubr.bf16.vlgmr.msra.gmra.mrb[60].mxu1 %v2991_v5  ;;  %v3693_v17 = vmul.f32 -1.702, %v5962_v28 }
 0x9fe   : > { %v4511_v38 = vpop.eup %4510  ;;  %v2877_v22 = vadd.f32 1.0, %v4509_v2  ;;  %4532 = vpow2.f32 %v2851_v41  ;;  %4031 = vmatpush3.bf16.msra.mxu1 %v5758_v51  ;;  %v3696_v41 = vmul.f32 -1.702, %v5972_v23  ;;  %v3698_v45 = vmul.f32 -1.702, %v5976_v8 }
 0x9ff   : > { %v4513_v60 = vpop.eup %4512  ;;  %v2876_v35 = vadd.f32 1.0, %v4511_v38  ;;  %v2995_v57 = vpack.c.bf16 %v5953_v62, %v5958_v58  ;;  %3367 = vmatprep.mubr.bf16.mxu0 %v2994_v61  ;;  %4024 = vmatprep.subr.bf16.mxu1 %v5761_v4  ;;  %v2849_v36 = vmul.f32 1.442695, %v3693_v17  ;;  %v3697_v20 = vmul.f32 -1.702, %v5982_v30  ;;  %v6223_v58 = vld [vmem:[#allocation39_spill] sm:$0xff] }
 0xa00   : > { %v4515_v46 = vpop.eup %4514  ;;  %4534 = vrcp.f32 %v2877_v22  ;;  %v2878_v10 = vadd.f32 1.0, %v4513_v60  ;;  %3368 = vmatmul.mubr.bf16.vlgmr.msra.gmra.mrb[68].mxu0 %v2993_v55  ;;  %v2853_v31 = vmul.f32 1.442695, %v3695_v48  ;;  %v3699_v2 = vmul.f32 -1.702, %v5988_v50 }
 0xa01   : > { %v4517_v7 = vpop.eup %4516  ;;  %4536 = vrcp.f32 %v2876_v35  ;;  %v2879_v47 = vadd.f32 1.0, %v4515_v46  ;;  %v2855_v22 = vmul.f32 1.442695, %v3696_v41  ;;  %v2968_v60 = vmul.f32 %v5946_v9, %v5860_v29 }
 0xa02   : > { %v4519_v6 = vpop.eup %4518  ;;  %4538 = vrcp.f32 %v2878_v10  ;;  %v2881_v37 = vadd.f32 1.0, %v4517_v7  ;;  %4032 = vmatpush3.bf16.msra.mxu1 %v5763_v63  ;;  %v2970_v35 = vmul.f32 %v5948_v16, %v5863_v3  ;;  %v2859_v46 = vmul.f32 1.442695, %v3698_v45 }
 0xa03   : > { %v4521_v24 = vpop.eup %4520  ;;  %4540 = vrcp.f32 %v2879_v47  ;;  %v2880_v42 = vadd.f32 1.0, %v4519_v6  ;;  %4025 = vmatprep.subr.bf16.mxu1 %v5767_v27  ;;  %v2857_v32 = vmul.f32 1.442695, %v3697_v20  ;;  %v2861_v61 = vmul.f32 1.442695, %v3699_v2  ;;  %v6220_v47 = vld [vmem:[#allocation35_spill] sm:$0xff] }
 0xa04   : > { %v4523_v1 = vpop.eup %4522  ;;  %4542 = vrcp.f32 %v2881_v37  ;;  %v2882_v43 = vadd.f32 1.0, %v4521_v24  ;;  %v6229_v20 = vld [vmem:[#allocation31_spill] sm:$0xff] }
 0xa05   : > { %v4525_v49 = vpop.eup %4524  ;;  %4544 = vrcp.f32 %v2880_v42  ;;  %v2883_v26 = vadd.f32 1.0, %v4523_v1  ;;  %v6222_v42 = vld [vmem:[#allocation36_spill] sm:$0xff] }
 0xa06   : > { %v4527_v55 = vpop.eup %4526  ;;  %4546 = vrcp.f32 %v2882_v43  ;;  %v2885_v5 = vadd.f32 1.0, %v4525_v49  ;;  %4033 = vmatpush3.bf16.msra.mxu1 %v5769_v11  ;;  %v6224_v43 = vld [vmem:[#allocation28_spill] sm:$0xff] }
 0xa07   : > { %v4529_v51 = vpop.eup %4528  ;;  %4548 = vrcp.f32 %v2883_v26  ;;  %v2884_v15 = vadd.f32 1.0, %v4527_v55  ;;  %4026 = vmatprep.subr.bf16.mxu1 %v5773_v12  ;;  %v6226_v26 = vld [vmem:[#allocation40_spill] sm:$0xff] }
 0xa08   : > { %v4531_v52 = vpop.eup %4530  ;;  %4550 = vrcp.f32 %v2885_v5  ;;  %v2886_v40 = vadd.f32 1.0, %v4529_v51  ;;  %v6227_v5 = vld [vmem:[#allocation29_spill] sm:$0xff] }
 0xa09   : > { %v4533_v4 = vpop.eup %4532  ;;  %4552 = vrcp.f32 %v2884_v15  ;;  %v2887_v1 = vadd.f32 1.0, %v4531_v52  ;;  %v6228_v52 = vld [vmem:[#allocation30_spill] sm:$0xff] }
 0xa0a   : > { %v4535_v44 = vpop.eup %4534  ;;  %4554 = vrcp.f32 %v2886_v40  ;;  %4034 = vmatpush3.bf16.msra.mxu1 %v5775_v18  ;;  %v6221_v18 = vld [vmem:[#allocation38_spill] sm:$0xff]  ;;  %v2889_v55 = vadd.f32 1.0, %v4533_v4 }
 0xa0b   : > { %v4537_v38 = vpop.eup %4536  ;;  %v2973_v39 = vmul.f32 %v4535_v44, %v5874_v14  ;;  %4556 = vpow2.f32 %v2849_v36  ;;  %4027 = vmatprep.subr.bf16.mxu1 %v5779_v21 }
 0xa0c   : > { %v4539_v63 = vpop.eup %4538  ;;  %v2972_v27 = vmul.f32 %v4537_v38, %v5877_v34  ;;  %4558 = vpow2.f32 %v2853_v31 }
 0xa0d   : > { %v4541_v10 = vpop.eup %4540  ;;  %v2974_v33 = vmul.f32 %v4539_v63, %v5880_v13  ;;  %v2997_v0 = vpack.c.bf16 %v2973_v39, %v2969_v25  ;;  %4560 = vpow2.f32 %v2855_v22  ;;  %v6230_v39 = vld [vmem:[#allocation32_spill] sm:$0xff]  ;;  %v6231_v63 = vld [vmem:[#allocation33_spill] sm:$0xff] }
 0xa0e   : > { %v4543_v14 = vpop.eup %4542  ;;  %v2996_v29 = vpack.c.bf16 %v2972_v27, %v2968_v60  ;;  %4562 = vpow2.f32 %v2859_v46  ;;  %v2975_v34 = vmul.f32 %v4541_v10, %v5886_v59  ;;  %4035 = vmatpush3.bf16.msra.mxu1 %v6224_v43  ;;  %v6232_v60 = vld [vmem:[#allocation34_spill] sm:$0xff] }
 0xa0f   : > { %v4545_v9 = vpop.eup %4544  ;;  %v2998_v3 = vpack.c.bf16 %v2974_v33, %v2970_v35  ;;  %4564 = vpow2.f32 %v2857_v32  ;;  %v6015_v6 = vmul.f32 %v4543_v14, %v6220_v47  ;;  %4028 = vmatprep.subr.bf16.mxu1 %v6227_v5 }
 0xa10   : > { %v4547_v16 = vpop.eup %4546  ;;  %3310 = vmatprep.mubr.bf16.mxu1 %v2996_v29  ;;  %4566 = vpow2.f32 %v2861_v61  ;;  %v2976_v62 = vmul.f32 %v4545_v9, %v6222_v42 }
 0xa11   : > { %v4549_v11 = vpop.eup %4548  ;;  %3375 = vmatprep.mubr.bf16.mxu0 %v2998_v3  ;;  %3311 = vmatmul.mubr.bf16.gmra.mrb[64].mxu1 %v2995_v57  ;;  %4568 = vrcp.f32 %v2887_v1 }
 0xa12   : > { %v4551_v12 = vpop.eup %4550  ;;  %v2979_v13 = vmul.f32 %v4549_v11, %v5900_v56  ;;  %3376 = vmatmul.mubr.bf16.gmra.mrb[72].mxu0 %v2997_v0  ;;  %v6225_v56 = vld [vmem:[#allocation37_spill] sm:$0xff]  ;;  %4036 = vmatpush3.bf16.msra.mxu1 %v6228_v52  ;;  %4570 = vrcp.f32 %v2889_v55 }
 0xa13   : > { %v4553_v7 = vpop.eup %4552  ;;  %v6018_v37 = vmul.f32 %v4551_v12, %v6221_v18  ;;  %v2978_v49 = vmul.f32 %v4547_v16, %v6225_v56  ;;  %4029 = vmatprep.subr.bf16.mxu1 %v6229_v20 }
 0xa14   : > { %v4555_v24 = vpop.eup %4554  ;;  %v2980_v57 = vmul.f32 %v4553_v7, %v6223_v58  ;;  %v2999_v59 = vpack.c.bf16 %v2979_v13, %v2975_v34 }
 0xa15   : > { %v3001_v21 = vpack.c.bf16 %v6018_v37, %v6015_v6  ;;  %v2982_v17 = vmul.f32 %v4555_v24, %v6226_v26  ;;  %v4557_v51 = vpop.eup %4556 }
 0xa16   : > { %v3000_v48 = vpack.c.bf16 %v2980_v57, %v2976_v62  ;;  %v4559_v41 = vpop.eup %4558  ;;  %v2888_v40 = vadd.f32 1.0, %v4557_v51  ;;  %4037 = vmatpush3.bf16.msra.mxu1 %v6230_v39 }
 0xa17   : > { %v3002_v15 = vpack.c.bf16 %v2982_v17, %v2978_v49  ;;  %v4561_v45 = vpop.eup %4560  ;;  %v2890_v36 = vadd.f32 1.0, %v4559_v41  ;;  %4030 = vmatprep.subr.bf16.mxu1 %v6231_v63  ;;  %v6235_v49 = vld [vmem:[#allocation21_spill] sm:$0xff] }
 0xa18   : > { %3318 = vmatprep.mubr.bf16.mxu1 %v3000_v48  ;;  %v4563_v44 = vpop.eup %4562  ;;  %4572 = vrcp.f32 %v2888_v40  ;;  %v2891_v4 = vadd.f32 1.0, %v4561_v45 }
 0xa19   : > { %3319 = vmatmul.mubr.bf16.gmra.mrb[68].mxu1 %v2999_v59  ;;  %v4565_v31 = vpop.eup %4564  ;;  %4574 = vrcp.f32 %v2890_v36  ;;  %v2893_v2 = vadd.f32 1.0, %v4563_v44  ;;  %v6234_v59 = vld [vmem:[#allocation20_spill] sm:$0xff] }
 0xa1a   : > { %v4567_v38 = vpop.eup %4566  ;;  %4576 = vrcp.f32 %v2891_v4  ;;  %v2892_v25 = vadd.f32 1.0, %v4565_v31  ;;  %4038 = vmatpush3.bf16.msra.mxu1 %v6232_v60  ;;  %v6236_v31 = vld [vmem:[#allocation22_spill] sm:$0xff] }
 0xa1b   : > { %4578 = vrcp.f32 %v2893_v2  ;;  %v2894_v22 = vadd.f32 1.0, %v4567_v38  ;;  %v4569_v35 = vpop.eup %4568 }
 0xa1c   : > { %4580 = vrcp.f32 %v2892_v25  ;;  %v4571_v27 = vpop.eup %4570  ;;  %v2983_v0 = vmul.f32 %v4569_v35, %v5928_v54 }
 0xa1d   : > { %4582 = vrcp.f32 %v2894_v22  ;;  %v2985_v29 = vmul.f32 %v4571_v27, %v5931_v53  ;;  %v6237_v22 = vld [vmem:[#allocation23_spill] sm:$0xff] }
 0xa22   : > { %v4573_v46 = vpop.eup %4572 }
 0xa23   : > { %v4575_v10 = vpop.eup %4574  ;;  %v2984_v16 = vmul.f32 %v4573_v46, %v5962_v28  ;;  %v6044_v28 = vld [vmem:[%s6233_s11] ss:$0 sm:$0xff] }
 0xa24   : > { %v4577_v33 = vpop.eup %4576  ;;  %v2986_v34 = vmul.f32 %v4575_v10, %v5968_v19 }
 0xa25   : > { %v4579_v32 = vpop.eup %4578  ;;  %v2987_v14 = vmul.f32 %v4577_v33, %v5972_v23 }
 0xa26   : > { %v4581_v61 = vpop.eup %4580  ;;  %v2989_v9 = vmul.f32 %v4579_v32, %v5976_v8 }
 0xa27   : > { %v4583_v3 = vpop.eup %4582  ;;  %v2988_v11 = vmul.f32 %v4581_v61, %v5982_v30  ;;  %v3003_v12 = vpack.c.bf16 %v2987_v14, %v2983_v0 }
 0xa28   : > { %v2990_v13 = vmul.f32 %v4583_v3, %v5988_v50  ;;  %v3005_v7 = vpack.c.bf16 %v2989_v9, %v2985_v29 }
 0xa29   : > { %v3004_v47 = vpack.c.bf16 %v2988_v11, %v2984_v16 }
 0xa2a   : > { %v3006_v54 = vpack.c.bf16 %v2990_v13, %v2986_v34 }
 0xa2b   : > { %3326 = vmatprep.mubr.bf16.mxu1 %v3004_v47  ;;  %v6238_v47 = vld [vmem:[#allocation24_spill] sm:$0xff] }
 0xa2c   : > { %3327 = vmatmul.mubr.bf16.gmra.mrb[72].mxu1 %v3003_v12 }
 0xa2d   : > { %3383 = vmatprep.mubr.bf16.mxu1 %v3002_v15 }
 0xa34   : > { %3384 = vmatmul.mubr.bf16.vlgmr.msra.gmra.mrb[76].mxu1 %v3001_v21 }
 0xa35   : > { %3391 = vmatprep.mubr.bf16.mxu1 %v3006_v54 }
 0xa3c   : > { %3392 = vmatmul.mubr.bf16.gmra.mrb[80].mxu1 %v3005_v7 }
 0xad0   : > { %v3815_v53 = vpop.f32.mrb[60].mxu1 }
 0xad1   : > { %v3816_v19 = vpop.f32.mrb[61].mxu1 }
 0xad2   : > { %v3817_v30 = vadd.f32 %v3816_v19, %v3815_v53  ;;  %v3818_v6 = vpop.f32.mrb[62].mxu1 }
 0xad3   : > { %v3855_v23 = vpop.f32.mrb[68].mxu0  ;;  %v3819_v37 = vpop.f32.mrb[63].mxu1 }
 0xad4   : > { %v3856_v8 = vpop.f32.mrb[69].mxu0  ;;  %v3305_v42 = vadd.f32 %v3817_v30, %v6044_v28  ;;  %v3820_v62 = vadd.f32 %v3819_v37, %v3818_v6 }
 0xad5   : > { %v3857_v50 = vadd.f32 %v3856_v8, %v3855_v23  ;;  %v3858_v18 = vpop.f32.mrb[70].mxu0  ;;  %v6239_v23 = vld [vmem:[#allocation25_spill] sm:$0xff] }
 0xad6   : > { %v3859_v24 = vpop.f32.mrb[71].mxu0  ;;  %v3308_v1 = vadd.f32 %v3820_v62, %v6044_v28 }
 0xad7   : > { %v3860_v58 = vadd.f32 %v3859_v24, %v3858_v18  ;;  %v3370_v57 = vadd.f32 %v3857_v50, %v3305_v42 }
 0xad9   : > { %v3400_v43 = vadd.f32 %v3370_v57, %v6234_v59  ;;  %v3373_v56 = vadd.f32 %v3860_v58, %v3308_v1  ;;  %v6240_v58 = vld [vmem:[#allocation26_spill] sm:$0xff]  ;;  %v6242_v59 = vld [vmem:[#allocation27_spill] sm:$0xff] }
 0xadb   : > { %3408 = vst [vmem:[%s6051_s17] sm:$0xff] %v3400_v43  ;;  %v3401_v21 = vadd.f32 %v3373_v56, %v6235_v49 }
 0xadd   : > { %3409 = vst [vmem:[%s6051_s17 + $0x8] sm:$0xff] %v3401_v21 }
 0xae4   : > { %v3821_v26 = vpop.f32.mrb[64].mxu1 }
 0xae5   : > { %v3861_v17 = vpop.f32.mrb[72].mxu0  ;;  %v3822_v55 = vpop.f32.mrb[65].mxu1 }
 0xae6   : > { %v3823_v5 = vadd.f32 %v3822_v55, %v3821_v26  ;;  %v3862_v48 = vpop.f32.mrb[73].mxu0  ;;  %v3824_v51 = vpop.f32.mrb[66].mxu1 }
 0xae7   : > { %v3863_v15 = vadd.f32 %v3862_v48, %v3861_v17  ;;  %v3864_v41 = vpop.f32.mrb[74].mxu0  ;;  %v3825_v40 = vpop.f32.mrb[67].mxu1 }
 0xae8   : > { %v3313_v52 = vadd.f32 %v3823_v5, %v6044_v28  ;;  %v3826_v45 = vadd.f32 %v3825_v40, %v3824_v51  ;;  %v3865_v36 = vpop.f32.mrb[75].mxu0 }
 0xae9   : > { %v3866_v20 = vadd.f32 %v3865_v36, %v3864_v41 }
 0xaea   : > { %v3378_v44 = vadd.f32 %v3863_v15, %v3313_v52  ;;  %v3316_v4 = vadd.f32 %v3826_v45, %v6044_v28 }
 0xaec   : > { %v3402_v2 = vadd.f32 %v3378_v44, %v6236_v31  ;;  %v3381_v38 = vadd.f32 %v3866_v20, %v3316_v4  ;;  %v3827_v25 = vpop.f32.mrb[68].mxu1 }
 0xaed   : > { %v3828_v39 = vpop.f32.mrb[69].mxu1 }
 0xaee   : > { %3410 = vst [vmem:[%s6051_s17 + $0x10] sm:$0xff] %v3402_v2  ;;  %v3403_v63 = vadd.f32 %v3381_v38, %v6237_v22  ;;  %v3829_v60 = vadd.f32 %v3828_v39, %v3827_v25  ;;  %v3830_v35 = vpop.f32.mrb[70].mxu1 }
 0xaef   : > { %v3831_v27 = vpop.f32.mrb[71].mxu1 }
 0xaf0   : > { %3411 = vst [vmem:[%s6051_s17 + $0x18] sm:$0xff] %v3403_v63  ;;  %v3832_v46 = vadd.f32 %v3831_v27, %v3830_v35  ;;  %v3321_v3 = vadd.f32 %v3829_v60, %v6044_v28 }
 0xaf2   : > { %v3324_v34 = vadd.f32 %v3832_v46, %v6044_v28 }
 0xaff   : > { %v3833_v10 = vpop.f32.mrb[72].mxu1 }
 0xb00   : > { %v3834_v33 = vpop.f32.mrb[73].mxu1 }
 0xb01   : > { %v3835_v32 = vadd.f32 %v3834_v33, %v3833_v10  ;;  %v3836_v0 = vpop.f32.mrb[74].mxu1 }
 0xb02   : > { %v3837_v14 = vpop.f32.mrb[75].mxu1 }
 0xb03   : > { %v3838_v61 = vadd.f32 %v3837_v14, %v3836_v0  ;;  %v3329_v50 = vadd.f32 %v3835_v32, %v6044_v28 }
 0xb05   : > { %v3332_v24 = vadd.f32 %v3838_v61, %v6044_v28 }
 0xb07   : > { %v3867_v29 = vpop.f32.mrb[76].mxu1 }
 0xb08   : > { %v3868_v9 = vpop.f32.mrb[77].mxu1 }
 0xb09   : > { %v3869_v16 = vadd.f32 %v3868_v9, %v3867_v29  ;;  %v3870_v11 = vpop.f32.mrb[78].mxu1 }
 0xb0a   : > { %v3871_v12 = vpop.f32.mrb[79].mxu1 }
 0xb0b   : > { %v3386_v13 = vadd.f32 %v3869_v16, %v3321_v3  ;;  %v3872_v7 = vadd.f32 %v3871_v12, %v3870_v11 }
 0xb0d   : > { %v3404_v54 = vadd.f32 %v3386_v13, %v6238_v47  ;;  %v3389_v53 = vadd.f32 %v3872_v7, %v3324_v34 }
 0xb0f   : > { %3412 = vst [vmem:[%s6051_s17 + $0x20] sm:$0xff] %v3404_v54  ;;  %v3405_v19 = vadd.f32 %v3389_v53, %v6239_v23  ;;  %v3873_v8 = vpop.f32.mrb[80].mxu1 }
 0xb10   : > { %v3874_v30 = vpop.f32.mrb[81].mxu1 }
 0xb11   : > { %3413 = vst [vmem:[%s6051_s17 + $0x28] sm:$0xff] %v3405_v19  ;;  %v3875_v6 = vadd.f32 %v3874_v30, %v3873_v8  ;;  %v3876_v18 = vpop.f32.mrb[82].mxu1 }
 0xb12   : > { %v3877_v37 = vpop.f32.mrb[83].mxu1 }
 0xb13   : > { %v3394_v42 = vadd.f32 %v3875_v6, %v3329_v50  ;;  %v3878_v62 = vadd.f32 %v3877_v37, %v3876_v18 }
 0xb15   : > { %v3406_v57 = vadd.f32 %v3394_v42, %v6240_v58  ;;  %v3397_v1 = vadd.f32 %v3878_v62, %v3332_v24 }
 0xb17   : > { %3414 = vst [vmem:[%s6051_s17 + $0x30] sm:$0xff] %v3406_v57  ;;  %v3407_v28 = vadd.f32 %v3397_v1, %v6242_v59 }
 0xb19   : > { %3415 = vst [vmem:[%s6051_s17 + $0x38] sm:$0xff] %v3407_v28 }
 0xb1a   : > { %4803 = shalt.err (!%p4800_p8)
}
 0xb1b   : > { %s4804_s21 = scalar_lea.hbm %s6076_s14, 1024  ;;  %s4808_s17 = scalar_lea.hbm %s6241_s7, 2048 }
 0xb1c   : > { %p4805_p7 = scmp.ne.s32.totalorder %s6076_s14, %s4804_s21  ;;  %p4809_p3 = scmp.lt.u32.totalorder %s6076_s14, %s6241_s7 }
 0xb1d   : > { %p4810_p0 = scmp.lt.u32.totalorder %s4808_s17, %s4804_s21  ;;  %p4812_p6 = scmp.lt.u32.totalorder %s4804_s21, %s6076_s14 }
 0xb1e   : > { %p4806_p9 = pnand %p4805_p7, %p6243_p5 }
 0xb1f   : > { %p4811_p2 = por %p4810_p0, %p4809_p3 }
 0xb20   : > { %p4807_p4 = pneg %p4806_p9 }
 0xb21   : > { %p4813_p10 = por %p4812_p6, %p4811_p2 }
 0xb23   : > { %p4814_p1 = pnand %p4813_p10, %p4807_p4 }
 0xb25   : > { %4817 = shalt.err (!%p4814_p1)
}
 0xb26   : > { %s4890_s4 = smov 128   ;;  %s4891_s19 = smov 8  }
 0xb27   : > { %4065 = dma.vmem_to_hbm [thread:$0]  (%p6243_p5), %s6078_s25, 1024, %s6076_s14, %s3417_s20, %s4890_s4, %s4890_s4, %s4891_s19  }
 0xb28 PF: > { %s3446_s27 = sand.u32 1, %s4856_s29   ;;  %p6244_p11 = scmp.ne.s32.totalorder %s6184_s1, 0 }
 0xb29   : > { %p6245_p12 = scmp.ge.s32.totalorder %s4868_s16, 2  ;;  %s3447_s28 = scalar_lea.sflag [#allocation4], %s3446_s27 }
 0xb2b   : > { %p4091_p13 = pnand %p6245_p12, %p6244_p11 }
 0xb2d   : > { %4851 = dma.done.wait (!%p4091_p13), %s3447_s28, 1024  }
 0xb2e   : > { %4853 = vsyncadd (!%p4091_p13), %s3447_s28, 4294966272  ;;  %p30_p8 = scmp.ge.s32.totalorder %s5142_s23, 4   ;;  %s6246_s29 = smov %s4860_s30 }
 0xb2f   : > { %s6247_s30 = smov %s4864_s15  ;;  %s6248_s15 = smov %s5153_s22 }
 0xb30   : > { %s6249_s16 = smov %s5142_s23  ;;  %32 = sbr.rel (!%p30_p8) target bundleno = 17 (0x11), region = 145 }
 0xb37   :  { %3452 = vsyncpa [#allocation3], 1 }
 0xb38   :  { %3454 = vsyncpa [#allocation3 + $0x1], 1 }
 0xb39   :  { %3455 = vsyncpa [#allocation6], 1 }
 0xb3a   :  { %3456 = vsyncpa [#allocation9], 1 }
 0xb3b   :  { %3457 = vsyncpa [#allocation12], 1 }
 0xb3c   :  { %3458 = vsyncpa [#allocation4], 1 }
 0xb3d   :  { %3460 = vsyncpa [#allocation4 + $0x1], 1 }

</bundles_post_ra>
